<compile_context>
chip_gen: v7x
topology: tpu7x:2x2x1
jax: 0.10.0
libtpu: 0.0.40
codegen_flags: <defaults>
</compile_context>

<pallas_src>
import math

import jax
import jax.numpy as jnp
from jax.experimental import pallas as pl
from jax.experimental.pallas import tpu as pltpu

EPS = 1e-5


# ----------------------------- in-kernel helpers -----------------------------
def _fill_halo(pad_ref, interior_bf16, Bt, H, W):
    """Stage a (Bt, H, W, C) bf16 tile into a (Bt, H+2, W+2, C) halo buffer.

    Only the 1-pixel halo is zeroed (O(perimeter) stores); re-zeroed every grid
    step so the kernel is safe under "parallel" (uninitialized) scratch.
    """
    C = pad_ref.shape[-1]
    zrow = jnp.zeros((Bt, 1, W + 2, C), pad_ref.dtype)
    zcol = jnp.zeros((Bt, H, 1, C), pad_ref.dtype)
    pad_ref[:, 0:1, :, :] = zrow
    pad_ref[:, H + 1:H + 2, :, :] = zrow
    pad_ref[:, 1:1 + H, 0:1, :] = zcol
    pad_ref[:, 1:1 + H, W + 1:W + 2, :] = zcol
    pad_ref[:, 1:1 + H, 1:1 + W, :] = interior_bf16


def _conv3x3_accum(pad_ref, w_ref, bias, Bt, H, W, C):
    """3x3 conv as 9 accumulating MXU matmuls (no materialized im2col).

    Each tap: (Bt*H*W, C) bf16 @ (C, C) bf16 with f32 accumulation. The tap
    reshape only collapses leading dims (minor dim C is preserved), so it does
    not force a lane relayout.
    """
    acc = None
    for k in range(9):
        dy, dx = divmod(k, 3)
        tap = pad_ref[:, dy:dy + H, dx:dx + W, :].reshape(Bt * H * W, C)
        part = jnp.dot(tap, w_ref[k], preferred_element_type=jnp.float32)
        acc = part if acc is None else acc + part
    return acc + bias                                           # (Bt*H*W, C) f32


def _store_stats(stat_ref, acc):
    """Per-step BN partials from the f32 accumulator: row 0 = sum, row 1 = sumsq."""
    s = jnp.sum(acc, axis=0, keepdims=True)
    sq = jnp.sum(acc * acc, axis=0, keepdims=True)
    stat_ref[0] = jnp.concatenate([s, sq], axis=0)


# --------------------------------- kernels -----------------------------------
def _conv1_kernel(x_ref, w_ref, b_ref, y_ref, stat_ref, pad_ref):
    # x_ref : (Bt, H, W, C)  bf16 input tile
    # w_ref : (9, C, C)      bf16 conv1 weights (tap-major, HWIO order)
    # b_ref : (1, C)         f32 conv1 bias
    # y_ref : (Bt, H*W, C)   bf16 conv1 pre-BN activations
    # stat_ref: (1, 2, C)    f32 per-step (sum, sum_sq)
    # pad_ref : (Bt, H+2, W+2, C) bf16 halo scratch
    Bt, H, W, C = x_ref.shape
    _fill_halo(pad_ref, x_ref[...], Bt, H, W)
    acc = _conv3x3_accum(pad_ref, w_ref, b_ref[...], Bt, H, W, C)
    y_ref[...] = acc.reshape(Bt, H * W, C).astype(jnp.bfloat16)
    _store_stats(stat_ref, acc)


def _bn_relu_conv2_kernel(a_ref, scale_ref, shift_ref, w_ref, b_ref,
                          y_ref, stat_ref, pad_ref):
    # a_ref : (Bt, H*W, C)   bf16 conv1 pre-BN activations
    # scale/shift : (1, C)   f32 fused BN1 affine
    # w_ref : (9, C, C) bf16 conv2 weights ; b_ref: (1, C) f32 bias
    # y_ref : (Bt, H*W, C)   bf16 conv2 pre-BN activations
    # stat_ref: (1, 2, C)    f32 per-step (sum, sum_sq)
    Bt, HW, C = a_ref.shape
    H = pad_ref.shape[1] - 2
    W = pad_ref.shape[2] - 2
    a = a_ref[...].astype(jnp.float32)
    y = a * scale_ref[...] + shift_ref[...]                     # BN1 (f32)
    y = jnp.maximum(y, 0.0).astype(jnp.bfloat16)                # ReLU -> bf16
    _fill_halo(pad_ref, y.reshape(Bt, H, W, C), Bt, H, W)
    acc = _conv3x3_accum(pad_ref, w_ref, b_ref[...], Bt, H, W, C)
    y_ref[...] = acc.reshape(Bt, HW, C).astype(jnp.bfloat16)
    _store_stats(stat_ref, acc)


def _bn2_add_relu_kernel(x_ref, a_ref, scale_ref, shift_ref, o_ref):
    # Lane-dense flattened elementwise pass:
    #   out = relu(x + scale2 * conv2_act + shift2)
    # x_ref/a_ref: (rb, L) bf16 ; scale/shift: (1, L) f32 (channel pattern tiled)
    x = x_ref[...].astype(jnp.float32)
    a = a_ref[...].astype(jnp.float32)
    o_ref[...] = jnp.maximum(x + a * scale_ref[...] + shift_ref[...], 0.0)


# ------------------------------ sizing helpers --------------------------------
def _vmem_limit_bytes():
    """Generation-aware scoped-VMEM limit (v7x has 64 MiB, v5e/v6e 128 MiB)."""
    cap = 128 * 1024 * 1024
    try:
        info = pltpu.get_tpu_info()
        cap = int(getattr(info, "vmem_capacity_bytes", cap) or cap)
    except Exception:
        pass
    return max(32 * 1024 * 1024, min(cap // 2, 64 * 1024 * 1024))


def _pick_bt(N, H, W, C, vmem_limit):
    """Images per grid step: fill the MXU M dim & amortize per-step overhead,
    stay inside a VMEM budget, keep >=2 grid steps when N allows (v7x 2 TCs)."""
    bt = max(1, -(-512 // (H * W)))                  # ceil(512 / (H*W)) rows target
    bt = min(bt, N)
    per_img = H * W * C * 2                          # bf16 bytes
    halo = (H + 2) * (W + 2) * C * 2
    budget = vmem_limit // 3
    while bt > 1 and bt * (4 * per_img + halo) > budget:
        bt -= 1
    while bt > 1 and (N % bt != 0 or N // bt < 2):
        bt -= 1
    return bt


def _flat_layout(numel, C):
    """Lane-dense 2D layout for the elementwise pass: last dim lcm(C, 128)."""
    L = (C * 128) // math.gcd(C, 128)
    if numel % L == 0:
        return numel // L, L
    return numel // C, C


def _pick_rows_block(rows, L, vmem_limit):
    bytes_per_row = L * (2 + 2 + 4) * 2              # bf16+bf16 in, f32 out, dbl-buf
    max_rows = max(8, min(rows, (vmem_limit // 4) // max(bytes_per_row, 1)))
    if rows <= max_rows:
        half = rows // 2
        if rows % 2 == 0 and half >= 8 and half % 8 == 0:
            return half                              # >=2 grid steps for v7x
        return rows
    for rb in range(max_rows, 7, -1):
        if rows % rb == 0 and rb % 8 == 0:
            return rb
    return rows


# ------------------------------ JAX wrapper -----------------------------------
def _finalize_bn(stats, gamma, beta, count):
    """Reduce per-step partials -> fused (scale, shift). Tiny O(C) op in XLA."""
    tot = jnp.sum(stats, axis=0)                                 # (2, C)
    mean = tot[0] / count
    var = jnp.maximum(tot[1] / count - mean * mean, 0.0)         # biased, clamped
    scale = gamma.reshape(-1) * jax.lax.rsqrt(var + EPS)
    shift = beta.reshape(-1) - mean * scale
    return (scale.reshape(1, -1).astype(jnp.float32),
            shift.reshape(1, -1).astype(jnp.float32))


def resnet_basic_block(x_nchw, params):
    """Pallas forward of ResnetBasicBlock (stride=1, in_channels==out_channels)."""
    N, C, H, W = x_nchw.shape
    M = N * H * W

    # NCHW -> NHWC once; kernel-side activations live in bf16.
    x_bf16 = jnp.transpose(x_nchw, (0, 2, 3, 1)).astype(jnp.bfloat16)

    # Conv weights tap-major (9, Cin, Cout), bf16 operands for the MXU.
    w1 = params["w1"].reshape(9, C, C).astype(jnp.bfloat16)
    w2 = params["w2"].reshape(9, C, C).astype(jnp.bfloat16)
    b1 = params["b1"].reshape(1, C).astype(jnp.float32)
    b2 = params["b2"].reshape(1, C).astype(jnp.float32)

    vmem_limit = _vmem_limit_bytes()
    Bt = _pick_bt(N, H, W, C, vmem_limit)
    G = N // Bt

    img_in_spec = pl.BlockSpec((Bt, H, W, C), lambda n: (n, 0, 0, 0))
    act_spec = pl.BlockSpec((Bt, H * W, C), lambda n: (n, 0, 0))
    stat_spec = pl.BlockSpec((1, 2, C), lambda n: (n, 0, 0))
    w_spec = pl.BlockSpec((9, C, C), lambda n: (0, 0, 0))
    vec_spec = pl.BlockSpec((1, C), lambda n: (0, 0))

    cparams = pltpu.CompilerParams(
        dimension_semantics=("parallel",),            # megacore split on v7x
        vmem_limit_bytes=vmem_limit,
    )
    conv_cost = pl.CostEstimate(
        flops=2 * M * 9 * C * C,
        transcendentals=0,
        bytes_accessed=2 * M * C * 2 + 9 * C * C * 2,
    )

    # ---- pass 1: conv1 (+ per-step BN1 partial stats) -------------------------
    a1, st1 = pl.pallas_call(
        _conv1_kernel,
        grid=(G,),
        in_specs=[img_in_spec, w_spec, vec_spec],
        out_specs=[act_spec, stat_spec],
        out_shape=[jax.ShapeDtypeStruct((N, H * W, C), jnp.bfloat16),
                   jax.ShapeDtypeStruct((G, 2, C), jnp.float32)],
        scratch_shapes=[pltpu.VMEM((Bt, H + 2, W + 2, C), jnp.bfloat16)],
        compiler_params=cparams,
        cost_estimate=conv_cost,
    )(x_bf16, w1, b1)

    scale1, shift1 = _finalize_bn(st1, params["g1"], params["be1"], M)

    # ---- pass 2: BN1 + ReLU + conv2 (+ per-step BN2 partial stats) ------------
    a2, st2 = pl.pallas_call(
        _bn_relu_conv2_kernel,
        grid=(G,),
        in_specs=[act_spec, vec_spec, vec_spec, w_spec, vec_spec],
        out_specs=[act_spec, stat_spec],
        out_shape=[jax.ShapeDtypeStruct((N, H * W, C), jnp.bfloat16),
                   jax.ShapeDtypeStruct((G, 2, C), jnp.float32)],
        scratch_shapes=[pltpu.VMEM((Bt, H + 2, W + 2, C), jnp.bfloat16)],
        compiler_params=cparams,
        cost_estimate=conv_cost,
    )(a1, scale1, shift1, w2, b2)

    scale2, shift2 = _finalize_bn(st2, params["g2"], params["be2"], M)

    # ---- pass 3: BN2 + residual add + final ReLU (128-lane-dense, flattened) --
    numel = N * H * W * C
    rows, L = _flat_layout(numel, C)
    rb = _pick_rows_block(rows, L, vmem_limit)
    reps = L // C
    x_flat = x_bf16.reshape(rows, L)                 # free row-major reshape
    a2_flat = a2.reshape(rows, L)
    scale2_flat = jnp.tile(scale2, (1, reps))        # lane l -> channel l % C
    shift2_flat = jnp.tile(shift2, (1, reps))

    flat_spec = pl.BlockSpec((rb, L), lambda n: (n, 0))
    vecL_spec = pl.BlockSpec((1, L), lambda n: (0, 0))
    ew_cost = pl.CostEstimate(flops=3 * numel, transcendentals=0,
                              bytes_accessed=numel * (2 + 2 + 4))

    out_flat = pl.pallas_call(
        _bn2_add_relu_kernel,
        grid=(rows // rb,),
        in_specs=[flat_spec, flat_spec, vecL_spec, vecL_spec],
        out_specs=flat_spec,
        out_shape=jax.ShapeDtypeStruct((rows, L), jnp.float32),
        compiler_params=cparams,
        cost_estimate=ew_cost,
    )(x_flat, a2_flat, scale2_flat, shift2_flat)

    out = out_flat.reshape(N, H, W, C)
    return jnp.transpose(out, (0, 3, 1, 2))          # NHWC -> NCHW


# ----------------------------- pure-JAX reference ------------------------------
def _ref_block(x_nchw, p):
    x = jnp.transpose(x_nchw, (0, 2, 3, 1)).astype(jnp.float32)

    def conv(inp, w, b):
        y = jax.lax.conv_general_dilated(
            inp, w, window_strides=(1, 1), padding="SAME",
            dimension_numbers=("NHWC", "HWIO", "NHWC"))
        return y + b.reshape(1, 1, 1, -1)

    def bn(y, g, be):
        m = jnp.mean(y, axis=(0, 1, 2), keepdims=True)
        v = jnp.mean((y - m) ** 2, axis=(0, 1, 2), keepdims=True)
        return (y - m) * jax.lax.rsqrt(v + EPS) * g.reshape(1, 1, 1, -1) \
            + be.reshape(1, 1, 1, -1)

    y = jax.nn.relu(bn(conv(x, p["w1"], p["b1"]), p["g1"], p["be1"]))
    y = bn(conv(y, p["w2"], p["b2"]), p["g2"], p["be2"])
    return jnp.transpose(jax.nn.relu(x + y), (0, 3, 1, 2))


if __name__ == "__main__":
    # Small shapes consistent with the module: residual add requires
    # in_channels == out_channels and stride == 1.
    N, C, H, W = 2, 4, 16, 16

    key = jax.random.PRNGKey(0)
    kx, k1, k2, k3, k4, k5, k6, k7, k8 = jax.random.split(key, 9)

    x = jax.random.normal(kx, (N, C, H, W), jnp.float32)

    params = {
        # conv weights stored as HWIO (3, 3, Cin, Cout)
        "w1": jax.random.normal(k1, (3, 3, C, C), jnp.float32) * 0.2,
        "b1": jax.random.normal(k2, (C,), jnp.float32) * 0.1,
        "w2": jax.random.normal(k3, (3, 3, C, C), jnp.float32) * 0.2,
        "b2": jax.random.normal(k4, (C,), jnp.float32) * 0.1,
        # BN affine params (deterministic, non-trivial)
        "g1": 1.0 + 0.1 * jax.random.normal(k5, (C,), jnp.float32),
        "be1": 0.1 * jax.random.normal(k6, (C,), jnp.float32),
        "g2": 1.0 + 0.1 * jax.random.normal(k7, (C,), jnp.float32),
        "be2": 0.1 * jax.random.normal(k8, (C,), jnp.float32),
    }

    fwd = jax.jit(resnet_basic_block)
    out = jax.block_until_ready(fwd(x, params))
    ref = jax.block_until_ready(_ref_block(x, params))

    assert out.shape == (N, C, H, W)
    assert jnp.allclose(out, ref, rtol=5e-2, atol=5e-2), (
        "mismatch vs JAX reference: max abs err = "
        f"{float(jnp.max(jnp.abs(out - ref)))}")

    print("KERNEL_OK")
</pallas_src>

<mosaic_0001>
module attributes {stable_mosaic.version = 11 : i64} {
  func.func @_conv1_kernel(%arg0: i32, %arg1: memref<1x16x16x4xbf16, #tpu.memory_space<vmem>>, %arg2: memref<9x4x4xbf16, #tpu.memory_space<vmem>>, %arg3: memref<1x4xf32, #tpu.memory_space<vmem>>, %arg4: memref<1x256x4xbf16, #tpu.memory_space<vmem>>, %arg5: memref<1x2x4xf32, #tpu.memory_space<vmem>>, %arg6: memref<1x18x18x4xbf16, #tpu.memory_space<vmem>>) attributes {dimension_semantics = [#tpu.dimension_semantics<parallel>], iteration_bounds = array<i64: 2>, scalar_prefetch = 0 : i64, scratch_operands = 1 : i64, tpu.core_type = #tpu.core_type<tc>, window_params = [{transform_indices = @transform_0, window_bounds = array<i64: 1, 16, 16, 4>}, {pipeline_mode = #tpu.pipeline_mode<synchronous>, transform_indices = @transform_1, window_bounds = array<i64: 9, 4, 4>}, {pipeline_mode = #tpu.pipeline_mode<synchronous>, transform_indices = @transform_2, window_bounds = array<i64: 1, 4>}, {transform_indices = @transform_3, window_bounds = array<i64: 1, 256, 4>}, {transform_indices = @transform_4, window_bounds = array<i64: 1, 2, 4>}]} {
    %c0 = arith.constant 0 : index
    %c0_0 = arith.constant 0 : index
    %c0_1 = arith.constant 0 : index
    %c0_2 = arith.constant 0 : index
    %0 = vector.load %arg1[%c0, %c0_0, %c0_1, %c0_2] : memref<1x16x16x4xbf16, #tpu.memory_space<vmem>>, vector<1x16x16x4xbf16>
    %cst = arith.constant 0.000000e+00 : bf16
    %1 = vector.broadcast %cst : bf16 to vector<1x1x18x4xbf16>
    %cst_3 = arith.constant 0.000000e+00 : bf16
    %2 = vector.broadcast %cst_3 : bf16 to vector<1x16x1x4xbf16>
    %c0_4 = arith.constant 0 : index
    %c0_5 = arith.constant 0 : index
    %c0_6 = arith.constant 0 : index
    %c0_7 = arith.constant 0 : index
    %3 = vector.load %arg6[%c0_4, %c0_5, %c0_6, %c0_7] : memref<1x18x18x4xbf16, #tpu.memory_space<vmem>>, vector<1x1x18x4xbf16>
    tpu.vector_store %arg6[%c0_4, %c0_5, %c0_6, %c0_7], %1 {strides = array<i32>} : memref<1x18x18x4xbf16, #tpu.memory_space<vmem>>, vector<1x1x18x4xbf16>,
    %c0_8 = arith.constant 0 : index
    %c17 = arith.constant 17 : index
    %c0_9 = arith.constant 0 : index
    %c0_10 = arith.constant 0 : index
    %4 = vector.load %arg6[%c0_8, %c17, %c0_9, %c0_10] : memref<1x18x18x4xbf16, #tpu.memory_space<vmem>>, vector<1x1x18x4xbf16>
    tpu.vector_store %arg6[%c0_8, %c17, %c0_9, %c0_10], %1 {strides = array<i32>} : memref<1x18x18x4xbf16, #tpu.memory_space<vmem>>, vector<1x1x18x4xbf16>,
    %c0_11 = arith.constant 0 : index
    %c1 = arith.constant 1 : index
    %c0_12 = arith.constant 0 : index
    %c0_13 = arith.constant 0 : index
    %5 = vector.load %arg6[%c0_11, %c1, %c0_12, %c0_13] : memref<1x18x18x4xbf16, #tpu.memory_space<vmem>>, vector<1x16x1x4xbf16>
    tpu.vector_store %arg6[%c0_11, %c1, %c0_12, %c0_13], %2 {strides = array<i32>} : memref<1x18x18x4xbf16, #tpu.memory_space<vmem>>, vector<1x16x1x4xbf16>,
    %c0_14 = arith.constant 0 : index
    %c1_15 = arith.constant 1 : index
    %c17_16 = arith.constant 17 : index
    %c0_17 = arith.constant 0 : index
    %6 = vector.load %arg6[%c0_14, %c1_15, %c17_16, %c0_17] : memref<1x18x18x4xbf16, #tpu.memory_space<vmem>>, vector<1x16x1x4xbf16>
    tpu.vector_store %arg6[%c0_14, %c1_15, %c17_16, %c0_17], %2 {strides = array<i32>} : memref<1x18x18x4xbf16, #tpu.memory_space<vmem>>, vector<1x16x1x4xbf16>,
    %c0_18 = arith.constant 0 : index
    %c1_19 = arith.constant 1 : index
    %c1_20 = arith.constant 1 : index
    %c0_21 = arith.constant 0 : index
    %7 = vector.load %arg6[%c0_18, %c1_19, %c1_20, %c0_21] : memref<1x18x18x4xbf16, #tpu.memory_space<vmem>>, vector<1x16x16x4xbf16>
    tpu.vector_store %arg6[%c0_18, %c1_19, %c1_20, %c0_21], %0 {strides = array<i32>} : memref<1x18x18x4xbf16, #tpu.memory_space<vmem>>, vector<1x16x16x4xbf16>,
    %c0_22 = arith.constant 0 : index
    %c0_23 = arith.constant 0 : index
    %8 = vector.load %arg3[%c0_22, %c0_23] : memref<1x4xf32, #tpu.memory_space<vmem>>, vector<1x4xf32>
    %c0_24 = arith.constant 0 : index
    %c0_25 = arith.constant 0 : index
    %c0_26 = arith.constant 0 : index
    %c0_27 = arith.constant 0 : index
    %9 = vector.load %arg6[%c0_24, %c0_25, %c0_26, %c0_27] : memref<1x18x18x4xbf16, #tpu.memory_space<vmem>>, vector<1x16x16x4xbf16>
    %10 = vector.shape_cast %9 : vector<1x16x16x4xbf16> to vector<256x4xbf16>
    %c0_28 = arith.constant 0 : index
    %c0_29 = arith.constant 0 : index
    %c0_30 = arith.constant 0 : index
    %11 = vector.load %arg2[%c0_28, %c0_29, %c0_30] : memref<9x4x4xbf16, #tpu.memory_space<vmem>>, vector<1x4x4xbf16>
    %12 = vector.shape_cast %11 : vector<1x4x4xbf16> to vector<4x4xbf16>
    %cst_31 = arith.constant dense<0.000000e+00> : vector<256x4xf32>
    %13 = tpu.matmul %10, %12, %cst_31 {dimension_numbers = #tpu.dot_dimension_numbers<[1], [0], [0], [1], [0, 0, 1, 1], [], []>} : vector<256x4xbf16>, vector<4x4xbf16>, vector<256x4xf32> -> vector<256x4xf32>
    %c0_32 = arith.constant 0 : index
    %c0_33 = arith.constant 0 : index
    %c1_34 = arith.constant 1 : index
    %c0_35 = arith.constant 0 : index
    %14 = vector.load %arg6[%c0_32, %c0_33, %c1_34, %c0_35] : memref<1x18x18x4xbf16, #tpu.memory_space<vmem>>, vector<1x16x16x4xbf16>
    %15 = vector.shape_cast %14 : vector<1x16x16x4xbf16> to vector<256x4xbf16>
    %c1_36 = arith.constant 1 : index
    %c0_37 = arith.constant 0 : index
    %c0_38 = arith.constant 0 : index
    %16 = vector.load %arg2[%c1_36, %c0_37, %c0_38] : memref<9x4x4xbf16, #tpu.memory_space<vmem>>, vector<1x4x4xbf16>
    %17 = vector.shape_cast %16 : vector<1x4x4xbf16> to vector<4x4xbf16>
    %cst_39 = arith.constant dense<0.000000e+00> : vector<256x4xf32>
    %18 = tpu.matmul %15, %17, %cst_39 {dimension_numbers = #tpu.dot_dimension_numbers<[1], [0], [0], [1], [0, 0, 1, 1], [], []>} : vector<256x4xbf16>, vector<4x4xbf16>, vector<256x4xf32> -> vector<256x4xf32>
    %19 = arith.addf %13, %18 : vector<256x4xf32>
    %c0_40 = arith.constant 0 : index
    %c0_41 = arith.constant 0 : index
    %c2 = arith.constant 2 : index
    %c0_42 = arith.constant 0 : index
    %20 = vector.load %arg6[%c0_40, %c0_41, %c2, %c0_42] : memref<1x18x18x4xbf16, #tpu.memory_space<vmem>>, vector<1x16x16x4xbf16>
    %21 = vector.shape_cast %20 : vector<1x16x16x4xbf16> to vector<256x4xbf16>
    %c2_43 = arith.constant 2 : index
    %c0_44 = arith.constant 0 : index
    %c0_45 = arith.constant 0 : index
    %22 = vector.load %arg2[%c2_43, %c0_44, %c0_45] : memref<9x4x4xbf16, #tpu.memory_space<vmem>>, vector<1x4x4xbf16>
    %23 = vector.shape_cast %22 : vector<1x4x4xbf16> to vector<4x4xbf16>
    %cst_46 = arith.constant dense<0.000000e+00> : vector<256x4xf32>
    %24 = tpu.matmul %21, %23, %cst_46 {dimension_numbers = #tpu.dot_dimension_numbers<[1], [0], [0], [1], [0, 0, 1, 1], [], []>} : vector<256x4xbf16>, vector<4x4xbf16>, vector<256x4xf32> -> vector<256x4xf32>
    %25 = arith.addf %19, %24 : vector<256x4xf32>
    %c0_47 = arith.constant 0 : index
    %c1_48 = arith.constant 1 : index
    %c0_49 = arith.constant 0 : index
    %c0_50 = arith.constant 0 : index
    %26 = vector.load %arg6[%c0_47, %c1_48, %c0_49, %c0_50] : memref<1x18x18x4xbf16, #tpu.memory_space<vmem>>, vector<1x16x16x4xbf16>
    %27 = vector.shape_cast %26 : vector<1x16x16x4xbf16> to vector<256x4xbf16>
    %c3 = arith.constant 3 : index
    %c0_51 = arith.constant 0 : index
    %c0_52 = arith.constant 0 : index
    %28 = vector.load %arg2[%c3, %c0_51, %c0_52] : memref<9x4x4xbf16, #tpu.memory_space<vmem>>, vector<1x4x4xbf16>
    %29 = vector.shape_cast %28 : vector<1x4x4xbf16> to vector<4x4xbf16>
    %cst_53 = arith.constant dense<0.000000e+00> : vector<256x4xf32>
    %30 = tpu.matmul %27, %29, %cst_53 {dimension_numbers = #tpu.dot_dimension_numbers<[1], [0], [0], [1], [0, 0, 1, 1], [], []>} : vector<256x4xbf16>, vector<4x4xbf16>, vector<256x4xf32> -> vector<256x4xf32>
    %31 = arith.addf %25, %30 : vector<256x4xf32>
    %c0_54 = arith.constant 0 : index
    %c1_55 = arith.constant 1 : index
    %c1_56 = arith.constant 1 : index
    %c0_57 = arith.constant 0 : index
    %32 = vector.load %arg6[%c0_54, %c1_55, %c1_56, %c0_57] : memref<1x18x18x4xbf16, #tpu.memory_space<vmem>>, vector<1x16x16x4xbf16>
    %33 = vector.shape_cast %32 : vector<1x16x16x4xbf16> to vector<256x4xbf16>
    %c4 = arith.constant 4 : index
    %c0_58 = arith.constant 0 : index
    %c0_59 = arith.constant 0 : index
    %34 = vector.load %arg2[%c4, %c0_58, %c0_59] : memref<9x4x4xbf16, #tpu.memory_space<vmem>>, vector<1x4x4xbf16>
    %35 = vector.shape_cast %34 : vector<1x4x4xbf16> to vector<4x4xbf16>
    %cst_60 = arith.constant dense<0.000000e+00> : vector<256x4xf32>
    %36 = tpu.matmul %33, %35, %cst_60 {dimension_numbers = #tpu.dot_dimension_numbers<[1], [0], [0], [1], [0, 0, 1, 1], [], []>} : vector<256x4xbf16>, vector<4x4xbf16>, vector<256x4xf32> -> vector<256x4xf32>
    %37 = arith.addf %31, %36 : vector<256x4xf32>
    %c0_61 = arith.constant 0 : index
    %c1_62 = arith.constant 1 : index
    %c2_63 = arith.constant 2 : index
    %c0_64 = arith.constant 0 : index
    %38 = vector.load %arg6[%c0_61, %c1_62, %c2_63, %c0_64] : memref<1x18x18x4xbf16, #tpu.memory_space<vmem>>, vector<1x16x16x4xbf16>
    %39 = vector.shape_cast %38 : vector<1x16x16x4xbf16> to vector<256x4xbf16>
    %c5 = arith.constant 5 : index
    %c0_65 = arith.constant 0 : index
    %c0_66 = arith.constant 0 : index
    %40 = vector.load %arg2[%c5, %c0_65, %c0_66] : memref<9x4x4xbf16, #tpu.memory_space<vmem>>, vector<1x4x4xbf16>
    %41 = vector.shape_cast %40 : vector<1x4x4xbf16> to vector<4x4xbf16>
    %cst_67 = arith.constant dense<0.000000e+00> : vector<256x4xf32>
    %42 = tpu.matmul %39, %41, %cst_67 {dimension_numbers = #tpu.dot_dimension_numbers<[1], [0], [0], [1], [0, 0, 1, 1], [], []>} : vector<256x4xbf16>, vector<4x4xbf16>, vector<256x4xf32> -> vector<256x4xf32>
    %43 = arith.addf %37, %42 : vector<256x4xf32>
    %c0_68 = arith.constant 0 : index
    %c2_69 = arith.constant 2 : index
    %c0_70 = arith.constant 0 : index
    %c0_71 = arith.constant 0 : index
    %44 = vector.load %arg6[%c0_68, %c2_69, %c0_70, %c0_71] : memref<1x18x18x4xbf16, #tpu.memory_space<vmem>>, vector<1x16x16x4xbf16>
    %45 = vector.shape_cast %44 : vector<1x16x16x4xbf16> to vector<256x4xbf16>
    %c6 = arith.constant 6 : index
    %c0_72 = arith.constant 0 : index
    %c0_73 = arith.constant 0 : index
    %46 = vector.load %arg2[%c6, %c0_72, %c0_73] : memref<9x4x4xbf16, #tpu.memory_space<vmem>>, vector<1x4x4xbf16>
    %47 = vector.shape_cast %46 : vector<1x4x4xbf16> to vector<4x4xbf16>
    %cst_74 = arith.constant dense<0.000000e+00> : vector<256x4xf32>
    %48 = tpu.matmul %45, %47, %cst_74 {dimension_numbers = #tpu.dot_dimension_numbers<[1], [0], [0], [1], [0, 0, 1, 1], [], []>} : vector<256x4xbf16>, vector<4x4xbf16>, vector<256x4xf32> -> vector<256x4xf32>
    %49 = arith.addf %43, %48 : vector<256x4xf32>
    %c0_75 = arith.constant 0 : index
    %c2_76 = arith.constant 2 : index
    %c1_77 = arith.constant 1 : index
    %c0_78 = arith.constant 0 : index
    %50 = vector.load %arg6[%c0_75, %c2_76, %c1_77, %c0_78] : memref<1x18x18x4xbf16, #tpu.memory_space<vmem>>, vector<1x16x16x4xbf16>
    %51 = vector.shape_cast %50 : vector<1x16x16x4xbf16> to vector<256x4xbf16>
    %c7 = arith.constant 7 : index
    %c0_79 = arith.constant 0 : index
    %c0_80 = arith.constant 0 : index
    %52 = vector.load %arg2[%c7, %c0_79, %c0_80] : memref<9x4x4xbf16, #tpu.memory_space<vmem>>, vector<1x4x4xbf16>
    %53 = vector.shape_cast %52 : vector<1x4x4xbf16> to vector<4x4xbf16>
    %cst_81 = arith.constant dense<0.000000e+00> : vector<256x4xf32>
    %54 = tpu.matmul %51, %53, %cst_81 {dimension_numbers = #tpu.dot_dimension_numbers<[1], [0], [0], [1], [0, 0, 1, 1], [], []>} : vector<256x4xbf16>, vector<4x4xbf16>, vector<256x4xf32> -> vector<256x4xf32>
    %55 = arith.addf %49, %54 : vector<256x4xf32>
    %c0_82 = arith.constant 0 : index
    %c2_83 = arith.constant 2 : index
    %c2_84 = arith.constant 2 : index
    %c0_85 = arith.constant 0 : index
    %56 = vector.load %arg6[%c0_82, %c2_83, %c2_84, %c0_85] : memref<1x18x18x4xbf16, #tpu.memory_space<vmem>>, vector<1x16x16x4xbf16>
    %57 = vector.shape_cast %56 : vector<1x16x16x4xbf16> to vector<256x4xbf16>
    %c8 = arith.constant 8 : index
    %c0_86 = arith.constant 0 : index
    %c0_87 = arith.constant 0 : index
    %58 = vector.load %arg2[%c8, %c0_86, %c0_87] : memref<9x4x4xbf16, #tpu.memory_space<vmem>>, vector<1x4x4xbf16>
    %59 = vector.shape_cast %58 : vector<1x4x4xbf16> to vector<4x4xbf16>
    %cst_88 = arith.constant dense<0.000000e+00> : vector<256x4xf32>
    %60 = tpu.matmul %57, %59, %cst_88 {dimension_numbers = #tpu.dot_dimension_numbers<[1], [0], [0], [1], [0, 0, 1, 1], [], []>} : vector<256x4xbf16>, vector<4x4xbf16>, vector<256x4xf32> -> vector<256x4xf32>
    %61 = arith.addf %55, %60 : vector<256x4xf32>
    %62 = vector.broadcast %8 : vector<1x4xf32> to vector<256x4xf32>
    %63 = arith.addf %61, %62 : vector<256x4xf32>
    %64 = vector.shape_cast %63 : vector<256x4xf32> to vector<1x256x4xf32>
    %65 = arith.truncf %64 : vector<1x256x4xf32> to vector<1x256x4xbf16>
    %c0_89 = arith.constant 0 : index
    %c0_90 = arith.constant 0 : index
    %c0_91 = arith.constant 0 : index
    %66 = vector.load %arg4[%c0_89, %c0_90, %c0_91] : memref<1x256x4xbf16, #tpu.memory_space<vmem>>, vector<1x256x4xbf16>
    tpu.vector_store %arg4[%c0_89, %c0_90, %c0_91], %65 {strides = array<i32>} : memref<1x256x4xbf16, #tpu.memory_space<vmem>>, vector<1x256x4xbf16>,
    %cst_92 = arith.constant dense<0.000000e+00> : vector<4xf32>
    %67 = vector.multi_reduction <add>, %63, %cst_92 [0] : vector<256x4xf32> to vector<4xf32>
    %68 = vector.shape_cast %67 : vector<4xf32> to vector<1x4xf32>
    %69 = arith.mulf %63, %63 : vector<256x4xf32>
    %cst_93 = arith.constant dense<0.000000e+00> : vector<4xf32>
    %70 = vector.multi_reduction <add>, %69, %cst_93 [0] : vector<256x4xf32> to vector<4xf32>
    %71 = vector.shape_cast %70 : vector<4xf32> to vector<1x4xf32>
    %72 = tpu.concatenate %68, %71 in 0 : vector<1x4xf32>, vector<1x4xf32> -> vector<2x4xf32>
    %c0_94 = arith.constant 0 : index
    %c0_95 = arith.constant 0 : index
    %c0_96 = arith.constant 0 : index
    %73 = vector.load %arg5[%c0_94, %c0_95, %c0_96] : memref<1x2x4xf32, #tpu.memory_space<vmem>>, vector<1x2x4xf32>
    %74 = vector.shape_cast %73 : vector<1x2x4xf32> to vector<2x4xf32>
    %75 = vector.shape_cast %72 : vector<2x4xf32> to vector<1x2x4xf32>
    tpu.vector_store %arg5[%c0_94, %c0_95, %c0_96], %75 {strides = array<i32>} : memref<1x2x4xf32, #tpu.memory_space<vmem>>, vector<1x2x4xf32>,
    return
  }
  func.func @transform_0(%arg0: i32) -> (i32, i32, i32, i32) {
    %c0_i32 = arith.constant 0 : i32
    %c0_i32_0 = arith.constant 0 : i32
    %c0_i32_1 = arith.constant 0 : i32
    %c0_i32_2 = arith.constant 0 : i32
    return %arg0, %c0_i32, %c0_i32_0, %c0_i32_1 : i32, i32, i32, i32
  }
  func.func @transform_1(%arg0: i32) -> (i32, i32, i32) {
    %c0_i32 = arith.constant 0 : i32
    %c0_i32_0 = arith.constant 0 : i32
    %c0_i32_1 = arith.constant 0 : i32
    %c0_i32_2 = arith.constant 0 : i32
    return %c0_i32, %c0_i32_0, %c0_i32_1 : i32, i32, i32
  }
  func.func @transform_2(%arg0: i32) -> (i32, i32) {
    %c0_i32 = arith.constant 0 : i32
    %c0_i32_0 = arith.constant 0 : i32
    %c0_i32_1 = arith.constant 0 : i32
    return %c0_i32, %c0_i32_0 : i32, i32
  }
  func.func @transform_3(%arg0: i32) -> (i32, i32, i32) {
    %c0_i32 = arith.constant 0 : i32
    %c0_i32_0 = arith.constant 0 : i32
    %c0_i32_1 = arith.constant 0 : i32
    return %arg0, %c0_i32, %c0_i32_0 : i32, i32, i32
  }
  func.func @transform_4(%arg0: i32) -> (i32, i32, i32) {
    %c0_i32 = arith.constant 0 : i32
    %c0_i32_0 = arith.constant 0 : i32
    %c0_i32_1 = arith.constant 0 : i32
    return %arg0, %c0_i32, %c0_i32_0 : i32, i32, i32
  }
}

module attributes {stable_mosaic.version = 11 : i64} {
  func.func @_bn_relu_conv2_kernel(%arg0: i32, %arg1: memref<1x256x4xbf16, #tpu.memory_space<vmem>>, %arg2: memref<1x4xf32, #tpu.memory_space<vmem>>, %arg3: memref<1x4xf32, #tpu.memory_space<vmem>>, %arg4: memref<9x4x4xbf16, #tpu.memory_space<vmem>>, %arg5: memref<1x4xf32, #tpu.memory_space<vmem>>, %arg6: memref<1x256x4xbf16, #tpu.memory_space<vmem>>, %arg7: memref<1x2x4xf32, #tpu.memory_space<vmem>>, %arg8: memref<1x18x18x4xbf16, #tpu.memory_space<vmem>>) attributes {dimension_semantics = [#tpu.dimension_semantics<parallel>], iteration_bounds = array<i64: 2>, scalar_prefetch = 0 : i64, scratch_operands = 1 : i64, tpu.core_type = #tpu.core_type<tc>, window_params = [{transform_indices = @transform_0, window_bounds = array<i64: 1, 256, 4>}, {pipeline_mode = #tpu.pipeline_mode<synchronous>, transform_indices = @transform_1, window_bounds = array<i64: 1, 4>}, {pipeline_mode = #tpu.pipeline_mode<synchronous>, transform_indices = @transform_2, window_bounds = array<i64: 1, 4>}, {pipeline_mode = #tpu.pipeline_mode<synchronous>, transform_indices = @transform_3, window_bounds = array<i64: 9, 4, 4>}, {pipeline_mode = #tpu.pipeline_mode<synchronous>, transform_indices = @transform_4, window_bounds = array<i64: 1, 4>}, {transform_indices = @transform_5, window_bounds = array<i64: 1, 256, 4>}, {transform_indices = @transform_6, window_bounds = array<i64: 1, 2, 4>}]} {
    %c0 = arith.constant 0 : index
    %c0_0 = arith.constant 0 : index
    %c0_1 = arith.constant 0 : index
    %0 = vector.load %arg1[%c0, %c0_0, %c0_1] : memref<1x256x4xbf16, #tpu.memory_space<vmem>>, vector<1x256x4xbf16>
    %1 = arith.extf %0 : vector<1x256x4xbf16> to vector<1x256x4xf32>
    %c0_2 = arith.constant 0 : index
    %c0_3 = arith.constant 0 : index
    %2 = vector.load %arg2[%c0_2, %c0_3] : memref<1x4xf32, #tpu.memory_space<vmem>>, vector<1x4xf32>
    %3 = vector.shape_cast %2 : vector<1x4xf32> to vector<1x1x4xf32>
    %4 = vector.broadcast %3 : vector<1x1x4xf32> to vector<1x256x4xf32>
    %5 = arith.mulf %1, %4 : vector<1x256x4xf32>
    %c0_4 = arith.constant 0 : index
    %c0_5 = arith.constant 0 : index
    %6 = vector.load %arg3[%c0_4, %c0_5] : memref<1x4xf32, #tpu.memory_space<vmem>>, vector<1x4xf32>
    %7 = vector.shape_cast %6 : vector<1x4xf32> to vector<1x1x4xf32>
    %8 = vector.broadcast %7 : vector<1x1x4xf32> to vector<1x256x4xf32>
    %9 = arith.addf %5, %8 : vector<1x256x4xf32>
    %cst = arith.constant 0.000000e+00 : f32
    %10 = vector.broadcast %cst : f32 to vector<1x256x4xf32>
    %11 = arith.maximumf %9, %10 : vector<1x256x4xf32>
    %12 = arith.truncf %11 : vector<1x256x4xf32> to vector<1x256x4xbf16>
    %13 = vector.shape_cast %12 : vector<1x256x4xbf16> to vector<1x16x16x4xbf16>
    %cst_6 = arith.constant 0.000000e+00 : bf16
    %14 = vector.broadcast %cst_6 : bf16 to vector<1x1x18x4xbf16>
    %cst_7 = arith.constant 0.000000e+00 : bf16
    %15 = vector.broadcast %cst_7 : bf16 to vector<1x16x1x4xbf16>
    %c0_8 = arith.constant 0 : index
    %c0_9 = arith.constant 0 : index
    %c0_10 = arith.constant 0 : index
    %c0_11 = arith.constant 0 : index
    %16 = vector.load %arg8[%c0_8, %c0_9, %c0_10, %c0_11] : memref<1x18x18x4xbf16, #tpu.memory_space<vmem>>, vector<1x1x18x4xbf16>
    tpu.vector_store %arg8[%c0_8, %c0_9, %c0_10, %c0_11], %14 {strides = array<i32>} : memref<1x18x18x4xbf16, #tpu.memory_space<vmem>>, vector<1x1x18x4xbf16>,
    %c0_12 = arith.constant 0 : index
    %c17 = arith.constant 17 : index
    %c0_13 = arith.constant 0 : index
    %c0_14 = arith.constant 0 : index
    %17 = vector.load %arg8[%c0_12, %c17, %c0_13, %c0_14] : memref<1x18x18x4xbf16, #tpu.memory_space<vmem>>, vector<1x1x18x4xbf16>
    tpu.vector_store %arg8[%c0_12, %c17, %c0_13, %c0_14], %14 {strides = array<i32>} : memref<1x18x18x4xbf16, #tpu.memory_space<vmem>>, vector<1x1x18x4xbf16>,
    %c0_15 = arith.constant 0 : index
    %c1 = arith.constant 1 : index
    %c0_16 = arith.constant 0 : index
    %c0_17 = arith.constant 0 : index
    %18 = vector.load %arg8[%c0_15, %c1, %c0_16, %c0_17] : memref<1x18x18x4xbf16, #tpu.memory_space<vmem>>, vector<1x16x1x4xbf16>
    tpu.vector_store %arg8[%c0_15, %c1, %c0_16, %c0_17], %15 {strides = array<i32>} : memref<1x18x18x4xbf16, #tpu.memory_space<vmem>>, vector<1x16x1x4xbf16>,
    %c0_18 = arith.constant 0 : index
    %c1_19 = arith.constant 1 : index
    %c17_20 = arith.constant 17 : index
    %c0_21 = arith.constant 0 : index
    %19 = vector.load %arg8[%c0_18, %c1_19, %c17_20, %c0_21] : memref<1x18x18x4xbf16, #tpu.memory_space<vmem>>, vector<1x16x1x4xbf16>
    tpu.vector_store %arg8[%c0_18, %c1_19, %c17_20, %c0_21], %15 {strides = array<i32>} : memref<1x18x18x4xbf16, #tpu.memory_space<vmem>>, vector<1x16x1x4xbf16>,
    %c0_22 = arith.constant 0 : index
    %c1_23 = arith.constant 1 : index
    %c1_24 = arith.constant 1 : index
    %c0_25 = arith.constant 0 : index
    %20 = vector.load %arg8[%c0_22, %c1_23, %c1_24, %c0_25] : memref<1x18x18x4xbf16, #tpu.memory_space<vmem>>, vector<1x16x16x4xbf16>
    tpu.vector_store %arg8[%c0_22, %c1_23, %c1_24, %c0_25], %13 {strides = array<i32>} : memref<1x18x18x4xbf16, #tpu.memory_space<vmem>>, vector<1x16x16x4xbf16>,
    %c0_26 = arith.constant 0 : index
    %c0_27 = arith.constant 0 : index
    %21 = vector.load %arg5[%c0_26, %c0_27] : memref<1x4xf32, #tpu.memory_space<vmem>>, vector<1x4xf32>
    %c0_28 = arith.constant 0 : index
    %c0_29 = arith.constant 0 : index
    %c0_30 = arith.constant 0 : index
    %c0_31 = arith.constant 0 : index
    %22 = vector.load %arg8[%c0_28, %c0_29, %c0_30, %c0_31] : memref<1x18x18x4xbf16, #tpu.memory_space<vmem>>, vector<1x16x16x4xbf16>
    %23 = vector.shape_cast %22 : vector<1x16x16x4xbf16> to vector<256x4xbf16>
    %c0_32 = arith.constant 0 : index
    %c0_33 = arith.constant 0 : index
    %c0_34 = arith.constant 0 : index
    %24 = vector.load %arg4[%c0_32, %c0_33, %c0_34] : memref<9x4x4xbf16, #tpu.memory_space<vmem>>, vector<1x4x4xbf16>
    %25 = vector.shape_cast %24 : vector<1x4x4xbf16> to vector<4x4xbf16>
    %cst_35 = arith.constant dense<0.000000e+00> : vector<256x4xf32>
    %26 = tpu.matmul %23, %25, %cst_35 {dimension_numbers = #tpu.dot_dimension_numbers<[1], [0], [0], [1], [0, 0, 1, 1], [], []>} : vector<256x4xbf16>, vector<4x4xbf16>, vector<256x4xf32> -> vector<256x4xf32>
    %c0_36 = arith.constant 0 : index
    %c0_37 = arith.constant 0 : index
    %c1_38 = arith.constant 1 : index
    %c0_39 = arith.constant 0 : index
    %27 = vector.load %arg8[%c0_36, %c0_37, %c1_38, %c0_39] : memref<1x18x18x4xbf16, #tpu.memory_space<vmem>>, vector<1x16x16x4xbf16>
    %28 = vector.shape_cast %27 : vector<1x16x16x4xbf16> to vector<256x4xbf16>
    %c1_40 = arith.constant 1 : index
    %c0_41 = arith.constant 0 : index
    %c0_42 = arith.constant 0 : index
    %29 = vector.load %arg4[%c1_40, %c0_41, %c0_42] : memref<9x4x4xbf16, #tpu.memory_space<vmem>>, vector<1x4x4xbf16>
    %30 = vector.shape_cast %29 : vector<1x4x4xbf16> to vector<4x4xbf16>
    %cst_43 = arith.constant dense<0.000000e+00> : vector<256x4xf32>
    %31 = tpu.matmul %28, %30, %cst_43 {dimension_numbers = #tpu.dot_dimension_numbers<[1], [0], [0], [1], [0, 0, 1, 1], [], []>} : vector<256x4xbf16>, vector<4x4xbf16>, vector<256x4xf32> -> vector<256x4xf32>
    %32 = arith.addf %26, %31 : vector<256x4xf32>
    %c0_44 = arith.constant 0 : index
    %c0_45 = arith.constant 0 : index
    %c2 = arith.constant 2 : index
    %c0_46 = arith.constant 0 : index
    %33 = vector.load %arg8[%c0_44, %c0_45, %c2, %c0_46] : memref<1x18x18x4xbf16, #tpu.memory_space<vmem>>, vector<1x16x16x4xbf16>
    %34 = vector.shape_cast %33 : vector<1x16x16x4xbf16> to vector<256x4xbf16>
    %c2_47 = arith.constant 2 : index
    %c0_48 = arith.constant 0 : index
    %c0_49 = arith.constant 0 : index
    %35 = vector.load %arg4[%c2_47, %c0_48, %c0_49] : memref<9x4x4xbf16, #tpu.memory_space<vmem>>, vector<1x4x4xbf16>
    %36 = vector.shape_cast %35 : vector<1x4x4xbf16> to vector<4x4xbf16>
    %cst_50 = arith.constant dense<0.000000e+00> : vector<256x4xf32>
    %37 = tpu.matmul %34, %36, %cst_50 {dimension_numbers = #tpu.dot_dimension_numbers<[1], [0], [0], [1], [0, 0, 1, 1], [], []>} : vector<256x4xbf16>, vector<4x4xbf16>, vector<256x4xf32> -> vector<256x4xf32>
    %38 = arith.addf %32, %37 : vector<256x4xf32>
    %c0_51 = arith.constant 0 : index
    %c1_52 = arith.constant 1 : index
    %c0_53 = arith.constant 0 : index
    %c0_54 = arith.constant 0 : index
    %39 = vector.load %arg8[%c0_51, %c1_52, %c0_53, %c0_54] : memref<1x18x18x4xbf16, #tpu.memory_space<vmem>>, vector<1x16x16x4xbf16>
    %40 = vector.shape_cast %39 : vector<1x16x16x4xbf16> to vector<256x4xbf16>
    %c3 = arith.constant 3 : index
    %c0_55 = arith.constant 0 : index
    %c0_56 = arith.constant 0 : index
    %41 = vector.load %arg4[%c3, %c0_55, %c0_56] : memref<9x4x4xbf16, #tpu.memory_space<vmem>>, vector<1x4x4xbf16>
    %42 = vector.shape_cast %41 : vector<1x4x4xbf16> to vector<4x4xbf16>
    %cst_57 = arith.constant dense<0.000000e+00> : vector<256x4xf32>
    %43 = tpu.matmul %40, %42, %cst_57 {dimension_numbers = #tpu.dot_dimension_numbers<[1], [0], [0], [1], [0, 0, 1, 1], [], []>} : vector<256x4xbf16>, vector<4x4xbf16>, vector<256x4xf32> -> vector<256x4xf32>
    %44 = arith.addf %38, %43 : vector<256x4xf32>
    %c0_58 = arith.constant 0 : index
    %c1_59 = arith.constant 1 : index
    %c1_60 = arith.constant 1 : index
    %c0_61 = arith.constant 0 : index
    %45 = vector.load %arg8[%c0_58, %c1_59, %c1_60, %c0_61] : memref<1x18x18x4xbf16, #tpu.memory_space<vmem>>, vector<1x16x16x4xbf16>
    %46 = vector.shape_cast %45 : vector<1x16x16x4xbf16> to vector<256x4xbf16>
    %c4 = arith.constant 4 : index
    %c0_62 = arith.constant 0 : index
    %c0_63 = arith.constant 0 : index
    %47 = vector.load %arg4[%c4, %c0_62, %c0_63] : memref<9x4x4xbf16, #tpu.memory_space<vmem>>, vector<1x4x4xbf16>
    %48 = vector.shape_cast %47 : vector<1x4x4xbf16> to vector<4x4xbf16>
    %cst_64 = arith.constant dense<0.000000e+00> : vector<256x4xf32>
    %49 = tpu.matmul %46, %48, %cst_64 {dimension_numbers = #tpu.dot_dimension_numbers<[1], [0], [0], [1], [0, 0, 1, 1], [], []>} : vector<256x4xbf16>, vector<4x4xbf16>, vector<256x4xf32> -> vector<256x4xf32>
    %50 = arith.addf %44, %49 : vector<256x4xf32>
    %c0_65 = arith.constant 0 : index
    %c1_66 = arith.constant 1 : index
    %c2_67 = arith.constant 2 : index
    %c0_68 = arith.constant 0 : index
    %51 = vector.load %arg8[%c0_65, %c1_66, %c2_67, %c0_68] : memref<1x18x18x4xbf16, #tpu.memory_space<vmem>>, vector<1x16x16x4xbf16>
    %52 = vector.shape_cast %51 : vector<1x16x16x4xbf16> to vector<256x4xbf16>
    %c5 = arith.constant 5 : index
    %c0_69 = arith.constant 0 : index
    %c0_70 = arith.constant 0 : index
    %53 = vector.load %arg4[%c5, %c0_69, %c0_70] : memref<9x4x4xbf16, #tpu.memory_space<vmem>>, vector<1x4x4xbf16>
    %54 = vector.shape_cast %53 : vector<1x4x4xbf16> to vector<4x4xbf16>
    %cst_71 = arith.constant dense<0.000000e+00> : vector<256x4xf32>
    %55 = tpu.matmul %52, %54, %cst_71 {dimension_numbers = #tpu.dot_dimension_numbers<[1], [0], [0], [1], [0, 0, 1, 1], [], []>} : vector<256x4xbf16>, vector<4x4xbf16>, vector<256x4xf32> -> vector<256x4xf32>
    %56 = arith.addf %50, %55 : vector<256x4xf32>
    %c0_72 = arith.constant 0 : index
    %c2_73 = arith.constant 2 : index
    %c0_74 = arith.constant 0 : index
    %c0_75 = arith.constant 0 : index
    %57 = vector.load %arg8[%c0_72, %c2_73, %c0_74, %c0_75] : memref<1x18x18x4xbf16, #tpu.memory_space<vmem>>, vector<1x16x16x4xbf16>
    %58 = vector.shape_cast %57 : vector<1x16x16x4xbf16> to vector<256x4xbf16>
    %c6 = arith.constant 6 : index
    %c0_76 = arith.constant 0 : index
    %c0_77 = arith.constant 0 : index
    %59 = vector.load %arg4[%c6, %c0_76, %c0_77] : memref<9x4x4xbf16, #tpu.memory_space<vmem>>, vector<1x4x4xbf16>
    %60 = vector.shape_cast %59 : vector<1x4x4xbf16> to vector<4x4xbf16>
    %cst_78 = arith.constant dense<0.000000e+00> : vector<256x4xf32>
    %61 = tpu.matmul %58, %60, %cst_78 {dimension_numbers = #tpu.dot_dimension_numbers<[1], [0], [0], [1], [0, 0, 1, 1], [], []>} : vector<256x4xbf16>, vector<4x4xbf16>, vector<256x4xf32> -> vector<256x4xf32>
    %62 = arith.addf %56, %61 : vector<256x4xf32>
    %c0_79 = arith.constant 0 : index
    %c2_80 = arith.constant 2 : index
    %c1_81 = arith.constant 1 : index
    %c0_82 = arith.constant 0 : index
    %63 = vector.load %arg8[%c0_79, %c2_80, %c1_81, %c0_82] : memref<1x18x18x4xbf16, #tpu.memory_space<vmem>>, vector<1x16x16x4xbf16>
    %64 = vector.shape_cast %63 : vector<1x16x16x4xbf16> to vector<256x4xbf16>
    %c7 = arith.constant 7 : index
    %c0_83 = arith.constant 0 : index
    %c0_84 = arith.constant 0 : index
    %65 = vector.load %arg4[%c7, %c0_83, %c0_84] : memref<9x4x4xbf16, #tpu.memory_space<vmem>>, vector<1x4x4xbf16>
    %66 = vector.shape_cast %65 : vector<1x4x4xbf16> to vector<4x4xbf16>
    %cst_85 = arith.constant dense<0.000000e+00> : vector<256x4xf32>
    %67 = tpu.matmul %64, %66, %cst_85 {dimension_numbers = #tpu.dot_dimension_numbers<[1], [0], [0], [1], [0, 0, 1, 1], [], []>} : vector<256x4xbf16>, vector<4x4xbf16>, vector<256x4xf32> -> vector<256x4xf32>
    %68 = arith.addf %62, %67 : vector<256x4xf32>
    %c0_86 = arith.constant 0 : index
    %c2_87 = arith.constant 2 : index
    %c2_88 = arith.constant 2 : index
    %c0_89 = arith.constant 0 : index
    %69 = vector.load %arg8[%c0_86, %c2_87, %c2_88, %c0_89] : memref<1x18x18x4xbf16, #tpu.memory_space<vmem>>, vector<1x16x16x4xbf16>
    %70 = vector.shape_cast %69 : vector<1x16x16x4xbf16> to vector<256x4xbf16>
    %c8 = arith.constant 8 : index
    %c0_90 = arith.constant 0 : index
    %c0_91 = arith.constant 0 : index
    %71 = vector.load %arg4[%c8, %c0_90, %c0_91] : memref<9x4x4xbf16, #tpu.memory_space<vmem>>, vector<1x4x4xbf16>
    %72 = vector.shape_cast %71 : vector<1x4x4xbf16> to vector<4x4xbf16>
    %cst_92 = arith.constant dense<0.000000e+00> : vector<256x4xf32>
    %73 = tpu.matmul %70, %72, %cst_92 {dimension_numbers = #tpu.dot_dimension_numbers<[1], [0], [0], [1], [0, 0, 1, 1], [], []>} : vector<256x4xbf16>, vector<4x4xbf16>, vector<256x4xf32> -> vector<256x4xf32>
    %74 = arith.addf %68, %73 : vector<256x4xf32>
    %75 = vector.broadcast %21 : vector<1x4xf32> to vector<256x4xf32>
    %76 = arith.addf %74, %75 : vector<256x4xf32>
    %77 = vector.shape_cast %76 : vector<256x4xf32> to vector<1x256x4xf32>
    %78 = arith.truncf %77 : vector<1x256x4xf32> to vector<1x256x4xbf16>
    %c0_93 = arith.constant 0 : index
    %c0_94 = arith.constant 0 : index
    %c0_95 = arith.constant 0 : index
    %79 = vector.load %arg6[%c0_93, %c0_94, %c0_95] : memref<1x256x4xbf16, #tpu.memory_space<vmem>>, vector<1x256x4xbf16>
    tpu.vector_store %arg6[%c0_93, %c0_94, %c0_95], %78 {strides = array<i32>} : memref<1x256x4xbf16, #tpu.memory_space<vmem>>, vector<1x256x4xbf16>,
    %cst_96 = arith.constant dense<0.000000e+00> : vector<4xf32>
    %80 = vector.multi_reduction <add>, %76, %cst_96 [0] : vector<256x4xf32> to vector<4xf32>
    %81 = vector.shape_cast %80 : vector<4xf32> to vector<1x4xf32>
    %82 = arith.mulf %76, %76 : vector<256x4xf32>
    %cst_97 = arith.constant dense<0.000000e+00> : vector<4xf32>
    %83 = vector.multi_reduction <add>, %82, %cst_97 [0] : vector<256x4xf32> to vector<4xf32>
    %84 = vector.shape_cast %83 : vector<4xf32> to vector<1x4xf32>
    %85 = tpu.concatenate %81, %84 in 0 : vector<1x4xf32>, vector<1x4xf32> -> vector<2x4xf32>
    %c0_98 = arith.constant 0 : index
    %c0_99 = arith.constant 0 : index
    %c0_100 = arith.constant 0 : index
    %86 = vector.load %arg7[%c0_98, %c0_99, %c0_100] : memref<1x2x4xf32, #tpu.memory_space<vmem>>, vector<1x2x4xf32>
    %87 = vector.shape_cast %86 : vector<1x2x4xf32> to vector<2x4xf32>
    %88 = vector.shape_cast %85 : vector<2x4xf32> to vector<1x2x4xf32>
    tpu.vector_store %arg7[%c0_98, %c0_99, %c0_100], %88 {strides = array<i32>} : memref<1x2x4xf32, #tpu.memory_space<vmem>>, vector<1x2x4xf32>,
    return
  }
  func.func @transform_0(%arg0: i32) -> (i32, i32, i32) {
    %c0_i32 = arith.constant 0 : i32
    %c0_i32_0 = arith.constant 0 : i32
    %c0_i32_1 = arith.constant 0 : i32
    return %arg0, %c0_i32, %c0_i32_0 : i32, i32, i32
  }
  func.func @transform_1(%arg0: i32) -> (i32, i32) {
    %c0_i32 = arith.constant 0 : i32
    %c0_i32_0 = arith.constant 0 : i32
    %c0_i32_1 = arith.constant 0 : i32
    return %c0_i32, %c0_i32_0 : i32, i32
  }
  func.func @transform_2(%arg0: i32) -> (i32, i32) {
    %c0_i32 = arith.constant 0 : i32
    %c0_i32_0 = arith.constant 0 : i32
    %c0_i32_1 = arith.constant 0 : i32
    return %c0_i32, %c0_i32_0 : i32, i32
  }
  func.func @transform_3(%arg0: i32) -> (i32, i32, i32) {
    %c0_i32 = arith.constant 0 : i32
    %c0_i32_0 = arith.constant 0 : i32
    %c0_i32_1 = arith.constant 0 : i32
    %c0_i32_2 = arith.constant 0 : i32
    return %c0_i32, %c0_i32_0, %c0_i32_1 : i32, i32, i32
  }
  func.func @transform_4(%arg0: i32) -> (i32, i32) {
    %c0_i32 = arith.constant 0 : i32
    %c0_i32_0 = arith.constant 0 : i32
    %c0_i32_1 = arith.constant 0 : i32
    return %c0_i32, %c0_i32_0 : i32, i32
  }
  func.func @transform_5(%arg0: i32) -> (i32, i32, i32) {
    %c0_i32 = arith.constant 0 : i32
    %c0_i32_0 = arith.constant 0 : i32
    %c0_i32_1 = arith.constant 0 : i32
    return %arg0, %c0_i32, %c0_i32_0 : i32, i32, i32
  }
  func.func @transform_6(%arg0: i32) -> (i32, i32, i32) {
    %c0_i32 = arith.constant 0 : i32
    %c0_i32_0 = arith.constant 0 : i32
    %c0_i32_1 = arith.constant 0 : i32
    return %arg0, %c0_i32, %c0_i32_0 : i32, i32, i32
  }
}

module attributes {stable_mosaic.version = 11 : i64} {
  func.func @_bn2_add_relu_kernel(%arg0: i32, %arg1: memref<8x128xbf16, #tpu.memory_space<vmem>>, %arg2: memref<8x128xbf16, #tpu.memory_space<vmem>>, %arg3: memref<1x128xf32, #tpu.memory_space<vmem>>, %arg4: memref<1x128xf32, #tpu.memory_space<vmem>>, %arg5: memref<8x128xf32, #tpu.memory_space<vmem>>) attributes {dimension_semantics = [#tpu.dimension_semantics<parallel>], iteration_bounds = array<i64: 2>, scalar_prefetch = 0 : i64, scratch_operands = 0 : i64, tpu.core_type = #tpu.core_type<tc>, window_params = [{transform_indices = @transform_0, window_bounds = array<i64: 8, 128>}, {transform_indices = @transform_1, window_bounds = array<i64: 8, 128>}, {pipeline_mode = #tpu.pipeline_mode<synchronous>, transform_indices = @transform_2, window_bounds = array<i64: 1, 128>}, {pipeline_mode = #tpu.pipeline_mode<synchronous>, transform_indices = @transform_3, window_bounds = array<i64: 1, 128>}, {transform_indices = @transform_4, window_bounds = array<i64: 8, 128>}]} {
    %c0 = arith.constant 0 : index
    %c0_0 = arith.constant 0 : index
    %0 = vector.load %arg1[%c0, %c0_0] : memref<8x128xbf16, #tpu.memory_space<vmem>>, vector<8x128xbf16>
    %1 = arith.extf %0 : vector<8x128xbf16> to vector<8x128xf32>
    %c0_1 = arith.constant 0 : index
    %c0_2 = arith.constant 0 : index
    %2 = vector.load %arg2[%c0_1, %c0_2] : memref<8x128xbf16, #tpu.memory_space<vmem>>, vector<8x128xbf16>
    %3 = arith.extf %2 : vector<8x128xbf16> to vector<8x128xf32>
    %c0_3 = arith.constant 0 : index
    %c0_4 = arith.constant 0 : index
    %4 = vector.load %arg3[%c0_3, %c0_4] : memref<1x128xf32, #tpu.memory_space<vmem>>, vector<1x128xf32>
    %5 = vector.broadcast %4 : vector<1x128xf32> to vector<8x128xf32>
    %6 = arith.mulf %3, %5 : vector<8x128xf32>
    %7 = arith.addf %1, %6 : vector<8x128xf32>
    %c0_5 = arith.constant 0 : index
    %c0_6 = arith.constant 0 : index
    %8 = vector.load %arg4[%c0_5, %c0_6] : memref<1x128xf32, #tpu.memory_space<vmem>>, vector<1x128xf32>
    %9 = vector.broadcast %8 : vector<1x128xf32> to vector<8x128xf32>
    %10 = arith.addf %7, %9 : vector<8x128xf32>
    %cst = arith.constant 0.000000e+00 : f32
    %11 = vector.broadcast %cst : f32 to vector<8x128xf32>
    %12 = arith.maximumf %10, %11 : vector<8x128xf32>
    %c0_7 = arith.constant 0 : index
    %c0_8 = arith.constant 0 : index
    %13 = vector.load %arg5[%c0_7, %c0_8] : memref<8x128xf32, #tpu.memory_space<vmem>>, vector<8x128xf32>
    tpu.vector_store %arg5[%c0_7, %c0_8], %12 {strides = array<i32>} : memref<8x128xf32, #tpu.memory_space<vmem>>, vector<8x128xf32>,
    return
  }
  func.func @transform_0(%arg0: i32) -> (i32, i32) {
    %c0_i32 = arith.constant 0 : i32
    %c0_i32_0 = arith.constant 0 : i32
    return %arg0, %c0_i32 : i32, i32
  }
  func.func @transform_1(%arg0: i32) -> (i32, i32) {
    %c0_i32 = arith.constant 0 : i32
    %c0_i32_0 = arith.constant 0 : i32
    return %arg0, %c0_i32 : i32, i32
  }
  func.func @transform_2(%arg0: i32) -> (i32, i32) {
    %c0_i32 = arith.constant 0 : i32
    %c0_i32_0 = arith.constant 0 : i32
    %c0_i32_1 = arith.constant 0 : i32
    return %c0_i32, %c0_i32_0 : i32, i32
  }
  func.func @transform_3(%arg0: i32) -> (i32, i32) {
    %c0_i32 = arith.constant 0 : i32
    %c0_i32_0 = arith.constant 0 : i32
    %c0_i32_1 = arith.constant 0 : i32
    return %c0_i32, %c0_i32_0 : i32, i32
  }
  func.func @transform_4(%arg0: i32) -> (i32, i32) {
    %c0_i32 = arith.constant 0 : i32
    %c0_i32_0 = arith.constant 0 : i32
    return %arg0, %c0_i32 : i32, i32
  }
}

</mosaic_0001>

<bundles_post_ra>
// kernel: resnet_basic_block.5
= control target key start
LH: loop header
LB: loop body
LE: loop exit
PB: predicated region body
PF: predicated region fallthrough
CT: control target
= control target key end

     0   :  { %s1010_s0 = inlined_call_operand.hbm [shape: bf16[16,128], index: 0, kind: input, shape index: {}]   ;;  %s1011_s1 = inlined_call_operand.hbm [shape: bf16[16,128], index: 1, kind: input, shape index: {}]   ;;  %s1012_s2 = inlined_call_operand.hbm [shape: f32[1,128], index: 2, kind: input, shape index: {}]   ;;  %s1013_s3 = inlined_call_operand.hbm [shape: f32[1,128], index: 3, kind: input, shape index: {}]   ;;  %s1014_s4 = inlined_call_operand.hbm [shape: f32[16,128], index: 4, kind: output, shape index: {}]  }
   0x1   :  { %1019 = sst [smem:[#allocation16_spill]] %s1012_s2 }
   0x2   :  { %9 = vsyncpa [#allocation3], 0 }
   0x3   :  { %11 = vsyncpa [#allocation3 + $0x1], 0 }
   0x4   :  { %12 = vsyncpa [#allocation6], 0 }
   0x5   :  { %14 = vsyncpa [#allocation6 + $0x1], 0 }
   0x6   :  { %15 = vsyncpa [#allocation9], 0 }
   0x7   :  { %16 = vsyncpa [#allocation4], 0 }
   0x8   :  { %18 = vsyncpa [#allocation4 + $0x1], 0  ;;  %s743_s15 = smov 0   ;;  %s745_s16 = smov 0  }
   0x9   :  { %s747_s17 = smov 0   ;;  %s749_s18 = smov 0  }
   0xa LB: > { %s764_s19 = sadd.s32 4294967295, %s711_s18   ;;  %s424_s20 = sadd.s32 4294967294, %s711_s18   ;;  %s711_s18 = sphi %s749_s18, %s1040_s18   ;;  %s707_s17 = sphi %s747_s17, %s1039_s17   ;;  %s703_s16 = sphi %s745_s16, %s1038_s16   ;;  %s699_s15 = sphi %s743_s15, %s1037_s15  }
   0xb   : > { %p44_p0 = scmp.ne.s32.totalorder %s703_s16, %s699_s15  ;;  %p1015_p1 = scmp.eq.s32.totalorder %s764_s19, 0 }
   0xc   : > { %p142_p3 = scmp.eq.s32.totalorder %s424_s20, 1  ;;  %p425_p5 = scmp.ge.s32.totalorder %s711_s18, 1 }
   0xd   : > { %p773_p4 = por %p1015_p1, %p44_p0  ;;  %p149_p7 = scmp.lt.s32.totalorder %s711_s18, 3 }
   0xe   : > { %p778_p6 = por %p142_p3, %p44_p0  ;;  %s713_s24 = smov [#allocation7]  }
   0xf   : > { %s1020_s21 = scalar_select %p773_p4, 1, 0 }
  0x10   : > { %s1021_s22 = scalar_select %p778_p6, 1, 0 }
  0x11   : > { %p783_p8 = pnand %p425_p5, %p149_p7  ;;  %s162_s25 = sshll.u32 %s713_s24, 4  ;;  %s163_s25 = int_to_ptr.vmem [resolvable:$true] %s162_s25 }
  0x12   : > { %s714_s26 = smov [#allocation8]   ;;  %s799_s29 = sadd.s32 1, %s711_s18  }
  0x13   : > { %s1022_s23 = scalar_select %p783_p8, 1, 0 }
  0x14   : > { %p459_p10 = pneg %p783_p8  ;;  %s173_s27 = sshll.u32 %s714_s26, 4  ;;  %s796_s27 = int_to_ptr.vmem [resolvable:$true] %s173_s27 }
  0x15   : > { %s28_s30 = ssub.s32 %s711_s18, %s799_s29  ;;  %s1024_s2 = sld [smem:[#allocation16_spill]] }
  0x16   : > { %p792_p11 = pnand %p459_p10, %p1015_p1 }
  0x18   : > { %p519_p13 = pneg %p792_p11 }
  0x1b   : > { %s517_s7 = scalar_lea.hbm %s1024_s2, 16 }
  0x1c   : > { %p518_p12 = scmp.ne.s32.totalorder %s1024_s2, %s517_s7  ;;  %p524_p5 = scmp.lt.u32.totalorder %s517_s7, %s1024_s2 }
  0x1e   : > { %p520_p0 = pnand %p519_p13, %p518_p12 }
  0x20   : > { %p521_p3 = pneg %p520_p0 }
  0x22   : > { %p526_p7 = pnand %p524_p5, %p521_p3 }
  0x24   : > { %529 = shalt.err (!%p526_p7)
}
  0x25   : > { %s530_s12 = scalar_lea.vmem %s163_s25, 16  ;;  %s537_s13 = scalar_lea.vmem %s163_s25, 32 }
  0x26   : > { %p531_p10 = scmp.ne.s32.totalorder %s163_s25, %s530_s12  ;;  %p538_p2 = scmp.lt.s32.totalorder %s163_s25, %s163_s25 }
  0x27   : > { %p539_p6 = scmp.lt.s32.totalorder %s537_s13, %s530_s12 }
  0x28   : > { %p533_p9 = pnand %p531_p10, %p519_p13 }
  0x29   : > { %p540_p4 = por %p539_p6, %p538_p2 }
  0x2a   : > { %p534_p1 = pneg %p533_p9 }
  0x2c   : > { %p541_p8 = pnand %p540_p4, %p534_p1 }
  0x2e   : > { %544 = shalt.err (!%p541_p8)
}
  0x2f   : > { %462 = dma.hbm_to_vmem [thread:$0]  (!%p792_p11), %s1024_s2, 16, %s163_s25, [#allocation6]  }
  0x30   : > { %s545_s5 = scalar_lea.hbm %s1013_s3, 16 }
  0x31   : > { %p546_p9 = scmp.ne.s32.totalorder %s1013_s3, %s545_s5  ;;  %p552_p4 = scmp.lt.u32.totalorder %s545_s5, %s1013_s3 }
  0x33   : > { %p548_p2 = pnand %p546_p9, %p519_p13 }
  0x35   : > { %p549_p1 = pneg %p548_p2 }
  0x37   : > { %p554_p6 = pnand %p552_p4, %p549_p1 }
  0x39   : > { %557 = shalt.err (!%p554_p6)
}
  0x3a   : > { %s558_s25 = scalar_lea.vmem %s796_s27, 16  ;;  %s565_s10 = scalar_lea.vmem %s796_s27, 32 }
  0x3b   : > { %p559_p8 = scmp.ne.s32.totalorder %s796_s27, %s558_s25  ;;  %p566_p3 = scmp.lt.s32.totalorder %s796_s27, %s796_s27 }
  0x3c   : > { %p567_p5 = scmp.lt.s32.totalorder %s565_s10, %s558_s25 }
  0x3d   : > { %p561_p12 = pnand %p559_p8, %p519_p13 }
  0x3e   : > { %p568_p7 = por %p567_p5, %p566_p3 }
  0x3f   : > { %p562_p0 = pneg %p561_p12 }
  0x41   : > { %p569_p10 = pnand %p568_p7, %p562_p0 }
  0x43   : > { %572 = shalt.err (!%p569_p10)
}
  0x44   : > { %465 = dma.hbm_to_vmem [thread:$0]  (!%p792_p11), %s1013_s3, 16, %s796_s27, [#allocation9]  }
  0x45   : > { %p29_p13 = scmp.eq.s32.totalorder %s28_s30, 0  ;;  %s31_s13 = sadd.s32 1, %s707_s17 }
  0x46   : > { %p38_p9 = scmp.ne.s32.totalorder %s707_s17, %s703_s16  ;;  %p39_p2 = scmp.eq.s32.totalorder %s711_s18, 0 }
  0x47   : > { %s859_s28 = scalar_select %p29_p13, %s707_s17, %s31_s13  }
  0x48   : > { %p40_p1 = por %p39_p2, %p38_p9  ;;  %p1025_p4 = scmp.eq.s32.totalorder %s764_s19, 1 }
  0x49   : > { %p479_p8 = scmp.lt.s32.totalorder %s711_s18, 2  ;;  %s184_s20 = sand.u32 1, %s707_s17  }
  0x4a   : > { %p863_p6 = por %p1025_p4, %p38_p9  ;;  %s869_s24 = sshll.u32 %s184_s20, 2 }
  0x4b   : > { %s430_s27 = sshll.u32 %s711_s18, 6  ;;  %s188_s6 = scalar_lea.vmem [#allocation2], %s869_s24 }
  0x4c   : > { %s1026_s14 = scalar_select %p863_p6, 1, 0 }
  0x4d   : > { %s875_s5 = scalar_lea.hbm %s1010_s0, %s430_s27  ;;  %s195_s7 = sshll.u32 %s188_s6, 4  ;;  %s878_s7 = int_to_ptr.vmem [resolvable:$true] %s195_s7 }
  0x4e   : > { %p880_p11 = pnand %p479_p8, %p40_p1  ;;  %s887_s10 = scalar_lea.hbm %s1011_s1, %s430_s27 }
  0x4f   : > { %s202_s11 = sand.u32 1, %s711_s18   ;;  %s185_s12 = scalar_lea.sflag [#allocation3], %s184_s20 }
  0x50   : > { %s573_s13 = scalar_lea.hbm %s875_s5, 64  ;;  %p575_p0 = pneg %p880_p11 }
  0x51   : > { %p574_p12 = scmp.ne.s32.totalorder %s875_s5, %s573_s13  ;;  %s578_s6 = scalar_lea.hbm %s1010_s0, 128 }
  0x52   : > { %p579_p7 = scmp.lt.u32.totalorder %s875_s5, %s1010_s0  ;;  %p580_p10 = scmp.lt.u32.totalorder %s578_s6, %s573_s13 }
  0x53   : > { %p576_p3 = pnand %p575_p0, %p574_p12  ;;  %p582_p9 = scmp.lt.u32.totalorder %s573_s13, %s875_s5 }
  0x54   : > { %p581_p13 = por %p580_p10, %p579_p7 }
  0x55   : > { %p577_p5 = pneg %p576_p3 }
  0x56   : > { %p583_p2 = por %p582_p9, %p581_p13 }
  0x58   : > { %p584_p1 = pnand %p583_p2, %p577_p5 }
  0x5a   : > { %587 = shalt.err (!%p584_p1)
}
  0x5b   : > { %s588_s20 = scalar_lea.vmem %s878_s7, 64  ;;  %s715_s27 = smov [#allocation2]  }
  0x5c   : > { %p589_p4 = scmp.ne.s32.totalorder %s878_s7, %s588_s20  ;;  %s593_s25 = sshll.u32 %s715_s27, 4  ;;  %s594_s25 = int_to_ptr.vmem [resolvable:$false] %s593_s25 }
  0x5d   : > { %s595_s2 = scalar_lea.vmem %s594_s25, 128  ;;  %p596_p3 = scmp.lt.s32.totalorder %s878_s7, %s594_s25 }
  0x5e   : > { %p591_p8 = pnand %p589_p4, %p575_p0  ;;  %p597_p7 = scmp.lt.s32.totalorder %s595_s2, %s588_s20 }
  0x60   : > { %p592_p12 = pneg %p591_p8  ;;  %p598_p10 = por %p597_p7, %p596_p3 }
  0x62   : > { %p599_p13 = pnand %p598_p10, %p592_p12 }
  0x64   : > { %602 = shalt.err (!%p599_p13)
}
  0x65   : > { %469 = dma.hbm_to_vmem [thread:$0]  (!%p880_p11), %s875_s5, 64, %s878_s7, %s185_s12  }
  0x66   : > { %s206_s13 = scalar_lea.vmem [#allocation5], %s869_s24  ;;  %s203_s30 = scalar_lea.sflag [#allocation6], %s202_s11 }
  0x67   : > { %s213_s26 = sshll.u32 %s206_s13, 4  ;;  %s603_s6 = scalar_lea.hbm %s887_s10, 64  ;;  %s214_s26 = int_to_ptr.vmem [resolvable:$true] %s213_s26 }
  0x68   : > { %p604_p5 = scmp.ne.s32.totalorder %s887_s10, %s603_s6  ;;  %s608_s27 = scalar_lea.hbm %s1011_s1, 128 }
  0x69   : > { %p609_p1 = scmp.lt.u32.totalorder %s887_s10, %s1011_s1  ;;  %p610_p4 = scmp.lt.u32.totalorder %s608_s27, %s603_s6 }
  0x6a   : > { %p606_p9 = pnand %p604_p5, %p575_p0  ;;  %p612_p12 = scmp.lt.u32.totalorder %s603_s6, %s887_s10 }
  0x6b   : > { %p611_p8 = por %p610_p4, %p609_p1 }
  0x6c   : > { %p607_p2 = pneg %p606_p9 }
  0x6d   : > { %p613_p3 = por %p612_p12, %p611_p8 }
  0x6f   : > { %p614_p7 = pnand %p613_p3, %p607_p2 }
  0x71   : > { %617 = shalt.err (!%p614_p7)
}
  0x72   : > { %s618_s24 = scalar_lea.vmem %s214_s26, 64  ;;  %s716_s5 = smov [#allocation5]  }
  0x73   : > { %p619_p10 = scmp.ne.s32.totalorder %s214_s26, %s618_s24  ;;  %s623_s7 = sshll.u32 %s716_s5, 4  ;;  %s624_s7 = int_to_ptr.vmem [resolvable:$false] %s623_s7 }
  0x74   : > { %s625_s11 = scalar_lea.vmem %s624_s7, 128  ;;  %p626_p9 = scmp.lt.s32.totalorder %s214_s26, %s624_s7 }
  0x75   : > { %p621_p13 = pnand %p619_p10, %p575_p0  ;;  %p627_p6 = scmp.lt.s32.totalorder %s625_s11, %s618_s24 }
  0x77   : > { %p622_p5 = pneg %p621_p13  ;;  %p628_p1 = por %p627_p6, %p626_p9 }
  0x79   : > { %p629_p4 = pnand %p628_p1, %p622_p5 }
  0x7b   : > { %632 = shalt.err (!%p629_p4)
}
  0x7c   : > { %472 = dma.hbm_to_vmem [thread:$0]  (!%p880_p11), %s887_s10, 64, %s214_s26, %s203_s30  }
  0x7d   : > { %p1028_p2 = scmp.ne.s32.totalorder %s1022_s23, 0 }
  0x7e   : > { %s940_s12 = sand.u32 (!%p1028_p2), 1, %s703_s16   ;;  %p1029_p0 = scmp.ne.s32.totalorder (!%p1028_p2), %s1020_s21, 0 }
  0x7f   : > { %222 = sbr.rel (%p1028_p2) target bundleno = 170 (0xaa), region = 36  ;;  %s434_s13 = sshll.u32 (!%p1028_p2), %s940_s12, 2 }
  0x80   : > { %s225_s6 = scalar_lea.sflag (!%p1028_p2), [#allocation3], %s940_s12  ;;  %s228_s9 = scalar_lea.vmem (!%p1028_p2), [#allocation2], %s434_s13 }
  0x86   : > { %678 = dma.done.wait (%p1029_p0), %s225_s6, 64  }
  0x87   : > { %680 = vsyncadd (%p1029_p0), %s225_s6, 4294967232  ;;  %s233_s8 = sand.u32 1, %s764_s19   ;;  %s237_s23 = scalar_lea.vmem [#allocation5], %s434_s13 }
  0x88   : > { %s234_s10 = scalar_lea.sflag [#allocation6], %s233_s8 }
  0x89   : > { %682 = dma.done.wait (%p1029_p0), %s234_s10, 64  }
  0x8a   : > { %684 = vsyncadd (%p1029_p0), %s234_s10, 4294967232  ;;  %p1030_p6 = scmp.eq.s32.totalorder %s764_s19, 0 }
  0x8c   : > { %686 = dma.done.wait (%p1030_p6), [#allocation6], 16   ;;  %p1031_p11 = pmov %p1030_p6 }
  0x8d   : > { %p1032_p8 = pmov %p1030_p6 }
  0x8e   : > { %688 = vsyncadd (%p1031_p11), [#allocation6], 4294967280 }
  0x8f   : > { %690 = dma.done.wait (%p1032_p8), [#allocation9], 16   ;;  %p1033_p12 = pmov %p1030_p6 }
  0x90   : > { %s438_s26 = sshll.u32 %s940_s12, 3  ;;  %v275_v0 = vld [vmem:[%s228_s9] sm:$0xf]  ;;  %v277_v1 = vld [vmem:[%s237_s23] sm:$0xf]  ;;  %s442_s20 = sshll.u32 %s764_s19, 7 }
  0x91   : > { %692 = vsyncadd (%p1033_p12), [#allocation9], 4294967280  ;;  %v439_v2 = vld [vmem:[#allocation7] ss:$0 sm:$0xff]  ;;  %v276_v3 = vunpack.c.l.bf16 %v275_v0  ;;  %v278_v4 = vunpack.c.l.bf16 %v277_v1  ;;  %v440_v6 = vld [vmem:[#allocation8] ss:$0 sm:$0xff]  ;;  %s968_s2 = scalar_lea.hbm %s1014_s4, %s442_s20 }
  0x92   : > { %s274_s21 = scalar_lea.vmem [#allocation10], %s438_s26  ;;  %s299_s24 = scalar_lea.sflag [#allocation4], %s940_s12 }
  0x93   : > { %v286_v5 = vmul.f32 %v439_v2, %v278_v4  ;;  %s312_s30 = sshll.u32 %s274_s21, 4  ;;  %p1034_p7 = scmp.ne.s32.totalorder %s1026_s14, 0  ;;  %s963_s30 = int_to_ptr.vmem [resolvable:$true] %s312_s30 }
  0x94   : > { %s633_s5 = scalar_lea.vmem %s963_s30, 128  ;;  %s717_s19 = smov [#allocation10]  }
  0x95   : > { %v287_v7 = vadd.f32 %v286_v5, %v276_v3  ;;  %p634_p3 = scmp.ne.s32.totalorder %s963_s30, %s633_s5  ;;  %s637_s7 = sshll.u32 %s717_s19, 4  ;;  %s638_s7 = int_to_ptr.vmem [resolvable:$false] %s637_s7 }
  0x96   : > { %s639_s11 = scalar_lea.vmem %s638_s7, 256  ;;  %p640_p5 = scmp.lt.s32.totalorder %s963_s30, %s638_s7 }
  0x97   : > { %v295_v8 = vadd.f32 %v440_v6, %v287_v7  ;;  %p635_p10 = pnand %p634_p3, %p1034_p7  ;;  %p641_p9 = scmp.lt.s32.totalorder %s639_s11, %s633_s5 }
  0x99   : > { %v296_v9 = vmax.f32 %v295_v8, 0.0  ;;  %p636_p13 = pneg %p635_p10  ;;  %p642_p1 = por %p641_p9, %p640_p5 }
  0x9b   : > { %297 = vst [vmem:[%s274_s21] sm:$0xff] %v296_v9  ;;  %p643_p4 = pnand %p642_p1, %p636_p13 }
  0x9d   : > { %646 = shalt.err (!%p643_p4)
}
  0x9e   : > { %s647_s12 = scalar_lea.hbm %s968_s2, 128  ;;  %s651_s9 = scalar_lea.hbm %s1014_s4, 256 }
  0x9f   : > { %p648_p2 = scmp.ne.s32.totalorder %s968_s2, %s647_s12  ;;  %p652_p11 = scmp.lt.u32.totalorder %s968_s2, %s1014_s4 }
  0xa0   : > { %p653_p8 = scmp.lt.u32.totalorder %s651_s9, %s647_s12  ;;  %p655_p3 = scmp.lt.u32.totalorder %s647_s12, %s968_s2 }
  0xa1   : > { %p649_p0 = pnand %p648_p2, %p1034_p7 }
  0xa2   : > { %p654_p12 = por %p653_p8, %p652_p11 }
  0xa3   : > { %p650_p6 = pneg %p649_p0 }
  0xa4   : > { %p656_p10 = por %p655_p3, %p654_p12 }
  0xa6   : > { %p657_p13 = pnand %p656_p10, %p650_p6 }
  0xa8   : > { %660 = shalt.err (!%p657_p13)
}
  0xa9   : > { %457 = dma.vmem_to_hbm [thread:$0]  (%p1034_p7), %s963_s30, 128, %s968_s2, %s299_s24  }
  0xaa PF: > { %s324_s23 = sand.u32 1, %s699_s15   ;;  %p1035_p5 = scmp.ne.s32.totalorder %s1021_s22, 0 }
  0xab   : > { %p1036_p9 = scmp.ge.s32.totalorder %s711_s18, 2  ;;  %s325_s26 = scalar_lea.sflag [#allocation4], %s324_s23 }
  0xad   : > { %p474_p1 = pnand %p1036_p9, %p1035_p5 }
  0xaf   : > { %694 = dma.done.wait (!%p474_p1), %s325_s26, 128  }
  0xb0   : > { %696 = vsyncadd (!%p474_p1), %s325_s26, 4294967168  ;;  %p21_p4 = scmp.ge.s32.totalorder %s799_s29, 4   ;;  %s1037_s15 = smov %s703_s16 }
  0xb1   : > { %s1038_s16 = smov %s707_s17  ;;  %s1039_s17 = smov %s859_s28 }
  0xb2   : > { %s1040_s18 = smov %s799_s29  ;;  %23 = sbr.rel (!%p21_p4) target bundleno = 10 (0xa), region = 102 }
  0xb9   :  { %330 = vsyncpa [#allocation3], 1 }
  0xba   :  { %332 = vsyncpa [#allocation3 + $0x1], 1 }
  0xbb   :  { %333 = vsyncpa [#allocation6], 1 }
  0xbc   :  { %335 = vsyncpa [#allocation6 + $0x1], 1 }
  0xbd   :  { %336 = vsyncpa [#allocation9], 1 }
  0xbe   :  { %337 = vsyncpa [#allocation4], 1 }
  0xbf   :  { %339 = vsyncpa [#allocation4 + $0x1], 1 }

// kernel: resnet_basic_block.3
= control target key start
LH: loop header
LB: loop body
LE: loop exit
PB: predicated region body
PF: predicated region fallthrough
CT: control target
= control target key end

     0   :  { %10 = vsyncpa [#allocation4], 0  ;;  %s9617_s0 = inlined_call_operand.hbm [shape: bf16[2,16,16,4], index: 0, kind: input, shape index: {}]   ;;  %s9618_s1 = inlined_call_operand.hbm [shape: bf16[9,4,4], index: 1, kind: input, shape index: {}]   ;;  %s9619_s2 = inlined_call_operand.hbm [shape: f32[1,4], index: 2, kind: input, shape index: {}]   ;;  %s9620_s3 = inlined_call_operand.hbm [shape: bf16[2,256,4], index: 3, kind: output, shape index: {0}]   ;;  %s9621_s4 = inlined_call_operand.hbm [shape: f32[2,2,4], index: 4, kind: output, shape index: {1}]  }
   0x1   :  { %12 = vsyncpa [#allocation4 + $0x1], 0 }
   0x2   :  { %13 = vsyncpa [#allocation7], 0 }
   0x3   :  { %14 = vsyncpa [#allocation5], 0 }
   0x4   :  { %16 = vsyncpa [#allocation5 + $0x1], 0 }
   0x5   :  { %17 = vsyncpa [#allocation11], 0 }
   0x6   :  { %19 = vsyncpa [#allocation11 + $0x1], 0  ;;  %s7466_s15 = smov 0   ;;  %s7468_s16 = smov 0  }
   0x7   :  { %s7470_s17 = smov 0   ;;  %s7472_s18 = smov 0  }
   0x8 LB: > { %s7487_s19 = sadd.s32 4294967295, %s7427_s18   ;;  %s5921_s20 = sadd.s32 4294967294, %s7427_s18   ;;  %s7427_s18 = sphi %s7472_s18, %s9743_s18   ;;  %s7423_s17 = sphi %s7470_s17, %s9742_s17   ;;  %s7419_s16 = sphi %s7468_s16, %s9741_s16   ;;  %s7415_s15 = sphi %s7466_s15, %s9740_s15  }
   0x9   : > { %p45_p0 = scmp.ne.s32.totalorder %s7419_s16, %s7415_s15  ;;  %p9622_p1 = scmp.eq.s32.totalorder %s7487_s19, 0 }
   0xa   : > { %p117_p3 = scmp.eq.s32.totalorder %s5921_s20, 1  ;;  %p5922_p5 = scmp.ge.s32.totalorder %s7427_s18, 1 }
   0xb   : > { %p7496_p4 = por %p9622_p1, %p45_p0  ;;  %p150_p7 = scmp.lt.s32.totalorder %s7427_s18, 3 }
   0xc   : > { %p7501_p6 = por %p117_p3, %p45_p0  ;;  %s7429_s24 = smov [#allocation6]  }
   0xd   : > { %s9646_s21 = scalar_select %p7496_p4, 1, 0 }
   0xe   : > { %s9647_s22 = scalar_select %p7501_p6, 1, 0 }
   0xf   : > { %p7506_p8 = pnand %p5922_p5, %p150_p7  ;;  %s162_s25 = sshll.u32 %s7429_s24, 4  ;;  %s7510_s25 = int_to_ptr.vmem [resolvable:$true] %s162_s25 }
  0x10   : > { %s7430_s27 = smov [#allocation8]   ;;  %s7239_s5 = scalar_lea.hbm %s9618_s1, 288 }
  0x11   : > { %p7086_p9 = pneg %p7506_p8  ;;  %s176_s28 = sshll.u32 %s7430_s27, 4  ;;  %s7521_s28 = int_to_ptr.vmem [resolvable:$true] %s176_s28 }
  0x12   : > { %p7240_p12 = scmp.ne.s32.totalorder %s9618_s1, %s7239_s5  ;;  %p7246_p5 = scmp.lt.u32.totalorder %s7239_s5, %s9618_s1 }
  0x13   : > { %p7517_p11 = pnand %p7086_p9, %p9622_p1 }
  0x15   : > { %p7241_p13 = pneg %p7517_p11 }
  0x17   : > { %p7242_p0 = pnand %p7241_p13, %p7240_p12 }
  0x19   : > { %p7243_p3 = pneg %p7242_p0 }
  0x1b   : > { %p7248_p7 = pnand %p7246_p5, %p7243_p3 }
  0x1d   : > { %7251 = shalt.err (!%p7248_p7)
}
  0x1e   : > { %s7252_s10 = scalar_lea.vmem %s7510_s25, 288  ;;  %p7260_p2 = scmp.lt.s32.totalorder %s7510_s25, %s7510_s25 }
  0x1f   : > { %p7253_p9 = scmp.ne.s32.totalorder %s7510_s25, %s7252_s10  ;;  %p7261_p12 = scmp.lt.s32.totalorder %s7252_s10, %s7252_s10 }
  0x21   : > { %p7255_p10 = pnand %p7253_p9, %p7241_p13  ;;  %p7262_p0 = por %p7261_p12, %p7260_p2 }
  0x23   : > { %p7256_p1 = pneg %p7255_p10 }
  0x25   : > { %p7263_p6 = pnand %p7262_p0, %p7256_p1 }
  0x27   : > { %7266 = shalt.err (!%p7263_p6)
}
  0x28   : > { %s7431_s11 = smov 32   ;;  %s7432_s12 = smov 2  }
  0x29   : > { %7089 = dma.hbm_to_vmem [thread:$0]  (!%p7517_p11), %s9618_s1, 288, %s7510_s25, [#allocation7], %s7431_s11, %s7431_s11, %s7432_s12  }
  0x2a   : > { %s7267_s27 = scalar_lea.hbm %s9619_s2, 16 }
  0x2b   : > { %p7268_p2 = scmp.ne.s32.totalorder %s9619_s2, %s7267_s27  ;;  %p7274_p10 = scmp.lt.u32.totalorder %s7267_s27, %s9619_s2 }
  0x2d   : > { %p7270_p1 = pnand %p7268_p2, %p7241_p13 }
  0x2f   : > { %p7271_p6 = pneg %p7270_p1 }
  0x31   : > { %p7276_p3 = pnand %p7274_p10, %p7271_p6 }
  0x33   : > { %7279 = shalt.err (!%p7276_p3)
}
  0x34   : > { %s7280_s25 = scalar_lea.vmem %s7521_s28, 16  ;;  %s7287_s7 = scalar_lea.vmem %s7521_s28, 32 }
  0x35   : > { %p7281_p5 = scmp.ne.s32.totalorder %s7521_s28, %s7280_s25  ;;  %p7288_p12 = scmp.lt.s32.totalorder %s7521_s28, %s7521_s28 }
  0x36   : > { %p7289_p0 = scmp.lt.s32.totalorder %s7287_s7, %s7280_s25 }
  0x37   : > { %p7283_p7 = pnand %p7281_p5, %p7241_p13 }
  0x38   : > { %p7290_p2 = por %p7289_p0, %p7288_p12 }
  0x39   : > { %p7284_p9 = pneg %p7283_p7 }
  0x3b   : > { %p7291_p1 = pnand %p7290_p2, %p7284_p9 }
  0x3d   : > { %7294 = shalt.err (!%p7291_p1)
}
  0x3e   : > { %7092 = dma.hbm_to_vmem [thread:$0]  (!%p7517_p11), %s9619_s2, 16, %s7521_s28, [#allocation7]  }
  0x3f   : > { %s7577_s10 = sadd.s32 1, %s7427_s18   ;;  %s32_s26 = sadd.s32 1, %s7423_s17 }
  0x40   : > { %s29_s11 = ssub.s32 %s7427_s18, %s7577_s10  ;;  %p39_p13 = scmp.ne.s32.totalorder %s7423_s17, %s7419_s16 }
  0x41   : > { %p30_p6 = scmp.eq.s32.totalorder %s29_s11, 0  ;;  %p40_p10 = scmp.eq.s32.totalorder %s7427_s18, 0 }
  0x42   : > { %p9650_p3 = scmp.eq.s32.totalorder %s7487_s19, 1  ;;  %p7106_p7 = scmp.lt.s32.totalorder %s7427_s18, 2 }
  0x43   : > { %s7593_s13 = scalar_select %p30_p6, %s7423_s17, %s32_s26  }
  0x44   : > { %p7587_p5 = por %p9650_p3, %p39_p13  ;;  %p41_p9 = por %p40_p10, %p39_p13 }
  0x45   : > { %s187_s14 = sand.u32 1, %s7423_s17   ;;  %s6311_s28 = sshll.u32 %s7427_s18, 11 }
  0x46   : > { %s9651_s12 = scalar_select %p7587_p5, 1, 0 }
  0x47   : > { %s5926_s20 = sshll.u32 %s187_s14, 7  ;;  %s7600_s29 = scalar_lea.hbm %s9617_s0, %s6311_s28 }
  0x48   : > { %s191_s30 = scalar_lea.vmem [#allocation3], %s5926_s20  ;;  %p7604_p11 = pnand %p7106_p7, %p41_p9 }
  0x49   : > { %s198_s5 = sshll.u32 %s191_s30, 4  ;;  %s7608_s25 = scalar_lea.sflag [#allocation4], %s187_s14  ;;  %s7602_s5 = int_to_ptr.vmem [resolvable:$true] %s198_s5 }
  0x4a   : > { %s7295_s7 = scalar_lea.hbm %s7600_s29, 2048  ;;  %p7297_p0 = pneg %p7604_p11 }
  0x4b   : > { %p7296_p12 = scmp.ne.s32.totalorder %s7600_s29, %s7295_s7  ;;  %s7300_s26 = scalar_lea.hbm %s9617_s0, 4096 }
  0x4c   : > { %p7301_p13 = scmp.lt.u32.totalorder %s7600_s29, %s9617_s0  ;;  %p7302_p6 = scmp.lt.u32.totalorder %s7300_s26, %s7295_s7 }
  0x4d   : > { %p7298_p2 = pnand %p7297_p0, %p7296_p12  ;;  %p7304_p3 = scmp.lt.u32.totalorder %s7295_s7, %s7600_s29 }
  0x4e   : > { %p7303_p10 = por %p7302_p6, %p7301_p13 }
  0x4f   : > { %p7299_p1 = pneg %p7298_p2 }
  0x50   : > { %p7305_p7 = por %p7304_p3, %p7303_p10 }
  0x52   : > { %p7306_p9 = pnand %p7305_p7, %p7299_p1 }
  0x54   : > { %7309 = shalt.err (!%p7306_p9)
}
  0x55   : > { %s7310_s14 = scalar_lea.vmem %s7602_s5, 2048  ;;  %s7433_s28 = smov [#allocation3]  }
  0x56   : > { %p7311_p12 = scmp.ne.s32.totalorder %s7602_s5, %s7310_s14  ;;  %s7315_s24 = sshll.u32 %s7433_s28, 4  ;;  %s7316_s24 = int_to_ptr.vmem [resolvable:$false] %s7315_s24 }
  0x57   : > { %s7317_s27 = scalar_lea.vmem %s7316_s24, 4096  ;;  %p7318_p4 = scmp.lt.s32.totalorder %s7602_s5, %s7316_s24 }
  0x58   : > { %p7313_p2 = pnand %p7311_p12, %p7297_p0  ;;  %p7319_p13 = scmp.lt.s32.totalorder %s7317_s27, %s7310_s14 }
  0x5a   : > { %p7314_p5 = pneg %p7313_p2  ;;  %p7320_p6 = por %p7319_p13, %p7318_p4 }
  0x5c   : > { %p7321_p10 = pnand %p7320_p6, %p7314_p5 }
  0x5e   : > { %7324 = shalt.err (!%p7321_p10)
}
  0x5f   : > { %s7434_s30 = smov 64   ;;  %s7435_s7 = smov 4  }
  0x60   : > { %7096 = dma.hbm_to_vmem [thread:$0]  (!%p7604_p11), %s7600_s29, 2048, %s7602_s5, %s7608_s25, %s7434_s30, %s7434_s30, %s7435_s7  }
  0x61   : > { %210 = sbr.rel (%p7506_p8) target bundleno = 807 (0x327), region = 32 }
  0x68   : > { %s7639_s8 = sand.u32 1, %s7419_s16   ;;  %p9653_p4 = scmp.ne.s32.totalorder %s9646_s21, 0 }
  0x69   : > { %s5930_s9 = sshll.u32 %s7639_s8, 7  ;;  %s213_s26 = scalar_lea.sflag [#allocation4], %s7639_s8 }
  0x6a   : > { %s7645_s11 = scalar_lea.vmem [#allocation3], %s5930_s9 }
  0x6b   : > { %7398 = dma.done.wait (%p9653_p4), %s213_s26, 2048  }
  0x6c   : > { %7400 = vsyncadd (%p9653_p4), %s213_s26, 4294965248  ;;  %p9654_p5 = scmp.eq.s32.totalorder %s7487_s19, 0 }
  0x6e   : > { %7402 = dma.done.wait (%p9654_p5), [#allocation7], 304   ;;  %p9655_p8 = pmov %p9654_p5 }
  0x6f   : > { %vm287_vm0 = vcmask 27648   ;;  %vm290_vm1 = vcmask 24576   ;;  %v7436_v0 = vmov 0   ;;  %vm1370_vm2 = vcmask 1041408   ;;  %v1272_v1 = vld [vmem:[#allocation6 + $0x2] sm:$0x3] }
  0x70   : > { %7404 = vsyncadd (%p9655_p8), [#allocation7], 4294966992  ;;  %288 = vst.msk [vmem:[#allocation2] sm:$0xf] %vm287_vm0, %v7436_v0  ;;  %vm298_vm3 = vsmask.f32 256  ;;  %7062 = vmatprep.subr.msk.bf16.mxu1 %vm1370_vm2, %v1272_v1 }
  0x71   : > { %289 = vst.msk [vmem:[#allocation2 + $0x4] sm:$0xf] %vm287_vm0, %v7436_v0  ;;  %293 = vst.msk [vmem:[#allocation2 + $0xcc] sm:$0xf] %vm287_vm0, %v7436_v0  ;;  %vm348_vm4 = vsmask.f32 7938 }
  0x72   : > { %291 = vst.msk [vmem:[#allocation2 + $0x8] sm:$0x1] %vm290_vm1, %v7436_v0  ;;  %295 = vst.msk [vmem:[#allocation2 + $0xd4] sm:$0x1] %vm290_vm1, %v7436_v0  ;;  %vm884_vm5 = vsmask.f32 3328 }
  0x73   : > { %294 = vst.msk [vmem:[#allocation2 + $0xd0] sm:$0xf] %vm287_vm0, %v7436_v0  ;;  %vm885_vm6 = vsmask.f32 7440  ;;  %vm398_vm7 = vsmask.f32 4368  ;;  %vm7670_vm8 = vmand %vm290_vm1, %vm298_vm3 }
  0x74   : > { %v3075_v2 = vld [vmem:[#allocation6 + $0x8] sm:$0x3]  ;;  %v255_v3 = vld [vmem:[%s7645_s11] sm:$0xf]  ;;  %v1372_v4 = vsel %vm1370_vm2, %v1272_v1, 0  ;;  %vm7677_vm9 = vmand %vm290_vm1, %vm348_vm4  ;;  %vm1321_vm11 = vcmask 31744  }
  0x75   : > { %7066 = vmatprep.subr.msk.bf16.mxu0 %vm1370_vm2, %v3075_v2  ;;  %v7666_v5 = vsel %vm1370_vm2, %v3075_v2, 0  ;;  %6499 = vmatpush3.bf16.msra.mxu1 %v1372_v4  ;;  %v256_v16 = vld [vmem:[%s7645_s11 + $0x4] sm:$0xf]  ;;  %v300_v17 = vld [vmem:[#allocation2 + $0xc] sm:$0x1]  ;;  %v401_v26 = vshrl.u32 %v255_v3, 16  ;;  %vm7692_vm10 = vmor %vm884_vm5, %vm885_vm6 }
  0x76   : > { %9656 = vst [vmem:[#allocation16_spill] sm:$0xff] %v7666_v5  ;;  %6635 = vmatpush3.bf16.msra.mxu0 %v7666_v5  ;;  %v350_v22 = vld [vmem:[#allocation2 + $0x14] sm:$0x1]  ;;  %v301_v24 = vsel %vm7670_vm8, 0, %v300_v17  ;;  %v867_v27 = vld [vmem:[#allocation6] sm:$0x3]  ;;  %vm7701_vm12 = vmor %vm298_vm3, %vm398_vm7 }
  0x77   : > { %v835_v7 = vld [vmem:[#allocation2] sm:$0xf]  ;;  %v351_v25 = vsel %vm7677_vm9, 0, %v350_v22  ;;  %302 = vst [vmem:[#allocation2 + $0xc] sm:$0x1] %v301_v24  ;;  %v404_v30 = vshll.u32 %v255_v3, 16  ;;  %7063 = vmatprep.subr.msk.bf16.mxu1 %vm1370_vm2, %v867_v27  ;;  %vm7715_vm13 = vmand %vm287_vm0, %vm348_vm4 }
  0x78   : > { %v836_v8 = vld [vmem:[#allocation2 + $0x4] sm:$0xf]  ;;  %v888_v11 = vshrl.u32 %v835_v7, 16  ;;  %v891_v12 = vshll.u32 %v835_v7, 16  ;;  %352 = vst [vmem:[#allocation2 + $0x14] sm:$0x1] %v351_v25 }
  0x79   : > { %v868_v10 = vld [vmem:[#allocation2 + $0x8] sm:$0x1]  ;;  %v897_v13 = vshll.u32 %v836_v8, 16  ;;  %v901_v14 = vshrl.u32 %v836_v8, 16  ;;  %v409_v31 = vshrl.u32 %v256_v16, 16  ;;  %v403_v35 = vrot.slane %v401_v26, 7 }
  0x7a   : > { %v907_v15 = vshll.u32 %v868_v10, 16  ;;  %v890_v18 = vrot.slane %v888_v11, 4  ;;  %v893_v19 = vrot.slane %v891_v12, 5  ;;  %v7687_v32 = vld [vmem:[#allocation6 + $0xa] sm:$0x3]  ;;  %v412_v36 = vshll.u32 %v256_v16, 16 }
  0x7b   : > { %v899_v20 = vrot.slane %v897_v13, 5  ;;  %v903_v21 = vrot.slane %v901_v14, 4  ;;  %v257_v33 = vld [vmem:[%s7645_s11 + $0x8] sm:$0xf]  ;;  %7068 = vmatprep.subr.msk.bf16.mxu0 %vm1370_vm2, %v7687_v32  ;;  %v258_v37 = vld [vmem:[%s7645_s11 + $0xc] sm:$0xf]  ;;  %v406_v45 = vor.u32 %v404_v30, %v403_v35 }
  0x7c   : > { %v909_v23 = vrot.slane %v907_v15, 5  ;;  %v894_v28 = vor.u32 %v893_v19, %v890_v18  ;;  %v418_v38 = vshrl.u32 %v257_v33, 16  ;;  %v411_v41 = vrot.slane %v409_v31, 7  ;;  %v303_v42 = vld [vmem:[#allocation2 + $0x18] sm:$0x1]  ;;  %s9369_s21 = scalar_lea.vmem [#allocation9], %s5930_s9 }
  0x7d   : > { %v904_v29 = vor.u32 %v903_v21, %v899_v20  ;;  %v421_v43 = vshll.u32 %v257_v33, 16  ;;  %v407_v46 = vrot.slane %v403_v35, 4  ;;  %v304_v47 = vsel %vm7670_vm8, 0, %v303_v42  ;;  %v353_v48 = vld [vmem:[#allocation2 + $0x20] sm:$0x1]  ;;  %s6344_s23 = sshll.u32 %s7487_s19, 11 }
  0x7e   : > { %v895_v39 = vrot.slane %v894_v28, 4  ;;  %v420_v49 = vrot.slane %v418_v38, 7  ;;  %v414_v52 = vor.u32 %v412_v36, %v411_v41  ;;  %v416_v53 = vrot.slane %v411_v41, 4  ;;  %305 = vst [vmem:[#allocation2 + $0x18] sm:$0x1] %v304_v47  ;;  %s5784_s29 = sshll.u32 %s9369_s21, 4  ;;  %s9527_s25 = scalar_lea.hbm %s9620_s3, %s6344_s23  ;;  %s9529_s29 = int_to_ptr.vmem [resolvable:$true] %s5784_s29 }
  0x7f   : > { %v905_v40 = vrot.slane %v904_v29, 4  ;;  %v259_v54 = vld [vmem:[%s7645_s11 + $0x10] sm:$0xf]  ;;  %v260_v55 = vld [vmem:[%s7645_s11 + $0x14] sm:$0xf]  ;;  %v7720_v58 = vsel %vm1370_vm2, %v867_v27, 0 }
  0x80   : > { %v900_v50 = vsel %vm7692_vm10, %v895_v39, %v899_v20  ;;  %v354_v59 = vsel %vm7677_vm9, 0, %v353_v48  ;;  %v306_v60 = vld [vmem:[#allocation2 + $0x24] sm:$0x1]  ;;  %v356_v61 = vld [vmem:[#allocation2 + $0x2c] sm:$0x1]  ;;  %v415_v62 = vsel %vm7701_vm12, %v407_v46, %v414_v52  ;;  %v424_v63 = vrot.slane %v420_v49, 4 }
  0x81   : > { %v910_v51 = vsel %vm7692_vm10, %v905_v40, %v909_v23  ;;  %355 = vst [vmem:[#allocation2 + $0x20] sm:$0x1] %v354_v59  ;;  %v426_v0 = vshrl.u32 %v258_v37, 16  ;;  %v429_v1 = vshll.u32 %v258_v37, 16  ;;  %v7727_v2 = vld [vmem:[%s7645_s11 + $0x18] sm:$0xf]  ;;  %v423_v7 = vor.u32 %v421_v43, %v420_v49 }
  0x82   : > { %v5935_v57 = vcombine.low %v900_v50, %v910_v51  ;;  %v722_v3 = vld [vmem:[#allocation2 + $0xc] sm:$0xf]  ;;  %725 = vst.msk [vmem:[#allocation2 + $0x10] sm:$0xf] %vm287_vm0, %v415_v62  ;;  %v726_v4 = vld [vmem:[#allocation2 + $0x14] sm:$0x1] }
  0x83   : > { %v307_v8 = vsel %vm7670_vm8, 0, %v306_v60  ;;  %v357_v10 = vsel %vm7677_vm9, 0, %v356_v61  ;;  %v723_v11 = vsel %vm7715_vm13, %v406_v45, %v722_v3  ;;  %v727_v12 = vsel %vm7670_vm8, %v416_v53, %v726_v4  ;;  %v262_v15 = vld [vmem:[%s7645_s11 + $0x1c] sm:$0xf]  ;;  %v309_v16 = vld [vmem:[#allocation2 + $0x30] sm:$0x1] }
  0x84   : > { %6500 = vmatprep.mubr.msk.bf16.mxu1 %vm1321_vm11, %v5935_v57  ;;  %v428_v13 = vrot.slane %v426_v0, 7  ;;  %308 = vst [vmem:[#allocation2 + $0x24] sm:$0x1] %v307_v8  ;;  %358 = vst [vmem:[#allocation2 + $0x2c] sm:$0x1] %v357_v10  ;;  %v435_v14 = vshrl.u32 %v259_v54, 16 }
  0x85   : > { %724 = vst [vmem:[#allocation2 + $0xc] sm:$0xf] %v723_v11  ;;  %728 = vst [vmem:[#allocation2 + $0x14] sm:$0x1] %v727_v12  ;;  %v438_v17 = vshll.u32 %v259_v54, 16  ;;  %v443_v18 = vshrl.u32 %v260_v55, 16 }
  0x86   : > { %v446_v19 = vshll.u32 %v260_v55, 16  ;;  %v310_v20 = vsel %vm7670_vm8, 0, %v309_v16  ;;  %v359_v21 = vld [vmem:[#allocation2 + $0x38] sm:$0x1]  ;;  %v431_v22 = vor.u32 %v429_v1, %v428_v13  ;;  %v433_v23 = vrot.slane %v428_v13, 4  ;;  %s5766_s20 = scalar_lea.sflag [#allocation5], %s7639_s8 }
  0x87   : > { %v437_v24 = vrot.slane %v435_v14, 7  ;;  %311 = vst [vmem:[#allocation2 + $0x30] sm:$0x1] %v310_v20  ;;  %v360_v25 = vsel %vm7677_vm9, 0, %v359_v21  ;;  %v729_v26 = vld [vmem:[#allocation2 + $0x18] sm:$0xf] }
  0x88   : > { %v7744_v27 = vrot.slane %v443_v18, 7  ;;  %361 = vst [vmem:[#allocation2 + $0x38] sm:$0x1] %v360_v25  ;;  %v452_v28 = vshrl.u32 %v7727_v2, 16  ;;  %v455_v29 = vshll.u32 %v7727_v2, 16  ;;  %v460_v30 = vshrl.u32 %v262_v15, 16 }
  0x89   : > { %v432_v31 = vsel %vm7701_vm12, %v424_v63, %v431_v22  ;;  %v730_v33 = vsel %vm7715_vm13, %v423_v7, %v729_v26  ;;  %v440_v35 = vor.u32 %v438_v17, %v437_v24  ;;  %v441_v36 = vrot.slane %v437_v24, 4  ;;  %v312_v37 = vld [vmem:[#allocation2 + $0x3c] sm:$0x1]  ;;  %v733_v38 = vld [vmem:[#allocation2 + $0x20] sm:$0x1]  ;;  %s7325_s14 = scalar_lea.vmem %s9529_s29, 2048 }
  0x8a   : > { %731 = vst [vmem:[#allocation2 + $0x18] sm:$0xf] %v730_v33  ;;  %732 = vst.msk [vmem:[#allocation2 + $0x1c] sm:$0xf] %vm287_vm0, %v432_v31  ;;  %v7755_v39 = vsel %vm1370_vm2, %v7687_v32, 0  ;;  %v448_v40 = vor.u32 %v446_v19, %v7744_v27  ;;  %v7758_v41 = vrot.slane %v452_v28, 7  ;;  %v734_v46 = vsel %vm7670_vm8, %v433_v23, %v733_v38  ;;  %p7326_p11 = scmp.ne.s32.totalorder %s9529_s29, %s7325_s14 }
  0x8b   : > { %v7760_v42 = vrot.slane %v460_v30, 7  ;;  %v7762_v43 = vld [vmem:[#allocation2 + $0x10] sm:$0xf]  ;;  %v463_v47 = vshll.u32 %v262_v15, 16  ;;  %v313_v48 = vsel %vm7670_vm8, 0, %v312_v37  ;;  %v450_v51 = vrot.slane %v7744_v27, 4 }
  0x8c   : > { %v7764_v45 = vld [vmem:[#allocation2 + $0x10] sm:$0xf]  ;;  %v921_v32 = vshll.u32 %v7762_v43, 16  ;;  %v925_v49 = vshrl.u32 %v7762_v43, 16  ;;  %735 = vst [vmem:[#allocation2 + $0x20] sm:$0x1] %v734_v46  ;;  %v449_v57 = vsel %vm7701_vm12, %v441_v36, %v448_v40  ;;  %v7781_v60 = vor.u32 %v455_v29, %v7758_v41 }
  0x8d   : > { %v2700_v50 = vshll.u32 %v7764_v45, 16  ;;  %v736_v52 = vld [vmem:[#allocation2 + $0x24] sm:$0xf]  ;;  %314 = vst [vmem:[#allocation2 + $0x3c] sm:$0x1] %v313_v48  ;;  %v7789_v7 = vor.u32 %v463_v47, %v7760_v42  ;;  %v2704_v16 = vshrl.u32 %v7764_v45, 16 }
  0x8e   : > { %v7774_v53 = vld [vmem:[#allocation2 + $0xc] sm:$0xf]  ;;  %v869_v54 = vld [vmem:[#allocation2 + $0x14] sm:$0x1]  ;;  %v737_v59 = vsel %vm7715_vm13, %v440_v35, %v736_v52  ;;  %v923_v63 = vrot.slane %v921_v32, 5  ;;  %v927_v0 = vrot.slane %v925_v49, 4 }
  0x8f   : > { %v2642_v55 = vld [vmem:[#allocation2 + $0xc] sm:$0xf]  ;;  %v912_v61 = vshrl.u32 %v7774_v53, 16  ;;  %v915_v62 = vshll.u32 %v7774_v53, 16  ;;  %738 = vst [vmem:[#allocation2 + $0x24] sm:$0xf] %v737_v59 }
  0x90   : > { %739 = vst.msk [vmem:[#allocation2 + $0x28] sm:$0xf] %vm287_vm0, %v449_v57  ;;  %v931_v1 = vshll.u32 %v869_v54, 16  ;;  %v7786_v2 = vld [vmem:[#allocation2 + $0x14] sm:$0x1]  ;;  %v2691_v3 = vshrl.u32 %v2642_v55, 16  ;;  %v928_v11 = vor.u32 %v927_v0, %v923_v63 }
  0x91   : > { %v2694_v4 = vshll.u32 %v2642_v55, 16  ;;  %v914_v8 = vrot.slane %v912_v61, 4  ;;  %v917_v10 = vrot.slane %v915_v62, 5  ;;  %v2702_v12 = vrot.slane %v2700_v50, 5  ;;  %v2645_v17 = vld [vmem:[#allocation2 + $0x18] sm:$0xf] }
  0x92   : > { %v933_v13 = vrot.slane %v931_v1, 5  ;;  %v2693_v14 = vrot.slane %v2691_v3, 4  ;;  %v929_v19 = vrot.slane %v928_v11, 4  ;;  %v2710_v20 = vshll.u32 %v7786_v2, 16  ;;  %v7794_v22 = vld [vmem:[#allocation2 + $0x1c] sm:$0xf] }
  0x93   : > { %v2696_v15 = vrot.slane %v2694_v4, 5  ;;  %v918_v18 = vor.u32 %v917_v10, %v914_v8  ;;  %v3434_v21 = vrot.slane %v7764_v45, 5  ;;  %v2706_v24 = vrot.slane %v2704_v16, 4  ;;  %v7797_v26 = vld [vmem:[#allocation2 + $0x20] sm:$0x1]  ;;  %p9737_p0 = scmp.ne.s32.totalorder %s9651_s12, 0 }
  0x94   : > { %v3437_v25 = vrot.slane %v7786_v2, 5  ;;  %v2715_v28 = vshrl.u32 %v2645_v17, 16  ;;  %v934_v30 = vsel %vm7692_vm10, %v929_v19, %v933_v13  ;;  %v2712_v31 = vrot.slane %v2710_v20, 5  ;;  %v839_v32 = vld [vmem:[#allocation2 + $0x18] sm:$0xf]  ;;  %s7437_s28 = smov [#allocation9]  }
  0x95   : > { %v2697_v23 = vor.u32 %v2696_v15, %v2693_v14  ;;  %v919_v29 = vrot.slane %v918_v18, 4  ;;  %v2718_v33 = vshll.u32 %v2645_v17, 16  ;;  %v2707_v36 = vor.u32 %v2706_v24, %v2702_v12  ;;  %v740_v55 = vld [vmem:[#allocation2 + $0x2c] sm:$0x1]  ;;  %v840_v0 = vld [vmem:[#allocation2 + $0x1c] sm:$0xf]  ;;  %p7327_p1 = pnand %p7326_p11, %p9737_p0 }
  0x96   : > { %v2717_v37 = vrot.slane %v2715_v28, 4  ;;  %v2724_v38 = vshll.u32 %v7794_v22, 16  ;;  %v2728_v47 = vshrl.u32 %v7794_v22, 16  ;;  %v2734_v48 = vshll.u32 %v7797_v26, 16  ;;  %v870_v3 = vld [vmem:[#allocation2 + $0x20] sm:$0x1] }
  0x97   : > { %v2698_v35 = vrot.slane %v2697_v23, 4  ;;  %v924_v40 = vsel %vm7692_vm10, %v919_v29, %v923_v63  ;;  %v2720_v46 = vrot.slane %v2718_v33, 5  ;;  %v2708_v52 = vrot.slane %v2707_v36, 4  ;;  %v841_v14 = vld [vmem:[#allocation2 + $0x24] sm:$0xf]  ;;  %p7328_p3 = pneg %p7327_p1  ;;  %s7329_s24 = sshll.u32 %s7437_s28, 4  ;;  %s7330_s24 = int_to_ptr.vmem [resolvable:$false] %s7329_s24 }
  0x98   : > { %v5936_v49 = vcombine.low %v924_v40, %v934_v30  ;;  %v2726_v54 = vrot.slane %v2724_v38, 5  ;;  %v2730_v59 = vrot.slane %v2728_v47, 4  ;;  %v2736_v61 = vrot.slane %v2734_v48, 5  ;;  %v842_v19 = vld [vmem:[#allocation2 + $0x28] sm:$0xf]  ;;  %s7331_s27 = scalar_lea.vmem %s7330_s24, 4096  ;;  %p7332_p7 = scmp.lt.s32.totalorder %s9529_s29, %s7330_s24 }
  0x99   : > { %v2703_v50 = vsel %vm7692_vm10, %v2698_v35, %v2702_v12  ;;  %v2721_v57 = vor.u32 %v2720_v46, %v2717_v37  ;;  %v3441_v62 = vrot.slane %v7794_v22, 5  ;;  %v2713_v63 = vsel %vm7692_vm10, %v2708_v52, %v2712_v31  ;;  %v2648_v33 = vld [vmem:[#allocation2 + $0x24] sm:$0xf]  ;;  %v7827_v40 = vld [vmem:[#allocation2 + $0x28] sm:$0xf]  ;;  %p7333_p9 = scmp.lt.s32.totalorder %s7331_s27, %s7325_s14 }
  0x9a   : > { %6501 = vmatmul.mubr.msk.bf16.vlgmr.msra.gmra.mrb[0].mxu1 %vm1321_vm11, %v5936_v49  ;;  %v3444_v1 = vrot.slane %v7797_v26, 5  ;;  %v936_v4 = vshrl.u32 %v839_v32, 16  ;;  %v939_v8 = vshll.u32 %v839_v32, 16  ;;  %v6079_v10 = vcombine.low %v2703_v50, %v2713_v63 }
  0x9b   : > { %6533 = vmatpush3.bf16.msra.mxu1 %v7720_v58  ;;  %v2722_v11 = vrot.slane %v2721_v57, 4  ;;  %v2731_v12 = vor.u32 %v2730_v59, %v2726_v54  ;;  %v7816_v13 = vrot.slane %v3441_v62, 4  ;;  %v945_v17 = vshll.u32 %v840_v0, 16  ;;  %p7334_p12 = por %p7333_p9, %p7332_p7 }
  0x9c   : > { %v938_v15 = vrot.slane %v936_v4, 4  ;;  %v941_v16 = vrot.slane %v939_v8, 5  ;;  %v949_v18 = vshrl.u32 %v840_v0, 16  ;;  %6636 = vmatprep.mubr.msk.bf16.mxu0 %vm1321_vm11, %v6079_v10  ;;  %v955_v24 = vshll.u32 %v870_v3, 16 }
  0x9d   : > { %v2727_v20 = vsel %vm7692_vm10, %v2722_v11, %v2726_v54  ;;  %v2732_v23 = vrot.slane %v2731_v12, 4  ;;  %v741_v58 = vsel %vm7670_vm8, %v450_v51, %v740_v55  ;;  %v947_v29 = vrot.slane %v945_v17, 5  ;;  %v743_v11 = vld [vmem:[#allocation2 + $0x30] sm:$0xf]  ;;  %v263_v12 = vld [vmem:[%s7645_s11 + $0x20] sm:$0xf]  ;;  %p7335_p2 = pnand %p7334_p12, %p7328_p3 }
  0x9e   : > { %v942_v28 = vor.u32 %v941_v16, %v938_v15  ;;  %v951_v30 = vrot.slane %v949_v18, 4  ;;  %742 = vst [vmem:[#allocation2 + $0x2c] sm:$0x1] %v741_v58  ;;  %v960_v31 = vshrl.u32 %v841_v14, 16  ;;  %v957_v36 = vrot.slane %v955_v24, 5 }
  0x9f   : > { %v2737_v35 = vsel %vm7692_vm10, %v2732_v23, %v2736_v61  ;;  %v963_v37 = vshll.u32 %v841_v14, 16  ;;  %v969_v38 = vshll.u32 %v842_v19, 16  ;;  %vm1875_vm14 = vcmask 1042432   ;;  %v747_v58 = vld [vmem:[#allocation2 + $0x38] sm:$0x1] }
  0xa0   : > { %v6080_v46 = vcombine.low %v2727_v20, %v2737_v35  ;;  %v943_v47 = vrot.slane %v942_v28, 4  ;;  %v952_v27 = vor.u32 %v951_v30, %v947_v29  ;;  %v962_v48 = vrot.slane %v960_v31, 4 }
  0xa1   : > { %vm1876_vm15 = vcmask 1046532   ;;  %v965_v51 = vrot.slane %v963_v37, 5  ;;  %v971_v32 = vrot.slane %v969_v38, 5  ;;  %v973_v49 = vshrl.u32 %v842_v19, 16  ;;  %v315_v38 = vld [vmem:[#allocation2 + $0x48] sm:$0x1] }
  0xa2   : > { %v2739_v50 = vshrl.u32 %v2648_v33, 16  ;;  %6637 = vmatmul.mubr.msk.bf16.vlgmr.msra.gmra.mrb[0].mxu0 %vm1321_vm11, %v6080_v46  ;;  %v948_v52 = vsel %vm7692_vm10, %v943_v47, %v947_v29  ;;  %v953_v54 = vrot.slane %v952_v27, 4  ;;  %v2742_v55 = vshll.u32 %v2648_v33, 16  ;;  %v264_v33 = vld [vmem:[%s7645_s11 + $0x24] sm:$0xf]  ;;  %vm7874_vm1 = vmor %vm1875_vm14, %vm1876_vm15 }
  0xa3   : > { %v2748_v57 = vshll.u32 %v7827_v40, 16  ;;  %6669 = vmatpush3.bf16.msra.mxu0 %v7755_v39  ;;  %v966_v59 = vor.u32 %v965_v51, %v962_v48  ;;  %v975_v61 = vrot.slane %v973_v49, 4  ;;  %v2752_v63 = vshrl.u32 %v7827_v40, 16  ;;  %v365_v48 = vld [vmem:[#allocation2 + $0x50] sm:$0x1] }
  0xa4   : > { %v2741_v0 = vrot.slane %v2739_v50, 4  ;;  %v958_v3 = vsel %vm7692_vm10, %v953_v54, %v957_v36  ;;  %v2744_v4 = vrot.slane %v2742_v55, 5  ;;  %v458_v10 = vrot.slane %v7758_v41, 4  ;;  %v362_v41 = vld [vmem:[#allocation2 + $0x44] sm:$0x1] }
  0xa5   : > { %v2750_v8 = vrot.slane %v2748_v57, 5  ;;  %v5937_v14 = vcombine.low %v948_v52, %v958_v3  ;;  %v871_v15 = vld [vmem:[#allocation2 + $0x2c] sm:$0x1]  ;;  %v967_v16 = vrot.slane %v966_v59, 4  ;;  %v976_v17 = vor.u32 %v975_v61, %v971_v32  ;;  %v7863_v50 = vld [vmem:[%s7645_s11 + $0x28] sm:$0xf] }
  0xa6   : > { %v7839_v39 = vld [vmem:[#allocation2 + $0x2c] sm:$0x1]  ;;  %v2754_v18 = vrot.slane %v2752_v63, 4  ;;  %v979_v19 = vshll.u32 %v871_v15, 16  ;;  %v2745_v20 = vor.u32 %v2744_v4, %v2741_v0  ;;  %v466_v24 = vsel %vm7701_vm12, %v458_v10, %v7789_v7  ;;  %v7865_v52 = vld [vmem:[#allocation6 + $0xc] sm:$0x3] }
  0xa7   : > { %v2758_v23 = vshll.u32 %v7839_v39, 16  ;;  %6504 = vmatprep.mubr.msk.bf16.mxu1 %vm1321_vm11, %v5937_v14  ;;  %v972_v28 = vsel %vm7692_vm10, %v967_v16, %v971_v32  ;;  %v977_v29 = vrot.slane %v976_v17, 4  ;;  %v467_v31 = vrot.slane %v7760_v42, 4  ;;  %746 = vst.msk [vmem:[#allocation2 + $0x34] sm:$0xf] %vm287_vm0, %v466_v24  ;;  %7069 = vmatprep.subr.msk.bf16.mxu0 %vm1370_vm2, %v7865_v52 }
  0xa8   : > { %v2755_v30 = vor.u32 %v2754_v18, %v2750_v8  ;;  %v981_v35 = vrot.slane %v979_v19, 5  ;;  %v2746_v36 = vrot.slane %v2745_v20, 4  ;;  %v744_v7 = vsel %vm7715_vm13, %v7781_v60, %v743_v11  ;;  %v7870_v61 = vld [vmem:[%s7645_s11 + $0x2c] sm:$0xf] }
  0xa9   : > { %v2760_v37 = vrot.slane %v2758_v23, 5  ;;  %745 = vst [vmem:[#allocation2 + $0x30] sm:$0xf] %v744_v7  ;;  %v748_v47 = vsel %vm7670_vm8, %v467_v31, %v747_v58  ;;  %v363_v42 = vsel %vm7677_vm9, 0, %v362_v41  ;;  %v469_v27 = vshrl.u32 %v263_v12, 16 }
  0xaa   : > { %v2756_v46 = vrot.slane %v2755_v30, 4  ;;  %v982_v51 = vsel %vm7692_vm10, %v977_v29, %v981_v35  ;;  %v2751_v32 = vsel %vm7692_vm10, %v2746_v36, %v2750_v8  ;;  %749 = vst [vmem:[#allocation2 + $0x38] sm:$0x1] %v748_v47  ;;  %364 = vst [vmem:[#allocation2 + $0x44] sm:$0x1] %v363_v42  ;;  %v472_v60 = vshll.u32 %v263_v12, 16 }
  0xab   : > { %v477_v49 = vshrl.u32 %v264_v33, 16  ;;  %v5938_v54 = vcombine.low %v972_v28, %v982_v51  ;;  %v471_v57 = vrot.slane %v469_v27, 7  ;;  %v480_v59 = vshll.u32 %v264_v33, 16  ;;  %v750_v12 = vld [vmem:[#allocation2 + $0x3c] sm:$0xf] }
  0xac   : > { %v2761_v55 = vsel %vm7692_vm10, %v2756_v46, %v2760_v37  ;;  %v316_v4 = vsel %vm7670_vm8, 0, %v315_v38  ;;  %v366_v8 = vsel %vm7677_vm9, 0, %v365_v48  ;;  %v486_v14 = vshrl.u32 %v7863_v50, 16 }
  0xad   : > { %v6081_v63 = vcombine.low %v2751_v32, %v2761_v55  ;;  %v479_v3 = vrot.slane %v477_v49, 7  ;;  %6505 = vmatmul.mubr.msk.bf16.gmra.mrb[4].mxu1 %vm1321_vm11, %v5938_v54  ;;  %v474_v10 = vor.u32 %v472_v60, %v471_v57  ;;  %v475_v11 = vrot.slane %v471_v57, 4  ;;  %317 = vst [vmem:[#allocation2 + $0x48] sm:$0x1] %v316_v4  ;;  %367 = vst [vmem:[#allocation2 + $0x50] sm:$0x1] %v366_v8 }
  0xae   : > { %v489_v15 = vshll.u32 %v7863_v50, 16  ;;  %v7888_v16 = vld [vmem:[#allocation2 + $0x34] sm:$0xf]  ;;  %v494_v20 = vshrl.u32 %v7870_v61, 16  ;;  %v7896_v23 = vsel %vm7874_vm1, %v7816_v13, %v3444_v1  ;;  %v7904_v26 = vrot.slane %v486_v14, 7 }
  0xaf   : > { %6640 = vmatprep.mubr.msk.bf16.mxu0 %vm1321_vm11, %v6081_v63  ;;  %v844_v17 = vld [vmem:[#allocation2 + $0x34] sm:$0xf]  ;;  %v482_v18 = vor.u32 %v480_v59, %v479_v3  ;;  %v484_v19 = vrot.slane %v479_v3, 4  ;;  %v2772_v24 = vshll.u32 %v7888_v16, 16  ;;  %v2776_v58 = vshrl.u32 %v7888_v16, 16 }
  0xb0   : > { %v993_v41 = vshll.u32 %v844_v17, 16  ;;  %v997_v28 = vshrl.u32 %v844_v17, 16  ;;  %v2651_v29 = vld [vmem:[#allocation2 + $0x30] sm:$0xf]  ;;  %v751_v33 = vsel %vm7715_vm13, %v474_v10, %v750_v12  ;;  %v7906_v35 = vrot.slane %v494_v20, 7 }
  0xb1   : > { %v843_v30 = vld [vmem:[#allocation2 + $0x30] sm:$0xf]  ;;  %v483_v31 = vsel %vm7701_vm12, %v475_v11, %v482_v18  ;;  %v7908_v1 = vld [vmem:[#allocation2 + $0x38] sm:$0x1]  ;;  %v2763_v13 = vshrl.u32 %v2651_v29, 16  ;;  %v2766_v36 = vshll.u32 %v2651_v29, 16  ;;  %v491_v12 = vor.u32 %v489_v15, %v7904_v26 }
  0xb2   : > { %v2774_v37 = vrot.slane %v2772_v24, 5  ;;  %v2778_v7 = vrot.slane %v2776_v58, 4  ;;  %752 = vst [vmem:[#allocation2 + $0x3c] sm:$0xf] %v751_v33  ;;  %753 = vst.msk [vmem:[#allocation2 + $0x40] sm:$0xf] %vm287_vm0, %v483_v31 }
  0xb3   : > { %v2782_v38 = vshll.u32 %v7908_v1, 16  ;;  %v872_v46 = vld [vmem:[#allocation2 + $0x38] sm:$0x1]  ;;  %v984_v47 = vshrl.u32 %v843_v30, 16  ;;  %v987_v42 = vshll.u32 %v843_v30, 16  ;;  %v995_v27 = vrot.slane %v993_v41, 5 }
  0xb4   : > { %v2765_v48 = vrot.slane %v2763_v13, 4  ;;  %v2768_v51 = vrot.slane %v2766_v36, 5  ;;  %v2779_v32 = vor.u32 %v2778_v7, %v2774_v37  ;;  %v999_v60 = vrot.slane %v997_v28, 4  ;;  %v754_v49 = vld [vmem:[#allocation2 + $0x44] sm:$0x1] }
  0xb5   : > { %v2784_v50 = vrot.slane %v2782_v38, 5  ;;  %v986_v54 = vrot.slane %v984_v47, 4  ;;  %v989_v55 = vrot.slane %v987_v42, 5  ;;  %v1003_v57 = vshll.u32 %v872_v46, 16  ;;  %v757_v8 = vld [vmem:[#allocation2 + $0x48] sm:$0xf] }
  0xb6   : > { %v2769_v59 = vor.u32 %v2768_v51, %v2765_v48  ;;  %v2780_v63 = vrot.slane %v2779_v32, 4  ;;  %v1000_v3 = vor.u32 %v999_v60, %v995_v27  ;;  %v755_v4 = vsel %vm7670_vm8, %v484_v19, %v754_v49  ;;  %v761_v49 = vld [vmem:[#allocation2 + $0x50] sm:$0x1]  ;;  %v8562_v5 = vld [vmem:[#allocation2 + $0x38] sm:$0x1] }
  0xb7   : > { %v990_v10 = vor.u32 %v989_v55, %v986_v54  ;;  %v1005_v11 = vrot.slane %v1003_v57, 5  ;;  %756 = vst [vmem:[#allocation2 + $0x44] sm:$0x1] %v755_v4  ;;  %v492_v14 = vrot.slane %v7904_v26, 4  ;;  %v497_v24 = vshll.u32 %v7870_v61, 16  ;;  %9676 = vst [vmem:[#allocation23_spill] sm:$0xff] %v8562_v5 }
  0xb8   : > { %v2770_v17 = vrot.slane %v2769_v59, 4  ;;  %v2785_v18 = vsel %vm7692_vm10, %v2780_v63, %v2784_v50  ;;  %v1001_v20 = vrot.slane %v1000_v3, 4  ;;  %v501_v19 = vrot.slane %v7906_v35, 4 }
  0xb9   : > { %v991_v58 = vrot.slane %v990_v10, 4  ;;  %v845_v41 = vld [vmem:[#allocation2 + $0x3c] sm:$0xf]  ;;  %v846_v28 = vld [vmem:[#allocation2 + $0x40] sm:$0xf]  ;;  %v758_v29 = vsel %vm7715_vm13, %v491_v12, %v757_v8  ;;  %v499_v59 = vor.u32 %v497_v24, %v7906_v35 }
  0xba   : > { %v2775_v15 = vsel %vm7692_vm10, %v2770_v17, %v2774_v37  ;;  %v1006_v30 = vsel %vm7692_vm10, %v1001_v20, %v1005_v11  ;;  %v1008_v31 = vshrl.u32 %v845_v41, 16  ;;  %v1011_v33 = vshll.u32 %v845_v41, 16  ;;  %v2654_v26 = vld [vmem:[#allocation2 + $0x3c] sm:$0xf]  ;;  %v7926_v13 = vld [vmem:[#allocation2 + $0x40] sm:$0xf] }
  0xbb   : > { %759 = vst [vmem:[#allocation2 + $0x48] sm:$0xf] %v758_v29  ;;  %v6082_v61 = vcombine.low %v2775_v15, %v2785_v18  ;;  %v996_v36 = vsel %vm7692_vm10, %v991_v58, %v995_v27  ;;  %v1017_v7 = vshll.u32 %v846_v28, 16  ;;  %v1021_v38 = vshrl.u32 %v846_v28, 16 }
  0xbc   : > { %v5939_v46 = vcombine.low %v996_v36, %v1006_v30  ;;  %v1010_v47 = vrot.slane %v1008_v31, 4  ;;  %v1013_v42 = vrot.slane %v1011_v33, 5  ;;  %v2787_v48 = vshrl.u32 %v2654_v26, 16  ;;  %v267_v31 = vld [vmem:[%s7645_s11 + $0x30] sm:$0xf] }
  0xbd   : > { %6641 = vmatmul.mubr.msk.bf16.gmra.mrb[4].mxu0 %vm1321_vm11, %v6082_v61  ;;  %v1019_v37 = vrot.slane %v1017_v7, 5  ;;  %v1023_v51 = vrot.slane %v1021_v38, 4  ;;  %v2790_v32 = vshll.u32 %v2654_v26, 16  ;;  %v2796_v60 = vshll.u32 %v7926_v13, 16  ;;  %v368_v7 = vld [vmem:[#allocation2 + $0x5c] sm:$0x1] }
  0xbe   : > { %6508 = vmatprep.mubr.msk.bf16.mxu1 %vm1321_vm11, %v5939_v46  ;;  %v873_v50 = vld [vmem:[#allocation2 + $0x44] sm:$0x1]  ;;  %v1014_v54 = vor.u32 %v1013_v42, %v1010_v47  ;;  %v2789_v27 = vrot.slane %v2787_v48, 4  ;;  %v2800_v57 = vshrl.u32 %v7926_v13, 16  ;;  %v500_v17 = vsel %vm7701_vm12, %v492_v14, %v499_v59  ;;  %v318_v14 = vld [vmem:[#allocation2 + $0x54] sm:$0x1] }
  0xbf   : > { %v7933_v55 = vld [vmem:[#allocation2 + $0x44] sm:$0x1]  ;;  %v1024_v63 = vor.u32 %v1023_v51, %v1019_v37  ;;  %v1027_v3 = vshll.u32 %v873_v50, 16  ;;  %v2792_v4 = vrot.slane %v2790_v32, 5  ;;  %v2798_v8 = vrot.slane %v2796_v60, 5 }
  0xc0   : > { %v1015_v10 = vrot.slane %v1014_v54, 4  ;;  %v2802_v11 = vrot.slane %v2800_v57, 4  ;;  %v2806_v12 = vshll.u32 %v7933_v55, 16  ;;  %760 = vst.msk [vmem:[#allocation2 + $0x4c] sm:$0xf] %vm287_vm0, %v500_v17  ;;  %v762_v35 = vsel %vm7670_vm8, %v501_v19, %v761_v49 }
  0xc1   : > { %v1025_v18 = vrot.slane %v1024_v63, 4  ;;  %v1029_v20 = vrot.slane %v1027_v3, 5  ;;  %v2793_v58 = vor.u32 %v2792_v4, %v2789_v27  ;;  %763 = vst [vmem:[#allocation2 + $0x50] sm:$0x1] %v762_v35  ;;  %v268_v42 = vld [vmem:[%s7645_s11 + $0x34] sm:$0xf] }
  0xc2   : > { %v2657_v24 = vld [vmem:[#allocation2 + $0x48] sm:$0xf]  ;;  %v1020_v28 = vsel %vm7692_vm10, %v1015_v10, %v1019_v37  ;;  %v2803_v29 = vor.u32 %v2802_v11, %v2798_v8  ;;  %v2808_v15 = vrot.slane %v2806_v12, 5  ;;  %v319_v32 = vsel %vm7670_vm8, 0, %v318_v14 }
  0xc3   : > { %v847_v41 = vld [vmem:[#allocation2 + $0x48] sm:$0xf]  ;;  %v2811_v30 = vshrl.u32 %v2657_v24, 16  ;;  %v1030_v33 = vsel %vm7692_vm10, %v1025_v18, %v1029_v20  ;;  %v2794_v26 = vrot.slane %v2793_v58, 4  ;;  %v2814_v61 = vshll.u32 %v2657_v24, 16 }
  0xc4   : > { %v1032_v36 = vshrl.u32 %v847_v41, 16  ;;  %v5940_v19 = vcombine.low %v1020_v28, %v1030_v33  ;;  %v2804_v38 = vrot.slane %v2803_v29, 4  ;;  %v1035_v47 = vshll.u32 %v847_v41, 16  ;;  %320 = vst [vmem:[#allocation2 + $0x54] sm:$0x1] %v319_v32 }
  0xc5   : > { %v2813_v46 = vrot.slane %v2811_v30, 4  ;;  %v2799_v48 = vsel %vm7692_vm10, %v2794_v26, %v2798_v8  ;;  %v2816_v37 = vrot.slane %v2814_v61, 5  ;;  %v369_v50 = vsel %vm7677_vm9, 0, %v368_v7  ;;  %v269_v30 = vld [vmem:[%s7645_s11 + $0x38] sm:$0xf] }
  0xc6   : > { %v1034_v51 = vrot.slane %v1032_v36, 4  ;;  %6509 = vmatmul.mubr.msk.bf16.gmra.mrb[8].mxu1 %vm1321_vm11, %v5940_v19  ;;  %v2809_v60 = vsel %vm7692_vm10, %v2804_v38, %v2808_v15  ;;  %v1037_v49 = vrot.slane %v1035_v47, 5  ;;  %v503_v54 = vshrl.u32 %v267_v31, 16  ;;  %370 = vst [vmem:[#allocation2 + $0x5c] sm:$0x1] %v369_v50 }
  0xc7   : > { %v6083_v27 = vcombine.low %v2799_v48, %v2809_v60  ;;  %v2817_v57 = vor.u32 %v2816_v37, %v2813_v46  ;;  %v506_v59 = vshll.u32 %v267_v31, 16  ;;  %v511_v63 = vshrl.u32 %v268_v42, 16  ;;  %v7958_v3 = vld [vmem:[#allocation2 + $0x4c] sm:$0xf]  ;;  %v321_v61 = vld [vmem:[#allocation2 + $0x60] sm:$0x1] }
  0xc8   : > { %v848_v4 = vld [vmem:[#allocation2 + $0x4c] sm:$0xf]  ;;  %v1038_v8 = vor.u32 %v1037_v49, %v1034_v51  ;;  %v505_v10 = vrot.slane %v503_v54, 7  ;;  %v514_v11 = vshll.u32 %v268_v42, 16  ;;  %v5968_v12 = vcombine.low %v7774_v53, %v7762_v43  ;;  %v7963_v17 = vld [vmem:[#allocation2 + $0x50] sm:$0x1] }
  0xc9   : > { %6644 = vmatprep.mubr.msk.bf16.mxu0 %vm1321_vm11, %v6083_v27  ;;  %v2818_v18 = vrot.slane %v2817_v57, 4  ;;  %v2820_v20 = vshll.u32 %v7958_v3, 16  ;;  %v2824_v58 = vshrl.u32 %v7958_v3, 16  ;;  %v1041_v35 = vshll.u32 %v848_v4, 16  ;;  %v874_v41 = vld [vmem:[#allocation2 + $0x50] sm:$0x1] }
  0xca   : > { %v2830_v24 = vshll.u32 %v7963_v17, 16  ;;  %v1039_v28 = vrot.slane %v1038_v8, 4  ;;  %v1045_v29 = vshrl.u32 %v848_v4, 16  ;;  %v508_v15 = vor.u32 %v506_v59, %v505_v10  ;;  %v371_v46 = vld [vmem:[#allocation2 + $0x68] sm:$0x1] }
  0xcb   : > { %v2822_v31 = vrot.slane %v2820_v20, 5  ;;  %v2826_v14 = vrot.slane %v2824_v58, 4  ;;  %v1043_v33 = vrot.slane %v1041_v35, 5  ;;  %v1051_v26 = vshll.u32 %v874_v41, 16  ;;  %v764_v51 = vld [vmem:[#allocation2 + $0x54] sm:$0xf] }
  0xcc   : > { %v2832_v36 = vrot.slane %v2830_v24, 5  ;;  %v1047_v7 = vrot.slane %v1045_v29, 4  ;;  %v509_v19 = vrot.slane %v505_v10, 4  ;;  %v513_v38 = vrot.slane %v511_v63, 7  ;;  %v270_v32 = vld [vmem:[%s7645_s11 + $0x3c] sm:$0xf] }
  0xcd   : > { %v2823_v47 = vsel %vm7692_vm10, %v2818_v18, %v2822_v31  ;;  %v2827_v42 = vor.u32 %v2826_v14, %v2822_v31  ;;  %v1044_v48 = vsel %vm7692_vm10, %v1039_v28, %v1043_v33  ;;  %v1053_v37 = vrot.slane %v1051_v26, 5  ;;  %v768_v27 = vld [vmem:[#allocation2 + $0x5c] sm:$0x1]  ;;  %v324_v57 = vld [vmem:[#allocation2 + $0x6c] sm:$0x1] }
  0xce   : > { %v1048_v60 = vor.u32 %v1047_v7, %v1043_v33  ;;  %v516_v49 = vor.u32 %v514_v11, %v513_v38  ;;  %v518_v50 = vrot.slane %v513_v38, 4  ;;  %v765_v54 = vsel %vm7715_vm13, %v508_v15, %v764_v51  ;;  %v374_v10 = vld [vmem:[#allocation2 + $0x74] sm:$0x1]  ;;  %v271_v35 = vld [vmem:[%s7645_s11 + $0x40] sm:$0xf] }
  0xcf   : > { %v2828_v59 = vrot.slane %v2827_v42, 4  ;;  %766 = vst [vmem:[#allocation2 + $0x54] sm:$0xf] %v765_v54  ;;  %v322_v63 = vsel %vm7670_vm8, 0, %v321_v61  ;;  %v372_v4 = vsel %vm7677_vm9, 0, %v371_v46  ;;  %v520_v8 = vshrl.u32 %v269_v30, 16 }
  0xd0   : > { %v1049_v18 = vrot.slane %v1048_v60, 4  ;;  %v517_v11 = vsel %vm7701_vm12, %v509_v19, %v516_v49  ;;  %v769_v20 = vsel %vm7670_vm8, %v518_v50, %v768_v27  ;;  %323 = vst [vmem:[#allocation2 + $0x60] sm:$0x1] %v322_v63  ;;  %373 = vst [vmem:[#allocation2 + $0x68] sm:$0x1] %v372_v4  ;;  %v523_v58 = vshll.u32 %v269_v30, 16 }
  0xd1   : > { %v1991_v24 = vld [vmem:[#allocation6 + $0x4] sm:$0x3]  ;;  %v2833_v41 = vsel %vm7692_vm10, %v2828_v59, %v2832_v36  ;;  %767 = vst.msk [vmem:[#allocation2 + $0x58] sm:$0xf] %vm287_vm0, %v517_v11  ;;  %770 = vst [vmem:[#allocation2 + $0x5c] sm:$0x1] %v769_v20 }
  0xd2   : > { %v522_v28 = vrot.slane %v520_v8, 7  ;;  %v528_v29 = vshrl.u32 %v270_v32, 16  ;;  %v531_v15 = vshll.u32 %v270_v32, 16  ;;  %v272_v31 = vld [vmem:[%s7645_s11 + $0x44] sm:$0xf]  ;;  %7064 = vmatprep.subr.msk.bf16.mxu1 %vm1370_vm2, %v1991_v24  ;;  %v6084_v14 = vcombine.low %v2823_v47, %v2833_v41 }
  0xd3   : > { %v1054_v33 = vsel %vm7692_vm10, %v1049_v18, %v1053_v37  ;;  %v325_v30 = vsel %vm7670_vm8, 0, %v324_v57  ;;  %v375_v26 = vsel %vm7677_vm9, 0, %v374_v10  ;;  %v7996_v61 = vld [vmem:[#allocation2 + $0xc] sm:$0xe]  ;;  %v537_v46 = vshrl.u32 %v271_v35, 16 }
  0xd4   : > { %v5941_v36 = vcombine.low %v1044_v48, %v1054_v33  ;;  %v525_v7 = vor.u32 %v523_v58, %v522_v28  ;;  %v526_v19 = vrot.slane %v522_v28, 4  ;;  %v530_v38 = vrot.slane %v528_v29, 7  ;;  %326 = vst [vmem:[#allocation2 + $0x6c] sm:$0x1] %v325_v30  ;;  %376 = vst [vmem:[#allocation2 + $0x74] sm:$0x1] %v375_v26  ;;  %6645 = vmatmul.mubr.msk.bf16.gmra.mrb[8].mxu0 %vm1321_vm11, %v6084_v14 }
  0xd5   : > { %v540_v47 = vshll.u32 %v271_v35, 16  ;;  %v545_v42 = vshrl.u32 %v272_v31, 16  ;;  %v548_v37 = vshll.u32 %v272_v31, 16  ;;  %v6111_v60 = vrot.slane %v7996_v61, 9 }
  0xd6   : > { %6512 = vmatprep.mubr.msk.bf16.mxu1 %vm1321_vm11, %v5941_v36  ;;  %v533_v51 = vor.u32 %v531_v15, %v530_v38  ;;  %v535_v32 = vrot.slane %v530_v38, 4  ;;  %v8003_v48 = vrot.slane %v3434_v21, 4  ;;  %v849_v49 = vld [vmem:[#allocation2 + $0x54] sm:$0xf]  ;;  %v539_v54 = vrot.slane %v537_v46, 7 }
  0xd7   : > { %v2660_v50 = vld [vmem:[#allocation2 + $0x54] sm:$0xf]  ;;  %v547_v27 = vrot.slane %v545_v42, 7  ;;  %v1056_v57 = vshrl.u32 %v849_v49, 16  ;;  %v1059_v59 = vshll.u32 %v849_v49, 16 }
  0xd8   : > { %v2835_v63 = vshrl.u32 %v2660_v50, 16  ;;  %v2838_v4 = vshll.u32 %v2660_v50, 16  ;;  %v771_v8 = vld [vmem:[#allocation2 + $0x60] sm:$0xf]  ;;  %v850_v10 = vld [vmem:[#allocation2 + $0x58] sm:$0xf]  ;;  %v534_v20 = vsel %vm7701_vm12, %v526_v19, %v533_v51  ;;  %v542_v35 = vor.u32 %v540_v47, %v539_v54 }
  0xd9   : > { %v875_v18 = vld [vmem:[#allocation2 + $0x5c] sm:$0x1]  ;;  %v8005_v11 = vld [vmem:[#allocation2 + $0x58] sm:$0xf]  ;;  %v772_v58 = vsel %vm7715_vm13, %v525_v7, %v771_v8  ;;  %v550_v24 = vor.u32 %v548_v37, %v547_v27  ;;  %v1058_v41 = vrot.slane %v1056_v57, 4  ;;  %v1061_v28 = vrot.slane %v1059_v59, 5 }
  0xda   : > { %v1065_v29 = vshll.u32 %v850_v10, 16  ;;  %v1069_v15 = vshrl.u32 %v850_v10, 16  ;;  %v8011_v31 = vld [vmem:[#allocation2 + $0x5c] sm:$0x1]  ;;  %773 = vst [vmem:[#allocation2 + $0x60] sm:$0xf] %v772_v58 }
  0xdb   : > { %774 = vst.msk [vmem:[#allocation2 + $0x64] sm:$0xf] %vm287_vm0, %v534_v20  ;;  %v1075_v14 = vshll.u32 %v875_v18, 16  ;;  %v2837_v33 = vrot.slane %v2835_v63, 4  ;;  %v2840_v30 = vrot.slane %v2838_v4, 5  ;;  %v2844_v26 = vshll.u32 %v8005_v11, 16 }
  0xdc   : > { %v775_v61 = vld [vmem:[#allocation2 + $0x68] sm:$0x1]  ;;  %v1062_v36 = vor.u32 %v1061_v28, %v1058_v41  ;;  %v1067_v19 = vrot.slane %v1065_v29, 5  ;;  %v1071_v7 = vrot.slane %v1069_v15, 4  ;;  %v2848_v38 = vshrl.u32 %v8005_v11, 16 }
  0xdd   : > { %v1077_v46 = vrot.slane %v1075_v14, 5  ;;  %v2841_v47 = vor.u32 %v2840_v30, %v2837_v33  ;;  %v2846_v42 = vrot.slane %v2844_v26, 5  ;;  %v2854_v37 = vshll.u32 %v8011_v31, 16  ;;  %v778_v51 = vld [vmem:[#allocation2 + $0x6c] sm:$0xf] }
  0xde   : > { %v1063_v49 = vrot.slane %v1062_v36, 4  ;;  %v1072_v50 = vor.u32 %v1071_v7, %v1067_v19  ;;  %v2850_v57 = vrot.slane %v2848_v38, 4  ;;  %v776_v59 = vsel %vm7670_vm8, %v535_v32, %v775_v61  ;;  %v782_v63 = vld [vmem:[#allocation2 + $0x74] sm:$0x1] }
  0xdf   : > { %v2842_v4 = vrot.slane %v2841_v47, 4  ;;  %v2856_v8 = vrot.slane %v2854_v37, 5  ;;  %777 = vst [vmem:[#allocation2 + $0x68] sm:$0x1] %v776_v59  ;;  %v543_v10 = vrot.slane %v539_v54, 4  ;;  %v552_v18 = vrot.slane %v547_v27, 4 }
  0xe0   : > { %v1068_v20 = vsel %vm7692_vm10, %v1063_v49, %v1067_v19  ;;  %v1073_v58 = vrot.slane %v1072_v50, 4  ;;  %v2851_v41 = vor.u32 %v2850_v57, %v2846_v42  ;;  %v779_v28 = vsel %vm7715_vm13, %v542_v35, %v778_v51 }
  0xe1   : > { %v2847_v29 = vsel %vm7692_vm10, %v2842_v4, %v2846_v42  ;;  %v2663_v15 = vld [vmem:[#allocation2 + $0x60] sm:$0xf]  ;;  %v551_v33 = vsel %vm7701_vm12, %v543_v10, %v550_v24  ;;  %780 = vst [vmem:[#allocation2 + $0x6c] sm:$0xf] %v779_v28  ;;  %v783_v54 = vsel %vm7670_vm8, %v552_v18, %v782_v63  ;;  %v8035_v27 = vsel %vm7874_vm1, %v6111_v60, %v3434_v21 }
  0xe2   : > { %v8025_v14 = vld [vmem:[#allocation2 + $0x64] sm:$0xf]  ;;  %v851_v32 = vld [vmem:[#allocation2 + $0x60] sm:$0xf]  ;;  %v1078_v35 = vsel %vm7692_vm10, %v1073_v58, %v1077_v46  ;;  %v2852_v30 = vrot.slane %v2851_v41, 4  ;;  %v2859_v26 = vshrl.u32 %v2663_v15, 16  ;;  %v3438_v4 = vsel %vm7874_vm1, %v8003_v48, %v3437_v25 }
  0xe3   : > { %v2862_v61 = vshll.u32 %v2663_v15, 16  ;;  %781 = vst.msk [vmem:[#allocation2 + $0x70] sm:$0xf] %vm287_vm0, %v551_v33  ;;  %784 = vst [vmem:[#allocation2 + $0x74] sm:$0x1] %v783_v54  ;;  %v5942_v24 = vcombine.low %v1068_v20, %v1078_v35  ;;  %v2868_v36 = vshll.u32 %v8025_v14, 16  ;;  %v6127_v15 = vcombine.low %v8035_v27, %v3438_v4 }
  0xe4   : > { %v2872_v19 = vshrl.u32 %v8025_v14, 16  ;;  %v852_v7 = vld [vmem:[#allocation2 + $0x64] sm:$0xf]  ;;  %v1080_v45 = vshrl.u32 %v851_v32, 16  ;;  %v2857_v21 = vsel %vm7692_vm10, %v2852_v30, %v2856_v8  ;;  %v2861_v60 = vrot.slane %v2859_v26, 4 }
  0xe5   : > { %v2864_v38 = vrot.slane %v2862_v61, 5  ;;  %v1083_v47 = vshll.u32 %v851_v32, 16  ;;  %6513 = vmatmul.mubr.msk.bf16.gmra.mrb[12].mxu1 %vm1321_vm11, %v5942_v24  ;;  %v6085_v46 = vcombine.low %v2847_v29, %v2857_v21  ;;  %v2870_v42 = vrot.slane %v2868_v36, 5  ;;  %v3369_v25 = vld [vmem:[#allocation2 + $0x18] sm:$0xe] }
  0xe6   : > { %v2874_v37 = vrot.slane %v2872_v19, 4  ;;  %v1082_v51 = vrot.slane %v1080_v45, 4  ;;  %v8045_v49 = vld [vmem:[#allocation2 + $0x68] sm:$0x1]  ;;  %v1089_v63 = vshll.u32 %v852_v7, 16  ;;  %v1093_v18 = vshrl.u32 %v852_v7, 16 }
  0xe7   : > { %v2865_v50 = vor.u32 %v2864_v38, %v2861_v60  ;;  %v876_v57 = vld [vmem:[#allocation2 + $0x68] sm:$0x1]  ;;  %v1085_v59 = vrot.slane %v1083_v47, 5  ;;  %6648 = vmatprep.mubr.msk.bf16.mxu0 %vm1321_vm11, %v6085_v46  ;;  %v2878_v10 = vshll.u32 %v8045_v49, 16  ;;  %v273_v45 = vld [vmem:[%s7645_s11 + $0x48] sm:$0xf] }
  0xe8   : > { %v2875_v8 = vor.u32 %v2874_v37, %v2870_v42  ;;  %v1099_v20 = vshll.u32 %v876_v57, 16  ;;  %v1091_v28 = vrot.slane %v1089_v63, 5  ;;  %v853_v29 = vld [vmem:[#allocation2 + $0x6c] sm:$0xf]  ;;  %v1095_v33 = vrot.slane %v1093_v18, 4 }
  0xe9   : > { %v2866_v58 = vrot.slane %v2865_v50, 4  ;;  %v1086_v41 = vor.u32 %v1085_v59, %v1082_v51  ;;  %v2880_v2 = vrot.slane %v2878_v10, 5  ;;  %v1104_v61 = vshrl.u32 %v853_v29, 16  ;;  %v327_v21 = vld [vmem:[#allocation2 + $0x78] sm:$0x1] }
  0xea   : > { %v2876_v32 = vrot.slane %v2875_v8, 4  ;;  %v1101_v54 = vrot.slane %v1099_v20, 5  ;;  %v854_v35 = vld [vmem:[#allocation2 + $0x70] sm:$0xf]  ;;  %v877_v26 = vld [vmem:[#allocation2 + $0x74] sm:$0x1]  ;;  %v1096_v19 = vor.u32 %v1095_v33, %v1091_v28 }
  0xeb   : > { %v2871_v48 = vsel %vm7692_vm10, %v2866_v58, %v2870_v42  ;;  %v1087_v30 = vrot.slane %v1086_v41, 4  ;;  %v1107_v24 = vshll.u32 %v853_v29, 16  ;;  %v1113_v27 = vshll.u32 %v854_v35, 16  ;;  %v377_v60 = vld [vmem:[#allocation2 + $0x80] sm:$0x1] }
  0xec   : > { %v2881_v36 = vsel %vm7692_vm10, %v2876_v32, %v2880_v2  ;;  %v1117_v7 = vshrl.u32 %v854_v35, 16  ;;  %v1106_v46 = vrot.slane %v1104_v61, 4  ;;  %v274_v37 = vld [vmem:[%s7645_s11 + $0x4c] sm:$0xf]  ;;  %v1097_v51 = vrot.slane %v1096_v19, 4 }
  0xed   : > { %v6086_v38 = vcombine.low %v2871_v48, %v2881_v36  ;;  %v1092_v47 = vsel %vm7692_vm10, %v1087_v30, %v1091_v28  ;;  %v1109_v42 = vrot.slane %v1107_v24, 5  ;;  %v1115_v50 = vrot.slane %v1113_v27, 5  ;;  %v330_v63 = vld [vmem:[#allocation2 + $0x84] sm:$0x1]  ;;  %v275_v20 = vld [vmem:[%s7645_s11 + $0x50] sm:$0xf] }
  0xee   : > { %v1119_v57 = vrot.slane %v1117_v7, 4  ;;  %v1123_v59 = vshll.u32 %v877_v26, 16  ;;  %v6112_v8 = vrot.slane %v3369_v25, 9  ;;  %v4002_v10 = vsel %vm1370_vm2, %v7865_v52, 0  ;;  %v380_v32 = vld [vmem:[#allocation2 + $0x8c] sm:$0x1] }
  0xef   : > { %6649 = vmatmul.mubr.msk.bf16.gmra.mrb[12].mxu0 %vm1321_vm11, %v6086_v38  ;;  %v1110_v4 = vor.u32 %v1109_v42, %v1106_v46  ;;  %v328_v18 = vsel %vm7670_vm8, 0, %v327_v21  ;;  %v1102_v58 = vsel %vm7692_vm10, %v1097_v51, %v1101_v54  ;;  %v378_v29 = vsel %vm7677_vm9, 0, %v377_v60  ;;  %v276_v25 = vld [vmem:[%s7645_s11 + $0x54] sm:$0xf]  ;;  %v3370_v26 = vld [vmem:[#allocation2 + $0x24] sm:$0xe] }
  0xf0   : > { %v1120_v41 = vor.u32 %v1119_v57, %v1115_v50  ;;  %v1125_v28 = vrot.slane %v1123_v59, 5  ;;  %6670 = vmatprep.mubr.msk.bf16.mxu0 %vm1321_vm11, %v6127_v15  ;;  %329 = vst [vmem:[#allocation2 + $0x78] sm:$0x1] %v328_v18  ;;  %v5943_v2 = vcombine.low %v1092_v47, %v1102_v58  ;;  %v3442_v52 = vsel %vm7874_vm1, %v6112_v8, %v3441_v62  ;;  %v4630_v7 = vld [vmem:[#allocation6 + $0xe] sm:$0x3] }
  0xf1   : > { %v1111_v33 = vrot.slane %v1110_v4, 4  ;;  %379 = vst [vmem:[#allocation2 + $0x80] sm:$0x1] %v378_v29  ;;  %v554_v35 = vshrl.u32 %v273_v45, 16  ;;  %v6128_v48 = vcombine.low %v3442_v52, %v7896_v23  ;;  %v557_v30 = vshll.u32 %v273_v45, 16 }
  0xf2   : > { %v1121_v54 = vrot.slane %v1120_v41, 4  ;;  %v562_v15 = vshrl.u32 %v274_v37, 16  ;;  %6516 = vmatprep.mubr.msk.bf16.mxu1 %vm1321_vm11, %v5943_v2  ;;  %v565_v36 = vshll.u32 %v274_v37, 16  ;;  %v331_v22 = vsel %vm7670_vm8, 0, %v330_v63  ;;  %v3371_v47 = vld [vmem:[#allocation2 + $0x30] sm:$0xe] }
  0xf3   : > { %v1116_v61 = vsel %vm7692_vm10, %v1111_v33, %v1115_v50  ;;  %v556_v24 = vrot.slane %v554_v35, 7  ;;  %332 = vst [vmem:[#allocation2 + $0x84] sm:$0x1] %v331_v22  ;;  %v381_v23 = vsel %vm7677_vm9, 0, %v380_v32  ;;  %v571_v27 = vshrl.u32 %v275_v20, 16 }
  0xf4   : > { %v1126_v62 = vsel %vm7692_vm10, %v1121_v54, %v1125_v28  ;;  %v564_v19 = vrot.slane %v562_v15, 7  ;;  %382 = vst [vmem:[#allocation2 + $0x8c] sm:$0x1] %v381_v23  ;;  %v574_v38 = vshll.u32 %v275_v20, 16  ;;  %v333_v46 = vld [vmem:[#allocation2 + $0x90] sm:$0x1] }
  0xf5   : > { %v5944_v45 = vcombine.low %v1116_v61, %v1126_v62  ;;  %v559_v21 = vor.u32 %v557_v30, %v556_v24  ;;  %v560_v60 = vrot.slane %v556_v24, 4  ;;  %v573_v51 = vrot.slane %v571_v27, 7  ;;  %v277_v29 = vld [vmem:[%s7645_s11 + $0x58] sm:$0xf]  ;;  %v383_v32 = vld [vmem:[#allocation2 + $0x98] sm:$0x1] }
  0xf6   : > { %v567_v42 = vor.u32 %v565_v36, %v564_v19  ;;  %v569_v37 = vrot.slane %v564_v19, 4  ;;  %v579_v50 = vshrl.u32 %v276_v25, 16  ;;  %v582_v59 = vshll.u32 %v276_v25, 16  ;;  %v278_v33 = vld [vmem:[%s7645_s11 + $0x5c] sm:$0xf] }
  0xf7   : > { %6517 = vmatmul.mubr.msk.bf16.gmra.mrb[16].mxu1 %vm1321_vm11, %v5944_v45  ;;  %6671 = vmatmul.mubr.msk.bf16.vlgmr.msra.gmra.mrb[0].mxu0 %vm1321_vm11, %v6128_v48  ;;  %v785_v57 = vld [vmem:[#allocation2 + $0x78] sm:$0xf]  ;;  %v6113_v63 = vrot.slane %v3370_v26, 9  ;;  %v3448_v4 = vrot.slane %v7827_v40, 5  ;;  %v3451_v8 = vrot.slane %v7839_v39, 5  ;;  %v576_v41 = vor.u32 %v574_v38, %v573_v51 }
  0xf8   : > { %6703 = vmatpush3.bf16.msra.mxu0 %v4002_v10  ;;  %v568_v18 = vsel %vm7701_vm12, %v560_v60, %v567_v42  ;;  %v786_v20 = vsel %vm7715_vm13, %v559_v21, %v785_v57  ;;  %v789_v58 = vld [vmem:[#allocation2 + $0x80] sm:$0x1]  ;;  %v577_v28 = vrot.slane %v573_v51, 4  ;;  %v581_v39 = vrot.slane %v579_v50, 7  ;;  %v336_v52 = vld [vmem:[#allocation2 + $0x9c] sm:$0x1] }
  0xf9   : > { %787 = vst [vmem:[#allocation2 + $0x78] sm:$0xf] %v786_v20  ;;  %788 = vst.msk [vmem:[#allocation2 + $0x7c] sm:$0xf] %vm287_vm0, %v568_v18  ;;  %v790_v40 = vsel %vm7670_vm8, %v569_v37, %v789_v58  ;;  %v3449_v10 = vsel %vm7874_vm1, %v6113_v63, %v3448_v4  ;;  %v3450_v2 = vrot.slane %v3448_v4, 4  ;;  %7070 = vmatprep.subr.msk.bf16.mxu0 %vm1370_vm2, %v4630_v7  ;;  %v6114_v35 = vrot.slane %v3371_v47, 9 }
  0xfa   : > { %791 = vst [vmem:[#allocation2 + $0x80] sm:$0x1] %v790_v40  ;;  %v3455_v25 = vrot.slane %v7888_v16, 5  ;;  %v3458_v54 = vrot.slane %v7908_v1, 5  ;;  %v334_v48 = vsel %vm7670_vm8, 0, %v333_v46  ;;  %v584_v26 = vor.u32 %v582_v59, %v581_v39 }
  0xfb   : > { %v8110_v30 = vld [vmem:[%s7645_s11 + $0x60] sm:$0xf]  ;;  %v386_v15 = vld [vmem:[#allocation2 + $0xa4] sm:$0x1]  ;;  %v586_v61 = vrot.slane %v581_v39, 4  ;;  %v3452_v36 = vsel %vm7874_vm1, %v3450_v2, %v3451_v8  ;;  %v384_v22 = vsel %vm7677_vm9, 0, %v383_v32 }
  0xfc   : > { %v792_v24 = vld [vmem:[#allocation2 + $0x84] sm:$0xf]  ;;  %335 = vst [vmem:[#allocation2 + $0x90] sm:$0x1] %v334_v48  ;;  %v796_v1 = vld [vmem:[#allocation2 + $0x8c] sm:$0x1]  ;;  %v6129_v62 = vcombine.low %v3449_v10, %v3452_v36  ;;  %v3456_v19 = vsel %vm7874_vm1, %v6114_v35, %v3455_v25  ;;  %v585_v27 = vsel %vm7701_vm12, %v577_v28, %v584_v26 }
  0xfd   : > { %v793_v16 = vsel %vm7715_vm13, %v576_v41, %v792_v24  ;;  %v3457_v23 = vrot.slane %v3455_v25, 4  ;;  %385 = vst [vmem:[#allocation2 + $0x98] sm:$0x1] %v384_v22  ;;  %v797_v7 = vsel %vm7670_vm8, %v586_v61, %v796_v1  ;;  %v588_v45 = vshrl.u32 %v277_v29, 16  ;;  %795 = vst.msk [vmem:[#allocation2 + $0x88] sm:$0xf] %vm287_vm0, %v585_v27 }
  0xfe   : > { %794 = vst [vmem:[#allocation2 + $0x84] sm:$0xf] %v793_v16  ;;  %v591_v21 = vshll.u32 %v277_v29, 16  ;;  %798 = vst [vmem:[#allocation2 + $0x8c] sm:$0x1] %v797_v7  ;;  %6674 = vmatprep.mubr.msk.bf16.mxu0 %vm1321_vm11, %v6129_v62  ;;  %v596_v38 = vshrl.u32 %v278_v33, 16 }
  0xff   : > { %v3459_v60 = vsel %vm7874_vm1, %v3457_v23, %v3458_v54  ;;  %v599_v47 = vshll.u32 %v278_v33, 16  ;;  %v337_v46 = vsel %vm7670_vm8, 0, %v336_v52  ;;  %v590_v37 = vrot.slane %v588_v45, 7  ;;  %v280_v27 = vld [vmem:[%s7645_s11 + $0x64] sm:$0xf] }
 0x100   : > { %v6130_v42 = vcombine.low %v3456_v19, %v3459_v60  ;;  %338 = vst [vmem:[#allocation2 + $0x9c] sm:$0x1] %v337_v46  ;;  %v387_v51 = vsel %vm7677_vm9, 0, %v386_v15  ;;  %v605_v50 = vshrl.u32 %v8110_v30, 16  ;;  %v8133_v57 = vld [vmem:[#allocation2 + $0x78] sm:$0xf] }
 0x101   : > { %v8135_v59 = vld [vmem:[#allocation2 + $0x7c] sm:$0xf]  ;;  %v598_v63 = vrot.slane %v596_v38, 7  ;;  %388 = vst [vmem:[#allocation2 + $0xa4] sm:$0x1] %v387_v51  ;;  %v608_v4 = vshll.u32 %v8110_v30, 16  ;;  %v593_v29 = vor.u32 %v591_v21, %v590_v37 }
 0x102   : > { %v878_v8 = vld [vmem:[#allocation2 + $0x80] sm:$0x1]  ;;  %v1128_v18 = vshrl.u32 %v8133_v57, 16  ;;  %v1131_v20 = vshll.u32 %v8133_v57, 16  ;;  %v1137_v58 = vshll.u32 %v8135_v59, 16  ;;  %v1141_v41 = vshrl.u32 %v8135_v59, 16  ;;  %6675 = vmatmul.mubr.msk.bf16.gmra.mrb[4].mxu0 %vm1321_vm11, %v6130_v42 }
 0x103   : > { %v1147_v28 = vshll.u32 %v878_v8, 16  ;;  %v594_v32 = vrot.slane %v590_v37, 4  ;;  %v601_v40 = vor.u32 %v599_v47, %v598_v63  ;;  %v799_v39 = vld [vmem:[#allocation2 + $0x90] sm:$0xf]  ;;  %v603_v30 = vrot.slane %v598_v63, 4 }
 0x104   : > { %v1130_v10 = vrot.slane %v1128_v18, 4  ;;  %v1133_v2 = vrot.slane %v1131_v20, 5  ;;  %v1139_v33 = vrot.slane %v1137_v58, 5  ;;  %v1143_v52 = vrot.slane %v1141_v41, 4  ;;  %v803_v35 = vld [vmem:[#allocation2 + $0x98] sm:$0x1] }
 0x105   : > { %v1149_v25 = vrot.slane %v1147_v28, 5  ;;  %v8143_v54 = vld [vmem:[#allocation2 + $0x84] sm:$0xf]  ;;  %v602_v48 = vsel %vm7701_vm12, %v594_v32, %v601_v40  ;;  %v800_v15 = vsel %vm7715_vm13, %v593_v29, %v799_v39  ;;  %v8149_v24 = vld [vmem:[#allocation2 + $0x88] sm:$0xf]  ;;  %v804_v23 = vsel %vm7670_vm8, %v603_v30, %v803_v35 }
 0x106   : > { %v1134_v26 = vor.u32 %v1133_v2, %v1130_v10  ;;  %v1144_v61 = vor.u32 %v1143_v52, %v1139_v33  ;;  %v879_v36 = vld [vmem:[#allocation2 + $0x8c] sm:$0x1]  ;;  %v1152_v22 = vshrl.u32 %v8143_v54, 16  ;;  %v1155_v16 = vshll.u32 %v8143_v54, 16  ;;  %801 = vst [vmem:[#allocation2 + $0x90] sm:$0xf] %v800_v15 }
 0x107   : > { %802 = vst.msk [vmem:[#allocation2 + $0x94] sm:$0xf] %vm287_vm0, %v602_v48  ;;  %v1161_v1 = vshll.u32 %v8149_v24, 16  ;;  %v1165_v62 = vshrl.u32 %v8149_v24, 16  ;;  %v1171_v19 = vshll.u32 %v879_v36, 16  ;;  %v607_v42 = vrot.slane %v605_v50, 7 }
 0x108   : > { %v1135_v7 = vrot.slane %v1134_v26, 4  ;;  %v1145_v45 = vrot.slane %v1144_v61, 4  ;;  %v1154_v21 = vrot.slane %v1152_v22, 4  ;;  %v1157_v60 = vrot.slane %v1155_v16, 5  ;;  %805 = vst [vmem:[#allocation2 + $0x98] sm:$0x1] %v804_v23 }
 0x109   : > { %v1163_v38 = vrot.slane %v1161_v1, 5  ;;  %v1167_v47 = vrot.slane %v1165_v62, 4  ;;  %v1173_v46 = vrot.slane %v1171_v19, 5  ;;  %v3372_v37 = vld [vmem:[#allocation2 + $0x3c] sm:$0xe]  ;;  %v613_v18 = vshrl.u32 %v280_v27, 16 }
 0x10a   : > { %v1140_v51 = vsel %vm7692_vm10, %v1135_v7, %v1139_v33  ;;  %v1150_v63 = vsel %vm7692_vm10, %v1145_v45, %v1149_v25  ;;  %v1158_v8 = vor.u32 %v1157_v60, %v1154_v21  ;;  %v806_v20 = vld [vmem:[#allocation2 + $0x9c] sm:$0xf]  ;;  %v610_v28 = vor.u32 %v608_v4, %v607_v42  ;;  %v810_v15 = vld [vmem:[#allocation2 + $0xa4] sm:$0x1] }
 0x10b   : > { %v5945_v58 = vcombine.low %v1140_v51, %v1150_v63  ;;  %v1168_v41 = vor.u32 %v1167_v47, %v1163_v38  ;;  %v611_v29 = vrot.slane %v607_v42, 4  ;;  %v615_v40 = vrot.slane %v613_v18, 7 }
 0x10c   : > { %v1159_v32 = vrot.slane %v1158_v8, 4  ;;  %v616_v39 = vshll.u32 %v280_v27, 16  ;;  %v6115_v10 = vrot.slane %v3372_v37, 9  ;;  %v807_v52 = vsel %vm7715_vm13, %v610_v28, %v806_v20  ;;  %v339_v27 = vld [vmem:[#allocation2 + $0xa8] sm:$0x1] }
 0x10d   : > { %6520 = vmatprep.mubr.msk.bf16.mxu1 %vm1321_vm11, %v5945_v58  ;;  %v1169_v50 = vrot.slane %v1168_v41, 4  ;;  %v8164_v2 = vld [vmem:[#allocation2 + $0x90] sm:$0xf]  ;;  %v3462_v35 = vrot.slane %v7926_v13, 5  ;;  %808 = vst [vmem:[#allocation2 + $0x9c] sm:$0xf] %v807_v52 }
 0x10e   : > { %v8166_v33 = vld [vmem:[#allocation2 + $0x94] sm:$0xf]  ;;  %v1164_v4 = vsel %vm7692_vm10, %v1159_v32, %v1163_v38  ;;  %v1176_v25 = vshrl.u32 %v8164_v2, 16  ;;  %v1179_v48 = vshll.u32 %v8164_v2, 16  ;;  %v618_v22 = vor.u32 %v616_v39, %v615_v40  ;;  %v3373_v13 = vld [vmem:[#allocation2 + $0x48] sm:$0xe] }
 0x10f   : > { %v1185_v30 = vshll.u32 %v8166_v33, 16  ;;  %v1174_v26 = vsel %vm7692_vm10, %v1169_v50, %v1173_v46  ;;  %v880_v61 = vld [vmem:[#allocation2 + $0x98] sm:$0x1]  ;;  %v1189_v36 = vshrl.u32 %v8166_v33, 16  ;;  %v620_v16 = vrot.slane %v615_v40, 4 }
 0x110   : > { %v5946_v1 = vcombine.low %v1164_v4, %v1174_v26  ;;  %v1178_v62 = vrot.slane %v1176_v25, 4  ;;  %v1181_v19 = vrot.slane %v1179_v48, 5  ;;  %v1195_v45 = vshll.u32 %v880_v61, 16  ;;  %v281_v37 = vld [vmem:[%s7645_s11 + $0x68] sm:$0xf] }
 0x111   : > { %v1187_v23 = vrot.slane %v1185_v30, 5  ;;  %v1191_v7 = vrot.slane %v1189_v36, 4  ;;  %v619_v21 = vsel %vm7701_vm12, %v611_v29, %v618_v22  ;;  %v811_v60 = vsel %vm7670_vm8, %v620_v16, %v810_v15  ;;  %v389_v20 = vld [vmem:[#allocation2 + $0xb0] sm:$0x1]  ;;  %v282_v50 = vld [vmem:[%s7645_s11 + $0x6c] sm:$0xf] }
 0x112   : > { %6521 = vmatmul.mubr.msk.bf16.gmra.mrb[20].mxu1 %vm1321_vm11, %v5946_v1  ;;  %v1182_v38 = vor.u32 %v1181_v19, %v1178_v62  ;;  %809 = vst.msk [vmem:[#allocation2 + $0xa0] sm:$0xf] %vm287_vm0, %v619_v21  ;;  %812 = vst [vmem:[#allocation2 + $0xa4] sm:$0x1] %v811_v60  ;;  %v3463_v47 = vsel %vm7874_vm1, %v6115_v10, %v3462_v35  ;;  %v3464_v46 = vrot.slane %v3462_v35, 4  ;;  %v3465_v42 = vrot.slane %v7933_v55, 5 }
 0x113   : > { %v1192_v51 = vor.u32 %v1191_v7, %v1187_v23  ;;  %v1197_v63 = vrot.slane %v1195_v45, 5  ;;  %v6116_v8 = vrot.slane %v3373_v13, 9  ;;  %v3469_v18 = vrot.slane %v7958_v3, 5  ;;  %v283_v62 = vld [vmem:[%s7645_s11 + $0x70] sm:$0xf] }
 0x114   : > { %v1183_v58 = vrot.slane %v1182_v38, 4  ;;  %v3466_v41 = vsel %vm7874_vm1, %v3464_v46, %v3465_v42  ;;  %v3472_v28 = vrot.slane %v7963_v17, 5  ;;  %v340_v29 = vsel %vm7670_vm8, 0, %v339_v27  ;;  %v8195_v40 = vld [vmem:[#allocation2 + $0x9c] sm:$0xf] }
 0x115   : > { %v1193_v32 = vrot.slane %v1192_v51, 4  ;;  %v6131_v55 = vcombine.low %v3463_v47, %v3466_v41  ;;  %v3470_v39 = vsel %vm7874_vm1, %v6116_v8, %v3469_v18  ;;  %v3471_v10 = vrot.slane %v3469_v18, 4  ;;  %341 = vst [vmem:[#allocation2 + $0xa8] sm:$0x1] %v340_v29  ;;  %v284_v45 = vld [vmem:[%s7645_s11 + $0x74] sm:$0xf] }
 0x116   : > { %v1188_v3 = vsel %vm7692_vm10, %v1183_v58, %v1187_v23  ;;  %v1200_v52 = vshrl.u32 %v8195_v40, 16  ;;  %v1203_v17 = vshll.u32 %v8195_v40, 16  ;;  %v390_v35 = vsel %vm7677_vm9, 0, %v389_v20  ;;  %v342_v21 = vld [vmem:[#allocation2 + $0xb4] sm:$0x1] }
 0x117   : > { %v1198_v4 = vsel %vm7692_vm10, %v1193_v32, %v1197_v63  ;;  %6678 = vmatprep.mubr.msk.bf16.mxu0 %vm1321_vm11, %v6131_v55  ;;  %v3473_v25 = vsel %vm7874_vm1, %v3471_v10, %v3472_v28  ;;  %391 = vst [vmem:[#allocation2 + $0xb0] sm:$0x1] %v390_v35  ;;  %v622_v48 = vshrl.u32 %v281_v37, 16  ;;  %v625_v30 = vshll.u32 %v281_v37, 16  ;;  %v392_v42 = vld [vmem:[#allocation2 + $0xbc] sm:$0x1] }
 0x118   : > { %v5947_v15 = vcombine.low %v1188_v3, %v1198_v4  ;;  %v1202_v26 = vrot.slane %v1200_v52, 4  ;;  %v1205_v61 = vrot.slane %v1203_v17, 5  ;;  %v6132_v36 = vcombine.low %v3470_v39, %v3473_v25  ;;  %v3374_v29 = vld [vmem:[#allocation2 + $0x54] sm:$0xe]  ;;  %v3375_v3 = vld [vmem:[#allocation2 + $0x60] sm:$0xe] }
 0x119   : > { %v8211_v22 = vld [vmem:[#allocation2 + $0xa0] sm:$0xf]  ;;  %v881_v16 = vld [vmem:[#allocation2 + $0xa4] sm:$0x1]  ;;  %v624_v13 = vrot.slane %v622_v48, 7  ;;  %v630_v1 = vshrl.u32 %v282_v50, 16 }
 0x11a   : > { %6524 = vmatprep.mubr.msk.bf16.mxu1 %vm1321_vm11, %v5947_v15  ;;  %v1206_v19 = vor.u32 %v1205_v61, %v1202_v26  ;;  %v1209_v23 = vshll.u32 %v8211_v22, 16  ;;  %v1213_v27 = vshrl.u32 %v8211_v22, 16  ;;  %v1219_v7 = vshll.u32 %v881_v16, 16  ;;  %6679 = vmatmul.mubr.msk.bf16.gmra.mrb[8].mxu0 %vm1321_vm11, %v6132_v36 }
 0x11b   : > { %v627_v60 = vor.u32 %v625_v30, %v624_v13  ;;  %v628_v38 = vrot.slane %v624_v13, 4  ;;  %v632_v47 = vrot.slane %v630_v1, 7  ;;  %v633_v46 = vshll.u32 %v282_v50, 16 }
 0x11c   : > { %v1207_v37 = vrot.slane %v1206_v19, 4  ;;  %v1211_v51 = vrot.slane %v1209_v23, 5  ;;  %v1215_v63 = vrot.slane %v1213_v27, 4  ;;  %v1221_v8 = vrot.slane %v1219_v7, 5  ;;  %v813_v18 = vld [vmem:[#allocation2 + $0xa8] sm:$0xf] }
 0x11d   : > { %v635_v20 = vor.u32 %v633_v46, %v632_v47  ;;  %v637_v58 = vrot.slane %v632_v47, 4  ;;  %v814_v41 = vsel %vm7715_vm13, %v627_v60, %v813_v18  ;;  %v343_v28 = vsel %vm7670_vm8, 0, %v342_v21  ;;  %v2667_v23 = vld [vmem:[#allocation2 + $0x70] sm:$0xf]  ;;  %v3376_v27 = vld [vmem:[#allocation2 + $0x6c] sm:$0xe] }
 0x11e   : > { %v1212_v32 = vsel %vm7692_vm10, %v1207_v37, %v1211_v51  ;;  %v1216_v55 = vor.u32 %v1215_v63, %v1211_v51  ;;  %815 = vst [vmem:[#allocation2 + $0xa8] sm:$0xf] %v814_v41  ;;  %v817_v39 = vld [vmem:[#allocation2 + $0xb0] sm:$0x1]  ;;  %344 = vst [vmem:[#allocation2 + $0xb4] sm:$0x1] %v343_v28 }
 0x11f   : > { %v393_v10 = vsel %vm7677_vm9, 0, %v392_v42  ;;  %v639_v50 = vshrl.u32 %v283_v62, 16  ;;  %v636_v52 = vsel %vm7701_vm12, %v628_v38, %v635_v20  ;;  %v818_v17 = vsel %vm7670_vm8, %v637_v58, %v817_v39  ;;  %v2668_v58 = vld [vmem:[#allocation2 + $0x74] sm:$0x1] }
 0x120   : > { %394 = vst [vmem:[#allocation2 + $0xbc] sm:$0x1] %v393_v10  ;;  %v642_v35 = vshll.u32 %v283_v62, 16  ;;  %v647_v4 = vshrl.u32 %v284_v45, 16  ;;  %v1217_v25 = vrot.slane %v1216_v55, 4  ;;  %v650_v30 = vshll.u32 %v284_v45, 16 }
 0x121   : > { %816 = vst.msk [vmem:[#allocation2 + $0xac] sm:$0xf] %vm287_vm0, %v636_v52  ;;  %819 = vst [vmem:[#allocation2 + $0xb0] sm:$0x1] %v818_v17  ;;  %v641_v48 = vrot.slane %v639_v50, 7  ;;  %v6117_v15 = vrot.slane %v3374_v29, 9 }
 0x122   : > { %v649_v26 = vrot.slane %v647_v4, 7  ;;  %v3476_v61 = vrot.slane %v8005_v11, 5  ;;  %v3479_v36 = vrot.slane %v8011_v31, 5  ;;  %v6118_v16 = vrot.slane %v3375_v3, 9  ;;  %v8266_v17 = vld [vmem:[#allocation2 + $0x7c] sm:$0xf] }
 0x123   : > { %v1222_v13 = vsel %vm7692_vm10, %v1217_v25, %v1221_v8  ;;  %v644_v1 = vor.u32 %v642_v35, %v641_v48  ;;  %v645_v19 = vrot.slane %v641_v48, 4  ;;  %v3483_v62 = vrot.slane %v8025_v14, 5 }
 0x124   : > { %v5948_v7 = vcombine.low %v1212_v32, %v1222_v13  ;;  %v652_v21 = vor.u32 %v650_v30, %v649_v26  ;;  %v654_v60 = vrot.slane %v649_v26, 4  ;;  %v3477_v45 = vsel %vm7874_vm1, %v6117_v15, %v3476_v61 }
 0x125   : > { %v3478_v38 = vrot.slane %v3476_v61, 4  ;;  %v3485_v11 = vrot.slane %v3483_v62, 4  ;;  %v3486_v31 = vrot.slane %v8045_v49, 5  ;;  %v8241_v47 = vld [vmem:[#allocation2 + $0xa8] sm:$0xf]  ;;  %v3484_v42 = vsel %vm7874_vm1, %v6118_v16, %v3483_v62 }
 0x126   : > { %6525 = vmatmul.mubr.msk.bf16.gmra.mrb[24].mxu1 %vm1321_vm11, %v5948_v7  ;;  %v653_v46 = vsel %vm7701_vm12, %v645_v19, %v652_v21  ;;  %v820_v14 = vld [vmem:[#allocation2 + $0xb4] sm:$0xf]  ;;  %v6119_v37 = vrot.slane %v3376_v27, 9  ;;  %v3490_v51 = vrot.slane %v2667_v23, 5  ;;  %v1224_v63 = vshrl.u32 %v8241_v47, 16 }
 0x127   : > { %v1227_v8 = vshll.u32 %v8241_v47, 16  ;;  %v821_v49 = vsel %vm7715_vm13, %v644_v1, %v820_v14  ;;  %823 = vst.msk [vmem:[#allocation2 + $0xb8] sm:$0xf] %vm287_vm0, %v653_v46  ;;  %v824_v18 = vld [vmem:[#allocation2 + $0xbc] sm:$0x1]  ;;  %v3480_v20 = vsel %vm7874_vm1, %v3478_v38, %v3479_v36  ;;  %v3487_v55 = vsel %vm7874_vm1, %v3485_v11, %v3486_v31 }
 0x128   : > { %v8254_v41 = vld [vmem:[#allocation2 + $0xac] sm:$0xf]  ;;  %v8256_v28 = vld [vmem:[#allocation2 + $0xb0] sm:$0x1]  ;;  %822 = vst [vmem:[#allocation2 + $0xb4] sm:$0xf] %v821_v49  ;;  %v825_v29 = vsel %vm7670_vm8, %v654_v60, %v824_v18  ;;  %v6133_v32 = vcombine.low %v3477_v45, %v3480_v20  ;;  %v3491_v39 = vsel %vm7874_vm1, %v6119_v37, %v3490_v51  ;;  %v6134_v4 = vcombine.low %v3484_v42, %v3487_v55 }
 0x129   : > { %v1226_v10 = vrot.slane %v1224_v63, 4  ;;  %v1229_v50 = vrot.slane %v1227_v8, 5  ;;  %v1233_v3 = vshll.u32 %v8254_v41, 16  ;;  %v1237_v52 = vshrl.u32 %v8254_v41, 16  ;;  %826 = vst [vmem:[#allocation2 + $0xbc] sm:$0x1] %v825_v29 }
 0x12a   : > { %v1243_v35 = vshll.u32 %v8256_v28, 16  ;;  %6682 = vmatprep.mubr.msk.bf16.mxu0 %vm1321_vm11, %v6133_v32  ;;  %v3492_v25 = vrot.slane %v3490_v51, 4  ;;  %v3493_v48 = vrot.slane %v2668_v58, 5  ;;  %v3377_v61 = vld [vmem:[#allocation2 + $0x78] sm:$0xe]  ;;  %v3497_v27 = vrot.slane %v8266_v17, 5 }
 0x12b   : > { %v1230_v30 = vor.u32 %v1229_v50, %v1226_v10  ;;  %v1235_v15 = vrot.slane %v1233_v3, 5  ;;  %v1239_v26 = vrot.slane %v1237_v52, 4  ;;  %6683 = vmatmul.mubr.msk.bf16.gmra.mrb[12].mxu0 %vm1321_vm11, %v6134_v4  ;;  %v6120_v23 = vrot.slane %v3377_v61, 9  ;;  %v8283_v11 = vld [vmem:[#allocation2 + $0x80] sm:$0x1] }
 0x12c   : > { %v3494_v36 = vsel %vm7874_vm1, %v3492_v25, %v3493_v48  ;;  %v1245_v1 = vrot.slane %v1243_v35, 5  ;;  %v2673_v31 = vld [vmem:[#allocation2 + $0x88] sm:$0xf]  ;;  %v2674_v37 = vld [vmem:[#allocation2 + $0x8c] sm:$0x1]  ;;  %v3499_v4 = vrot.slane %v3497_v27, 4 }
 0x12d   : > { %v1231_v16 = vrot.slane %v1230_v30, 4  ;;  %v1240_v13 = vor.u32 %v1239_v26, %v1235_v15  ;;  %v6135_v19 = vcombine.low %v3491_v39, %v3494_v36  ;;  %v3378_v18 = vld [vmem:[#allocation2 + $0x84] sm:$0xe]  ;;  %v7183_v32 = vld [vmem:[#allocation2] sm:$0xf]  ;;  %v3498_v35 = vsel %vm7874_vm1, %v6120_v23, %v3497_v27 }
 0x12e   : > { %v8273_v62 = vld [vmem:[#allocation2 + $0xb8] sm:$0xf]  ;;  %v8292_v55 = vld [vmem:[#allocation2 + $0x4] sm:$0xf]  ;;  %v2676_v10 = vld [vmem:[#allocation2 + $0x94] sm:$0xf] }
 0x12f   : > { %v1236_v7 = vsel %vm7692_vm10, %v1231_v16, %v1235_v15  ;;  %v1241_v21 = vrot.slane %v1240_v13, 4  ;;  %v8278_v60 = vld [vmem:[#allocation2 + $0xb4] sm:$0xf]  ;;  %v1257_v45 = vshll.u32 %v8273_v62, 16  ;;  %v1261_v38 = vshrl.u32 %v8273_v62, 16  ;;  %6686 = vmatprep.mubr.msk.bf16.mxu0 %vm1321_vm11, %v6135_v19 }
 0x130   : > { %v8285_v46 = vld [vmem:[#allocation2 + $0xbc] sm:$0x1]  ;;  %v1248_v14 = vshrl.u32 %v8278_v60, 16  ;;  %v1251_v42 = vshll.u32 %v8278_v60, 16  ;;  %v5967_v39 = vcombine.low %v7183_v32, %v8292_v55  ;;  %v3379_v50 = vld [vmem:[#allocation2 + $0x90] sm:$0xe] }
 0x131   : > { %v1246_v51 = vsel %vm7692_vm10, %v1241_v21, %v1245_v1  ;;  %v1259_v63 = vrot.slane %v1257_v45, 5  ;;  %v1263_v8 = vrot.slane %v1261_v38, 4  ;;  %v1267_v49 = vshll.u32 %v8285_v46, 16  ;;  %v2677_v25 = vld [vmem:[#allocation2 + $0x98] sm:$0x1] }
 0x132   : > { %v5949_v20 = vcombine.low %v1236_v7, %v1246_v51  ;;  %v1250_v58 = vrot.slane %v1248_v14, 4  ;;  %v1253_v29 = vrot.slane %v1251_v42, 5  ;;  %v3500_v30 = vrot.slane %v8283_v11, 5  ;;  %v3380_v1 = vld [vmem:[#allocation2 + $0x9c] sm:$0xe] }
 0x133   : > { %v1264_v3 = vor.u32 %v1263_v8, %v1259_v63  ;;  %v1269_v52 = vrot.slane %v1267_v49, 5  ;;  %v6121_v15 = vrot.slane %v3378_v18, 9  ;;  %v3504_v26 = vrot.slane %v2673_v31, 5  ;;  %v2679_v21 = vld [vmem:[#allocation2 + $0xa0] sm:$0xf] }
 0x134   : > { %6528 = vmatprep.mubr.msk.bf16.mxu1 %vm1321_vm11, %v5949_v20  ;;  %v1254_v48 = vor.u32 %v1253_v29, %v1250_v58  ;;  %v3507_v36 = vrot.slane %v2674_v37, 5  ;;  %v6122_v16 = vrot.slane %v3379_v50, 9  ;;  %v3511_v13 = vrot.slane %v2676_v10, 5  ;;  %v2680_v45 = vld [vmem:[#allocation2 + $0xa4] sm:$0x1] }
 0x135   : > { %v1265_v61 = vrot.slane %v1264_v3, 4  ;;  %v3501_v7 = vsel %vm7874_vm1, %v3499_v4, %v3500_v30  ;;  %v3505_v23 = vsel %vm7874_vm1, %v6121_v15, %v3504_v26  ;;  %v3506_v27 = vrot.slane %v3504_v26, 4  ;;  %v2682_v37 = vld [vmem:[#allocation2 + $0xac] sm:$0xf]  ;;  %v3381_v20 = vld [vmem:[#allocation2 + $0xa8] sm:$0xe] }
 0x136   : > { %v1255_v19 = vrot.slane %v1254_v48, 4  ;;  %v6136_v31 = vcombine.low %v3498_v35, %v3501_v7  ;;  %v3512_v14 = vsel %vm7874_vm1, %v6122_v16, %v3511_v13  ;;  %v3513_v42 = vrot.slane %v3511_v13, 4  ;;  %v285_v58 = vld [vmem:[%s7645_s11 + $0x78] sm:$0xf]  ;;  %v345_v4 = vld [vmem:[#allocation2 + $0xc0] sm:$0x1] }
 0x137   : > { %v1270_v38 = vsel %vm7692_vm10, %v1265_v61, %v1269_v52  ;;  %v3508_v8 = vsel %vm7874_vm1, %v3506_v27, %v3507_v36  ;;  %v3514_v49 = vrot.slane %v2677_v25, 5  ;;  %v6123_v18 = vrot.slane %v3380_v1, 9  ;;  %v2683_v3 = vld [vmem:[#allocation2 + $0xb0] sm:$0x1]  ;;  %v2685_v52 = vld [vmem:[#allocation2 + $0xb8] sm:$0xf] }
 0x138   : > { %v1260_v51 = vsel %vm7692_vm10, %v1255_v19, %v1259_v63  ;;  %6687 = vmatmul.mubr.msk.bf16.gmra.mrb[16].mxu0 %vm1321_vm11, %v6136_v31  ;;  %v6137_v32 = vcombine.low %v3505_v23, %v3508_v8  ;;  %v3518_v10 = vrot.slane %v2679_v21, 5  ;;  %v3521_v50 = vrot.slane %v2680_v45, 5  ;;  %v395_v48 = vld [vmem:[#allocation2 + $0xc8] sm:$0x1]  ;;  %v2686_v15 = vld [vmem:[#allocation2 + $0xbc] sm:$0x1] }
 0x139   : > { %v5950_v29 = vcombine.low %v1260_v51, %v1270_v38  ;;  %v3515_v35 = vsel %vm7874_vm1, %v3513_v42, %v3514_v49  ;;  %v3525_v63 = vrot.slane %v2682_v37, 5  ;;  %v3382_v26 = vld [vmem:[#allocation2 + $0xb4] sm:$0xe]  ;;  %v6124_v36 = vrot.slane %v3381_v20, 9  ;;  %v7185_v51 = vld [vmem:[#allocation2 + $0x10] sm:$0xf] }
 0x13a   : > { %6690 = vmatprep.mubr.msk.bf16.mxu0 %vm1321_vm11, %v6137_v32  ;;  %v3519_v25 = vsel %vm7874_vm1, %v6123_v18, %v3518_v10  ;;  %v3520_v30 = vrot.slane %v3518_v10, 4  ;;  %v6138_v61 = vcombine.low %v3512_v14, %v3515_v35  ;;  %v3528_v16 = vrot.slane %v2683_v3, 5  ;;  %v286_v1 = vld [vmem:[%s7645_s11 + $0x7c] sm:$0xf]  ;;  %v7186_v49 = vld [vmem:[#allocation2 + $0x18] sm:$0xf] }
 0x13b   : > { %6529 = vmatmul.mubr.msk.bf16.gmra.mrb[28].mxu1 %vm1321_vm11, %v5950_v29  ;;  %v3532_v13 = vrot.slane %v2685_v52, 5  ;;  %v346_v7 = vsel %vm7670_vm8, 0, %v345_v4  ;;  %v396_v23 = vsel %vm7677_vm9, 0, %v395_v48  ;;  %v656_v27 = vshrl.u32 %v285_v58, 16  ;;  %v8327_v18 = vld [vmem:[#allocation2 + $0x1c] sm:$0xf] }
 0x13c   : > { %6534 = vmatprep.mubr.msk.bf16.mxu1 %vm1321_vm11, %v5967_v39  ;;  %v3522_v19 = vsel %vm7874_vm1, %v3520_v30, %v3521_v50  ;;  %v3527_v45 = vrot.slane %v3525_v63, 4  ;;  %v6125_v38 = vrot.slane %v3382_v26, 9  ;;  %v3535_v31 = vrot.slane %v2686_v15, 5  ;;  %347 = vst [vmem:[#allocation2 + $0xc0] sm:$0x1] %v346_v7 }
 0x13d   : > { %v6139_v21 = vcombine.low %v3519_v25, %v3522_v19  ;;  %397 = vst [vmem:[#allocation2 + $0xc8] sm:$0x1] %v396_v23  ;;  %v3534_v39 = vrot.slane %v3532_v13, 4  ;;  %v658_v14 = vrot.slane %v656_v27, 7  ;;  %v659_v42 = vshll.u32 %v285_v58, 16 }
 0x13e   : > { %v664_v37 = vshrl.u32 %v286_v1, 16  ;;  %v1887_v8 = vrot.slane %v7185_v51, 5  ;;  %v5969_v20 = vcombine.low %v7186_v49, %v8327_v18  ;;  %v667_v9 = vshll.u32 %v286_v1, 16  ;;  %v7188_v29 = vld [vmem:[#allocation6 + $0x4] sm:$0x3] }
 0x13f   : > { %v2089_v32 = vsel %vm1370_vm2, %v7188_v29, 0  ;;  %v662_v10 = vrot.slane %v658_v14, 4  ;;  %v1828_v3 = vld [vmem:[#allocation2 + $0xc] sm:$0xe]  ;;  %v7189_v52 = vld [vmem:[#allocation2 + $0x14] sm:$0x1]  ;;  %v3526_v58 = vsel %vm7874_vm1, %v6124_v36, %v3525_v63  ;;  %v3529_v4 = vsel %vm7874_vm1, %v3527_v45, %v3528_v16 }
 0x140   : > { %6691 = vmatmul.mubr.msk.bf16.gmra.mrb[20].mxu0 %vm1321_vm11, %v6138_v61  ;;  %v666_v50 = vrot.slane %v664_v37, 7  ;;  %v1890_v35 = vrot.slane %v7189_v52, 5  ;;  %v661_v48 = vor.u32 %v659_v42, %v658_v14  ;;  %v8337_v25 = vld [vmem:[#allocation6 + $0x6] sm:$0x3]  ;;  %v3533_v30 = vsel %vm7874_vm1, %v6125_v38, %v3532_v13  ;;  %v7190_v7 = vld [vmem:[#allocation2 + $0x24] sm:$0xf] }
 0x141   : > { %6694 = vmatprep.mubr.msk.bf16.mxu0 %vm1321_vm11, %v6139_v21  ;;  %v3536_v15 = vsel %vm7874_vm1, %v3534_v39, %v3535_v31  ;;  %v6000_v63 = vrot.slane %v1828_v3, 9  ;;  %v1889_v36 = vrot.slane %v1887_v8, 4  ;;  %v6140_v16 = vcombine.low %v3526_v58, %v3529_v4  ;;  %v8357_v23 = vld [vmem:[#allocation2 + $0x28] sm:$0xf]  ;;  %v8368_v21 = vld [vmem:[#allocation2 + $0x34] sm:$0xf] }
 0x142   : > { %v669_v26 = vor.u32 %v667_v9, %v666_v50  ;;  %v671_v61 = vrot.slane %v666_v50, 4  ;;  %v5970_v44 = vcombine.low %v7190_v7, %v8357_v23  ;;  %v7193_v45 = vld [vmem:[#allocation2 + $0x30] sm:$0xf]  ;;  %v2916_v31 = vshll.u32 %v8266_v17, 16  ;;  %v8379_v49 = vld [vmem:[#allocation2 + $0x40] sm:$0xf] }
 0x143   : > { %6535 = vmatmul.mubr.msk.bf16.vlgmr.msra.gmra.mrb[0].mxu1 %vm1321_vm11, %v5968_v12  ;;  %v827_v43 = vld [vmem:[#allocation2 + $0xc0] sm:$0xf]  ;;  %v6141_v12 = vcombine.low %v3533_v30, %v3536_v15  ;;  %v8362_v27 = vsel %vm7874_vm1, %v6000_v63, %v1887_v8  ;;  %v8366_v56 = vsel %vm7874_vm1, %v1889_v36, %v1890_v35  ;;  %v5971_v6 = vcombine.low %v7193_v45, %v8368_v21  ;;  %v7194_v8 = vld [vmem:[#allocation2 + $0x3c] sm:$0xf]  ;;  %v7199_v63 = vld [vmem:[#allocation2 + $0x54] sm:$0xf] }
 0x144   : > { %6567 = vmatpush3.bf16.msra.mxu1 %v2089_v32  ;;  %6538 = vmatprep.mubr.msk.bf16.mxu1 %vm1321_vm11, %v5969_v20  ;;  %v670_v1 = vsel %vm7701_vm12, %v662_v10, %v669_v26  ;;  %v831_v53 = vld [vmem:[#allocation2 + $0xc8] sm:$0x1]  ;;  %v828_v13 = vsel %vm7715_vm13, %v661_v48, %v827_v43  ;;  %v2920_v14 = vshrl.u32 %v8266_v17, 16  ;;  %v5972_v20 = vcombine.low %v7194_v8, %v8379_v49  ;;  %v8382_v10 = vld [vmem:[#allocation2 + $0x4c] sm:$0xf]  ;;  %v7151_v4 = vld [vmem:[#allocation2 + $0x18] sm:$0xff]  }
 0x145   : > { %7065 = vmatprep.subr.msk.bf16.mxu1 %vm1370_vm2, %v8337_v25  ;;  %830 = vst.msk [vmem:[#allocation2 + $0xc4] sm:$0xf] %vm287_vm0, %v670_v1  ;;  %v832_v19 = vsel %vm7670_vm8, %v671_v61, %v831_v53  ;;  %829 = vst [vmem:[#allocation2 + $0xc0] sm:$0xf] %v828_v13  ;;  %v7196_v32 = vld [vmem:[#allocation2 + $0x48] sm:$0xf] }
 0x146   : > { %833 = vst [vmem:[#allocation2 + $0xc8] sm:$0x1] %v832_v19  ;;  %v5973_v50 = vcombine.low %v7196_v32, %v8382_v10  ;;  %v8387_v17 = vrot.slane %v2916_v31, 5  ;;  %v2922_v35 = vrot.slane %v2920_v14, 4  ;;  %v2926_v30 = vshll.u32 %v8283_v11, 16  ;;  %v7152_v1 = vld [vmem:[#allocation2 + $0x24] sm:$0xff]  }
 0x147   : > { %v7198_v26 = vld [vmem:[#allocation2 + $0x8] sm:$0x1]  ;;  %v8397_v36 = vld [vmem:[#allocation2 + $0x58] sm:$0xf]  ;;  %v1827_v43 = vld [vmem:[#allocation2] sm:$0xe]  ;;  %v5978_v32 = vcombine.low %v8143_v54, %v8149_v24 }
 0x148   : > { %6695 = vmatmul.mubr.msk.bf16.gmra.mrb[24].mxu0 %vm1321_vm11, %v6140_v16  ;;  %9669 = vst [vmem:[#allocation17_spill] sm:$0xff] %v8387_v17  ;;  %v2923_v15 = vor.u32 %v2922_v35, %v8387_v17  ;;  %v1883_v61 = vrot.slane %v7198_v26, 5  ;;  %v5974_v16 = vcombine.low %v7199_v63, %v8397_v36  ;;  %v7201_v53 = vld [vmem:[#allocation2 + $0x60] sm:$0xf]  ;;  %v7153_v13 = vld [vmem:[#allocation2 + $0x30] sm:$0xff]   ;;  %v1880_v19 = vrot.slane %v8292_v55, 5 }
 0x149   : > { %6698 = vmatprep.mubr.msk.bf16.mxu0 %vm1321_vm11, %v6141_v12  ;;  %v8400_v12 = vld [vmem:[#allocation2 + $0x64] sm:$0xf]  ;;  %v1829_v7 = vld [vmem:[#allocation2 + $0x18] sm:$0xe]  ;;  %v1901_v31 = vrot.slane %v8357_v23, 5  ;;  %v1908_v8 = vrot.slane %v8368_v21, 5 }
 0x14a   : > { %v5975_v11 = vcombine.low %v7201_v53, %v8400_v12  ;;  %v1830_v45 = vld [vmem:[#allocation2 + $0x24] sm:$0xe]  ;;  %v8408_v14 = vrot.slane %v2923_v15, 4  ;;  %v6001_v23 = vrot.slane %v1829_v7, 9  ;;  %v1915_v21 = vrot.slane %v8379_v49, 5 }
 0x14b   : > { %6539 = vmatmul.mubr.msk.bf16.gmra.mrb[4].mxu1 %vm1321_vm11, %v5970_v44  ;;  %v1894_v44 = vrot.slane %v8327_v18, 5  ;;  %v7205_v55 = vld [vmem:[#allocation6 + $0xe] sm:$0x3]  ;;  %v1910_v26 = vrot.slane %v1908_v8, 4  ;;  %v7208_v63 = vld [vmem:[#allocation2 + $0x38] sm:$0x1] }
 0x14c   : > { %6542 = vmatprep.mubr.msk.bf16.mxu1 %vm1321_vm11, %v5971_v6  ;;  %v2688_v39 = vld [vmem:[#allocation2 + $0xc4] sm:$0xf]  ;;  %v3383_v37 = vld [vmem:[#allocation2 + $0xc0] sm:$0xe]  ;;  %v8405_v6 = vrot.slane %v2926_v30, 5  ;;  %9671 = vst [vmem:[#allocation19_spill] sm:$0xff] %v8408_v14 }
 0x14d   : > { %v2689_v42 = vld [vmem:[#allocation2 + $0xc8] sm:$0x1]  ;;  %v3539_v51 = vrot.slane %v2688_v39, 5  ;;  %v6126_v9 = vrot.slane %v3383_v37, 9  ;;  %v1831_v39 = vld [vmem:[#allocation2 + $0x30] sm:$0xe]  ;;  %v8438_v53 = vsel %vm7874_vm1, %v6001_v23, %v1894_v44 }
 0x14e   : > { %v3542_v29 = vrot.slane %v2689_v42, 5  ;;  %9670 = vst [vmem:[#allocation18_spill] sm:$0xff] %v8405_v6  ;;  %v7203_v42 = vld [vmem:[#allocation2 + $0x6c] sm:$0xf]  ;;  %v8410_v37 = vld [vmem:[#allocation2 + $0x70] sm:$0xf] }
 0x14f   : > { %v3541_v3 = vrot.slane %v3539_v51, 4  ;;  %v3540_v52 = vsel %vm7874_vm1, %v6126_v9, %v3539_v51  ;;  %v5976_v51 = vcombine.low %v7203_v42, %v8410_v37  ;;  %v4728_v18 = vsel %vm1370_vm2, %v7205_v55, 0  ;;  %v1834_v55 = vld [vmem:[#allocation2 + $0x54] sm:$0xe]  ;;  %v1835_v23 = vld [vmem:[#allocation2 + $0x60] sm:$0xe] }
 0x150   : > { %v5999_v9 = vrot.slane %v1827_v43, 9  ;;  %v6003_v15 = vrot.slane %v1831_v39, 9  ;;  %v7209_v39 = vld [vmem:[#allocation2 + $0x44] sm:$0x1]  ;;  %v4206_v17 = vld [vmem:[#allocation2 + $0x3c] sm:$0xf] }
 0x151   : > { %v3543_v58 = vsel %vm7874_vm1, %v3541_v3, %v3542_v29  ;;  %v8418_v29 = vld [vmem:[#allocation6 + $0x10] sm:$0x3]  ;;  %v1896_v3 = vrot.slane %v1894_v44, 4  ;;  %v1918_v42 = vrot.slane %v7209_v39, 5  ;;  %v1836_v39 = vld [vmem:[#allocation2 + $0x6c] sm:$0xe] }
 0x152   : > { %v6142_v48 = vcombine.low %v3540_v52, %v3543_v58  ;;  %v7206_v52 = vld [vmem:[#allocation2 + $0x20] sm:$0x1]  ;;  %v6002_v58 = vrot.slane %v1830_v45, 9  ;;  %v8434_v43 = vsel %vm7874_vm1, %v5999_v9, %v1880_v19  ;;  %v1917_v45 = vrot.slane %v1915_v21, 4  ;;  %v8655_v6 = vld [vmem:[#allocation2 + $0x50] sm:$0x1] }
 0x153   : > { %6543 = vmatmul.mubr.msk.bf16.gmra.mrb[8].mxu1 %vm1321_vm11, %v5972_v20  ;;  %v5977_v20 = vcombine.low %v8133_v57, %v8135_v59  ;;  %v1897_v35 = vrot.slane %v7206_v52, 5  ;;  %v7207_v57 = vld [vmem:[#allocation2 + $0x2c] sm:$0x1]  ;;  %v7157_v30 = vld [vmem:[#allocation2 + $0x60] sm:$0xff]  }
 0x154   : > { %6546 = vmatprep.mubr.msk.bf16.mxu1 %vm1321_vm11, %v5973_v50  ;;  %6699 = vmatmul.mubr.msk.bf16.gmra.mrb[28].mxu0 %vm1321_vm11, %v6142_v48  ;;  %v1882_v50 = vrot.slane %v1880_v19, 4  ;;  %v1904_v59 = vrot.slane %v7207_v57, 5  ;;  %v1832_v48 = vld [vmem:[#allocation2 + $0x3c] sm:$0xe]  ;;  %v8452_v44 = vsel %vm7874_vm1, %v6002_v58, %v1901_v31  ;;  %v7155_v52 = vld [vmem:[#allocation2 + $0x48] sm:$0xff]   ;;  %v7156_v57 = vld [vmem:[#allocation2 + $0x54] sm:$0xff]  }
 0x155   : > { %6704 = vmatprep.mubr.msk.bf16.mxu0 %vm1321_vm11, %v7151_v4  ;;  %v1903_v4 = vrot.slane %v1901_v31, 4  ;;  %v6004_v7 = vrot.slane %v1832_v48, 9  ;;  %v8448_v19 = vsel %vm7874_vm1, %v1896_v3, %v1897_v35  ;;  %v8463_v3 = vsel %vm1370_vm2, %v8337_v25, 0 }
 0x156   : > { %v8467_v31 = vsel %vm7874_vm1, %v6003_v15, %v1908_v8  ;;  %v4198_v15 = vld [vmem:[#allocation2 + $0x1c] sm:$0xf] }
 0x157   : > { %v8456_v9 = vsel %vm7874_vm1, %v1903_v4, %v1904_v59  ;;  %v1929_v4 = vrot.slane %v8397_v36, 5  ;;  %v1936_v59 = vrot.slane %v8400_v12, 5  ;;  %v8485_v48 = vsel %vm7874_vm1, %v6004_v7, %v1915_v21 }
 0x158   : > { %v6007_v7 = vrot.slane %v1835_v23, 9  ;;  %v4259_v38 = vshrl.u32 %v4198_v15, 16 }
 0x159   : > { %v1931_v25 = vrot.slane %v1929_v4, 4 }
 0x15a   : > { %v4261_v24 = vrot.slane %v4259_v38, 4 }
 0x15b   : > { %6547 = vmatmul.mubr.msk.bf16.gmra.mrb[12].mxu1 %vm1321_vm11, %v5974_v16  ;;  %v1911_v16 = vrot.slane %v7208_v63, 5  ;;  %v6006_v63 = vrot.slane %v1834_v55, 9  ;;  %v4255_v55 = vshll.u32 %v4198_v15, 16 }
 0x15c   : > { %6550 = vmatprep.mubr.msk.bf16.mxu1 %vm1321_vm11, %v5975_v11  ;;  %6705 = vmatmul.mubr.msk.bf16.vlgmr.msra.gmra.mrb[0].mxu0 %vm1321_vm11, %v7152_v1  ;;  %v1833_v11 = vld [vmem:[#allocation2 + $0x48] sm:$0xe]  ;;  %v1943_v1 = vrot.slane %v8410_v37, 5 }
 0x15d   : > { %6737 = vmatpush3.bf16.msra.mxu0 %v4728_v18  ;;  %6708 = vmatprep.mubr.msk.bf16.mxu0 %vm1321_vm11, %v7153_v13  ;;  %v8444_v13 = vsel %vm7874_vm1, %v1882_v50, %v1883_v61  ;;  %v7154_v18 = vld [vmem:[#allocation2 + $0x3c] sm:$0xff]   ;;  %v1922_v61 = vrot.slane %v8382_v10, 5  ;;  %v4197_v50 = vld [vmem:[#allocation2 + $0x18] sm:$0xf]  ;;  %v8471_v35 = vsel %vm7874_vm1, %v1910_v26, %v1911_v16  ;;  %v6005_v58 = vrot.slane %v1833_v11, 9 }
 0x15e   : > { %7071 = vmatprep.subr.msk.bf16.mxu0 %vm1370_vm2, %v8418_v29  ;;  %v4200_v16 = vld [vmem:[#allocation2 + $0x24] sm:$0xf]  ;;  %v7211_v11 = vld [vmem:[#allocation2 + $0x5c] sm:$0x1]  ;;  %v4246_v8 = vshrl.u32 %v4197_v50, 16  ;;  %v8528_v54 = vrot.slane %v4255_v55, 5 }
 0x15f   : > { %v1924_v12 = vrot.slane %v1922_v61, 4  ;;  %v1932_v21 = vrot.slane %v7211_v11, 5  ;;  %v8499_v36 = vsel %vm7874_vm1, %v6005_v58, %v1922_v61  ;;  %v4270_v10 = vshrl.u32 %v4200_v16, 16  ;;  %v7212_v11 = vld [vmem:[#allocation2 + $0x68] sm:$0x1] }
 0x160   : > { %v1939_v23 = vrot.slane %v7212_v11, 5  ;;  %v8508_v61 = vsel %vm7874_vm1, %v6006_v63, %v1929_v4  ;;  %v4248_v58 = vrot.slane %v4246_v8, 4  ;;  %v8522_v4 = vld [vmem:[#allocation2 + $0x20] sm:$0x1]  ;;  %v4203_v8 = vld [vmem:[#allocation2 + $0x30] sm:$0xf]  ;;  %v9673_v63 = vcombine.low %v8164_v2, %v8166_v33 }
 0x161   : > { %v8516_v37 = vsel %vm7874_vm1, %v1931_v25, %v1932_v21  ;;  %9672 = vst [vmem:[#allocation20_spill] sm:$0xff] %v8522_v4  ;;  %v8530_v21 = vld [vmem:[#allocation2 + $0x34] sm:$0xf]  ;;  %v1837_v55 = vld [vmem:[#allocation2 + $0x78] sm:$0xe] }
 0x162   : > { %9674 = vst [vmem:[#allocation21_spill] sm:$0xff] %v8530_v21  ;;  %v4303_v11 = vshll.u32 %v8530_v21, 16 }
 0x163   : > { %6551 = vmatmul.mubr.msk.bf16.gmra.mrb[16].mxu1 %vm1321_vm11, %v5976_v51  ;;  %v8489_v51 = vsel %vm7874_vm1, %v1917_v45, %v1918_v42  ;;  %v4249_v45 = vshll.u32 %v4197_v50, 16  ;;  %v4201_v42 = vld [vmem:[#allocation2 + $0x28] sm:$0xf] }
 0x164   : > { %6554 = vmatprep.mubr.msk.bf16.mxu1 %vm1321_vm11, %v5977_v20  ;;  %6709 = vmatmul.mubr.msk.bf16.gmra.mrb[4].mxu0 %vm1321_vm11, %v7154_v18  ;;  %v7210_v20 = vld [vmem:[#allocation2 + $0x50] sm:$0x1]  ;;  %v4279_v50 = vshll.u32 %v4201_v42, 16  ;;  %v4283_v49 = vshrl.u32 %v4201_v42, 16 }
 0x165   : > { %v1925_v26 = vrot.slane %v7210_v20, 5  ;;  %6712 = vmatprep.mubr.msk.bf16.mxu0 %vm1321_vm11, %v7155_v52  ;;  %v1938_v20 = vrot.slane %v1936_v59, 4  ;;  %v4273_v52 = vshll.u32 %v4200_v16, 16  ;;  %v4251_v15 = vrot.slane %v4249_v45, 5 }
 0x166   : > { %v8520_v16 = vsel %vm7874_vm1, %v6007_v7, %v1936_v59  ;;  %v1945_v7 = vrot.slane %v1943_v1, 4  ;;  %v4285_v45 = vrot.slane %v4283_v49, 4  ;;  %v4307_v49 = vshrl.u32 %v8530_v21, 16 }
 0x167   : > { %v8504_v18 = vsel %vm7874_vm1, %v1924_v12, %v1925_v26  ;;  %v6008_v12 = vrot.slane %v1836_v39, 9  ;;  %v7213_v26 = vld [vmem:[#allocation2 + $0x74] sm:$0x1]  ;;  %v4275_v25 = vrot.slane %v4273_v52, 5  ;;  %v8535_v59 = vsel %vm7874_vm1, %v1938_v20, %v1939_v23 }
 0x168   : > { %v1946_v42 = vrot.slane %v7213_v26, 5  ;;  %v8537_v39 = vrot.slane %v4279_v50, 5  ;;  %v4252_v38 = vor.u32 %v4251_v15, %v4248_v58  ;;  %v4294_v20 = vshrl.u32 %v4203_v8, 16  ;;  %v7214_v26 = vld [vmem:[#allocation2 + $0x7c] sm:$0xf]  ;;  %v7158_v58 = vld [vmem:[#allocation2 + $0x6c] sm:$0xff]  }
 0x169   : > { %v4297_v52 = vshll.u32 %v4203_v8, 16  ;;  %v4262_v23 = vor.u32 %v4261_v24, %v8528_v54  ;;  %v7159_v15 = vld [vmem:[#allocation2 + $0x78] sm:$0xff]   ;;  %v8554_v33 = vsel %vm7874_vm1, %v6008_v12, %v1943_v1  ;;  %v9677_v1 = vcombine.low %v8195_v40, %v8211_v22 }
 0x16a   : > { %v8558_v8 = vsel %vm7874_vm1, %v1945_v7, %v1946_v42  ;;  %v4286_v2 = vor.u32 %v4285_v45, %v8537_v39  ;;  %v4296_v12 = vrot.slane %v4294_v20, 4  ;;  %v8568_v7 = vrot.slane %v4303_v11, 5 }
 0x16b   : > { %6555 = vmatmul.mubr.msk.bf16.gmra.mrb[20].mxu1 %vm1321_vm11, %v5978_v32  ;;  %v4272_v32 = vrot.slane %v4270_v10, 4  ;;  %v4265_v10 = vshll.u32 %v8522_v4, 16  ;;  %v4253_v4 = vrot.slane %v4252_v38, 4  ;;  %v4299_v42 = vrot.slane %v4297_v52, 5  ;;  %v7217_v52 = vld [vmem:[#allocation2 + $0x8c] sm:$0x1] }
 0x16c   : > { %6558 = vmatprep.mubr.msk.bf16.mxu1 %vm1321_vm11, %v9673_v63  ;;  %6713 = vmatmul.mubr.msk.bf16.gmra.mrb[8].mxu0 %vm1321_vm11, %v7156_v57  ;;  %v8545_v57 = vld [vmem:[#allocation2 + $0x2c] sm:$0x1]  ;;  %v1950_v63 = vrot.slane %v7214_v26, 5  ;;  %v4309_v45 = vrot.slane %v4307_v49, 4  ;;  %v9678_v38 = vcombine.low %v8241_v47, %v8254_v41  ;;  %v4287_v40 = vrot.slane %v4286_v2, 4 }
 0x16d   : > { %6716 = vmatprep.mubr.msk.bf16.mxu0 %vm1321_vm11, %v7157_v30  ;;  %9675 = vst [vmem:[#allocation22_spill] sm:$0xff] %v8545_v57  ;;  %v4276_v50 = vor.u32 %v4275_v25, %v4272_v32  ;;  %v4289_v21 = vshll.u32 %v8545_v57, 16  ;;  %v1838_v30 = vld [vmem:[#allocation2 + $0x84] sm:$0xe]  ;;  %v4267_v24 = vrot.slane %v4265_v10, 5  ;;  %v6009_v32 = vrot.slane %v1837_v55, 9 }
 0x16e   : > { %v7215_v25 = vld [vmem:[#allocation2 + $0x88] sm:$0xf]  ;;  %v4263_v10 = vrot.slane %v4262_v23, 4  ;;  %v7216_v57 = vld [vmem:[#allocation2 + $0x80] sm:$0x1]  ;;  %v6010_v20 = vrot.slane %v1838_v30, 9  ;;  %v4258_v2 = vsel %vm7692_vm10, %v4253_v4, %v8528_v54 }
 0x16f   : > { %v1957_v26 = vrot.slane %v7215_v25, 5  ;;  %v4277_v55 = vrot.slane %v4276_v50, 4  ;;  %v1952_v25 = vrot.slane %v1950_v63, 4  ;;  %v1953_v14 = vrot.slane %v7216_v57, 5  ;;  %v8577_v47 = vld [vmem:[#allocation2 + $0x40] sm:$0xf] }
 0x170   : > { %v4291_v22 = vrot.slane %v4289_v21, 5  ;;  %v1960_v11 = vrot.slane %v7217_v52, 5  ;;  %9679 = vst [vmem:[#allocation24_spill] sm:$0xff] %v8577_v47  ;;  %v4321_v23 = vshll.u32 %v4206_v17, 16  ;;  %v4300_v21 = vor.u32 %v4299_v42, %v4296_v12  ;;  %v4209_v52 = vld [vmem:[#allocation2 + $0x48] sm:$0xf] }
 0x171   : > { %v1959_v49 = vrot.slane %v1957_v26, 4  ;;  %v4310_v57 = vor.u32 %v4309_v45, %v8568_v7  ;;  %v4268_v30 = vsel %vm7692_vm10, %v4263_v10, %v4267_v24  ;;  %v7160_v4 = vld [vmem:[#allocation2 + $0x84] sm:$0xff]   ;;  %v8602_v24 = vsel %vm7874_vm1, %v6010_v20, %v1957_v26 }
 0x172   : > { %v4292_v54 = vsel %vm7692_vm10, %v4287_v40, %v4291_v22  ;;  %v8604_v12 = vld [vmem:[#allocation2 + $0x44] sm:$0x1]  ;;  %v4323_v10 = vrot.slane %v4321_v23, 5  ;;  %v9681_v26 = vcombine.low %v8278_v60, %v8273_v62  ;;  %v1839_v22 = vld [vmem:[#allocation2 + $0x90] sm:$0xe]  ;;  %v4342_v20 = vshrl.u32 %v4209_v52, 16 }
 0x173   : > { %6559 = vmatmul.mubr.msk.bf16.gmra.mrb[24].mxu1 %vm1321_vm11, %v9677_v1  ;;  %v4313_v1 = vshll.u32 %v8562_v5, 16  ;;  %9680 = vst [vmem:[#allocation25_spill] sm:$0xff] %v8604_v12  ;;  %v4311_v40 = vrot.slane %v4310_v57, 4  ;;  %v4345_v50 = vshll.u32 %v4209_v52, 16  ;;  %v4337_v57 = vshll.u32 %v8604_v12, 16 }
 0x174   : > { %6562 = vmatprep.mubr.msk.bf16.mxu1 %vm1321_vm11, %v9678_v38  ;;  %6717 = vmatmul.mubr.msk.bf16.gmra.mrb[12].mxu0 %vm1321_vm11, %v7158_v58  ;;  %v4318_v38 = vshrl.u32 %v4206_v17, 16  ;;  %v4282_v58 = vsel %vm7692_vm10, %v4277_v55, %v8537_v39  ;;  %v8592_v17 = vsel %vm7874_vm1, %v6009_v32, %v1950_v63  ;;  %v4327_v39 = vshll.u32 %v8577_v47, 16  ;;  %v7161_v32 = vld [vmem:[#allocation2 + $0x90] sm:$0xff]   ;;  %v8612_v55 = vld [vmem:[#allocation2 + $0x4c] sm:$0xf] }
 0x175   : > { %6720 = vmatprep.mubr.msk.bf16.mxu0 %vm1321_vm11, %v7159_v15  ;;  %v8596_v15 = vsel %vm7874_vm1, %v1952_v25, %v1953_v14  ;;  %v4331_v63 = vshrl.u32 %v8577_v47, 16  ;;  %v8610_v14 = vsel %vm7874_vm1, %v1959_v49, %v1960_v11  ;;  %v4315_v42 = vrot.slane %v4313_v1, 5  ;;  %v7218_v60 = vld [vmem:[#allocation2 + $0x94] sm:$0xf] }
 0x176   : > { %v4320_v45 = vrot.slane %v4318_v38, 4  ;;  %v4301_v25 = vrot.slane %v4300_v21, 4  ;;  %v9682_v47 = vcombine.low %v8434_v43, %v8444_v13  ;;  %v8622_v11 = vcombine.low %v4258_v2, %v4268_v30  ;;  %v4212_v38 = vld [vmem:[#allocation2 + $0x54] sm:$0xf] }
 0x177   : > { %v8624_v49 = vcombine.low %v4282_v58, %v4292_v54  ;;  %v8628_v1 = vsel %vm1370_vm2, %v8418_v29, 0  ;;  %v8633_v23 = vrot.slane %v4327_v39, 5  ;;  %v4333_v21 = vrot.slane %v4331_v63, 4 }
 0x178   : > { %v4351_v43 = vshll.u32 %v8612_v55, 16  ;;  %v4355_v13 = vshrl.u32 %v8612_v55, 16  ;;  %v4324_v2 = vor.u32 %v4323_v10, %v4320_v45  ;;  %v6011_v30 = vrot.slane %v1839_v22, 9  ;;  %v7162_v45 = vld [vmem:[#allocation2 + $0x9c] sm:$0xff]   ;;  %v7163_v10 = vld [vmem:[#allocation2 + $0xa8] sm:$0xff]  }
 0x179   : > { %v4306_v58 = vsel %vm7692_vm10, %v4301_v25, %v8568_v7  ;;  %v4316_v52 = vsel %vm7692_vm10, %v4311_v40, %v4315_v42  ;;  %v4344_v54 = vrot.slane %v4342_v20, 4  ;;  %v4347_v39 = vrot.slane %v4345_v50, 5  ;;  %v7219_v42 = vld [vmem:[#allocation2 + $0x98] sm:$0x1]  ;;  %v7220_v20 = vld [vmem:[#allocation2 + $0xa0] sm:$0xf] }
 0x17a   : > { %v4366_v63 = vshrl.u32 %v4212_v38, 16  ;;  %v4334_v22 = vor.u32 %v4333_v21, %v8633_v23  ;;  %v1964_v12 = vrot.slane %v7218_v60, 5  ;;  %v8651_v5 = vrot.slane %v4351_v43, 5 }
 0x17b   : > { %6563 = vmatmul.mubr.msk.bf16.gmra.mrb[28].mxu1 %vm1321_vm11, %v9681_v26  ;;  %v4369_v26 = vshll.u32 %v4212_v38, 16  ;;  %v4357_v7 = vrot.slane %v4355_v13, 4  ;;  %v8653_v25 = vrot.slane %v4337_v57, 5  ;;  %v1967_v40 = vrot.slane %v7219_v42, 5  ;;  %v8669_v57 = vld [vmem:[#allocation2 + $0x5c] sm:$0x1] }
 0x17c   : > { %6568 = vmatprep.mubr.msk.bf16.mxu1 %vm1321_vm11, %v9682_v47  ;;  %6721 = vmatmul.mubr.msk.bf16.gmra.mrb[16].mxu0 %vm1321_vm11, %v7160_v4  ;;  %v8637_v47 = vld [vmem:[#allocation2 + $0x58] sm:$0xf]  ;;  %v1840_v4 = vld [vmem:[#allocation2 + $0x9c] sm:$0xe]  ;;  %v1971_v38 = vrot.slane %v7220_v20, 5  ;;  %v8661_v21 = vcombine.low %v4306_v58, %v4316_v52  ;;  %v8663_v60 = vrot.slane %v4324_v2, 4  ;;  %v8667_v43 = vsel %vm7874_vm1, %v6011_v30, %v1964_v12 }
 0x17d   : > { %9683 = vst [vmem:[#allocation26_spill] sm:$0xff] %v8637_v47  ;;  %6724 = vmatprep.mubr.msk.bf16.mxu0 %vm1321_vm11, %v7161_v32  ;;  %v4375_v32 = vshll.u32 %v8637_v47, 16  ;;  %v4379_v29 = vshrl.u32 %v8637_v47, 16  ;;  %v6012_v50 = vrot.slane %v1840_v4, 9  ;;  %v9684_v47 = vcombine.low %v8362_v27, %v8366_v56  ;;  %9685 = vst [vmem:[#allocation27_spill] sm:$0xff] %v8669_v57 }
 0x17e   : > { %v4348_v13 = vor.u32 %v4347_v39, %v4344_v54  ;;  %v9686_v4 = vcombine.low %v8438_v53, %v8448_v19  ;;  %v4368_v27 = vrot.slane %v4366_v63, 4  ;;  %v4371_v56 = vrot.slane %v4369_v26, 5  ;;  %v4215_v58 = vld [vmem:[#allocation2 + $0x60] sm:$0xf] }
 0x17f   : > { %v4381_v2 = vrot.slane %v4379_v29, 4  ;;  %v4335_v30 = vrot.slane %v4334_v22, 4  ;;  %v1966_v52 = vrot.slane %v1964_v12, 4  ;;  %v4358_v54 = vor.u32 %v4357_v7, %v8651_v5  ;;  %v7221_v42 = vld [vmem:[#allocation6 + $0x8] sm:$0x3]  ;;  %v7164_v7 = vld [vmem:[#allocation2 + $0xb4] sm:$0xff]  }
 0x180   : > { %v4361_v39 = vshll.u32 %v8655_v6, 16  ;;  %v8685_v53 = vsel %vm7874_vm1, %v6012_v50, %v1971_v38  ;;  %v1973_v19 = vrot.slane %v1971_v38, 4  ;;  %v7222_v29 = vld [vmem:[#allocation2 + $0xa4] sm:$0x1]  ;;  %v1978_v26 = vrot.slane %v8254_v41, 5 }
 0x181   : > { %9687 = vst [vmem:[#allocation28_spill] sm:$0xff] %v8685_v53  ;;  %v1974_v63 = vrot.slane %v7222_v29, 5  ;;  %v4349_v12 = vrot.slane %v4348_v13, 4  ;;  %v4393_v22 = vshll.u32 %v4215_v58, 16  ;;  %v4372_v20 = vor.u32 %v4371_v56, %v4368_v27  ;;  %v8701_v29 = vld [vmem:[#allocation2 + $0x64] sm:$0xf] }
 0x182   : > { %v4340_v38 = vsel %vm7692_vm10, %v4335_v30, %v8653_v25  ;;  %v8699_v41 = vsel %vm7874_vm1, %v1966_v52, %v1967_v40  ;;  %v4359_v13 = vrot.slane %v4358_v54, 4  ;;  %v1981_v27 = vrot.slane %v8256_v28, 5  ;;  %v8709_v25 = vld [vmem:[#allocation2 + $0x68] sm:$0x1] }
 0x183   : > { %6569 = vmatmul.mubr.msk.bf16.vlgmr.msra.gmra.mrb[0].mxu1 %vm1321_vm11, %v9684_v47  ;;  %v8676_v47 = vrot.slane %v4375_v32, 5  ;;  %v4385_v32 = vshll.u32 %v8669_v57, 16  ;;  %v7165_v57 = vld [vmem:[#allocation2 + $0xc0] sm:$0xff]   ;;  %v1985_v56 = vrot.slane %v8273_v62, 5  ;;  %v9689_v40 = vcombine.low %v8452_v44, %v8456_v9 }
 0x184   : > { %6601 = vmatpush3.bf16.msra.mxu1 %v8463_v3  ;;  %6572 = vmatprep.mubr.msk.bf16.mxu1 %vm1321_vm11, %v9686_v4  ;;  %v1841_v3 = vld [vmem:[#allocation2 + $0xa8] sm:$0xe]  ;;  %v4395_v54 = vrot.slane %v4393_v22, 5  ;;  %v9690_v28 = vcombine.low %v8467_v31, %v8471_v35  ;;  %v8724_v62 = vrot.slane %v4372_v20, 4  ;;  %v1988_v31 = vrot.slane %v8285_v46, 5 }
 0x185   : > { %6725 = vmatmul.mubr.msk.bf16.gmra.mrb[20].mxu0 %vm1321_vm11, %v7162_v45  ;;  %7067 = vmatprep.subr.msk.bf16.mxu1 %vm1370_vm2, %v7221_v42  ;;  %v4390_v45 = vshrl.u32 %v4215_v58, 16  ;;  %v4382_v50 = vor.u32 %v4381_v2, %v8676_v47  ;;  %v6013_v4 = vrot.slane %v1841_v3, 9  ;;  %v4363_v58 = vrot.slane %v4361_v39, 5  ;;  %v1842_v42 = vld [vmem:[#allocation2 + $0xb4] sm:$0xe] }
 0x186   : > { %6728 = vmatprep.mubr.msk.bf16.mxu0 %vm1321_vm11, %v7163_v10  ;;  %v4330_v10 = vsel %vm7692_vm10, %v8663_v60, %v8633_v23  ;;  %v8705_v23 = vsel %vm7874_vm1, %v1973_v19, %v1974_v63  ;;  %v1980_v60 = vrot.slane %v1978_v26, 4  ;;  %v4354_v2 = vsel %vm7692_vm10, %v4349_v12, %v8651_v5  ;;  %v4218_v39 = vld [vmem:[#allocation2 + $0x6c] sm:$0xf]  ;;  %v8732_v5 = vld [vmem:[#allocation2 + $0x70] sm:$0xf] }
 0x187   : > { %9688 = vst [vmem:[#allocation29_spill] sm:$0xff] %v8705_v23  ;;  %v8718_v30 = vrot.slane %v4385_v32, 5  ;;  %v4392_v52 = vrot.slane %v4390_v45, 4  ;;  %v8726_v3 = vrot.slane %v4382_v50, 4  ;;  %v8730_v44 = vsel %vm7874_vm1, %v6013_v4, %v1978_v26  ;;  %9692 = vst [vmem:[#allocation31_spill] sm:$0xff] %v8732_v5  ;;  %v7166_v50 = vld [vmem:[#allocation2 + $0xcc] sm:$0xff]  }
 0x188   : > { %9691 = vst [vmem:[#allocation30_spill] sm:$0xff] %v8730_v44  ;;  %v6014_v9 = vrot.slane %v1842_v42, 9  ;;  %v4364_v19 = vsel %vm7692_vm10, %v4359_v13, %v4363_v58  ;;  %v4399_v35 = vshll.u32 %v8701_v29, 16  ;;  %v4403_v63 = vshrl.u32 %v8701_v29, 16  ;;  %v8759_v42 = vld [vmem:[#allocation2 + $0x74] sm:$0x1] }
 0x189   : > { %v8743_v26 = vsel %vm7874_vm1, %v1980_v60, %v1981_v27  ;;  %v1987_v12 = vrot.slane %v1985_v56, 4  ;;  %v4409_v32 = vshll.u32 %v8709_v25, 16  ;;  %v4414_v45 = vshrl.u32 %v4218_v39, 16  ;;  %9694 = vst [vmem:[#allocation33_spill] sm:$0xff] %v8759_v42 }
 0x18a   : > { %9693 = vst [vmem:[#allocation32_spill] sm:$0xff] %v8743_v26  ;;  %v4417_v20 = vshll.u32 %v4218_v39, 16  ;;  %v4423_v46 = vshll.u32 %v8732_v5, 16  ;;  %v8749_v4 = vcombine.low %v4330_v10, %v4340_v38  ;;  %v8753_v13 = vcombine.low %v4354_v2, %v4364_v19  ;;  %v8769_v2 = vld [vmem:[#allocation2 + $0x7c] sm:$0xf] }
 0x18b   : > { %6573 = vmatmul.mubr.msk.bf16.gmra.mrb[4].mxu1 %vm1321_vm11, %v9689_v40  ;;  %v8767_v38 = vrot.slane %v4399_v35, 5  ;;  %v4405_v27 = vrot.slane %v4403_v63, 4  ;;  %v4221_v40 = vld [vmem:[#allocation2 + $0x78] sm:$0xf]  ;;  %9695 = vst [vmem:[#allocation34_spill] sm:$0xff] %v8769_v2  ;;  %v8779_v39 = vrot.slane %v4409_v32, 5  ;;  %v9697_v35 = vcombine.low %v8485_v48, %v8489_v51 }
 0x18c   : > { %6576 = vmatprep.mubr.msk.bf16.mxu1 %vm1321_vm11, %v9690_v28  ;;  %v4416_v28 = vrot.slane %v4414_v45, 4  ;;  %v4224_v19 = vld [vmem:[#allocation2 + $0x84] sm:$0xf]  ;;  %v4419_v10 = vrot.slane %v4417_v20, 5  ;;  %v4438_v32 = vshrl.u32 %v4221_v40, 16  ;;  %v4441_v45 = vshll.u32 %v4221_v40, 16 }
 0x18d   : > { %6729 = vmatmul.mubr.msk.bf16.gmra.mrb[24].mxu0 %vm1321_vm11, %v7164_v7  ;;  %v4396_v7 = vor.u32 %v4395_v54, %v4392_v52  ;;  %v8773_v52 = vsel %vm7874_vm1, %v6014_v9, %v1985_v56  ;;  %v8777_v54 = vsel %vm7874_vm1, %v1987_v12, %v1988_v31  ;;  %v8789_v56 = vrot.slane %v4423_v46, 5  ;;  %v4227_v31 = vld [vmem:[#allocation2 + $0x90] sm:$0xf]  ;;  %v8798_v51 = vld [vmem:[#allocation2 + $0x94] sm:$0xf] }
 0x18e   : > { %6732 = vmatprep.mubr.msk.bf16.mxu0 %vm1321_vm11, %v7165_v57  ;;  %v8781_v57 = vld [vmem:[#allocation2 + $0x88] sm:$0xf]  ;;  %v4427_v9 = vshrl.u32 %v8732_v5, 16  ;;  %v9698_v12 = vcombine.low %v8499_v36, %v8504_v18  ;;  %v4447_v22 = vshll.u32 %v8769_v2, 16  ;;  %v4451_v48 = vshrl.u32 %v8769_v2, 16  ;;  %9699 = vst [vmem:[#allocation36_spill] sm:$0xff] %v8798_v51 }
 0x18f   : > { %9696 = vst [vmem:[#allocation35_spill] sm:$0xff] %v8781_v57  ;;  %v8787_v63 = vrot.slane %v4396_v7, 4  ;;  %v4406_v7 = vor.u32 %v4405_v27, %v8767_v38  ;;  %v4433_v20 = vshll.u32 %v8759_v42, 16  ;;  %v4462_v46 = vshrl.u32 %v4224_v19, 16  ;;  %v8807_v2 = vld [vmem:[#allocation2 + $0x80] sm:$0x1] }
 0x190   : > { %v4471_v36 = vshll.u32 %v8781_v57, 16  ;;  %v4475_v18 = vshrl.u32 %v8781_v57, 16  ;;  %v4486_v40 = vshrl.u32 %v4227_v31, 16  ;;  %v4420_v58 = vor.u32 %v4419_v10, %v4416_v28  ;;  %v8819_v10 = vld [vmem:[#allocation2 + $0x8c] sm:$0x1] }
 0x191   : > { %v4429_v60 = vrot.slane %v4427_v9, 4  ;;  %v4499_v27 = vshrl.u32 %v8798_v51, 16  ;;  %v4440_v26 = vrot.slane %v4438_v32, 4  ;;  %v4443_v44 = vrot.slane %v4441_v45, 5  ;;  %v8829_v42 = vld [vmem:[#allocation2 + $0x98] sm:$0x1] }
 0x192   : > { %v4453_v23 = vrot.slane %v4451_v48, 4  ;;  %v4464_v28 = vrot.slane %v4462_v46, 4  ;;  %v8821_v53 = vrot.slane %v4471_v36, 5  ;;  %v4488_v32 = vrot.slane %v4486_v40, 4  ;;  %9702 = vst [vmem:[#allocation38_spill] sm:$0xff] %v8829_v42 }
 0x193   : > { %6577 = vmatmul.mubr.msk.bf16.gmra.mrb[8].mxu1 %vm1321_vm11, %v9697_v35  ;;  %v4465_v35 = vshll.u32 %v4224_v19, 16  ;;  %v8811_v19 = vrot.slane %v4447_v22, 5  ;;  %v8823_v22 = vld [vmem:[#allocation2 + $0xa0] sm:$0xf]  ;;  %v9701_v48 = vcombine.low %v8508_v61, %v8516_v37  ;;  %v4501_v57 = vrot.slane %v4499_v27, 4 }
 0x194   : > { %6580 = vmatprep.mubr.msk.bf16.mxu1 %vm1321_vm11, %v9698_v12  ;;  %v4489_v12 = vshll.u32 %v4227_v31, 16  ;;  %v8817_v31 = vrot.slane %v4406_v7, 4  ;;  %9700 = vst [vmem:[#allocation37_spill] sm:$0xff] %v8823_v22  ;;  %v4430_v36 = vor.u32 %v4429_v60, %v8789_v56  ;;  %v4457_v61 = vshll.u32 %v8807_v2, 16 }
 0x195   : > { %6733 = vmatmul.mubr.msk.bf16.gmra.mrb[28].mxu0 %vm1321_vm11, %v7166_v50  ;;  %v4495_v50 = vshll.u32 %v8798_v51, 16  ;;  %v4467_v9 = vrot.slane %v4465_v35, 5  ;;  %v4477_v51 = vrot.slane %v4475_v18, 4  ;;  %v9703_v35 = vcombine.low %v8520_v16, %v8535_v59 }
 0x196   : > { %6738 = vmatprep.mubr.msk.bf16.mxu0 %vm1321_vm11, %v8622_v11  ;;  %v4230_v11 = vld [vmem:[#allocation2 + $0x9c] sm:$0xf]  ;;  %v4491_v45 = vrot.slane %v4489_v12, 5  ;;  %v4444_v18 = vor.u32 %v4443_v44, %v4440_v26  ;;  %v4454_v40 = vor.u32 %v4453_v23, %v8811_v19  ;;  %v4421_v37 = vrot.slane %v4420_v58, 4  ;;  %v4233_v26 = vld [vmem:[#allocation2 + $0xa8] sm:$0xf] }
 0x197   : > { %v8831_v7 = vrot.slane %v4495_v50, 5  ;;  %v4510_v5 = vshrl.u32 %v4230_v11, 16  ;;  %v4513_v46 = vshll.u32 %v4230_v11, 16  ;;  %v4435_v12 = vrot.slane %v4433_v20, 5 }
 0x198   : > { %v4519_v50 = vshll.u32 %v8823_v22, 16  ;;  %v4523_v27 = vshrl.u32 %v8823_v22, 16  ;;  %v4468_v16 = vor.u32 %v4467_v9, %v4464_v28  ;;  %v4478_v59 = vor.u32 %v4477_v51, %v8821_v53 }
 0x199   : > { %v4481_v23 = vshll.u32 %v8819_v10, 16  ;;  %v4505_v44 = vshll.u32 %v8829_v42, 16  ;;  %v4502_v58 = vor.u32 %v4501_v57, %v8831_v7  ;;  %v4512_v60 = vrot.slane %v4510_v5, 4  ;;  %v8857_v57 = vld [vmem:[#allocation2 + $0xa4] sm:$0x1] }
 0x19a   : > { %v4515_v20 = vrot.slane %v4513_v46, 5  ;;  %v4431_v11 = vrot.slane %v4430_v36, 4  ;;  %v8851_v22 = vrot.slane %v4519_v50, 5  ;;  %v4534_v28 = vshrl.u32 %v4233_v26, 16 }
 0x19b   : > { %6581 = vmatmul.mubr.msk.bf16.gmra.mrb[12].mxu1 %vm1321_vm11, %v9701_v48  ;;  %v4445_v48 = vrot.slane %v4444_v18, 4  ;;  %v4537_v9 = vshll.u32 %v4233_v26, 16  ;;  %v4412_v51 = vsel %vm7692_vm10, %v8817_v31, %v8779_v39  ;;  %v4469_v42 = vrot.slane %v4468_v16, 4 }
 0x19c   : > { %6584 = vmatprep.mubr.msk.bf16.mxu1 %vm1321_vm11, %v9703_v35  ;;  %v4455_v35 = vrot.slane %v4454_v40, 4  ;;  %v9704_v5 = vcombine.low %v8554_v33, %v8558_v8  ;;  %v4503_v36 = vrot.slane %v4502_v58, 4  ;;  %v4507_v18 = vrot.slane %v4505_v44, 5  ;;  %v4927_v58 = vld [vmem:[#allocation2 + $0x48] sm:$0xe] }
 0x19d   : > { %6739 = vmatmul.mubr.msk.bf16.vlgmr.msra.gmra.mrb[0].mxu0 %vm1321_vm11, %v8624_v49  ;;  %v4492_v49 = vor.u32 %v4491_v45, %v4488_v32  ;;  %v4479_v32 = vrot.slane %v4478_v59, 4  ;;  %v4483_v45 = vrot.slane %v4481_v23, 5  ;;  %v4516_v40 = vor.u32 %v4515_v20, %v4512_v60  ;;  %v8900_v59 = vld [vmem:[#allocation2 + $0xb0] sm:$0x1]  ;;  %v4236_v23 = vld [vmem:[#allocation2 + $0xb4] sm:$0xf] }
 0x19e   : > { %6771 = vmatpush3.bf16.msra.mxu0 %v8628_v1  ;;  %6742 = vmatprep.mubr.msk.bf16.mxu0 %vm1321_vm11, %v8661_v21  ;;  %v4459_v1 = vrot.slane %v4457_v61, 5  ;;  %v4525_v21 = vrot.slane %v4523_v27, 4  ;;  %v8863_v61 = vld [vmem:[#allocation2 + $0xac] sm:$0xf]  ;;  %v9705_v50 = vcombine.low %v8592_v17, %v8596_v15  ;;  %v4426_v39 = vsel %vm7692_vm10, %v4421_v37, %v8789_v56 }
 0x19f   : > { %v4493_v46 = vrot.slane %v4492_v49, 4  ;;  %v4436_v33 = vsel %vm7692_vm10, %v4431_v11, %v4435_v12  ;;  %v4450_v8 = vsel %vm7692_vm10, %v4445_v48, %v8811_v19  ;;  %v4529_v15 = vshll.u32 %v8857_v57, 16  ;;  %v8922_v49 = vld [vmem:[#allocation2 + $0xb8] sm:$0xf] }
 0x1a0   : > { %v4460_v31 = vsel %vm7692_vm10, %v4455_v35, %v4459_v1  ;;  %v4526_v17 = vor.u32 %v4525_v21, %v8851_v22  ;;  %v4536_v27 = vrot.slane %v4534_v28, 4  ;;  %v4539_v16 = vrot.slane %v4537_v9, 5  ;;  %v4928_v35 = vld [vmem:[#allocation2 + $0x54] sm:$0xe] }
 0x1a1   : > { %v9706_v56 = vsel %vm7692_vm10, %v8726_v3, %v8718_v30  ;;  %v9707_v19 = vsel %vm7692_vm10, %v8724_v62, %v8676_v47  ;;  %v4474_v37 = vsel %vm7692_vm10, %v4469_v42, %v8821_v53  ;;  %v4484_v12 = vsel %vm7692_vm10, %v4479_v32, %v4483_v45 }
 0x1a2   : > { %v4498_v30 = vsel %vm7692_vm10, %v4493_v46, %v8831_v7  ;;  %v4508_v3 = vsel %vm7692_vm10, %v4503_v36, %v4507_v18  ;;  %v8908_v47 = vrot.slane %v4516_v40, 4  ;;  %v4547_v62 = vshrl.u32 %v8863_v61, 16 }
 0x1a3   : > { %6585 = vmatmul.mubr.msk.bf16.gmra.mrb[16].mxu1 %vm1321_vm11, %v9704_v5  ;;  %v6030_v53 = vcombine.low %v8773_v52, %v8777_v54  ;;  %v9708_v42 = vsel %vm7692_vm10, %v8787_v63, %v8767_v38  ;;  %v8918_v26 = vcombine.low %v4426_v39, %v4436_v33  ;;  %v8920_v7 = vcombine.low %v4450_v8, %v4460_v31  ;;  %v4929_v5 = vld [vmem:[#allocation2 + $0x60] sm:$0xe]  ;;  %v4930_v33 = vld [vmem:[#allocation2 + $0x6c] sm:$0xe] }
 0x1a4   : > { %6588 = vmatprep.mubr.msk.bf16.mxu1 %vm1321_vm11, %v9705_v50  ;;  %v6197_v44 = vcombine.low %v9708_v42, %v4412_v51  ;;  %v8924_v60 = vrot.slane %v4526_v17, 4  ;;  %v8926_v20 = vrot.slane %v4529_v15, 5  ;;  %v4540_v11 = vor.u32 %v4539_v16, %v4536_v27  ;;  %v9712_v8 = vld [vmem:[#allocation27_spill] sm:$0xff]  ;;  %v8990_v42 = vld [vmem:[#allocation2 + $0xc4] sm:$0xf] }
 0x1a5   : > { %6743 = vmatmul.mubr.msk.bf16.gmra.mrb[4].mxu0 %vm1321_vm11, %v8749_v4  ;;  %v6196_v4 = vcombine.low %v9707_v19, %v9706_v56  ;;  %v4553_v48 = vshll.u32 %v8900_v59, 16  ;;  %v8929_v1 = vcombine.low %v4474_v37, %v4484_v12  ;;  %v8931_v21 = vcombine.low %v4498_v30, %v4508_v3 }
 0x1a6   : > { %6746 = vmatprep.mubr.msk.bf16.mxu0 %vm1321_vm11, %v8753_v13  ;;  %v4543_v13 = vshll.u32 %v8863_v61, 16  ;;  %v4558_v63 = vshrl.u32 %v4236_v23, 16  ;;  %v9709_v28 = vcombine.low %v8602_v24, %v8610_v14  ;;  %v4522_v9 = vsel %vm7692_vm10, %v8908_v47, %v8851_v22  ;;  %v9726_v47 = vld [vmem:[#allocation36_spill] sm:$0xff] }
 0x1a7   : > { %v4549_v51 = vrot.slane %v4547_v62, 4  ;;  %v4561_v32 = vshll.u32 %v4236_v23, 16  ;;  %v6227_v45 = vrot.slane %v4927_v58, 9  ;;  %v9710_v46 = vcombine.low %v8667_v43, %v8699_v41  ;;  %v9711_v43 = vld [vmem:[#allocation26_spill] sm:$0xff] }
 0x1a8   : > { %v8933_v38 = vrot.slane %v4543_v13, 5  ;;  %v4567_v36 = vshll.u32 %v8922_v49, 16  ;;  %v5017_v24 = vrot.slane %v8612_v55, 5  ;;  %v5020_v14 = vrot.slane %v8655_v6, 5 }
 0x1a9   : > { %v6228_v18 = vrot.slane %v4928_v35, 9  ;;  %v4532_v40 = vsel %vm7692_vm10, %v8924_v60, %v8926_v20  ;;  %v8955_v50 = vrot.slane %v4540_v11, 4  ;;  %v8957_v39 = vrot.slane %v4553_v48, 5  ;;  %v9714_v11 = vld [vmem:[#allocation33_spill] sm:$0xff]  ;;  %v9715_v35 = vld [vmem:[#allocation28_spill] sm:$0xff] }
 0x1aa   : > { %v5024_v41 = vrot.slane %v9711_v43, 5  ;;  %v8963_v6 = vsel %vm7874_vm1, %v6227_v45, %v5017_v24  ;;  %v5019_v55 = vrot.slane %v5017_v24, 4  ;;  %v5027_v31 = vrot.slane %v9712_v8, 5  ;;  %v2669_v24 = vld [vmem:[#allocation2 + $0x78] sm:$0xf] }
 0x1ab   : > { %6589 = vmatmul.mubr.msk.bf16.gmra.mrb[20].mxu1 %vm1321_vm11, %v9709_v28  ;;  %v6229_v17 = vrot.slane %v4929_v5, 9  ;;  %v4550_v15 = vor.u32 %v4549_v51, %v8933_v38  ;;  %v5031_v56 = vrot.slane %v8701_v29, 5  ;;  %v4571_v19 = vshrl.u32 %v8922_v49, 16  ;;  %v9716_v28 = vld [vmem:[#allocation29_spill] sm:$0xff] }
 0x1ac   : > { %6592 = vmatprep.mubr.msk.bf16.mxu1 %vm1321_vm11, %v9710_v46  ;;  %v8969_v27 = vsel %vm7874_vm1, %v6228_v18, %v5024_v41  ;;  %v5026_v16 = vrot.slane %v5024_v41, 4  ;;  %v8975_v37 = vsel %vm7874_vm1, %v5019_v55, %v5020_v14  ;;  %v5034_v12 = vrot.slane %v8709_v25, 5  ;;  %v9718_v14 = vld [vmem:[#allocation30_spill] sm:$0xff]  ;;  %v9719_v18 = vld [vmem:[#allocation32_spill] sm:$0xff] }
 0x1ad   : > { %6747 = vmatmul.mubr.msk.bf16.gmra.mrb[8].mxu0 %vm1321_vm11, %v6196_v4  ;;  %v4239_v4 = vld [vmem:[#allocation2 + $0xc0] sm:$0xf]  ;;  %v6230_v13 = vrot.slane %v4930_v33, 9  ;;  %v6243_v30 = vcombine.low %v8963_v6, %v8975_v37  ;;  %v8986_v29 = vsel %vm7874_vm1, %v6229_v17, %v5031_v56  ;;  %v5033_v62 = vrot.slane %v5031_v56, 4  ;;  %v9029_v56 = vld [vmem:[#allocation2 + $0xbc] sm:$0x1] }
 0x1ae   : > { %6750 = vmatprep.mubr.msk.bf16.mxu0 %vm1321_vm11, %v6197_v44  ;;  %v8982_v3 = vsel %vm7874_vm1, %v5026_v16, %v5027_v31  ;;  %v8988_v23 = vrot.slane %v4558_v63, 4  ;;  %v9713_v44 = vld [vmem:[#allocation31_spill] sm:$0xff]  ;;  %v5041_v48 = vrot.slane %v9714_v11, 5  ;;  %v9717_v51 = vcombine.low %v9715_v35, %v9716_v28  ;;  %v4931_v16 = vld [vmem:[#allocation2 + $0x78] sm:$0xe] }
 0x1af   : > { %v6244_v25 = vcombine.low %v8969_v27, %v8982_v3  ;;  %v5038_v58 = vrot.slane %v9713_v44, 5  ;;  %v9000_v45 = vrot.slane %v4561_v32, 5  ;;  %v4582_v5 = vshrl.u32 %v4239_v4, 16  ;;  %v7167_v35 = vld [vmem:[#allocation2 + $0xc] sm:$0xff]   ;;  %v7228_v3 = vld [vmem:[#allocation2 + $0x94] sm:$0xf] }
 0x1b0   : > { %v4585_v46 = vshll.u32 %v4239_v4, 16  ;;  %v9004_v63 = vsel %vm7874_vm1, %v5033_v62, %v5034_v12  ;;  %v9720_v43 = vcombine.low %v9718_v14, %v9719_v18  ;;  %v9010_v41 = vrot.slane %v4567_v36, 5  ;;  %v9722_v62 = vld [vmem:[#allocation19_spill] sm:$0xff]  ;;  %v9723_v14 = vld [vmem:[#allocation34_spill] sm:$0xff]  ;;  %v2675_v37 = vld [vmem:[#allocation2 + $0x90] sm:$0xf] }
 0x1b1   : > { %v6245_v33 = vcombine.low %v8986_v29, %v9004_v63  ;;  %v9016_v32 = vsel %vm7874_vm1, %v6230_v13, %v5038_v58  ;;  %v5040_v55 = vrot.slane %v5038_v58, 4  ;;  %v4546_v8 = vsel %vm7692_vm10, %v8955_v50, %v8933_v38  ;;  %v9721_v13 = vld [vmem:[#allocation18_spill] sm:$0xff]  ;;  %v7229_v63 = vld [vmem:[#allocation2 + $0x8c] sm:$0x1] }
 0x1b2   : > { %v9024_v31 = vrot.slane %v4550_v15, 4  ;;  %v4573_v36 = vrot.slane %v4571_v19, 4  ;;  %v4591_v17 = vshll.u32 %v8990_v42, 16  ;;  %v2910_v12 = vshll.u32 %v2669_v24, 16  ;;  %v4932_v19 = vld [vmem:[#allocation2 + $0x84] sm:$0xe] }
 0x1b3   : > { %6593 = vmatmul.mubr.msk.bf16.gmra.mrb[24].mxu1 %vm1321_vm11, %v9717_v51  ;;  %v9033_v4 = vsel %vm7874_vm1, %v5040_v55, %v5041_v48  ;;  %v2929_v15 = vsel %vm7692_vm10, %v9722_v62, %v9721_v13  ;;  %v4584_v44 = vrot.slane %v4582_v5, 4  ;;  %v4587_v58 = vrot.slane %v4585_v46, 5  ;;  %v4242_v46 = vld [vmem:[#allocation2 + $0xcc] sm:$0xf] }
 0x1b4   : > { %6596 = vmatprep.mubr.msk.bf16.mxu1 %vm1321_vm11, %v9720_v43  ;;  %v4595_v11 = vshrl.u32 %v8990_v42, 16  ;;  %v2912_v51 = vrot.slane %v2910_v12, 5  ;;  %v6231_v48 = vrot.slane %v4931_v16, 9  ;;  %v5045_v18 = vrot.slane %v9723_v14, 5  ;;  %v9062_v16 = vld [vmem:[#allocation2 + $0xd0] sm:$0xf] }
 0x1b5   : > { %6751 = vmatmul.mubr.msk.bf16.gmra.mrb[12].mxu0 %vm1321_vm11, %v8918_v26  ;;  %v2907_v26 = vshrl.u32 %v2669_v24, 16  ;;  %v4564_v24 = vor.u32 %v9000_v45, %v8988_v23  ;;  %v4577_v43 = vshll.u32 %v9029_v56, 16  ;;  %v5048_v55 = vrot.slane %v8807_v2, 5 }
 0x1b6   : > { %6754 = vmatprep.mubr.msk.bf16.mxu0 %vm1321_vm11, %v8920_v7  ;;  %v6232_v5 = vrot.slane %v4932_v19, 9  ;;  %v9049_v62 = vsel %vm7874_vm1, %v6231_v48, %v5045_v18  ;;  %v5047_v7 = vrot.slane %v5045_v18, 4  ;;  %v4556_v2 = vsel %vm7692_vm10, %v9024_v31, %v8957_v39 }
 0x1b7   : > { %v2909_v28 = vrot.slane %v2907_v26, 4  ;;  %v9724_v26 = vld [vmem:[#allocation35_spill] sm:$0xff]  ;;  %v9060_v23 = vrot.slane %v4591_v17, 5  ;;  %v4597_v45 = vrot.slane %v4595_v11, 4  ;;  %v5055_v19 = vrot.slane %v8819_v10, 5  ;;  %v9725_v11 = vld [vmem:[#allocation17_spill] sm:$0xff] }
 0x1b8   : > { %v5052_v12 = vrot.slane %v9724_v26, 5  ;;  %v4588_v52 = vor.u32 %v4587_v58, %v4584_v44  ;;  %v4606_v39 = vshrl.u32 %v4242_v46, 16  ;;  %v4609_v17 = vshll.u32 %v4242_v46, 16 }
 0x1b9   : > { %v2913_v13 = vor.u32 %v2912_v51, %v2909_v28  ;;  %v4574_v28 = vor.u32 %v4573_v36, %v9010_v41  ;;  %v9067_v51 = vld [vmem:[#allocation2 + $0xc8] sm:$0x1]  ;;  %v4615_v44 = vshll.u32 %v9062_v16, 16  ;;  %v4619_v58 = vshrl.u32 %v9062_v16, 16 }
 0x1ba   : > { %v9079_v10 = vsel %vm7874_vm1, %v6232_v5, %v5052_v12  ;;  %v5054_v36 = vrot.slane %v5052_v12, 4  ;;  %v4601_v48 = vshll.u32 %v9067_v51, 16  ;;  %v4565_v5 = vrot.slane %v4564_v24, 4 }
 0x1bb   : > { %6597 = vmatmul.mubr.msk.bf16.gmra.mrb[28].mxu1 %vm1321_vm11, %v6030_v53  ;;  %v2914_v54 = vrot.slane %v2913_v13, 4  ;;  %v9071_v53 = vsel %vm7874_vm1, %v5047_v7, %v5048_v55  ;;  %v7168_v7 = vld [vmem:[#allocation2 + $0x18] sm:$0xff]   ;;  %v7169_v55 = vld [vmem:[#allocation2 + $0x24] sm:$0xff]   ;;  %v4575_v46 = vrot.slane %v4574_v28, 4  ;;  %v4579_v13 = vrot.slane %v4577_v43, 5 }
 0x1bc   : > { %6602 = vmatprep.mubr.msk.bf16.mxu1 %vm1321_vm11, %v7167_v35  ;;  %v6247_v31 = vcombine.low %v9049_v62, %v9071_v53  ;;  %v4598_v35 = vor.u32 %v4597_v45, %v9060_v23  ;;  %v9094_v18 = vsel %vm7874_vm1, %v5054_v36, %v5055_v19  ;;  %v6203_v24 = vcombine.low %v4546_v8, %v4556_v2  ;;  %v9113_v45 = vld [vmem:[#allocation2 + $0xd4] sm:$0x1]  ;;  %v9728_v8 = vld [vmem:[#allocation38_spill] sm:$0xff]  ;;  %v7232_v62 = vld [vmem:[#allocation2 + $0xac] sm:$0xf] }
 0x1bd   : > { %6755 = vmatmul.mubr.msk.bf16.gmra.mrb[16].mxu0 %vm1321_vm11, %v8929_v1  ;;  %v2919_v1 = vsel %vm7692_vm10, %v2914_v54, %v9725_v11  ;;  %v6248_v26 = vcombine.low %v9079_v10, %v9094_v18  ;;  %v4589_v43 = vrot.slane %v4588_v52, 4  ;;  %v4608_v12 = vrot.slane %v4606_v39, 4  ;;  %v9727_v36 = vld [vmem:[#allocation16_spill] sm:$0xff] }
 0x1be   : > { %6758 = vmatprep.mubr.msk.bf16.mxu0 %vm1321_vm11, %v8931_v21  ;;  %v9090_v14 = vcombine.low %v2919_v1, %v2929_v15  ;;  %v4933_v21 = vld [vmem:[#allocation2 + $0x90] sm:$0xe]  ;;  %v6202_v15 = vcombine.low %v4522_v9, %v4532_v40  ;;  %v4611_v19 = vrot.slane %v4609_v17, 5  ;;  %v9115_v28 = vrot.slane %v4615_v44, 5  ;;  %v4934_v40 = vld [vmem:[#allocation2 + $0x9c] sm:$0xe] }
 0x1bf   : > { %v4621_v60 = vrot.slane %v4619_v58, 4  ;;  %v6233_v20 = vrot.slane %v4933_v21, 9  ;;  %v4599_v54 = vrot.slane %v4598_v35, 4  ;;  %v4603_v22 = vrot.slane %v4601_v48, 5  ;;  %v9729_v1 = vld [vmem:[#allocation37_spill] sm:$0xff]  ;;  %v7170_v35 = vld [vmem:[#allocation2 + $0x30] sm:$0xff]  }
 0x1c0   : > { %v5059_v9 = vrot.slane %v9726_v47, 5  ;;  %v4570_v38 = vsel %vm7692_vm10, %v4565_v5, %v9010_v41  ;;  %v4580_v50 = vsel %vm7692_vm10, %v4575_v46, %v4579_v13  ;;  %v5062_v2 = vrot.slane %v9728_v8, 5  ;;  %v7171_v46 = vld [vmem:[#allocation2 + $0x3c] sm:$0xff]   ;;  %v4923_v13 = vld [vmem:[#allocation2 + $0x18] sm:$0xe] }
 0x1c1   : > { %v4594_v52 = vsel %vm7692_vm10, %v4589_v43, %v9060_v23  ;;  %v4625_v39 = vshll.u32 %v9113_v45, 16  ;;  %v4612_v41 = vor.u32 %v4611_v19, %v4608_v12  ;;  %v4622_v58 = vor.u32 %v4621_v60, %v9115_v28  ;;  %v7223_v23 = vld [vmem:[#allocation2 + $0x1c] sm:$0xf]  ;;  %v4935_v8 = vld [vmem:[#allocation2 + $0xa8] sm:$0xe] }
 0x1c2   : > { %v9134_v17 = vsel %vm7874_vm1, %v6233_v20, %v5059_v9  ;;  %v5061_v44 = vrot.slane %v5059_v9, 4  ;;  %v6234_v11 = vrot.slane %v4934_v40, 9  ;;  %v4604_v48 = vsel %vm7692_vm10, %v4599_v54, %v4603_v22  ;;  %v9730_v9 = vld [vmem:[#allocation20_spill] sm:$0xff] }
 0x1c3   : > { %6603 = vmatmul.mubr.msk.bf16.vlgmr.msra.gmra.mrb[0].mxu1 %vm1321_vm11, %v7168_v7  ;;  %v5066_v7 = vrot.slane %v9729_v1, 5  ;;  %v4989_v21 = vrot.slane %v7223_v23, 5  ;;  %v5069_v5 = vrot.slane %v8857_v57, 5  ;;  %v6204_v12 = vcombine.low %v4570_v38, %v4580_v50  ;;  %v4924_v38 = vld [vmem:[#allocation2 + $0x24] sm:$0xe] }
 0x1c4   : > { %6805 = vmatpush3.bf16.msra.mxu1 %v9727_v36  ;;  %6606 = vmatprep.mubr.msk.bf16.mxu1 %vm1321_vm11, %v7169_v55  ;;  %v9143_v55 = vsel %vm7874_vm1, %v5061_v44, %v5062_v2  ;;  %v4627_v19 = vrot.slane %v4625_v39, 5  ;;  %v6205_v60 = vcombine.low %v4594_v52, %v4604_v48  ;;  %v4613_v20 = vrot.slane %v4612_v41, 4  ;;  %v7224_v50 = vld [vmem:[#allocation2 + $0x28] sm:$0xf]  ;;  %v4936_v41 = vld [vmem:[#allocation2 + $0xb4] sm:$0xe] }
 0x1c5   : > { %6759 = vmatmul.mubr.msk.bf16.gmra.mrb[20].mxu0 %vm1321_vm11, %v6202_v15  ;;  %v6249_v15 = vcombine.low %v9134_v17, %v9143_v55  ;;  %v5068_v43 = vrot.slane %v5066_v7, 4  ;;  %v4623_v54 = vrot.slane %v4622_v58, 4  ;;  %v6223_v57 = vrot.slane %v4923_v13, 9  ;;  %v7172_v58 = vld [vmem:[#allocation2 + $0x48] sm:$0xff]   ;;  %v7173_v48 = vld [vmem:[#allocation2 + $0x54] sm:$0xff]  }
 0x1c6   : > { %6762 = vmatprep.mubr.msk.bf16.mxu0 %vm1321_vm11, %v6203_v24  ;;  %v9150_v24 = vsel %vm7874_vm1, %v6234_v11, %v5066_v7  ;;  %v4991_v47 = vrot.slane %v4989_v21, 4  ;;  %v4992_v40 = vrot.slane %v9730_v9, 5  ;;  %v4996_v2 = vrot.slane %v7224_v50, 5  ;;  %v9731_v7 = vld [vmem:[#allocation21_spill] sm:$0xff]  ;;  %v4937_v17 = vld [vmem:[#allocation2 + $0xc0] sm:$0xe] }
 0x1c7   : > { %v9154_v22 = vsel %vm7874_vm1, %v5068_v43, %v5069_v5  ;;  %v4618_v52 = vsel %vm7692_vm10, %v4613_v20, %v9115_v28  ;;  %v4628_v39 = vsel %vm7692_vm10, %v4623_v54, %v4627_v19  ;;  %v6235_v44 = vrot.slane %v4935_v8, 9  ;;  %v4925_v5 = vld [vmem:[#allocation2 + $0x30] sm:$0xe] }
 0x1c8   : > { %v6250_v36 = vcombine.low %v9150_v24, %v9154_v22  ;;  %v4990_v11 = vsel %vm7874_vm1, %v6223_v57, %v4989_v21  ;;  %v4993_v1 = vsel %vm7874_vm1, %v4991_v47, %v4992_v40  ;;  %v6224_v23 = vrot.slane %v4924_v38, 9 }
 0x1c9   : > { %v5076_v28 = vrot.slane %v8900_v59, 5  ;;  %v6206_v13 = vcombine.low %v4618_v52, %v4628_v39  ;;  %v4998_v43 = vrot.slane %v4996_v2, 4  ;;  %v6239_v20 = vcombine.low %v4990_v11, %v4993_v1  ;;  %v7174_v11 = vld [vmem:[#allocation2 + $0x60] sm:$0xff]  }
 0x1ca   : > { %v5080_v57 = vrot.slane %v8922_v49, 5  ;;  %v6225_v47 = vrot.slane %v4925_v5, 9  ;;  %v5083_v59 = vrot.slane %v9029_v56, 5  ;;  %v9734_v49 = vld [vmem:[#allocation24_spill] sm:$0xff]  ;;  %v4997_v56 = vsel %vm7874_vm1, %v6224_v23, %v4996_v2 }
 0x1cb   : > { %6607 = vmatmul.mubr.msk.bf16.gmra.mrb[4].mxu1 %vm1321_vm11, %v7170_v35  ;;  %v5003_v35 = vrot.slane %v9731_v7, 5  ;;  %v5010_v52 = vrot.slane %v9734_v49, 5  ;;  %v7175_v5 = vld [vmem:[#allocation2 + $0x6c] sm:$0xff]   ;;  %v2958_v27 = vshll.u32 %v2675_v37, 16  ;;  %v3012_v53 = vshll.u32 %v7232_v62, 16 }
 0x1cc   : > { %6610 = vmatprep.mubr.msk.bf16.mxu1 %vm1321_vm11, %v7171_v46  ;;  %v5073_v46 = vrot.slane %v8863_v61, 5  ;;  %v9733_v61 = vld [vmem:[#allocation23_spill] sm:$0xff]  ;;  %v5082_v50 = vrot.slane %v5080_v57, 4  ;;  %v5087_v10 = vrot.slane %v8990_v42, 5 }
 0x1cd   : > { %6763 = vmatmul.mubr.msk.bf16.gmra.mrb[24].mxu0 %vm1321_vm11, %v6204_v12  ;;  %v9732_v12 = vld [vmem:[#allocation22_spill] sm:$0xff]  ;;  %v5005_v9 = vrot.slane %v5003_v35, 4  ;;  %v5006_v40 = vrot.slane %v9733_v61, 5  ;;  %v5004_v1 = vsel %vm7874_vm1, %v6225_v47, %v5003_v35  ;;  %v5097_v47 = vrot.slane %v9113_v45, 5 }
 0x1ce   : > { %6766 = vmatprep.mubr.msk.bf16.mxu0 %vm1321_vm11, %v6205_v60  ;;  %v4999_v19 = vrot.slane %v9732_v12, 5  ;;  %v6236_v60 = vrot.slane %v4936_v41, 9  ;;  %v9178_v21 = vsel %vm7874_vm1, %v6235_v44, %v5073_v46  ;;  %v5075_v54 = vrot.slane %v5073_v46, 4  ;;  %v4926_v41 = vld [vmem:[#allocation2 + $0x3c] sm:$0xe] }
 0x1cf   : > { %v5007_v7 = vsel %vm7874_vm1, %v5005_v9, %v5006_v40  ;;  %v6226_v23 = vrot.slane %v4926_v41, 9  ;;  %v5012_v46 = vrot.slane %v5010_v52, 4  ;;  %v4938_v12 = vld [vmem:[#allocation2 + $0xcc] sm:$0xe]  ;;  %v7177_v9 = vld [vmem:[#allocation2 + $0x84] sm:$0xff]  }
 0x1d0   : > { %v9187_v8 = vsel %vm7874_vm1, %v5075_v54, %v5076_v28  ;;  %v9191_v38 = vsel %vm7874_vm1, %v6236_v60, %v5080_v57  ;;  %v5000_v44 = vsel %vm7874_vm1, %v4998_v43, %v4999_v19  ;;  %v9735_v28 = vld [vmem:[#allocation25_spill] sm:$0xff]  ;;  %v6241_v43 = vcombine.low %v5004_v1, %v5007_v7 }
 0x1d1   : > { %v6251_v39 = vcombine.low %v9178_v21, %v9187_v8  ;;  %v6240_v2 = vcombine.low %v4997_v56, %v5000_v44  ;;  %v5011_v35 = vsel %vm7874_vm1, %v6226_v23, %v5010_v52  ;;  %v6238_v60 = vrot.slane %v4938_v12, 9  ;;  %v7176_v57 = vld [vmem:[#allocation2 + $0x78] sm:$0xff]   ;;  %v7225_v52 = vld [vmem:[#allocation2 + $0x70] sm:$0xf]  ;;  %v2672_v23 = vld [vmem:[#allocation2 + $0x84] sm:$0xf] }
 0x1d2   : > { %v5094_v54 = vrot.slane %v9062_v16, 5  ;;  %v2892_v56 = vshll.u32 %v7225_v52, 16  ;;  %v2896_v44 = vshrl.u32 %v7225_v52, 16  ;;  %v2931_v12 = vshrl.u32 %v2672_v23, 16 }
 0x1d3   : > { %6611 = vmatmul.mubr.msk.bf16.gmra.mrb[8].mxu1 %vm1321_vm11, %v7172_v58  ;;  %v9204_v58 = vsel %vm7874_vm1, %v5082_v50, %v5083_v59 }
 0x1d4   : > { %6614 = vmatprep.mubr.msk.bf16.mxu1 %vm1321_vm11, %v7173_v48  ;;  %v6252_v48 = vcombine.low %v9191_v38, %v9204_v58  ;;  %v9225_v50 = vsel %vm7874_vm1, %v6238_v60, %v5094_v54  ;;  %v5096_v49 = vrot.slane %v5094_v54, 4  ;;  %v2894_v1 = vrot.slane %v2892_v56, 5 }
 0x1d5   : > { %6767 = vmatmul.mubr.msk.bf16.gmra.mrb[28].mxu0 %vm1321_vm11, %v6206_v13  ;;  %v5013_v13 = vrot.slane %v9735_v28, 5  ;;  %v2898_v7 = vrot.slane %v2896_v44, 4  ;;  %v2968_v56 = vshrl.u32 %v7228_v3, 16 }
 0x1d6   : > { %6772 = vmatprep.mubr.msk.bf16.mxu0 %vm1321_vm11, %v6239_v20  ;;  %v2666_v20 = vld [vmem:[#allocation2 + $0x6c] sm:$0xf]  ;;  %v9230_v16 = vsel %vm7874_vm1, %v5096_v49, %v5097_v47  ;;  %v2933_v47 = vrot.slane %v2931_v12, 4  ;;  %v7181_v49 = vld [vmem:[#allocation2 + $0xb4] sm:$0xff]   ;;  %v9736_v12 = vcombine.low %v9016_v32, %v9033_v4 }
 0x1d7   : > { %v5014_v19 = vsel %vm7874_vm1, %v5012_v46, %v5013_v13  ;;  %v2883_v40 = vshrl.u32 %v2666_v20, 16  ;;  %v2886_v59 = vshll.u32 %v2666_v20, 16  ;;  %v6254_v45 = vcombine.low %v9225_v50, %v9230_v16  ;;  %v7226_v13 = vld [vmem:[#allocation2 + $0x74] sm:$0x1]  ;;  %v7180_v20 = vld [vmem:[#allocation2 + $0xa8] sm:$0xff]  }
 0x1d8   : > { %v6242_v61 = vcombine.low %v5011_v35, %v5014_v19  ;;  %v2899_v28 = vor.u32 %v2898_v7, %v2894_v1  ;;  %v2934_v35 = vshll.u32 %v2672_v23, 16  ;;  %v7227_v19 = vld [vmem:[#allocation2 + $0x88] sm:$0xf] }
 0x1d9   : > { %v2885_v41 = vrot.slane %v2883_v40, 4  ;;  %v2940_v60 = vshll.u32 %v7227_v19, 16  ;;  %v2944_v6 = vshrl.u32 %v7227_v19, 16  ;;  %v2955_v40 = vshrl.u32 %v2675_v37, 16 }
 0x1da   : > { %v2900_v54 = vrot.slane %v2899_v28, 4 }
 0x1db   : > { %6615 = vmatmul.mubr.msk.bf16.gmra.mrb[12].mxu1 %vm1321_vm11, %v7174_v11  ;;  %v2888_v11 = vrot.slane %v2886_v59, 5  ;;  %v2678_v59 = vld [vmem:[#allocation2 + $0x9c] sm:$0xf]  ;;  %v2946_v52 = vrot.slane %v2944_v6, 4 }
 0x1dc   : > { %6618 = vmatprep.mubr.msk.bf16.mxu1 %vm1321_vm11, %v7175_v5  ;;  %v7178_v5 = vld [vmem:[#allocation2 + $0x90] sm:$0xff]  }
 0x1dd   : > { %6773 = vmatmul.mubr.msk.bf16.vlgmr.msra.gmra.mrb[0].mxu0 %vm1321_vm11, %v6240_v2  ;;  %v7179_v2 = vld [vmem:[#allocation2 + $0x9c] sm:$0xff]   ;;  %v2889_v46 = vor.u32 %v2888_v11, %v2885_v41  ;;  %v2979_v41 = vshrl.u32 %v2678_v59, 16  ;;  %v2982_v11 = vshll.u32 %v2678_v59, 16 }
 0x1de   : > { %6776 = vmatprep.mubr.msk.bf16.mxu0 %vm1321_vm11, %v6241_v43  ;;  %v2902_v43 = vshll.u32 %v7226_v13, 16  ;;  %v2960_v13 = vrot.slane %v2958_v27, 5  ;;  %v2684_v27 = vld [vmem:[#allocation2 + $0xb4] sm:$0xf] }
 0x1df   : > { %v2981_v6 = vrot.slane %v2979_v41, 4  ;;  %v2984_v37 = vrot.slane %v2982_v11, 5 }
 0x1e3   : > { %6619 = vmatmul.mubr.msk.bf16.gmra.mrb[16].mxu1 %vm1321_vm11, %v7176_v57  ;;  %v2904_v57 = vrot.slane %v2902_v43, 5  ;;  %v2970_v43 = vrot.slane %v2968_v56, 4 }
 0x1e4   : > { %6622 = vmatprep.mubr.msk.bf16.mxu1 %vm1321_vm11, %v7177_v9  ;;  %v2936_v9 = vrot.slane %v2934_v35, 5  ;;  %v2681_v35 = vld [vmem:[#allocation2 + $0xa8] sm:$0xf] }
 0x1e5   : > { %6777 = vmatmul.mubr.msk.bf16.gmra.mrb[4].mxu0 %vm1321_vm11, %v6242_v61  ;;  %v9250_v61 = vrot.slane %v2940_v60, 5  ;;  %v2905_v29 = vsel %vm7692_vm10, %v2900_v54, %v2904_v57  ;;  %v7231_v54 = vld [vmem:[#allocation2 + $0x98] sm:$0x1]  ;;  %v3003_v59 = vshrl.u32 %v2681_v35, 16 }
 0x1e6   : > { %6780 = vmatprep.mubr.msk.bf16.mxu0 %vm1321_vm11, %v6243_v30  ;;  %v2890_v30 = vrot.slane %v2889_v46, 4  ;;  %v2937_v7 = vor.u32 %v2936_v9, %v2933_v47  ;;  %v2974_v57 = vshll.u32 %v7231_v54, 16  ;;  %v7235_v54 = vld [vmem:[#allocation2 + $0xb0] sm:$0x1] }
 0x1e7   : > { %v2947_v28 = vor.u32 %v2946_v52, %v9250_v61  ;;  %v3006_v52 = vshll.u32 %v2681_v35, 16  ;;  %v3005_v11 = vrot.slane %v3003_v59, 4 }
 0x1e8   : > { %v2895_v44 = vsel %vm7692_vm10, %v2890_v30, %v2894_v1  ;;  %v7182_v30 = vld [vmem:[#allocation2 + $0xc0] sm:$0xff]  }
 0x1e9   : > { %v6087_v19 = vcombine.low %v2895_v44, %v2905_v29  ;;  %v2948_v32 = vrot.slane %v2947_v28, 4  ;;  %v7233_v44 = vld [vmem:[#allocation2 + $0xa4] sm:$0x1]  ;;  %v3008_v28 = vrot.slane %v3006_v52, 5 }
 0x1ea   : > { %v2998_v29 = vshll.u32 %v7233_v44, 16 }
 0x1eb   : > { %6623 = vmatmul.mubr.msk.bf16.gmra.mrb[20].mxu1 %vm1321_vm11, %v7178_v5  ;;  %v2957_v5 = vrot.slane %v2955_v40, 4 }
 0x1ec   : > { %6626 = vmatprep.mubr.msk.bf16.mxu1 %vm1321_vm11, %v7179_v2  ;;  %v7230_v2 = vld [vmem:[#allocation2 + $0xa0] sm:$0xf]  ;;  %v3000_v35 = vrot.slane %v2998_v29, 5 }
 0x1ed   : > { %6781 = vmatmul.mubr.msk.bf16.gmra.mrb[8].mxu0 %vm1321_vm11, %v6244_v25  ;;  %v2964_v25 = vshll.u32 %v7228_v3, 16  ;;  %v2988_v23 = vshll.u32 %v7230_v2, 16  ;;  %v2992_v46 = vshrl.u32 %v7230_v2, 16  ;;  %v2961_v4 = vor.u32 %v2960_v13, %v2957_v5  ;;  %v7234_v5 = vld [vmem:[#allocation2 + $0xb8] sm:$0xf] }
 0x1ee   : > { %6784 = vmatprep.mubr.msk.bf16.mxu0 %vm1321_vm11, %v6245_v33  ;;  %v2950_v33 = vshll.u32 %v7229_v63, 16  ;;  %v3036_v2 = vshll.u32 %v7234_v5, 16  ;;  %v9288_v13 = vrot.slane %v3012_v53, 5  ;;  %v7237_v53 = vld [vmem:[#allocation2 + $0xbc] sm:$0x1] }
 0x1ef   : > { %v9259_v1 = vrot.slane %v2964_v25, 5  ;;  %v9269_v47 = vrot.slane %v2988_v23, 5  ;;  %v2994_v9 = vrot.slane %v2992_v46, 4  ;;  %v2976_v25 = vrot.slane %v2974_v57, 5 }
 0x1f0   : > { %v2952_v60 = vrot.slane %v2950_v33, 5  ;;  %v2962_v33 = vrot.slane %v2961_v4, 4  ;;  %v3040_v23 = vshrl.u32 %v7234_v5, 16  ;;  %v3022_v57 = vshll.u32 %v7235_v54, 16 }
 0x1f1   : > { %v2971_v40 = vor.u32 %v2970_v43, %v9259_v1  ;;  %v2995_v56 = vor.u32 %v2994_v9, %v9269_v47  ;;  %v6237_v9 = vrot.slane %v4937_v17, 9  ;;  %v5090_v4 = vrot.slane %v9067_v51, 5 }
 0x1f2   : > { %v2953_v63 = vsel %vm7692_vm10, %v2948_v32, %v2952_v60  ;;  %v3038_v60 = vrot.slane %v3036_v2, 5  ;;  %v5089_v32 = vrot.slane %v5087_v10, 4 }
 0x1f3   : > { %6627 = vmatmul.mubr.msk.bf16.gmra.mrb[24].mxu1 %vm1321_vm11, %v7180_v20  ;;  %v2938_v20 = vrot.slane %v2937_v7, 4  ;;  %v2972_v41 = vrot.slane %v2971_v40, 4  ;;  %v3027_v7 = vshrl.u32 %v2684_v27, 16  ;;  %v5088_v44 = vsel %vm7874_vm1, %v6237_v9, %v5087_v10 }
 0x1f4   : > { %6630 = vmatprep.mubr.msk.bf16.mxu1 %vm1321_vm11, %v7181_v49  ;;  %v2985_v49 = vor.u32 %v2984_v37, %v2981_v6  ;;  %v3042_v6 = vrot.slane %v3040_v23, 4  ;;  %v2687_v37 = vld [vmem:[#allocation2 + $0xc0] sm:$0xf]  ;;  %v5091_v24 = vsel %vm7874_vm1, %v5089_v32, %v5090_v4 }
 0x1f5   : > { %6785 = vmatmul.mubr.msk.bf16.gmra.mrb[12].mxu0 %vm1321_vm11, %v9736_v12  ;;  %v2943_v3 = vsel %vm7692_vm10, %v2938_v20, %v9250_v61  ;;  %v3030_v61 = vshll.u32 %v2684_v27, 16  ;;  %v2996_v12 = vrot.slane %v2995_v56, 4  ;;  %v3029_v55 = vrot.slane %v3027_v7, 4 }
 0x1f6   : > { %6788 = vmatprep.mubr.msk.bf16.mxu0 %vm1321_vm11, %v6247_v31  ;;  %v3016_v31 = vshrl.u32 %v7232_v62, 16  ;;  %v2986_v46 = vrot.slane %v2985_v49, 4  ;;  %v6089_v18 = vcombine.low %v2943_v3, %v2953_v63  ;;  %v3009_v20 = vor.u32 %v3008_v28, %v3005_v11 }
 0x1f7   : > { %v3051_v40 = vshrl.u32 %v2687_v37, 16  ;;  %v3054_v59 = vshll.u32 %v2687_v37, 16  ;;  %v3043_v62 = vor.u32 %v3042_v6, %v3038_v60  ;;  %v6253_v7 = vcombine.low %v5088_v44, %v5091_v24 }
 0x1f8   : > { %v3018_v43 = vrot.slane %v3016_v31, 4  ;;  %v3046_v31 = vshll.u32 %v7237_v53, 16  ;;  %v3010_v51 = vrot.slane %v3009_v20, 4 }
 0x1f9   : > { %v3053_v22 = vrot.slane %v3051_v40, 4 }
 0x1fa   : > { %v3019_v42 = vor.u32 %v3018_v43, %v9288_v13  ;;  %v3048_v11 = vrot.slane %v3046_v31, 5  ;;  %v3015_v21 = vsel %vm7692_vm10, %v3010_v51, %v9288_v13 }
 0x1fb   : > { %6631 = vmatmul.mubr.msk.bf16.gmra.mrb[28].mxu1 %vm1321_vm11, %v7182_v30  ;;  %v2991_v30 = vsel %vm7692_vm10, %v2986_v46, %v9269_v47  ;;  %v7236_v47 = vld [vmem:[#allocation2 + $0xc4] sm:$0xf] }
 0x1fc   : > { %6652 = vmatprep.mubr.msk.bf16.mxu1 %vm1321_vm11, %v6087_v19  ;;  %v2977_v19 = vsel %vm7692_vm10, %v2972_v41, %v2976_v25  ;;  %v3060_v49 = vshll.u32 %v7236_v47, 16  ;;  %v3064_v52 = vshrl.u32 %v7236_v47, 16  ;;  %v3024_v25 = vrot.slane %v3022_v57, 5 }
 0x1fd   : > { %6789 = vmatmul.mubr.msk.bf16.gmra.mrb[16].mxu0 %vm1321_vm11, %v6248_v26  ;;  %v2967_v26 = vsel %vm7692_vm10, %v2962_v33, %v9259_v1  ;;  %v3001_v1 = vsel %vm7692_vm10, %v2996_v12, %v3000_v35  ;;  %v3020_v56 = vrot.slane %v3019_v42, 4  ;;  %v3044_v41 = vrot.slane %v3043_v62, 4 }
 0x1fe   : > { %6792 = vmatprep.mubr.msk.bf16.mxu0 %vm1321_vm11, %v6249_v15  ;;  %v3032_v15 = vrot.slane %v3030_v61, 5  ;;  %v6090_v27 = vcombine.low %v2967_v26, %v2977_v19  ;;  %v6091_v3 = vcombine.low %v2991_v30, %v3001_v1  ;;  %v3062_v29 = vrot.slane %v3060_v49, 5  ;;  %v7238_v61 = vld [vmem:[#allocation2 + $0xc8] sm:$0x1]  ;;  %v9359_v30 = vld [vmem:[#allocation8] ss:$0 sm:$0xff] }
 0x1ff   : > { %v3066_v63 = vrot.slane %v3064_v52, 4  ;;  %v3025_v0 = vsel %vm7692_vm10, %v3020_v56, %v3024_v25  ;;  %v3070_v5 = vshll.u32 %v7238_v61, 16  ;;  %v3049_v23 = vsel %vm7692_vm10, %v3044_v41, %v3048_v11 }
 0x200   : > { %v6092_v46 = vcombine.low %v3015_v21, %v3025_v0 }
 0x201   : > { %v3072_v12 = vrot.slane %v3070_v5, 5 }
 0x203   : > { %6653 = vmatmul.mubr.msk.bf16.vlgmr.msra.gmra.mrb[16].mxu1 %vm1321_vm11, %v9090_v14  ;;  %v3033_v14 = vor.u32 %v3032_v15, %v3029_v55 }
 0x204   : > { %6656 = vmatprep.mubr.msk.bf16.mxu1 %vm1321_vm11, %v6089_v18 }
 0x205   : > { %6793 = vmatmul.mubr.msk.bf16.gmra.mrb[20].mxu0 %vm1321_vm11, %v6250_v36  ;;  %v3056_v36 = vrot.slane %v3054_v59, 5  ;;  %v3034_v33 = vrot.slane %v3033_v14, 4 }
 0x206   : > { %6796 = vmatprep.mubr.msk.bf16.mxu0 %vm1321_vm11, %v6251_v39  ;;  %v3067_v39 = vor.u32 %v3066_v63, %v3062_v29 }
 0x207   : > { %v3057_v8 = vor.u32 %v3056_v36, %v3053_v22  ;;  %v3039_v2 = vsel %vm7692_vm10, %v3034_v33, %v3038_v60 }
 0x208   : > { %v6093_v28 = vcombine.low %v3039_v2, %v3049_v23  ;;  %v3068_v43 = vrot.slane %v3067_v39, 4 }
 0x209   : > { %v3058_v13 = vrot.slane %v3057_v8, 4 }
 0x20a   : > { %v3073_v58 = vsel %vm7692_vm10, %v3068_v43, %v3072_v12 }
 0x20b   : > { %6657 = vmatmul.mubr.msk.bf16.gmra.mrb[20].mxu1 %vm1321_vm11, %v6090_v27  ;;  %v3063_v38 = vsel %vm7692_vm10, %v3058_v13, %v3062_v29 }
 0x20c   : > { %6660 = vmatprep.mubr.msk.bf16.mxu1 %vm1321_vm11, %v6091_v3 }
 0x20d   : > { %6797 = vmatmul.mubr.msk.bf16.gmra.mrb[24].mxu0 %vm1321_vm11, %v6252_v48  ;;  %v6094_v48 = vcombine.low %v3063_v38, %v3073_v58 }
 0x20e   : > { %6800 = vmatprep.mubr.msk.bf16.mxu0 %vm1321_vm11, %v6253_v7 }
 0x213   : > { %6661 = vmatmul.mubr.msk.bf16.gmra.mrb[24].mxu1 %vm1321_vm11, %v6092_v46 }
 0x214   : > { %6664 = vmatprep.mubr.msk.bf16.mxu1 %vm1321_vm11, %v6093_v28 }
 0x215   : > { %6801 = vmatmul.mubr.msk.bf16.gmra.mrb[28].mxu0 %vm1321_vm11, %v6254_v45 }
 0x21b   : > { %6665 = vmatmul.mubr.msk.bf16.gmra.mrb[28].mxu1 %vm1321_vm11, %v6094_v48 }
 0x296   : > { %v6604_v35 = vpop.f32.mrb[0].mxu1 }
 0x297   : > { %v2483_v10 = vpop.f32.mrb[1].mxu1 }
 0x298   : > { %v6605_v18 = vpop.f32.mrb[2].mxu1 }
 0x299   : > { %v2486_v26 = vpop.f32.mrb[3].mxu1 }
 0x29e   : > { %v6608_v19 = vpop.f32.mrb[4].mxu1 }
 0x29f   : > { %v2499_v17 = vpop.f32.mrb[5].mxu1 }
 0x2a0   : > { %v6609_v55 = vpop.f32.mrb[6].mxu1 }
 0x2a1   : > { %v2502_v15 = vpop.f32.mrb[7].mxu1 }
 0x2a6   : > { %v9345_v60 = vpop.f32.mrb[8].mxu1 }
 0x2a7   : > { %v9347_v34 = vpop.f32.mrb[9].mxu1 }
 0x2a8   : > { %v9349_v6 = vpop.f32.mrb[10].mxu1 }
 0x2a9   : > { %v9351_v50 = vpop.f32.mrb[11].mxu1 }
 0x2ae   : > { %v9353_v16 = vpop.f32.mrb[12].mxu1 }
 0x2af   : > { %v9355_v45 = vpop.f32.mrb[13].mxu1 }
 0x2b0   : > { %v9357_v37 = vpop.f32.mrb[14].mxu1  ;;  %v6774_v20 = vpop.f32.mrb[0].mxu0 }
 0x2b1   : > { %v9361_v42 = vpop.f32.mrb[15].mxu1  ;;  %v6806_v54 = vadd.f32 %v6774_v20, %v6604_v35  ;;  %v5234_v57 = vpop.f32.mrb[1].mxu0 }
 0x2b2   : > { %v6807_v1 = vadd.f32 %v5234_v57, %v2483_v10  ;;  %v6775_v9 = vpop.f32.mrb[2].mxu0 }
 0x2b3   : > { %v5401_v32 = vadd.f32 %v6806_v54, %v9359_v30  ;;  %v6808_v4 = vadd.f32 %v6775_v9, %v6605_v18  ;;  %v5237_v40 = vpop.f32.mrb[3].mxu0 }
 0x2b4   : > { %v5399_v59 = vadd.f32 %v6807_v1, %v9359_v30  ;;  %v6809_v47 = vadd.f32 %v5237_v40, %v2486_v26 }
 0x2b5   : > { %v6314_v49 = vpack.c.bf16 %v5401_v32, %v5401_v32  ;;  %v5402_v52 = vadd.f32 %v6808_v4, %v9359_v30  ;;  %v5662_v31 = vmul.f32 %v5401_v32, %v5401_v32  ;;  %v5594_v63 = vsel %vm1321_vm11, %v5401_v32, 0.0 }
 0x2b6   : > { %v6312_v14 = vpack.c.bf16 %v5399_v59, %v5399_v59  ;;  %v5660_v62 = vmul.f32 %v5399_v59, %v5399_v59  ;;  %v5400_v53 = vadd.f32 %v6809_v47, %v9359_v30  ;;  %v5591_v3 = vsel %vm1321_vm11, %v5399_v59, 0.0 }
 0x2b7   : > { %5561 = vst.msk [vmem:[%s9369_s21 + $0x8] sm:$0xf] %vm287_vm0, %v6314_v49  ;;  %v6315_v27 = vpack.c.bf16 %v5402_v52, %v5402_v52  ;;  %v5663_v24 = vmul.f32 %v5402_v52, %v5402_v52  ;;  %v5695_v5 = vsel %vm1321_vm11, %v5662_v31, 0.0  ;;  %v5596_v46 = vsel %vm1321_vm11, %v5402_v52, 0.0 }
 0x2b8   : > { %5559 = vst.msk [vmem:[%s9369_s21] sm:$0xf] %vm287_vm0, %v6312_v14  ;;  %v6313_v25 = vpack.c.bf16 %v5400_v53, %v5400_v53  ;;  %v5592_v51 = vsel %vm1321_vm11, %v5400_v53, 0.0  ;;  %v5661_v56 = vmul.f32 %v5400_v53, %v5400_v53  ;;  %v6778_v44 = vpop.f32.mrb[4].mxu0  ;;  %v5692_v33 = vsel %vm1321_vm11, %v5660_v62, 0.0 }
 0x2b9   : > { %5562 = vst.msk [vmem:[%s9369_s21 + $0xc] sm:$0xf] %vm287_vm0, %v6315_v27  ;;  %v5593_v22 = vadd.f32 %v5592_v51, %v5591_v3  ;;  %v6810_v36 = vadd.f32 %v6778_v44, %v6608_v19  ;;  %v5250_v29 = vpop.f32.mrb[5].mxu0  ;;  %v5697_v28 = vsel %vm1321_vm11, %v5663_v24, 0.0 }
 0x2ba   : > { %5560 = vst.msk [vmem:[%s9369_s21 + $0x4] sm:$0xf] %vm287_vm0, %v6313_v25  ;;  %v5693_v41 = vsel %vm1321_vm11, %v5661_v56, 0.0  ;;  %v6811_v11 = vadd.f32 %v5250_v29, %v2499_v17  ;;  %v6779_v7 = vpop.f32.mrb[6].mxu0 }
 0x2bb   : > { %v5595_v21 = vadd.f32 %v5594_v63, %v5593_v22  ;;  %v5694_v0 = vadd.f32 %v5693_v41, %v5692_v33  ;;  %v5405_v8 = vadd.f32 %v6810_v36, %v9359_v30  ;;  %v6812_v39 = vadd.f32 %v6779_v7, %v6609_v55  ;;  %v5253_v61 = vpop.f32.mrb[7].mxu0 }
 0x2bc   : > { %v5403_v2 = vadd.f32 %v6811_v11, %v9359_v30  ;;  %v6813_v23 = vadd.f32 %v5253_v61, %v2502_v15 }
 0x2bd   : > { %v5696_v13 = vadd.f32 %v5695_v5, %v5694_v0  ;;  %v6318_v43 = vpack.c.bf16 %v5405_v8, %v5405_v8  ;;  %v5597_v38 = vadd.f32 %v5596_v46, %v5595_v21  ;;  %v5406_v10 = vadd.f32 %v6812_v39, %v9359_v30 }
 0x2be   : > { %v6316_v12 = vpack.c.bf16 %v5403_v2, %v5403_v2  ;;  %v5598_v58 = vsel %vm1321_vm11, %v5403_v2, 0.0  ;;  %v5664_v48 = vmul.f32 %v5403_v2, %v5403_v2  ;;  %v5404_v18 = vadd.f32 %v6813_v23, %v9359_v30 }
 0x2bf   : > { %5565 = vst.msk [vmem:[%s9369_s21 + $0x18] sm:$0xf] %vm287_vm0, %v6318_v43  ;;  %v5698_v35 = vadd.f32 %v5697_v28, %v5696_v13  ;;  %v5599_v26 = vadd.f32 %v5598_v58, %v5597_v38  ;;  %v5666_v55 = vmul.f32 %v5405_v8, %v5405_v8  ;;  %v6319_v20 = vpack.c.bf16 %v5406_v10, %v5406_v10 }
 0x2c0   : > { %5563 = vst.msk [vmem:[%s9369_s21 + $0x10] sm:$0xf] %vm287_vm0, %v6316_v12  ;;  %v5699_v19 = vsel %vm1321_vm11, %v5664_v48, 0.0  ;;  %v6782_v17 = vpop.f32.mrb[8].mxu0  ;;  %v6317_v57 = vpack.c.bf16 %v5404_v18, %v5404_v18  ;;  %v5600_v1 = vsel %vm1321_vm11, %v5404_v18, 0.0  ;;  %v5665_v9 = vmul.f32 %v5404_v18, %v5404_v18 }
 0x2c1   : > { %v5700_v15 = vadd.f32 %v5699_v19, %v5698_v35  ;;  %v5266_v54 = vpop.f32.mrb[9].mxu0  ;;  %v6814_v32 = vadd.f32 %v6782_v17, %v9345_v60  ;;  %v5602_v40 = vsel %vm1321_vm11, %v5405_v8, 0.0  ;;  %5566 = vst.msk [vmem:[%s9369_s21 + $0x1c] sm:$0xf] %vm287_vm0, %v6319_v20  ;;  %v5601_v59 = vadd.f32 %v5600_v1, %v5599_v26 }
 0x2c2   : > { %v6783_v4 = vpop.f32.mrb[10].mxu0  ;;  %v6815_v47 = vadd.f32 %v5266_v54, %v9347_v34  ;;  %v5667_v14 = vmul.f32 %v5406_v10, %v5406_v10  ;;  %5564 = vst.msk [vmem:[%s9369_s21 + $0x14] sm:$0xf] %vm287_vm0, %v6317_v57  ;;  %v5701_v62 = vsel %vm1321_vm11, %v5665_v9, 0.0  ;;  %v5703_v34 = vsel %vm1321_vm11, %v5666_v55, 0.0 }
 0x2c3   : > { %v6816_v49 = vadd.f32 %v6783_v4, %v9349_v6  ;;  %v5269_v52 = vpop.f32.mrb[11].mxu0  ;;  %v5409_v53 = vadd.f32 %v6814_v32, %v9359_v30  ;;  %v5603_v31 = vadd.f32 %v5602_v40, %v5601_v59  ;;  %v5702_v27 = vadd.f32 %v5701_v62, %v5700_v15 }
 0x2c4   : > { %v6817_v60 = vadd.f32 %v5269_v52, %v9351_v50  ;;  %v5407_v3 = vadd.f32 %v6815_v47, %v9359_v30  ;;  %v5604_v6 = vsel %vm1321_vm11, %v5406_v10, 0.0  ;;  %v5705_v36 = vsel %vm1321_vm11, %v5667_v14, 0.0 }
 0x2c5   : > { %v5410_v25 = vadd.f32 %v6816_v49, %v9359_v30  ;;  %v6322_v51 = vpack.c.bf16 %v5409_v53, %v5409_v53  ;;  %v5704_v44 = vadd.f32 %v5703_v34, %v5702_v27  ;;  %v5605_v22 = vadd.f32 %v5604_v6, %v5603_v31 }
 0x2c6   : > { %v5408_v56 = vadd.f32 %v6817_v60, %v9359_v30  ;;  %v6320_v24 = vpack.c.bf16 %v5407_v3, %v5407_v3  ;;  %v5606_v50 = vsel %vm1321_vm11, %v5407_v3, 0.0  ;;  %v5610_v29 = vsel %vm1321_vm11, %v5409_v53, 0.0 }
 0x2c7   : > { %5569 = vst.msk [vmem:[%s9369_s21 + $0x28] sm:$0xf] %vm287_vm0, %v6322_v51  ;;  %v5668_v63 = vmul.f32 %v5407_v3, %v5407_v3  ;;  %v6323_v33 = vpack.c.bf16 %v5410_v25, %v5410_v25  ;;  %v5670_v11 = vmul.f32 %v5409_v53, %v5409_v53  ;;  %v5607_v7 = vadd.f32 %v5606_v50, %v5605_v22 }
 0x2c8   : > { %v6786_v41 = vpop.f32.mrb[12].mxu0  ;;  %5567 = vst.msk [vmem:[%s9369_s21 + $0x20] sm:$0xf] %vm287_vm0, %v6320_v24  ;;  %v5706_v21 = vadd.f32 %v5705_v36, %v5704_v44  ;;  %v6321_v0 = vpack.c.bf16 %v5408_v56, %v5408_v56  ;;  %v5608_v61 = vsel %vm1321_vm11, %v5408_v56, 0.0  ;;  %v5669_v5 = vmul.f32 %v5408_v56, %v5408_v56 }
 0x2c9   : > { %v5282_v8 = vpop.f32.mrb[13].mxu0  ;;  %v5707_v39 = vsel %vm1321_vm11, %v5668_v63, 0.0  ;;  %5570 = vst.msk [vmem:[%s9369_s21 + $0x2c] sm:$0xf] %vm287_vm0, %v6323_v33  ;;  %v6818_v2 = vadd.f32 %v6786_v41, %v9353_v16  ;;  %v5671_v28 = vmul.f32 %v5410_v25, %v5410_v25  ;;  %v5609_v13 = vadd.f32 %v5608_v61, %v5607_v7 }
 0x2ca   : > { %v6787_v23 = vpop.f32.mrb[14].mxu0  ;;  %v5708_v46 = vadd.f32 %v5707_v39, %v5706_v21  ;;  %5568 = vst.msk [vmem:[%s9369_s21 + $0x24] sm:$0xf] %vm287_vm0, %v6321_v0  ;;  %v6819_v43 = vadd.f32 %v5282_v8, %v9355_v45  ;;  %v5709_v38 = vsel %vm1321_vm11, %v5669_v5, 0.0  ;;  %v5711_v26 = vsel %vm1321_vm11, %v5670_v11, 0.0 }
 0x2cb   : > { %v5285_v12 = vpop.f32.mrb[15].mxu0  ;;  %v5413_v58 = vadd.f32 %v6818_v2, %v9359_v30  ;;  %v6820_v48 = vadd.f32 %v6787_v23, %v9357_v37  ;;  %v5611_v10 = vadd.f32 %v5610_v29, %v5609_v13  ;;  %v5612_v19 = vsel %vm1321_vm11, %v5410_v25, 0.0 }
 0x2cc   : > { %v6821_v35 = vadd.f32 %v5285_v12, %v9361_v42  ;;  %v5710_v16 = vadd.f32 %v5709_v38, %v5708_v46  ;;  %v5411_v18 = vadd.f32 %v6819_v43, %v9359_v30  ;;  %v5713_v42 = vsel %vm1321_vm11, %v5671_v28, 0.0 }
 0x2cd   : > { %v6326_v45 = vpack.c.bf16 %v5413_v58, %v5413_v58  ;;  %v5414_v17 = vadd.f32 %v6820_v48, %v9359_v30  ;;  %v5613_v20 = vadd.f32 %v5612_v19, %v5611_v10  ;;  %v5674_v53 = vmul.f32 %v5413_v58, %v5413_v58 }
 0x2ce   : > { %v5712_v55 = vadd.f32 %v5711_v26, %v5710_v16  ;;  %v6324_v15 = vpack.c.bf16 %v5411_v18, %v5411_v18  ;;  %v5614_v37 = vsel %vm1321_vm11, %v5411_v18, 0.0  ;;  %v5672_v54 = vmul.f32 %v5411_v18, %v5411_v18 }
 0x2cf   : > { %5573 = vst.msk [vmem:[%s9369_s21 + $0x38] sm:$0xf] %vm287_vm0, %v6326_v45  ;;  %v6327_v57 = vpack.c.bf16 %v5414_v17, %v5414_v17  ;;  %v5615_v9 = vadd.f32 %v5614_v37, %v5613_v20  ;;  %v5412_v4 = vadd.f32 %v6821_v35, %v9359_v30  ;;  %v5618_v27 = vsel %vm1321_vm11, %v5413_v58, 0.0 }
 0x2d0   : > { %v6790_v1 = vpop.f32.mrb[16].mxu0  ;;  %5571 = vst.msk [vmem:[%s9369_s21 + $0x30] sm:$0xf] %vm287_vm0, %v6324_v15  ;;  %v5714_v32 = vadd.f32 %v5713_v42, %v5712_v55  ;;  %v5715_v59 = vsel %vm1321_vm11, %v5672_v54, 0.0  ;;  %v5675_v3 = vmul.f32 %v5414_v17, %v5414_v17  ;;  %v5620_v51 = vsel %vm1321_vm11, %v5414_v17, 0.0 }
 0x2d1   : > { %v5298_v40 = vpop.f32.mrb[17].mxu0  ;;  %5574 = vst.msk [vmem:[%s9369_s21 + $0x3c] sm:$0xf] %vm287_vm0, %v6327_v57  ;;  %v6325_v52 = vpack.c.bf16 %v5412_v4, %v5412_v4  ;;  %v5616_v14 = vsel %vm1321_vm11, %v5412_v4, 0.0  ;;  %v5673_v31 = vmul.f32 %v5412_v4, %v5412_v4  ;;  %v5719_v22 = vsel %vm1321_vm11, %v5674_v53, 0.0 }
 0x2d2   : > { %v6791_v47 = vpop.f32.mrb[18].mxu0  ;;  %v5716_v49 = vadd.f32 %v5715_v59, %v5714_v32  ;;  %v5617_v60 = vadd.f32 %v5616_v14, %v5615_v9  ;;  %v5721_v0 = vsel %vm1321_vm11, %v5675_v3, 0.0 }
 0x2d3   : > { %v5301_v62 = vpop.f32.mrb[19].mxu0  ;;  %5572 = vst.msk [vmem:[%s9369_s21 + $0x34] sm:$0xf] %vm287_vm0, %v6325_v52  ;;  %v5717_v34 = vsel %vm1321_vm11, %v5673_v31, 0.0 }
 0x2d4   : > { %v5619_v25 = vadd.f32 %v5618_v27, %v5617_v60  ;;  %v5718_v56 = vadd.f32 %v5717_v34, %v5716_v49 }
 0x2d6   : > { %v6654_v6 = vpop.f32.mrb[16].mxu1  ;;  %v5621_v29 = vadd.f32 %v5620_v51, %v5619_v25  ;;  %v5720_v33 = vadd.f32 %v5719_v22, %v5718_v56 }
 0x2d7   : > { %v3273_v44 = vpop.f32.mrb[17].mxu1  ;;  %v6822_v24 = vadd.f32 %v6790_v1, %v6654_v6 }
 0x2d8   : > { %v6655_v50 = vpop.f32.mrb[18].mxu1  ;;  %v6823_v36 = vadd.f32 %v5298_v40, %v3273_v44  ;;  %v6794_v63 = vpop.f32.mrb[20].mxu0  ;;  %v5722_v2 = vadd.f32 %v5721_v0, %v5720_v33 }
 0x2d9   : > { %v5417_v41 = vadd.f32 %v6822_v24, %v9359_v30  ;;  %v3276_v11 = vpop.f32.mrb[19].mxu1  ;;  %v6824_v7 = vadd.f32 %v6791_v47, %v6655_v50  ;;  %v5314_v21 = vpop.f32.mrb[21].mxu0 }
 0x2da   : > { %v5415_v8 = vadd.f32 %v6823_v36, %v9359_v30  ;;  %v6825_v39 = vadd.f32 %v5301_v62, %v3276_v11  ;;  %v6795_v61 = vpop.f32.mrb[22].mxu0 }
 0x2db   : > { %v6330_v5 = vpack.c.bf16 %v5417_v41, %v5417_v41  ;;  %v5317_v23 = vpop.f32.mrb[23].mxu0  ;;  %v5418_v43 = vadd.f32 %v6824_v7, %v9359_v30  ;;  %v5678_v58 = vmul.f32 %v5417_v41, %v5417_v41  ;;  %v5626_v54 = vsel %vm1321_vm11, %v5417_v41, 0.0 }
 0x2dc   : > { %v6328_v46 = vpack.c.bf16 %v5415_v8, %v5415_v8  ;;  %v5622_v28 = vsel %vm1321_vm11, %v5415_v8, 0.0  ;;  %v5676_v13 = vmul.f32 %v5415_v8, %v5415_v8  ;;  %v5416_v38 = vadd.f32 %v6825_v39, %v9359_v30 }
 0x2dd   : > { %5577 = vst.msk [vmem:[%s9369_s21 + $0x48] sm:$0xf] %vm287_vm0, %v6330_v5  ;;  %v5623_v12 = vadd.f32 %v5622_v28, %v5621_v29  ;;  %v6331_v35 = vpack.c.bf16 %v5418_v43, %v5418_v43  ;;  %v5679_v17 = vmul.f32 %v5418_v43, %v5418_v43  ;;  %v5727_v52 = vsel %vm1321_vm11, %v5678_v58, 0.0 }
 0x2de   : > { %5575 = vst.msk [vmem:[%s9369_s21 + $0x40] sm:$0xf] %vm287_vm0, %v6328_v46  ;;  %v5723_v48 = vsel %vm1321_vm11, %v5676_v13, 0.0  ;;  %v6658_v10 = vpop.f32.mrb[20].mxu1  ;;  %v6329_v18 = vpack.c.bf16 %v5416_v38, %v5416_v38  ;;  %v5624_v26 = vsel %vm1321_vm11, %v5416_v38, 0.0  ;;  %v5677_v19 = vmul.f32 %v5416_v38, %v5416_v38 }
 0x2df   : > { %v5724_v16 = vadd.f32 %v5723_v48, %v5722_v2  ;;  %v3289_v45 = vpop.f32.mrb[21].mxu1  ;;  %5578 = vst.msk [vmem:[%s9369_s21 + $0x4c] sm:$0xf] %vm287_vm0, %v6331_v35  ;;  %v5625_v55 = vadd.f32 %v5624_v26, %v5623_v12  ;;  %v6826_v15 = vadd.f32 %v6794_v63, %v6658_v10  ;;  %v5628_v60 = vsel %vm1321_vm11, %v5418_v43, 0.0 }
 0x2e0   : > { %v6659_v20 = vpop.f32.mrb[22].mxu1  ;;  %v6827_v37 = vadd.f32 %v5314_v21, %v3289_v45  ;;  %v6798_v42 = vpop.f32.mrb[24].mxu0  ;;  %5576 = vst.msk [vmem:[%s9369_s21 + $0x44] sm:$0xf] %vm287_vm0, %v6329_v18  ;;  %v5725_v57 = vsel %vm1321_vm11, %v5677_v19, 0.0  ;;  %v5729_v31 = vsel %vm1321_vm11, %v5679_v17, 0.0 }
 0x2e1   : > { %v3292_v1 = vpop.f32.mrb[23].mxu1  ;;  %v6828_v9 = vadd.f32 %v6795_v61, %v6659_v20  ;;  %v5330_v32 = vpop.f32.mrb[25].mxu0  ;;  %v5627_v4 = vadd.f32 %v5626_v54, %v5625_v55  ;;  %v5726_v40 = vadd.f32 %v5725_v57, %v5724_v16  ;;  %v5421_v59 = vadd.f32 %v6826_v15, %v9359_v30 }
 0x2e2   : > { %v5419_v47 = vadd.f32 %v6827_v37, %v9359_v30  ;;  %v6799_v49 = vpop.f32.mrb[26].mxu0  ;;  %v6829_v62 = vadd.f32 %v5317_v23, %v3292_v1 }
 0x2e3   : > { %v5422_v14 = vadd.f32 %v6828_v9, %v9359_v30  ;;  %v5333_v53 = vpop.f32.mrb[27].mxu0  ;;  %v5728_v27 = vadd.f32 %v5727_v52, %v5726_v40  ;;  %v6334_v3 = vpack.c.bf16 %v5421_v59, %v5421_v59  ;;  %v5629_v34 = vadd.f32 %v5628_v60, %v5627_v4 }
 0x2e4   : > { %v6332_v25 = vpack.c.bf16 %v5419_v47, %v5419_v47  ;;  %v5630_v6 = vsel %vm1321_vm11, %v5419_v47, 0.0  ;;  %v5680_v51 = vmul.f32 %v5419_v47, %v5419_v47  ;;  %v5420_v36 = vadd.f32 %v6829_v62, %v9359_v30 }
 0x2e5   : > { %5581 = vst.msk [vmem:[%s9369_s21 + $0x58] sm:$0xf] %vm287_vm0, %v6334_v3  ;;  %v5730_v56 = vadd.f32 %v5729_v31, %v5728_v27  ;;  %v6335_v44 = vpack.c.bf16 %v5422_v14, %v5422_v14  ;;  %v5631_v22 = vadd.f32 %v5630_v6, %v5629_v34  ;;  %v5682_v63 = vmul.f32 %v5421_v59, %v5421_v59 }
 0x2e6   : > { %v6662_v24 = vpop.f32.mrb[24].mxu1  ;;  %5579 = vst.msk [vmem:[%s9369_s21 + $0x50] sm:$0xf] %vm287_vm0, %v6332_v25  ;;  %v5731_v50 = vsel %vm1321_vm11, %v5680_v51, 0.0  ;;  %v6333_v0 = vpack.c.bf16 %v5420_v36, %v5420_v36  ;;  %v5632_v8 = vsel %vm1321_vm11, %v5420_v36, 0.0  ;;  %v5681_v39 = vmul.f32 %v5420_v36, %v5420_v36 }
 0x2e7   : > { %v3305_v29 = vpop.f32.mrb[25].mxu1  ;;  %v5732_v33 = vadd.f32 %v5731_v50, %v5730_v56  ;;  %5582 = vst.msk [vmem:[%s9369_s21 + $0x5c] sm:$0xf] %vm287_vm0, %v6335_v44  ;;  %v6830_v41 = vadd.f32 %v6798_v42, %v6662_v24  ;;  %v5633_v2 = vadd.f32 %v5632_v8, %v5631_v22  ;;  %v5634_v43 = vsel %vm1321_vm11, %v5421_v59, 0.0 }
 0x2e8   : > { %v6663_v11 = vpop.f32.mrb[26].mxu1  ;;  %v6831_v7 = vadd.f32 %v5330_v32, %v3305_v29  ;;  %v6802_v21 = vpop.f32.mrb[28].mxu0  ;;  %v5683_v12 = vmul.f32 %v5422_v14, %v5422_v14  ;;  %5580 = vst.msk [vmem:[%s9369_s21 + $0x54] sm:$0xf] %vm287_vm0, %v6333_v0  ;;  %v5733_v38 = vsel %vm1321_vm11, %v5681_v39, 0.0  ;;  %v5735_v35 = vsel %vm1321_vm11, %v5682_v63, 0.0 }
 0x2e9   : > { %v3308_v61 = vpop.f32.mrb[27].mxu1  ;;  %v5346_v5 = vpop.f32.mrb[29].mxu0  ;;  %v5425_v23 = vadd.f32 %v6830_v41, %v9359_v30  ;;  %v6832_v28 = vadd.f32 %v6799_v49, %v6663_v11  ;;  %v5635_v10 = vadd.f32 %v5634_v43, %v5633_v2  ;;  %v5734_v16 = vadd.f32 %v5733_v38, %v5732_v33 }
 0x2ea   : > { %v5423_v46 = vadd.f32 %v6831_v7, %v9359_v30  ;;  %v6803_v13 = vpop.f32.mrb[30].mxu0  ;;  %v6833_v58 = vadd.f32 %v5333_v53, %v3308_v61  ;;  %v5636_v26 = vsel %vm1321_vm11, %v5422_v14, 0.0  ;;  %v5737_v54 = vsel %vm1321_vm11, %v5683_v12, 0.0 }
 0x2eb   : > { %v5349_v48 = vpop.f32.mrb[31].mxu0  ;;  %v6338_v18 = vpack.c.bf16 %v5425_v23, %v5425_v23  ;;  %v5736_v55 = vadd.f32 %v5735_v35, %v5734_v16  ;;  %v5637_v15 = vadd.f32 %v5636_v26, %v5635_v10  ;;  %v5426_v20 = vadd.f32 %v6832_v28, %v9359_v30 }
 0x2ec   : > { %v6336_v19 = vpack.c.bf16 %v5423_v46, %v5423_v46  ;;  %v5638_v45 = vsel %vm1321_vm11, %v5423_v46, 0.0  ;;  %v5684_v17 = vmul.f32 %v5423_v46, %v5423_v46  ;;  %v5424_v37 = vadd.f32 %v6833_v58, %v9359_v30 }
 0x2ed   : > { %5585 = vst.msk [vmem:[%s9369_s21 + $0x68] sm:$0xf] %vm287_vm0, %v6338_v18  ;;  %v5686_v32 = vmul.f32 %v5425_v23, %v5425_v23  ;;  %v5639_v4 = vadd.f32 %v5638_v45, %v5637_v15  ;;  %v5738_v40 = vadd.f32 %v5737_v54, %v5736_v55  ;;  %v6339_v59 = vpack.c.bf16 %v5426_v20, %v5426_v20 }
 0x2ee   : > { %v6666_v42 = vpop.f32.mrb[28].mxu1  ;;  %5583 = vst.msk [vmem:[%s9369_s21 + $0x60] sm:$0xf] %vm287_vm0, %v6336_v19  ;;  %v5739_v57 = vsel %vm1321_vm11, %v5684_v17, 0.0  ;;  %v5642_v49 = vsel %vm1321_vm11, %v5425_v23, 0.0  ;;  %v6337_v52 = vpack.c.bf16 %v5424_v37, %v5424_v37  ;;  %v5640_v14 = vsel %vm1321_vm11, %v5424_v37, 0.0 }
 0x2ef   : > { %v3321_v1 = vpop.f32.mrb[29].mxu1  ;;  %v6834_v9 = vadd.f32 %v6802_v21, %v6666_v42  ;;  %v5685_v62 = vmul.f32 %v5424_v37, %v5424_v37  ;;  %v5740_v60 = vadd.f32 %v5739_v57, %v5738_v40  ;;  %5586 = vst.msk [vmem:[%s9369_s21 + $0x6c] sm:$0xf] %vm287_vm0, %v6339_v59  ;;  %v5641_v31 = vadd.f32 %v5640_v14, %v5639_v4 }
 0x2f0   : > { %v6667_v47 = vpop.f32.mrb[30].mxu1  ;;  %v6835_v3 = vadd.f32 %v5346_v5, %v3321_v1  ;;  %v5687_v25 = vmul.f32 %v5426_v20, %v5426_v20  ;;  %5584 = vst.msk [vmem:[%s9369_s21 + $0x64] sm:$0xf] %vm287_vm0, %v6337_v52  ;;  %v5743_v56 = vsel %vm1321_vm11, %v5686_v32, 0.0  ;;  %v5644_v50 = vsel %vm1321_vm11, %v5426_v20, 0.0 }
 0x2f1   : > { %v3324_v53 = vpop.f32.mrb[31].mxu1  ;;  %v5429_v27 = vadd.f32 %v6834_v9, %v9359_v30  ;;  %v5741_v34 = vsel %vm1321_vm11, %v5685_v62, 0.0  ;;  %v6836_v6 = vadd.f32 %v6803_v13, %v6667_v47  ;;  %v5643_v44 = vadd.f32 %v5642_v49, %v5641_v31 }
 0x2f2   : > { %v6837_v51 = vadd.f32 %v5349_v48, %v3324_v53  ;;  %v5742_v24 = vadd.f32 %v5741_v34, %v5740_v60  ;;  %v5427_v36 = vadd.f32 %v6835_v3, %v9359_v30  ;;  %v5745_v11 = vsel %vm1321_vm11, %v5687_v25, 0.0 }
 0x2f3   : > { %v6342_v22 = vpack.c.bf16 %v5429_v27, %v5429_v27  ;;  %v5430_v29 = vadd.f32 %v6836_v6, %v9359_v30  ;;  %v5645_v41 = vadd.f32 %v5644_v50, %v5643_v44  ;;  %v5690_v23 = vmul.f32 %v5429_v27, %v5429_v27 }
 0x2f4   : > { %v5428_v63 = vadd.f32 %v6837_v51, %v9359_v30  ;;  %v5744_v33 = vadd.f32 %v5743_v56, %v5742_v24  ;;  %v6340_v7 = vpack.c.bf16 %v5427_v36, %v5427_v36  ;;  %v5646_v21 = vsel %vm1321_vm11, %v5427_v36, 0.0 }
 0x2f5   : > { %5589 = vst.msk [vmem:[%s9369_s21 + $0x78] sm:$0xf] %vm287_vm0, %v6342_v22  ;;  %v5688_v0 = vmul.f32 %v5427_v36, %v5427_v36  ;;  %v5647_v8 = vadd.f32 %v5646_v21, %v5645_v41  ;;  %v6343_v61 = vpack.c.bf16 %v5430_v29, %v5430_v29  ;;  %v5650_v43 = vsel %vm1321_vm11, %v5429_v27, 0.0 }
 0x2f6   : > { %v5746_v39 = vadd.f32 %v5745_v11, %v5744_v33  ;;  %5587 = vst.msk [vmem:[%s9369_s21 + $0x70] sm:$0xf] %vm287_vm0, %v6340_v7  ;;  %v6341_v5 = vpack.c.bf16 %v5428_v63, %v5428_v63  ;;  %v5648_v2 = vsel %vm1321_vm11, %v5428_v63, 0.0  ;;  %v5689_v13 = vmul.f32 %v5428_v63, %v5428_v63 }
 0x2f7   : > { %v5747_v30 = vsel %vm1321_vm11, %v5688_v0, 0.0  ;;  %5590 = vst.msk [vmem:[%s9369_s21 + $0x7c] sm:$0xf] %vm287_vm0, %v6343_v61  ;;  %v5649_v28 = vadd.f32 %v5648_v2, %v5647_v8  ;;  %v5691_v12 = vmul.f32 %v5430_v29, %v5430_v29 }
 0x2f8   : > { %v5748_v46 = vadd.f32 %v5747_v30, %v5746_v39  ;;  %5588 = vst.msk [vmem:[%s9369_s21 + $0x74] sm:$0xf] %vm287_vm0, %v6341_v5  ;;  %v5749_v58 = vsel %vm1321_vm11, %v5689_v13, 0.0 }
 0x2f9   : > { %v5651_v38 = vadd.f32 %v5650_v43, %v5649_v28 }
 0x2fa   : > { %7338 = shalt.err (!%p7335_p2)
}
 0x2fb   : > { %s7339_s30 = scalar_lea.hbm %s9527_s25, 2048  ;;  %s7343_s26 = scalar_lea.hbm %s9620_s3, 4096 }
 0x2fc   : > { %p7340_p13 = scmp.ne.s32.totalorder %s9527_s25, %s7339_s30  ;;  %p7344_p4 = scmp.lt.u32.totalorder %s9527_s25, %s9620_s3 }
 0x2fd   : > { %p7345_p5 = scmp.lt.u32.totalorder %s7343_s26, %s7339_s30  ;;  %p7347_p11 = scmp.lt.u32.totalorder %s7339_s30, %s9527_s25 }
 0x2fe   : > { %p7341_p6 = pnand %p7340_p13, %p9737_p0 }
 0x2ff   : > { %p7346_p8 = por %p7345_p5, %p7344_p4 }
 0x300   : > { %p7342_p10 = pneg %p7341_p6 }
 0x301   : > { %p7348_p1 = por %p7347_p11, %p7346_p8 }
 0x303   : > { %p7349_p3 = pnand %p7348_p1, %p7342_p10 }
 0x305   : > { %7352 = shalt.err (!%p7349_p3)
}
 0x306   : > { %s7438_s23 = smov 64   ;;  %s7439_s5 = smov 4   ;;  %v5652_v48 = vsel %vm1321_vm11, %v5430_v29, 0.0  ;;  %v5750_v35 = vadd.f32 %v5749_v58, %v5748_v46  ;;  %v5751_v10 = vsel %vm1321_vm11, %v5690_v23, 0.0  ;;  %v5753_v26 = vsel %vm1321_vm11, %v5691_v12, 0.0 }
 0x307   : > { %7082 = dma.vmem_to_hbm [thread:$0]  (%p9737_p0), %s9529_s29, 2048, %s9527_s25, %s5766_s20, %s7438_s23, %s7438_s23, %s7439_s5   ;;  %v5653_v16 = vadd.f32 %v5652_v48, %v5651_v38  ;;  %vm5761_vm0 = vcmask 1040384   ;;  %vm5763_vm2 = vcmask 25600  }
 0x308   : > { %v5752_v18 = vadd.f32 %v5751_v10, %v5750_v35  ;;  %s5934_s6 = sshll.u32 %s7639_s8, 1  ;;  %s6308_s29 = sshll.u32 %s7487_s19, 5 }
 0x309   : > { %v5654_v19 = vrot.slane %v5653_v16, 4  ;;  %s253_s25 = scalar_lea.vmem [#allocation10], %s5934_s6  ;;  %s9573_s24 = scalar_lea.hbm %s9621_s4, %s6308_s29 }
 0x30a   : > { %v5754_v45 = vadd.f32 %v5753_v26, %v5752_v18  ;;  %s5800_s20 = sshll.u32 %s253_s25, 4  ;;  %s5771_s27 = scalar_lea.sflag [#allocation11], %s7639_s8  ;;  %s9575_s20 = int_to_ptr.vmem [resolvable:$true] %s5800_s20 }
 0x30b   : > { %v5655_v17 = vadd.f32 %v5654_v19, %v5653_v16  ;;  %s7353_s19 = scalar_lea.vmem %s9575_s20, 32  ;;  %s7440_s30 = smov [#allocation10]  }
 0x30c   : > { %v5755_v55 = vrot.slane %v5754_v45, 4  ;;  %p7354_p7 = scmp.ne.s32.totalorder %s9575_s20, %s7353_s19  ;;  %s7357_s7 = sshll.u32 %s7440_s30, 4  ;;  %s7358_s7 = int_to_ptr.vmem [resolvable:$false] %s7357_s7 }
 0x30d   : > { %v5656_v15 = vrot.slane %v5655_v17, 2  ;;  %s7359_s9 = scalar_lea.vmem %s7358_s7, 64  ;;  %p7360_p2 = scmp.lt.s32.totalorder %s9575_s20, %s7358_s7 }
 0x30e   : > { %v5756_v20 = vadd.f32 %v5755_v55, %v5754_v45  ;;  %p7355_p9 = pnand %p7354_p7, %p9737_p0  ;;  %p7361_p13 = scmp.lt.s32.totalorder %s7359_s9, %s7353_s19 }
 0x30f   : > { %v5657_v37 = vadd.f32 %v5656_v15, %v5655_v17 }
 0x310   : > { %v5757_v42 = vrot.slane %v5756_v20, 2  ;;  %p7356_p12 = pneg %p7355_p9  ;;  %p7362_p6 = por %p7361_p13, %p7360_p2 }
 0x311   : > { %v5658_v54 = vrot.slane %v5657_v37, 1 }
 0x312   : > { %v5758_v57 = vadd.f32 %v5757_v42, %v5756_v20  ;;  %p7363_p10 = pnand %p7362_p6, %p7356_p12 }
 0x313   : > { %v5659_v9 = vadd.f32 %v5658_v54, %v5657_v37 }
 0x314   : > { %v5759_v1 = vrot.slane %v5758_v57, 1 }
 0x316   : > { %v5760_v32 = vadd.f32 %v5759_v1, %v5758_v57 }
 0x318   : > { %v5762_v4 = vsel %vm5761_vm0, %v5659_v9, %v5760_v32 }
 0x319   : > { %5764 = vst.msk [vmem:[%s253_s25] sm:$0x3] %vm5763_vm2, %v5762_v4 }
 0x31a   : > { %7366 = shalt.err (!%p7363_p10)
}
 0x31b   : > { %s7367_s8 = scalar_lea.hbm %s9573_s24, 32  ;;  %s7371_s21 = scalar_lea.hbm %s9621_s4, 64 }
 0x31c   : > { %p7368_p4 = scmp.ne.s32.totalorder %s9573_s24, %s7367_s8  ;;  %p7372_p11 = scmp.lt.u32.totalorder %s9573_s24, %s9621_s4 }
 0x31d   : > { %p7373_p1 = scmp.lt.u32.totalorder %s7371_s21, %s7367_s8  ;;  %p7375_p7 = scmp.lt.u32.totalorder %s7367_s8, %s9573_s24 }
 0x31e   : > { %p7369_p5 = pnand %p7368_p4, %p9737_p0 }
 0x31f   : > { %p7374_p3 = por %p7373_p1, %p7372_p11 }
 0x320   : > { %p7370_p8 = pneg %p7369_p5 }
 0x321   : > { %p7376_p9 = por %p7375_p7, %p7374_p3 }
 0x323   : > { %p7377_p12 = pnand %p7376_p9, %p7370_p8 }
 0x325   : > { %7380 = shalt.err (!%p7377_p12)
}
 0x326   : > { %7083 = dma.vmem_to_hbm [thread:$0]  (%p9737_p0), %s9575_s20, 32, %s9573_s24, %s5771_s27  }
 0x327 PF: > { %s5812_s6 = sand.u32 1, %s7415_s15   ;;  %p9738_p2 = scmp.ne.s32.totalorder %s9647_s22, 0 }
 0x328   : > { %p9739_p13 = scmp.ge.s32.totalorder %s7427_s18, 2  ;;  %s5813_s29 = scalar_lea.sflag [#allocation5], %s5812_s6 }
 0x32a   : > { %p7098_p6 = pnand %p9739_p13, %p9738_p2 }
 0x32c   : > { %7406 = dma.done.wait (!%p7098_p6), %s5813_s29, 2048  }
 0x32d   : > { %7408 = vsyncadd (!%p7098_p6), %s5813_s29, 4294965248  ;;  %s5822_s25 = scalar_lea.sflag [#allocation11], %s5812_s6 }
 0x32e   : > { %7410 = dma.done.wait (!%p7098_p6), %s5822_s25, 32  }
 0x32f   : > { %7412 = vsyncadd (!%p7098_p6), %s5822_s25, 4294967264  ;;  %p22_p0 = scmp.ge.s32.totalorder %s7577_s10, 4   ;;  %s9740_s15 = smov %s7419_s16 }
 0x330   : > { %s9741_s16 = smov %s7423_s17  ;;  %s9742_s17 = smov %s7593_s13 }
 0x331   : > { %s9743_s18 = smov %s7577_s10  ;;  %24 = sbr.rel (!%p22_p0) target bundleno = 8 (0x8), region = 113 }
 0x338   :  { %5827 = vsyncpa [#allocation4], 1 }
 0x339   :  { %5829 = vsyncpa [#allocation4 + $0x1], 1 }
 0x33a   :  { %5830 = vsyncpa [#allocation7], 1 }
 0x33b   :  { %5831 = vsyncpa [#allocation5], 1 }
 0x33c   :  { %5833 = vsyncpa [#allocation5 + $0x1], 1 }
 0x33d   :  { %5834 = vsyncpa [#allocation11], 1 }
 0x33e   :  { %5836 = vsyncpa [#allocation11 + $0x1], 1 }

// kernel: resnet_basic_block.4
= control target key start
LH: loop header
LB: loop body
LE: loop exit
PB: predicated region body
PF: predicated region fallthrough
CT: control target
= control target key end

     0   :  { %12 = vsyncpa [#allocation4], 0  ;;  %s10375_s0 = inlined_call_operand.hbm [shape: bf16[2,256,4], index: 0, kind: input, shape index: {}]   ;;  %s10376_s1 = inlined_call_operand.hbm [shape: f32[1,4], index: 1, kind: input, shape index: {}]   ;;  %s10377_s2 = inlined_call_operand.hbm [shape: f32[1,4], index: 2, kind: input, shape index: {}]   ;;  %s10378_s3 = inlined_call_operand.hbm [shape: bf16[9,4,4], index: 3, kind: input, shape index: {}]   ;;  %s10379_s4 = inlined_call_operand.hbm [shape: f32[1,4], index: 4, kind: input, shape index: {}]   ;;  %s10380_s5 = inlined_call_operand.hbm [shape: bf16[2,256,4], index: 5, kind: output, shape index: {0}]   ;;  %s10381_s6 = inlined_call_operand.hbm [shape: f32[2,2,4], index: 6, kind: output, shape index: {1}]  }
   0x1   :  { %14 = vsyncpa [#allocation4 + $0x1], 0 }
   0x2   :  { %15 = vsyncpa [#allocation7], 0 }
   0x3   :  { %16 = vsyncpa [#allocation10], 0 }
   0x4   :  { %17 = vsyncpa [#allocation5], 0 }
   0x5   :  { %19 = vsyncpa [#allocation5 + $0x1], 0 }
   0x6   :  { %20 = vsyncpa [#allocation14], 0 }
   0x7   :  { %22 = vsyncpa [#allocation14 + $0x1], 0  ;;  %s8050_s21 = smov 0   ;;  %s8052_s22 = smov 0  }
   0x8   :  { %s8054_s23 = smov 0   ;;  %s8056_s24 = smov 0  }
   0x9 LB: > { %s8071_s25 = sadd.s32 4294967295, %s7999_s24   ;;  %s6257_s26 = sadd.s32 4294967294, %s7999_s24   ;;  %s7999_s24 = sphi %s8056_s24, %s10487_s24   ;;  %s7995_s23 = sphi %s8054_s23, %s10486_s23   ;;  %s7991_s22 = sphi %s8052_s22, %s10485_s22   ;;  %s7987_s21 = sphi %s8050_s21, %s10484_s21  }
   0xa   : > { %p48_p0 = scmp.ne.s32.totalorder %s7991_s22, %s7987_s21  ;;  %p10382_p1 = scmp.eq.s32.totalorder %s8071_s25, 0 }
   0xb   : > { %p162_p3 = scmp.eq.s32.totalorder %s6257_s26, 1  ;;  %p6258_p5 = scmp.ge.s32.totalorder %s7999_s24, 1 }
   0xc   : > { %p8080_p4 = por %p10382_p1, %p48_p0  ;;  %p195_p7 = scmp.lt.s32.totalorder %s7999_s24, 3 }
   0xd   : > { %p8085_p6 = por %p162_p3, %p48_p0  ;;  %s8001_s30 = smov [#allocation6]  }
   0xe   : > { %s10399_s27 = scalar_select %p8080_p4, 1, 0 }
   0xf   : > { %s10400_s28 = scalar_select %p8085_p6, 1, 0 }
  0x10   : > { %p8090_p8 = pnand %p6258_p5, %p195_p7  ;;  %s208_s7 = sshll.u32 %s8001_s30, 4  ;;  %s209_s7 = int_to_ptr.vmem [resolvable:$true] %s208_s7 }
  0x11   : > { %s8002_s8 = smov [#allocation9]   ;;  %s8003_s11 = smov [#allocation8]  }
  0x12   : > { %s10401_s29 = scalar_select %p8090_p8, 1, 0 }
  0x13   : > { %p7579_p10 = pneg %p8090_p8  ;;  %s229_s9 = sshll.u32 %s8002_s8, 4  ;;  %s8103_s9 = int_to_ptr.vmem [resolvable:$true] %s229_s9 }
  0x14   : > { %s8105_s12 = sshll.u32 %s8003_s11, 4  ;;  %s7751_s15 = scalar_lea.hbm %s10376_s1, 16  ;;  %s220_s12 = int_to_ptr.vmem [resolvable:$true] %s8105_s12 }
  0x15   : > { %p8099_p11 = pnand %p7579_p10, %p10382_p1  ;;  %p7752_p12 = scmp.ne.s32.totalorder %s10376_s1, %s7751_s15 }
  0x16   : > { %p7758_p5 = scmp.lt.u32.totalorder %s7751_s15, %s10376_s1 }
  0x17   : > { %p8115_p13 = pneg %p8099_p11 }
  0x19   : > { %p7754_p0 = pnand %p8115_p13, %p7752_p12 }
  0x1b   : > { %p7755_p3 = pneg %p7754_p0 }
  0x1d   : > { %p7760_p7 = pnand %p7758_p5, %p7755_p3 }
  0x1f   : > { %7763 = shalt.err (!%p7760_p7)
}
  0x20   : > { %s7764_s26 = scalar_lea.vmem %s209_s7, 16  ;;  %s7771_s30 = scalar_lea.vmem %s209_s7, 32 }
  0x21   : > { %p7765_p10 = scmp.ne.s32.totalorder %s209_s7, %s7764_s26  ;;  %p7772_p2 = scmp.lt.s32.totalorder %s209_s7, %s209_s7 }
  0x22   : > { %p7773_p6 = scmp.lt.s32.totalorder %s7771_s30, %s7764_s26 }
  0x23   : > { %p7767_p9 = pnand %p7765_p10, %p8115_p13 }
  0x24   : > { %p7774_p4 = por %p7773_p6, %p7772_p2 }
  0x25   : > { %p7768_p1 = pneg %p7767_p9 }
  0x27   : > { %p7775_p8 = pnand %p7774_p4, %p7768_p1 }
  0x29   : > { %7778 = shalt.err (!%p7775_p8)
}
  0x2a   : > { %7582 = dma.hbm_to_vmem [thread:$0]  (!%p8099_p11), %s10376_s1, 16, %s209_s7, [#allocation7]  }
  0x2b   : > { %s7779_s15 = scalar_lea.hbm %s10378_s3, 288 }
  0x2c   : > { %p7780_p9 = scmp.ne.s32.totalorder %s10378_s3, %s7779_s15  ;;  %p7786_p1 = scmp.lt.u32.totalorder %s7779_s15, %s10378_s3 }
  0x2e   : > { %p7782_p12 = pnand %p7780_p9, %p8115_p13 }
  0x30   : > { %p7783_p2 = pneg %p7782_p12 }
  0x32   : > { %p7788_p4 = pnand %p7786_p1, %p7783_p2 }
  0x34   : > { %7791 = shalt.err (!%p7788_p4)
}
  0x35   : > { %s7792_s7 = scalar_lea.vmem %s8103_s9, 288  ;;  %p7800_p3 = scmp.lt.s32.totalorder %s8103_s9, %s8103_s9 }
  0x36   : > { %p7793_p6 = scmp.ne.s32.totalorder %s8103_s9, %s7792_s7  ;;  %p7801_p5 = scmp.lt.s32.totalorder %s7792_s7, %s7792_s7 }
  0x38   : > { %p7795_p8 = pnand %p7793_p6, %p8115_p13  ;;  %p7802_p7 = por %p7801_p5, %p7800_p3 }
  0x3a   : > { %p7796_p0 = pneg %p7795_p8 }
  0x3c   : > { %p7803_p10 = pnand %p7802_p7, %p7796_p0 }
  0x3e   : > { %7806 = shalt.err (!%p7803_p10)
}
  0x3f   : > { %s8004_s26 = smov 32   ;;  %s8005_s30 = smov 2  }
  0x40   : > { %7588 = dma.hbm_to_vmem [thread:$0]  (!%p8099_p11), %s10378_s3, 288, %s8103_s9, [#allocation10], %s8004_s26, %s8004_s26, %s8005_s30  }
  0x41   : > { %s7807_s15 = scalar_lea.hbm %s10377_s2, 16 }
  0x42   : > { %p7808_p9 = scmp.ne.s32.totalorder %s10377_s2, %s7807_s15  ;;  %p7814_p1 = scmp.lt.u32.totalorder %s7807_s15, %s10377_s2 }
  0x44   : > { %p7810_p12 = pnand %p7808_p9, %p8115_p13 }
  0x46   : > { %p7811_p2 = pneg %p7810_p12 }
  0x48   : > { %p7816_p4 = pnand %p7814_p1, %p7811_p2 }
  0x4a   : > { %7819 = shalt.err (!%p7816_p4)
}
  0x4b   : > { %s7820_s7 = scalar_lea.vmem %s220_s12, 16  ;;  %s7827_s9 = scalar_lea.vmem %s220_s12, 32 }
  0x4c   : > { %p7821_p6 = scmp.ne.s32.totalorder %s220_s12, %s7820_s7  ;;  %p7828_p3 = scmp.lt.s32.totalorder %s220_s12, %s220_s12 }
  0x4d   : > { %p7829_p5 = scmp.lt.s32.totalorder %s7827_s9, %s7820_s7 }
  0x4e   : > { %p7823_p8 = pnand %p7821_p6, %p8115_p13 }
  0x4f   : > { %p7830_p7 = por %p7829_p5, %p7828_p3 }
  0x50   : > { %p7824_p0 = pneg %p7823_p8 }
  0x52   : > { %p7831_p10 = pnand %p7830_p7, %p7824_p0 }
  0x54   : > { %7834 = shalt.err (!%p7831_p10)
}
  0x55   : > { %7585 = dma.hbm_to_vmem [thread:$0]  (!%p8099_p11), %s10377_s2, 16, %s220_s12, [#allocation7]  }
  0x56   : > { %s8006_s8 = smov [#allocation11]   ;;  %s7835_s15 = scalar_lea.hbm %s10379_s4, 16 }
  0x57   : > { %s243_s11 = sshll.u32 %s8006_s8, 4  ;;  %p7836_p9 = scmp.ne.s32.totalorder %s10379_s4, %s7835_s15  ;;  %s244_s11 = int_to_ptr.vmem [resolvable:$true] %s243_s11 }
  0x58   : > { %p7842_p1 = scmp.lt.u32.totalorder %s7835_s15, %s10379_s4 }
  0x59   : > { %p7838_p12 = pnand %p7836_p9, %p8115_p13 }
  0x5b   : > { %p7839_p2 = pneg %p7838_p12 }
  0x5d   : > { %p7844_p4 = pnand %p7842_p1, %p7839_p2 }
  0x5f   : > { %7847 = shalt.err (!%p7844_p4)
}
  0x60   : > { %s7848_s12 = scalar_lea.vmem %s244_s11, 16  ;;  %s7855_s7 = scalar_lea.vmem %s244_s11, 32 }
  0x61   : > { %p7849_p6 = scmp.ne.s32.totalorder %s244_s11, %s7848_s12  ;;  %p7856_p3 = scmp.lt.s32.totalorder %s244_s11, %s244_s11 }
  0x62   : > { %p7857_p5 = scmp.lt.s32.totalorder %s7855_s7, %s7848_s12 }
  0x63   : > { %p7851_p8 = pnand %p7849_p6, %p8115_p13 }
  0x64   : > { %p7858_p7 = por %p7857_p5, %p7856_p3 }
  0x65   : > { %p7852_p0 = pneg %p7851_p8 }
  0x67   : > { %p7859_p10 = pnand %p7858_p7, %p7852_p0 }
  0x69   : > { %7862 = shalt.err (!%p7859_p10)
}
  0x6a   : > { %7591 = dma.hbm_to_vmem [thread:$0]  (!%p8099_p11), %s10379_s4, 16, %s244_s11, [#allocation10]  }
  0x6b   : > { %s8192_s18 = sadd.s32 1, %s7999_s24   ;;  %s35_s30 = sadd.s32 1, %s7995_s23 }
  0x6c   : > { %s32_s10 = ssub.s32 %s7999_s24, %s8192_s18  ;;  %p42_p13 = scmp.ne.s32.totalorder %s7995_s23, %s7991_s22 }
  0x6d   : > { %p33_p9 = scmp.eq.s32.totalorder %s32_s10, 0  ;;  %p43_p12 = scmp.eq.s32.totalorder %s7999_s24, 0 }
  0x6e   : > { %p10404_p2 = scmp.eq.s32.totalorder %s8071_s25, 1  ;;  %p7607_p4 = scmp.lt.s32.totalorder %s7999_s24, 2 }
  0x6f   : > { %s8208_s13 = scalar_select %p33_p9, %s7995_s23, %s35_s30  }
  0x70   : > { %p8202_p1 = por %p10404_p2, %p42_p13  ;;  %p44_p6 = por %p43_p12, %p42_p13 }
  0x71   : > { %s254_s14 = sand.u32 1, %s7995_s23   ;;  %s6685_s11 = sshll.u32 %s7999_s24, 11 }
  0x72   : > { %s6264_s15 = sshll.u32 %s254_s14, 7  ;;  %s8215_s19 = scalar_lea.hbm %s10375_s0, %s6685_s11 }
  0x73   : > { %s258_s20 = scalar_lea.vmem [#allocation3], %s6264_s15  ;;  %p8219_p11 = pnand %p7607_p4, %p44_p6 }
  0x74   : > { %s265_s12 = sshll.u32 %s258_s20, 4  ;;  %s8223_s9 = scalar_lea.sflag [#allocation4], %s254_s14  ;;  %s8217_s12 = int_to_ptr.vmem [resolvable:$true] %s265_s12 }
  0x75   : > { %s7863_s26 = scalar_lea.hbm %s8215_s19, 2048  ;;  %p7865_p0 = pneg %p8219_p11 }
  0x76   : > { %p7864_p8 = scmp.ne.s32.totalorder %s8215_s19, %s7863_s26  ;;  %s7868_s15 = scalar_lea.hbm %s10375_s0, 4096 }
  0x77   : > { %p7869_p7 = scmp.lt.u32.totalorder %s8215_s19, %s10375_s0  ;;  %p7870_p10 = scmp.lt.u32.totalorder %s7868_s15, %s7863_s26 }
  0x78   : > { %p7866_p3 = pnand %p7865_p0, %p7864_p8  ;;  %p7872_p9 = scmp.lt.u32.totalorder %s7863_s26, %s8215_s19 }
  0x79   : > { %p7871_p13 = por %p7870_p10, %p7869_p7 }
  0x7a   : > { %p7867_p5 = pneg %p7866_p3 }
  0x7b   : > { %p7873_p12 = por %p7872_p9, %p7871_p13 }
  0x7d   : > { %p7874_p2 = pnand %p7873_p12, %p7867_p5 }
  0x7f   : > { %7877 = shalt.err (!%p7874_p2)
}
  0x80   : > { %s7878_s14 = scalar_lea.vmem %s8217_s12, 2048  ;;  %s8007_s17 = smov [#allocation3]  }
  0x81   : > { %p7879_p4 = scmp.ne.s32.totalorder %s8217_s12, %s7878_s14  ;;  %s7883_s20 = sshll.u32 %s8007_s17, 4  ;;  %s7884_s20 = int_to_ptr.vmem [resolvable:$false] %s7883_s20 }
  0x82   : > { %s7885_s30 = scalar_lea.vmem %s7884_s20, 4096  ;;  %p7886_p3 = scmp.lt.s32.totalorder %s8217_s12, %s7884_s20 }
  0x83   : > { %p7881_p6 = pnand %p7879_p4, %p7865_p0  ;;  %p7887_p7 = scmp.lt.s32.totalorder %s7885_s30, %s7878_s14 }
  0x85   : > { %p7882_p8 = pneg %p7881_p6  ;;  %p7888_p10 = por %p7887_p7, %p7886_p3 }
  0x87   : > { %p7889_p13 = pnand %p7888_p10, %p7882_p8 }
  0x89   : > { %7892 = shalt.err (!%p7889_p13)
}
  0x8a   : > { %s8008_s26 = smov 64   ;;  %s8009_s10 = smov 4  }
  0x8b   : > { %7595 = dma.hbm_to_vmem [thread:$0]  (!%p8219_p11), %s8215_s19, 2048, %s8217_s12, %s8223_s9, %s8008_s26, %s8008_s26, %s8009_s10  }
  0x8c   : > { %p10407_p0 = scmp.ne.s32.totalorder %s10401_s29, 0 }
  0x8e   : > { %277 = sbr.rel (%p10407_p0) target bundleno = 888 (0x378), region = 40 }
  0x95   : > { %s8254_s15 = sand.u32 1, %s7991_s22   ;;  %p10408_p5 = scmp.ne.s32.totalorder %s10399_s27, 0 }
  0x96   : > { %s6268_s11 = sshll.u32 %s8254_s15, 7  ;;  %s280_s16 = scalar_lea.sflag [#allocation4], %s8254_s15 }
  0x97   : > { %s8260_s14 = scalar_lea.vmem [#allocation3], %s6268_s11 }
  0x98   : > { %7966 = dma.done.wait (%p10408_p5), %s280_s16, 2048  }
  0x99   : > { %7968 = vsyncadd (%p10408_p5), %s280_s16, 4294965248  ;;  %p10409_p11 = scmp.eq.s32.totalorder %s8071_s25, 0 }
  0x9b   : > { %7970 = dma.done.wait (%p10409_p11), [#allocation7], 32   ;;  %p10410_p9 = pmov %p10409_p11 }
  0x9d   : > { %7972 = vsyncadd (%p10410_p9), [#allocation7], 4294967264  ;;  %p10411_p12 = pmov %p10410_p9 }
  0x9e   : > { %p10412_p2 = pmov %p10410_p9 }
  0x9f   : > { %7974 = dma.done.wait (%p10411_p12), [#allocation10], 304  }
  0xa0   : > { %7976 = vsyncadd (%p10412_p2), [#allocation10], 4294966992  ;;  %vm524_vm0 = vcmask 27648   ;;  %vm527_vm1 = vcmask 24576   ;;  %v8010_v0 = vmov 0   ;;  %vm1687_vm2 = vcmask 1041408  }
  0xa1   : > { %525 = vst.msk [vmem:[#allocation2] sm:$0xf] %vm524_vm0, %v8010_v0  ;;  %526 = vst.msk [vmem:[#allocation2 + $0x4] sm:$0xf] %vm524_vm0, %v8010_v0  ;;  %vm535_vm3 = vsmask.f32 256 }
  0xa2   : > { %528 = vst.msk [vmem:[#allocation2 + $0x8] sm:$0x1] %vm527_vm1, %v8010_v0  ;;  %532 = vst.msk [vmem:[#allocation2 + $0xd4] sm:$0x1] %vm527_vm1, %v8010_v0  ;;  %vm585_vm4 = vsmask.f32 7938 }
  0xa3   : > { %530 = vst.msk [vmem:[#allocation2 + $0xcc] sm:$0xf] %vm524_vm0, %v8010_v0  ;;  %531 = vst.msk [vmem:[#allocation2 + $0xd0] sm:$0xf] %vm524_vm0, %v8010_v0  ;;  %vm1201_vm5 = vsmask.f32 3328 }
  0xa4   : > { %vm1202_vm6 = vsmask.f32 7440  ;;  %v1589_v1 = vld [vmem:[#allocation9 + $0x2] sm:$0x3]  ;;  %v3392_v2 = vld [vmem:[#allocation9 + $0x8] sm:$0x3]  ;;  %vm8290_vm7 = vmand %vm527_vm1, %vm535_vm3 }
  0xa5   : > { %v6752_v3 = vld [vmem:[%s8260_s14] sm:$0xff]   ;;  %7547 = vmatprep.subr.msk.bf16.mxu1 %vm1687_vm2, %v1589_v1  ;;  %7551 = vmatprep.subr.msk.bf16.mxu0 %vm1687_vm2, %v3392_v2  ;;  %v1689_v4 = vsel %vm1687_vm2, %v1589_v1, 0  ;;  %v8285_v5 = vsel %vm1687_vm2, %v3392_v2, 0  ;;  %vm8296_vm8 = vmand %vm527_vm1, %vm585_vm4  ;;  %v537_v24 = vld [vmem:[#allocation2 + $0xc] sm:$0x1]  ;;  %vm1638_vm9 = vcmask 31744  }
  0xa6   : > { %10413 = vst [vmem:[#allocation20_spill] sm:$0xff] %v8285_v5  ;;  %v6753_v8 = vunpack.c.l.bf16 %v6752_v3  ;;  %v6754_v9 = vunpack.c.h.bf16 %v6752_v3  ;;  %6984 = vmatpush3.bf16.msra.mxu1 %v1689_v4  ;;  %7120 = vmatpush3.bf16.msra.mxu0 %v8285_v5  ;;  %v8300_v18 = vld [vmem:[#allocation6] ss:$0 sm:$0xff]  ;;  %v8302_v19 = vld [vmem:[#allocation8] ss:$0 sm:$0xff]  ;;  %v538_v27 = vsel %vm8290_vm7, 0, %v537_v24  ;;  %vm8312_vm10 = vmor %vm1201_vm5, %vm1202_vm6 }
  0xa7   : > { %v587_v28 = vld [vmem:[#allocation2 + $0x14] sm:$0x1]  ;;  %v8308_v29 = vld [vmem:[#allocation9] sm:$0x3]  ;;  %539 = vst [vmem:[#allocation2 + $0xc] sm:$0x1] %v538_v27  ;;  %vm8351_vm12 = vmand %vm524_vm0, %vm585_vm4 }
  0xa8   : > { %v1152_v6 = vld [vmem:[#allocation2] sm:$0xf]  ;;  %v1153_v7 = vld [vmem:[#allocation2 + $0x4] sm:$0xf]  ;;  %v405_v25 = vmul.f32 %v6753_v8, %v8300_v18  ;;  %v406_v26 = vmul.f32 %v6754_v9, %v8300_v18  ;;  %v588_v34 = vsel %vm8296_vm8, 0, %v587_v28  ;;  %7548 = vmatprep.subr.msk.bf16.mxu1 %vm1687_vm2, %v8308_v29  ;;  %v6816_v43 = vld [vmem:[%s8260_s14 + $0x10] sm:$0xff]  }
  0xa9   : > { %v1185_v11 = vld [vmem:[#allocation2 + $0x8] sm:$0x1]  ;;  %v1205_v12 = vshrl.u32 %v1152_v6, 16  ;;  %v1208_v13 = vshll.u32 %v1152_v6, 16  ;;  %v1214_v14 = vshll.u32 %v1153_v7, 16  ;;  %v1218_v15 = vshrl.u32 %v1153_v7, 16 }
  0xaa   : > { %v1224_v17 = vshll.u32 %v1185_v11, 16  ;;  %v8320_v35 = vld [vmem:[#allocation9 + $0xa] sm:$0x3]  ;;  %v444_v37 = vadd.f32 %v8302_v19, %v405_v25  ;;  %v445_v38 = vadd.f32 %v8302_v19, %v406_v26  ;;  %589 = vst [vmem:[#allocation2 + $0x14] sm:$0x1] %v588_v34  ;;  %v6761_v55 = vunpack.c.l.bf16 %v6816_v43  ;;  %v8344_v1 = vld [vmem:[%s8260_s14 + $0x18] sm:$0xff]  }
  0xab   : > { %v1207_v20 = vrot.slane %v1205_v12, 4  ;;  %v1210_v21 = vrot.slane %v1208_v13, 5  ;;  %v1216_v22 = vrot.slane %v1214_v14, 5  ;;  %v1220_v23 = vrot.slane %v1218_v15, 4  ;;  %v6815_v36 = vld [vmem:[%s8260_s14 + $0x8] sm:$0xff]   ;;  %7553 = vmatprep.subr.msk.bf16.mxu0 %vm1687_vm2, %v8320_v35  ;;  %s10113_s27 = scalar_lea.vmem [#allocation12], %s6268_s11 }
  0xac   : > { %v1226_v33 = vrot.slane %v1224_v17, 5  ;;  %v6757_v39 = vunpack.c.l.bf16 %v6815_v36  ;;  %v6758_v40 = vunpack.c.h.bf16 %v6815_v36  ;;  %v540_v41 = vld [vmem:[#allocation2 + $0x18] sm:$0x1]  ;;  %v590_v42 = vld [vmem:[#allocation2 + $0x20] sm:$0x1]  ;;  %v476_v48 = vmax.f32 %v444_v37, 0.0 }
  0xad   : > { %v1211_v31 = vor.u32 %v1210_v21, %v1207_v20  ;;  %v1221_v32 = vor.u32 %v1220_v23, %v1216_v22  ;;  %v541_v46 = vsel %vm8290_vm7, 0, %v540_v41  ;;  %v591_v47 = vsel %vm8296_vm8, 0, %v590_v42  ;;  %v543_v52 = vld [vmem:[#allocation2 + $0x24] sm:$0x1]  ;;  %v593_v0 = vld [vmem:[#allocation2 + $0x2c] sm:$0x1] }
  0xae   : > { %v477_v49 = vmax.f32 %v445_v38, 0.0  ;;  %v407_v50 = vmul.f32 %v6757_v39, %v8300_v18  ;;  %v408_v51 = vmul.f32 %v6758_v40, %v8300_v18  ;;  %542 = vst [vmem:[#allocation2 + $0x18] sm:$0x1] %v541_v46  ;;  %592 = vst [vmem:[#allocation2 + $0x20] sm:$0x1] %v591_v47  ;;  %v6686_v57 = vpack.c.bf16 %v476_v48, %v476_v48  ;;  %s6750_s29 = sshll.u32 %s8071_s25, 11 }
  0xaf   : > { %v1212_v44 = vrot.slane %v1211_v31, 4  ;;  %v1222_v45 = vrot.slane %v1221_v32, 4  ;;  %vm715_vm11 = vsmask.f32 4368  ;;  %v6762_v61 = vunpack.c.h.bf16 %v6816_v43  ;;  %v1039_v21 = vld [vmem:[#allocation2 + $0xc] sm:$0xf]  ;;  %s10278_s9 = scalar_lea.hbm %s10380_s5, %s6750_s29 }
  0xb0   : > { %v6687_v58 = vpack.c.bf16 %v477_v49, %v477_v49  ;;  %v446_v59 = vadd.f32 %v8302_v19, %v407_v50  ;;  %v447_v60 = vadd.f32 %v8302_v19, %v408_v51  ;;  %v409_v62 = vmul.f32 %v6761_v55, %v8300_v18  ;;  %vm8360_vm13 = vmor %vm535_vm3, %vm715_vm11  ;;  %v596_v39 = vld [vmem:[#allocation2 + $0x38] sm:$0x1]  ;;  %s6101_s19 = sshll.u32 %s10113_s27, 4  ;;  %s6083_s17 = scalar_lea.sflag [#allocation5], %s8254_s15  ;;  %s10280_s19 = int_to_ptr.vmem [resolvable:$true] %s6101_s19 }
  0xb1   : > { %v1217_v53 = vsel %vm8312_vm10, %v1212_v44, %v1216_v22  ;;  %v1227_v54 = vsel %vm8312_vm10, %v1222_v45, %v1226_v33  ;;  %v544_v63 = vsel %vm8290_vm7, 0, %v543_v52  ;;  %v718_v2 = vshrl.u32 %v6686_v57, 16  ;;  %v1043_v22 = vld [vmem:[#allocation2 + $0x14] sm:$0x1]  ;;  %v546_v33 = vld [vmem:[#allocation2 + $0x30] sm:$0x1] }
  0xb2   : > { %v6309_v56 = vcombine.low %v1217_v53, %v1227_v54  ;;  %v721_v3 = vshll.u32 %v6686_v57, 16  ;;  %v726_v4 = vshrl.u32 %v6687_v58, 16  ;;  %v729_v6 = vshll.u32 %v6687_v58, 16  ;;  %545 = vst [vmem:[#allocation2 + $0x24] sm:$0x1] %v544_v63  ;;  %v8379_v58 = vld [vmem:[%s8260_s14 + $0x20] sm:$0xff]  }
  0xb3   : > { %v478_v7 = vmax.f32 %v446_v59, 0.0  ;;  %v479_v8 = vmax.f32 %v447_v60, 0.0  ;;  %v410_v9 = vmul.f32 %v6762_v61, %v8300_v18  ;;  %v448_v11 = vadd.f32 %v8302_v19, %v409_v62  ;;  %v549_v59 = vld [vmem:[#allocation2 + $0x3c] sm:$0x1]  ;;  %s7893_s20 = scalar_lea.vmem %s10280_s19, 2048  ;;  %s8011_s30 = smov [#allocation12]  }
  0xb4   : > { %6985 = vmatprep.mubr.msk.bf16.mxu1 %vm1638_vm9, %v6309_v56  ;;  %v720_v13 = vrot.slane %v718_v2, 7  ;;  %v728_v14 = vrot.slane %v726_v4, 7  ;;  %v594_v15 = vsel %vm8296_vm8, 0, %v593_v0  ;;  %v6765_v17 = vunpack.c.l.bf16 %v8344_v1  ;;  %v599_v0 = vld [vmem:[#allocation2 + $0x44] sm:$0x1]  ;;  %p7894_p4 = scmp.ne.s32.totalorder %s10280_s19, %s7893_s20  ;;  %s7897_s26 = sshll.u32 %s8011_s30, 4  ;;  %s7898_s26 = int_to_ptr.vmem [resolvable:$false] %s7897_s26 }
  0xb5   : > { %v6688_v23 = vpack.c.bf16 %v478_v7, %v478_v7  ;;  %v6689_v24 = vpack.c.bf16 %v479_v8, %v479_v8  ;;  %v449_v25 = vadd.f32 %v8302_v19, %v410_v9  ;;  %v480_v26 = vmax.f32 %v448_v11, 0.0  ;;  %595 = vst [vmem:[#allocation2 + $0x2c] sm:$0x1] %v594_v15  ;;  %v1046_v46 = vld [vmem:[#allocation2 + $0x18] sm:$0xf]  ;;  %v8410_v15 = vld [vmem:[%s8260_s14 + $0x28] sm:$0xff]   ;;  %p7900_p3 = scmp.lt.s32.totalorder %s10280_s19, %s7898_s26 }
  0xb6   : > { %v723_v27 = vor.u32 %v721_v3, %v720_v13  ;;  %v724_v28 = vrot.slane %v720_v13, 4  ;;  %v731_v31 = vor.u32 %v729_v6, %v728_v14  ;;  %v733_v32 = vrot.slane %v728_v14, 4  ;;  %v1050_v47 = vld [vmem:[#allocation2 + $0x20] sm:$0x1]  ;;  %p7895_p6 = pnand %p7894_p4, %p8202_p1  ;;  %s7899_s10 = scalar_lea.vmem %s7898_s26, 4096 }
  0xb7   : > { %v735_v34 = vshrl.u32 %v6688_v23, 16  ;;  %v738_v36 = vshll.u32 %v6688_v23, 16  ;;  %v743_v37 = vshrl.u32 %v6689_v24, 16  ;;  %v746_v38 = vshll.u32 %v6689_v24, 16  ;;  %p7901_p7 = scmp.lt.s32.totalorder %s7899_s10, %s7893_s20 }
  0xb8   : > { %v732_v40 = vsel %vm8360_vm13, %v724_v28, %v731_v31  ;;  %v1040_v41 = vsel %vm8351_vm12, %v723_v27, %v1039_v21  ;;  %v1044_v42 = vsel %vm8290_vm7, %v733_v32, %v1043_v22  ;;  %v481_v43 = vmax.f32 %v449_v25, 0.0  ;;  %p7896_p8 = pneg %p7895_p6 }
  0xb9   : > { %1041 = vst [vmem:[#allocation2 + $0xc] sm:$0xf] %v1040_v41  ;;  %1042 = vst.msk [vmem:[#allocation2 + $0x10] sm:$0xf] %vm524_vm0, %v732_v40  ;;  %v737_v44 = vrot.slane %v735_v34, 7  ;;  %v745_v45 = vrot.slane %v743_v37, 7  ;;  %v6690_v48 = vpack.c.bf16 %v480_v26, %v480_v26  ;;  %v6766_v49 = vunpack.c.h.bf16 %v8344_v1  ;;  %p7902_p10 = por %p7901_p7, %p7900_p3 }
  0xba   : > { %1045 = vst [vmem:[#allocation2 + $0x14] sm:$0x1] %v1044_v42  ;;  %v6691_v50 = vpack.c.bf16 %v481_v43, %v481_v43  ;;  %v411_v51 = vmul.f32 %v6765_v17, %v8300_v18  ;;  %v547_v52 = vsel %vm8290_vm7, 0, %v546_v33  ;;  %v597_v53 = vsel %vm8296_vm8, 0, %v596_v39 }
  0xbb   : > { %v740_v54 = vor.u32 %v738_v36, %v737_v44  ;;  %v741_v55 = vrot.slane %v737_v44, 4  ;;  %v748_v56 = vor.u32 %v746_v38, %v745_v45  ;;  %v750_v57 = vrot.slane %v745_v45, 4  ;;  %548 = vst [vmem:[#allocation2 + $0x30] sm:$0x1] %v547_v52  ;;  %598 = vst [vmem:[#allocation2 + $0x38] sm:$0x1] %v597_v53  ;;  %p7903_p13 = pnand %p7902_p10, %p7896_p8 }
  0xbc   : > { %v752_v60 = vshrl.u32 %v6690_v48, 16  ;;  %v755_v61 = vshll.u32 %v6690_v48, 16  ;;  %v760_v62 = vshrl.u32 %v6691_v50, 16  ;;  %v763_v63 = vshll.u32 %v6691_v50, 16 }
  0xbd   : > { %v749_v1 = vsel %vm8360_vm13, %v741_v55, %v748_v56  ;;  %v1047_v2 = vsel %vm8351_vm12, %v740_v54, %v1046_v46  ;;  %v1051_v3 = vsel %vm8290_vm7, %v750_v57, %v1050_v47  ;;  %v412_v4 = vmul.f32 %v6766_v49, %v8300_v18 }
  0xbe   : > { %v8390_v6 = vsel %vm1687_vm2, %v8308_v29, 0  ;;  %1048 = vst [vmem:[#allocation2 + $0x18] sm:$0xf] %v1047_v2  ;;  %1049 = vst.msk [vmem:[#allocation2 + $0x1c] sm:$0xf] %vm524_vm0, %v749_v1  ;;  %v8393_v7 = vrot.slane %v752_v60, 7  ;;  %v6769_v9 = vunpack.c.l.bf16 %v8379_v58  ;;  %v8403_v13 = vadd.f32 %v8302_v19, %v411_v51 }
  0xbf   : > { %1052 = vst [vmem:[#allocation2 + $0x20] sm:$0x1] %v1051_v3  ;;  %v8395_v8 = vrot.slane %v760_v62, 7  ;;  %v8400_v11 = vsel %vm1687_vm2, %v8320_v35, 0  ;;  %v550_v29 = vsel %vm8290_vm7, 0, %v549_v59  ;;  %v600_v14 = vsel %vm8296_vm8, 0, %v599_v0 }
  0xc0   : > { %v1154_v17 = vld [vmem:[#allocation2 + $0xc] sm:$0xf]  ;;  %v1155_v21 = vld [vmem:[#allocation2 + $0x10] sm:$0xf]  ;;  %v8413_v23 = vor.u32 %v755_v61, %v8393_v7  ;;  %v8419_v24 = vadd.f32 %v8302_v19, %v412_v4  ;;  %v6770_v25 = vunpack.c.h.bf16 %v8379_v58  ;;  %551 = vst [vmem:[#allocation2 + $0x3c] sm:$0x1] %v550_v29  ;;  %v8425_v37 = vmul.f32 %v6769_v9, %v8300_v18 }
  0xc1   : > { %v1186_v22 = vld [vmem:[#allocation2 + $0x14] sm:$0x1]  ;;  %v8416_v35 = vor.u32 %v763_v63, %v8395_v8  ;;  %601 = vst [vmem:[#allocation2 + $0x44] sm:$0x1] %v600_v14  ;;  %v1229_v26 = vshrl.u32 %v1154_v17, 16  ;;  %v1232_v27 = vshll.u32 %v1154_v17, 16  ;;  %v6773_v38 = vunpack.c.l.bf16 %v8410_v15 }
  0xc2   : > { %v1238_v28 = vshll.u32 %v1155_v21, 16  ;;  %v1242_v31 = vshrl.u32 %v1155_v21, 16  ;;  %v2959_v32 = vld [vmem:[#allocation2 + $0xc] sm:$0xf]  ;;  %v1248_v33 = vshll.u32 %v1186_v22, 16  ;;  %vm2192_vm14 = vcmask 1042432  }
  0xc3   : > { %v8422_v34 = vld [vmem:[#allocation2 + $0x10] sm:$0xf]  ;;  %v3008_v36 = vshrl.u32 %v2959_v32, 16  ;;  %v1231_v39 = vrot.slane %v1229_v26, 4  ;;  %v1234_v40 = vrot.slane %v1232_v27, 5  ;;  %v3011_v46 = vshll.u32 %v2959_v32, 16 }
  0xc4   : > { %v1240_v41 = vrot.slane %v1238_v28, 5  ;;  %v1244_v42 = vrot.slane %v1242_v31, 4  ;;  %v8428_v43 = vld [vmem:[#allocation2 + $0x14] sm:$0x1]  ;;  %v1250_v44 = vrot.slane %v1248_v33, 5  ;;  %v3017_v47 = vshll.u32 %v8422_v34, 16 }
  0xc5   : > { %v3010_v45 = vrot.slane %v3008_v36, 4  ;;  %v1235_v48 = vor.u32 %v1234_v40, %v1231_v39  ;;  %v3021_v50 = vshrl.u32 %v8422_v34, 16  ;;  %v3027_v51 = vshll.u32 %v8428_v43, 16  ;;  %v2962_v52 = vld [vmem:[#allocation2 + $0x18] sm:$0xf] }
  0xc6   : > { %v1245_v49 = vor.u32 %v1244_v42, %v1240_v41  ;;  %v8433_v53 = vld [vmem:[#allocation2 + $0x1c] sm:$0xf]  ;;  %v3013_v54 = vrot.slane %v3011_v46, 5  ;;  %v3019_v55 = vrot.slane %v3017_v47, 5  ;;  %v3751_v56 = vrot.slane %v8422_v34, 5 }
  0xc7   : > { %v3754_v57 = vrot.slane %v8428_v43, 5  ;;  %v1236_v59 = vrot.slane %v1235_v48, 4  ;;  %v3023_v61 = vrot.slane %v3021_v50, 4  ;;  %v3029_v62 = vrot.slane %v3027_v51, 5  ;;  %v8437_v0 = vld [vmem:[#allocation2 + $0x20] sm:$0x1] }
  0xc8   : > { %v1246_v60 = vrot.slane %v1245_v49, 4  ;;  %v3014_v63 = vor.u32 %v3013_v54, %v3010_v45  ;;  %v3032_v1 = vshrl.u32 %v2962_v52, 16  ;;  %v3035_v2 = vshll.u32 %v2962_v52, 16  ;;  %v1156_v27 = vld [vmem:[#allocation2 + $0x18] sm:$0xf] }
  0xc9   : > { %v3041_v3 = vshll.u32 %v8433_v53, 16  ;;  %v1241_v4 = vsel %vm8312_vm10, %v1236_v59, %v1240_v41  ;;  %v3024_v29 = vor.u32 %v3023_v61, %v3019_v55  ;;  %v3045_v14 = vshrl.u32 %v8433_v53, 16  ;;  %v1157_v42 = vld [vmem:[#allocation2 + $0x1c] sm:$0xf]  ;;  %v1187_v47 = vld [vmem:[#allocation2 + $0x20] sm:$0x1] }
  0xca   : > { %v1251_v9 = vsel %vm8312_vm10, %v1246_v60, %v1250_v44  ;;  %v3015_v21 = vrot.slane %v3014_v63, 4  ;;  %v3034_v22 = vrot.slane %v3032_v1, 4  ;;  %v3037_v26 = vrot.slane %v3035_v2, 5  ;;  %v1053_v54 = vld [vmem:[#allocation2 + $0x24] sm:$0xf] }
  0xcb   : > { %v6310_v17 = vcombine.low %v1241_v4, %v1251_v9  ;;  %v3025_v28 = vrot.slane %v3024_v29, 4  ;;  %v3043_v31 = vrot.slane %v3041_v3, 5  ;;  %v3047_v32 = vrot.slane %v3045_v14, 4  ;;  %v1057_v2 = vld [vmem:[#allocation2 + $0x2c] sm:$0x1] }
  0xcc   : > { %v3051_v33 = vshll.u32 %v8437_v0, 16  ;;  %v3020_v36 = vsel %vm8312_vm10, %v3015_v21, %v3019_v55  ;;  %v3038_v39 = vor.u32 %v3037_v26, %v3034_v22  ;;  %v3758_v40 = vrot.slane %v8433_v53, 5  ;;  %v8465_v14 = vld [vmem:[#allocation9 + $0xc] sm:$0x3] }
  0xcd   : > { %6986 = vmatmul.mubr.msk.bf16.vlgmr.msra.gmra.mrb[0].mxu1 %vm1638_vm9, %v6310_v17  ;;  %v3761_v41 = vrot.slane %v8437_v0, 5  ;;  %v3030_v44 = vsel %vm8312_vm10, %v3025_v28, %v3029_v62  ;;  %v3048_v45 = vor.u32 %v3047_v32, %v3043_v31  ;;  %v1253_v48 = vshrl.u32 %v1156_v27, 16 }
  0xce   : > { %7018 = vmatpush3.bf16.msra.mxu1 %v8390_v6  ;;  %v3053_v46 = vrot.slane %v3051_v33, 5  ;;  %v6453_v49 = vcombine.low %v3020_v36, %v3030_v44  ;;  %v3039_v50 = vrot.slane %v3038_v39, 4  ;;  %v8456_v51 = vrot.slane %v3758_v40, 4 }
  0xcf   : > { %v1256_v52 = vshll.u32 %v1156_v27, 16  ;;  %v3049_v55 = vrot.slane %v3048_v45, 4  ;;  %v1255_v59 = vrot.slane %v1253_v48, 4  ;;  %v1262_v60 = vshll.u32 %v1157_v42, 16 }
  0xd0   : > { %v1266_v61 = vshrl.u32 %v1157_v42, 16  ;;  %7121 = vmatprep.mubr.msk.bf16.mxu0 %vm1638_vm9, %v6453_v49  ;;  %v3044_v6 = vsel %vm8312_vm10, %v3039_v50, %v3043_v31  ;;  %v1272_v63 = vshll.u32 %v1187_v47, 16  ;;  %v758_v1 = vrot.slane %v8393_v7, 4 }
  0xd1   : > { %v1258_v62 = vrot.slane %v1256_v52, 5  ;;  %v3054_v3 = vsel %vm8312_vm10, %v3049_v55, %v3053_v46  ;;  %v1264_v4 = vrot.slane %v1262_v60, 5  ;;  %v767_v29 = vrot.slane %v8395_v8, 4  ;;  %v552_v46 = vld [vmem:[#allocation2 + $0x48] sm:$0x1] }
  0xd2   : > { %v1268_v9 = vrot.slane %v1266_v61, 4  ;;  %v6454_v17 = vcombine.low %v3044_v6, %v3054_v3  ;;  %v1274_v22 = vrot.slane %v1272_v63, 5  ;;  %v766_v26 = vsel %vm8360_vm13, %v758_v1, %v8416_v35 }
  0xd3   : > { %v1259_v21 = vor.u32 %v1258_v62, %v1255_v59  ;;  %v1054_v7 = vsel %vm8351_vm12, %v8413_v23, %v1053_v54  ;;  %1056 = vst.msk [vmem:[#allocation2 + $0x28] sm:$0xf] %vm524_vm0, %v766_v26  ;;  %v1058_v28 = vsel %vm8290_vm7, %v767_v29, %v1057_v2  ;;  %v482_v8 = vmax.f32 %v8403_v13, 0.0 }
  0xd4   : > { %v1269_v27 = vor.u32 %v1268_v9, %v1264_v4  ;;  %7122 = vmatmul.mubr.msk.bf16.vlgmr.msra.gmra.mrb[0].mxu0 %vm1638_vm9, %v6454_v17  ;;  %1055 = vst [vmem:[#allocation2 + $0x24] sm:$0xf] %v1054_v7  ;;  %1059 = vst [vmem:[#allocation2 + $0x2c] sm:$0x1] %v1058_v28  ;;  %v483_v32 = vmax.f32 %v8419_v24, 0.0  ;;  %v414_v35 = vmul.f32 %v6770_v25, %v8300_v18  ;;  %v6774_v13 = vunpack.c.h.bf16 %v8410_v15  ;;  %v8498_v15 = vld [vmem:[%s8260_s14 + $0x30] sm:$0xff]  }
  0xd5   : > { %v1260_v31 = vrot.slane %v1259_v21, 4  ;;  %v452_v23 = vadd.f32 %v8302_v19, %v8425_v37  ;;  %7154 = vmatpush3.bf16.msra.mxu0 %v8400_v11  ;;  %v6692_v36 = vpack.c.bf16 %v482_v8, %v482_v8  ;;  %v415_v39 = vmul.f32 %v6773_v38, %v8300_v18 }
  0xd6   : > { %v1270_v33 = vrot.slane %v1269_v27, 4  ;;  %v6693_v42 = vpack.c.bf16 %v483_v32, %v483_v32  ;;  %v453_v58 = vadd.f32 %v8302_v19, %v414_v35  ;;  %7554 = vmatprep.subr.msk.bf16.mxu0 %vm1687_vm2, %v8465_v14  ;;  %v416_v45 = vmul.f32 %v6774_v13, %v8300_v18  ;;  %v1060_v13 = vld [vmem:[#allocation2 + $0x30] sm:$0xf] }
  0xd7   : > { %v1265_v24 = vsel %vm8312_vm10, %v1260_v31, %v1264_v4  ;;  %v484_v25 = vmax.f32 %v452_v23, 0.0  ;;  %v769_v37 = vshrl.u32 %v6692_v36, 16  ;;  %v772_v44 = vshll.u32 %v6692_v36, 16 }
  0xd8   : > { %v1275_v11 = vsel %vm8312_vm10, %v1270_v33, %v1274_v22  ;;  %v777_v47 = vshrl.u32 %v6693_v42, 16  ;;  %v780_v48 = vshll.u32 %v6693_v42, 16  ;;  %v485_v49 = vmax.f32 %v453_v58, 0.0 }
  0xd9   : > { %v6311_v38 = vcombine.low %v1265_v24, %v1275_v11  ;;  %v771_v50 = vrot.slane %v769_v37, 7  ;;  %v8500_v52 = vpack.c.bf16 %v484_v25, %v484_v25  ;;  %v8503_v54 = vadd.f32 %v8302_v19, %v415_v39  ;;  %v1064_v25 = vld [vmem:[#allocation2 + $0x38] sm:$0x1] }
  0xda   : > { %v8506_v55 = vadd.f32 %v8302_v19, %v416_v45  ;;  %v1159_v59 = vld [vmem:[#allocation2 + $0x28] sm:$0xf]  ;;  %v779_v61 = vrot.slane %v777_v47, 7  ;;  %v8511_v6 = vpack.c.bf16 %v485_v49, %v485_v49  ;;  %v553_v62 = vsel %vm8290_vm7, 0, %v552_v46 }
  0xdb   : > { %6989 = vmatprep.mubr.msk.bf16.mxu1 %vm1638_vm9, %v6311_v38  ;;  %v8509_v60 = vld [vmem:[#allocation2 + $0x28] sm:$0xf]  ;;  %v6777_v63 = vunpack.c.l.bf16 %v8498_v15  ;;  %v1158_v1 = vld [vmem:[#allocation2 + $0x24] sm:$0xf]  ;;  %v1188_v2 = vld [vmem:[#allocation2 + $0x2c] sm:$0x1]  ;;  %v774_v9 = vor.u32 %v772_v44, %v771_v50  ;;  %v6778_v29 = vunpack.c.h.bf16 %v8498_v15 }
  0xdc   : > { %v1286_v3 = vshll.u32 %v1159_v59, 16  ;;  %v1290_v4 = vshrl.u32 %v1159_v59, 16  ;;  %554 = vst [vmem:[#allocation2 + $0x48] sm:$0x1] %v553_v62  ;;  %v1277_v17 = vshrl.u32 %v1158_v1, 16  ;;  %v1280_v21 = vshll.u32 %v1158_v1, 16 }
  0xdd   : > { %v1296_v22 = vshll.u32 %v1188_v2, 16  ;;  %v2965_v26 = vld [vmem:[#allocation2 + $0x24] sm:$0xf]  ;;  %v3065_v27 = vshll.u32 %v8509_v60, 16  ;;  %v8518_v8 = vld [vmem:[#allocation2 + $0x2c] sm:$0x1]  ;;  %v782_v45 = vor.u32 %v780_v48, %v779_v61  ;;  %v1061_v2 = vsel %vm8351_vm12, %v774_v9, %v1060_v13 }
  0xde   : > { %v1288_v7 = vrot.slane %v1286_v3, 5  ;;  %v1292_v28 = vrot.slane %v1290_v4, 4  ;;  %v3056_v31 = vshrl.u32 %v2965_v26, 16  ;;  %v3059_v32 = vshll.u32 %v2965_v26, 16  ;;  %1062 = vst [vmem:[#allocation2 + $0x30] sm:$0xf] %v1061_v2 }
  0xdf   : > { %v1279_v35 = vrot.slane %v1277_v17, 4  ;;  %v1282_v23 = vrot.slane %v1280_v21, 5  ;;  %v1298_v33 = vrot.slane %v1296_v22, 5  ;;  %v3067_v36 = vrot.slane %v3065_v27, 5  ;;  %v602_v22 = vld [vmem:[#allocation2 + $0x50] sm:$0x1] }
  0xe0   : > { %v1293_v39 = vor.u32 %v1292_v28, %v1288_v7  ;;  %v3058_v24 = vrot.slane %v3056_v31, 4  ;;  %v3061_v42 = vrot.slane %v3059_v32, 5  ;;  %v3069_v58 = vshrl.u32 %v8509_v60, 16 }
  0xe1   : > { %v1283_v11 = vor.u32 %v1282_v23, %v1279_v35  ;;  %v3075_v37 = vshll.u32 %v8518_v8, 16  ;;  %v775_v44 = vrot.slane %v771_v50, 4  ;;  %v784_v49 = vrot.slane %v779_v61, 4 }
  0xe2   : > { %v1294_v46 = vrot.slane %v1293_v39, 4  ;;  %v3062_v38 = vor.u32 %v3061_v42, %v3058_v24  ;;  %v3071_v47 = vrot.slane %v3069_v58, 4  ;;  %v786_v61 = vshrl.u32 %v8500_v52, 16  ;;  %v6821_v39 = vld [vmem:[%s8260_s14 + $0x38] sm:$0xff]  }
  0xe3   : > { %v1284_v59 = vrot.slane %v1283_v11, 4  ;;  %v3077_v62 = vrot.slane %v3075_v37, 5  ;;  %v783_v1 = vsel %vm8360_vm13, %v775_v44, %v782_v45  ;;  %v1065_v48 = vsel %vm8290_vm7, %v784_v49, %v1064_v25  ;;  %v1071_v25 = vld [vmem:[#allocation2 + $0x44] sm:$0x1] }
  0xe4   : > { %v1299_v3 = vsel %vm8312_vm10, %v1294_v46, %v1298_v33  ;;  %v3063_v4 = vrot.slane %v3062_v38, 4  ;;  %v3072_v17 = vor.u32 %v3071_v47, %v3067_v36  ;;  %1063 = vst.msk [vmem:[#allocation2 + $0x34] sm:$0xf] %vm524_vm0, %v783_v1  ;;  %1066 = vst [vmem:[#allocation2 + $0x38] sm:$0x1] %v1065_v48  ;;  %v789_v21 = vshll.u32 %v8500_v52, 16 }
  0xe5   : > { %v1289_v50 = vsel %vm8312_vm10, %v1284_v59, %v1288_v7  ;;  %v794_v9 = vshrl.u32 %v8511_v6, 16  ;;  %v797_v31 = vshll.u32 %v8511_v6, 16  ;;  %v788_v32 = vrot.slane %v786_v61, 7  ;;  %v1067_v33 = vld [vmem:[#allocation2 + $0x3c] sm:$0xf] }
  0xe6   : > { %v6312_v26 = vcombine.low %v1289_v50, %v1299_v3  ;;  %v3068_v27 = vsel %vm8312_vm10, %v3063_v4, %v3067_v36  ;;  %v3073_v28 = vrot.slane %v3072_v17, 4  ;;  %v486_v7 = vmax.f32 %v8503_v54, 0.0  ;;  %v2968_v15 = vld [vmem:[#allocation2 + $0x30] sm:$0xf] }
  0xe7   : > { %v796_v35 = vrot.slane %v794_v9, 7  ;;  %v487_v23 = vmax.f32 %v8506_v55, 0.0  ;;  %v603_v13 = vsel %vm8296_vm8, 0, %v602_v22  ;;  %v417_v36 = vmul.f32 %v6777_v63, %v8300_v18 }
  0xe8   : > { %6990 = vmatmul.mubr.msk.bf16.gmra.mrb[4].mxu1 %vm1638_vm9, %v6312_v26  ;;  %v3078_v52 = vsel %vm8312_vm10, %v3073_v28, %v3077_v62  ;;  %v418_v6 = vmul.f32 %v6778_v29, %v8300_v18  ;;  %v791_v54 = vor.u32 %v789_v21, %v788_v32  ;;  %v792_v42 = vrot.slane %v788_v32, 4  ;;  %604 = vst [vmem:[#allocation2 + $0x50] sm:$0x1] %v603_v13  ;;  %v1160_v29 = vld [vmem:[#allocation2 + $0x30] sm:$0xf] }
  0xe9   : > { %v6455_v24 = vcombine.low %v3068_v27, %v3078_v52  ;;  %v799_v55 = vor.u32 %v797_v31, %v796_v35  ;;  %v801_v58 = vrot.slane %v796_v35, 4  ;;  %v8551_v11 = vpack.c.bf16 %v486_v7, %v486_v7 }
  0xea   : > { %v8553_v37 = vpack.c.bf16 %v487_v23, %v487_v23  ;;  %v8556_v44 = vadd.f32 %v8302_v19, %v417_v36  ;;  %v1068_v46 = vsel %vm8351_vm12, %v791_v54, %v1067_v33  ;;  %v8566_v38 = vadd.f32 %v8302_v19, %v418_v6  ;;  %v8577_v33 = vld [vmem:[%s8260_s14 + $0x40] sm:$0xff]  }
  0xeb   : > { %7125 = vmatprep.mubr.msk.bf16.mxu0 %vm1638_vm9, %v6455_v24  ;;  %v8559_v63 = vld [vmem:[#allocation2 + $0x34] sm:$0xf]  ;;  %v800_v45 = vsel %vm8360_vm13, %v792_v42, %v799_v55  ;;  %v6781_v47 = vunpack.c.l.bf16 %v6821_v39  ;;  %v8568_v49 = vld [vmem:[#allocation2 + $0x38] sm:$0x1]  ;;  %v3080_v59 = vshrl.u32 %v2968_v15, 16  ;;  %v3083_v62 = vshll.u32 %v2968_v15, 16 }
  0xec   : > { %v3089_v1 = vshll.u32 %v8559_v63, 16  ;;  %v3093_v2 = vshrl.u32 %v8559_v63, 16  ;;  %1069 = vst [vmem:[#allocation2 + $0x3c] sm:$0xf] %v1068_v46  ;;  %1070 = vst.msk [vmem:[#allocation2 + $0x40] sm:$0xf] %vm524_vm0, %v800_v45  ;;  %v1072_v50 = vsel %vm8290_vm7, %v801_v58, %v1071_v25  ;;  %v6782_v61 = vunpack.c.h.bf16 %v6821_v39 }
  0xed   : > { %v3099_v3 = vshll.u32 %v8568_v49, 16  ;;  %v1161_v4 = vld [vmem:[#allocation2 + $0x34] sm:$0xf]  ;;  %v1189_v17 = vld [vmem:[#allocation2 + $0x38] sm:$0x1]  ;;  %v1301_v48 = vshrl.u32 %v1160_v29, 16  ;;  %v6785_v46 = vunpack.c.l.bf16 %v8577_v33 }
  0xee   : > { %v3082_v21 = vrot.slane %v3080_v59, 4  ;;  %v3085_v9 = vrot.slane %v3083_v62, 5  ;;  %v3091_v22 = vrot.slane %v3089_v1, 5  ;;  %v3095_v26 = vrot.slane %v3093_v2, 4  ;;  %1073 = vst [vmem:[#allocation2 + $0x44] sm:$0x1] %v1072_v50 }
  0xef   : > { %v3101_v27 = vrot.slane %v3099_v3, 5  ;;  %v1303_v28 = vrot.slane %v1301_v48, 4  ;;  %v1304_v31 = vshll.u32 %v1160_v29, 16  ;;  %v1310_v32 = vshll.u32 %v1161_v4, 16 }
  0xf0   : > { %v3086_v35 = vor.u32 %v3085_v9, %v3082_v21  ;;  %v3096_v7 = vor.u32 %v3095_v26, %v3091_v22  ;;  %v1314_v23 = vshrl.u32 %v1161_v4, 16  ;;  %v1320_v52 = vshll.u32 %v1189_v17, 16 }
  0xf1   : > { %v1306_v13 = vrot.slane %v1304_v31, 5  ;;  %v1312_v36 = vrot.slane %v1310_v32, 5  ;;  %v803_v6 = vshrl.u32 %v8551_v11, 16  ;;  %v806_v39 = vshll.u32 %v8551_v11, 16 }
  0xf2   : > { %v3087_v24 = vrot.slane %v3086_v35, 4  ;;  %v3097_v54 = vrot.slane %v3096_v7, 4  ;;  %v1316_v42 = vrot.slane %v1314_v23, 4  ;;  %v1322_v55 = vrot.slane %v1320_v52, 5 }
  0xf3   : > { %v1307_v58 = vor.u32 %v1306_v13, %v1303_v28  ;;  %v1162_v25 = vld [vmem:[#allocation2 + $0x3c] sm:$0xf]  ;;  %v1163_v15 = vld [vmem:[#allocation2 + $0x40] sm:$0xf]  ;;  %v8582_v29 = vmul.f32 %v6781_v47, %v8300_v18  ;;  %v8585_v45 = vmul.f32 %v6782_v61, %v8300_v18  ;;  %vm2193_vm15 = vcmask 1046532  }
  0xf4   : > { %v3092_v59 = vsel %vm8312_vm10, %v3087_v24, %v3091_v22  ;;  %v3102_v11 = vsel %vm8312_vm10, %v3097_v54, %v3101_v27  ;;  %v1317_v62 = vor.u32 %v1316_v42, %v1312_v36  ;;  %v1325_v1 = vshrl.u32 %v1162_v25, 16  ;;  %v2971_v2 = vld [vmem:[#allocation2 + $0x3c] sm:$0xf]  ;;  %v8592_v3 = vld [vmem:[#allocation2 + $0x40] sm:$0xf]  ;;  %vm8711_vm1 = vmor %vm2192_vm14, %vm2193_vm15 }
  0xf5   : > { %v6456_v4 = vcombine.low %v3092_v59, %v3102_v11  ;;  %v1308_v17 = vrot.slane %v1307_v58, 4  ;;  %v1190_v47 = vld [vmem:[#allocation2 + $0x44] sm:$0x1]  ;;  %v1328_v48 = vshll.u32 %v1162_v25, 16  ;;  %v1334_v50 = vshll.u32 %v1163_v15, 16 }
  0xf6   : > { %v1318_v18 = vrot.slane %v1317_v62, 4  ;;  %v1327_v61 = vrot.slane %v1325_v1, 4  ;;  %v1338_v21 = vshrl.u32 %v1163_v15, 16  ;;  %v1344_v9 = vshll.u32 %v1190_v47, 16  ;;  %v8594_v26 = vld [vmem:[#allocation2 + $0x44] sm:$0x1] }
  0xf7   : > { %7126 = vmatmul.mubr.msk.bf16.gmra.mrb[4].mxu0 %vm1638_vm9, %v6456_v4  ;;  %v1313_v22 = vsel %vm8312_vm10, %v1308_v17, %v1312_v36  ;;  %v1330_v27 = vrot.slane %v1328_v48, 5  ;;  %v1336_v28 = vrot.slane %v1334_v50, 5  ;;  %v3104_v31 = vshrl.u32 %v2971_v2, 16  ;;  %v1074_v17 = vld [vmem:[#allocation2 + $0x48] sm:$0xf] }
  0xf8   : > { %v1323_v32 = vsel %vm8312_vm10, %v1318_v18, %v1322_v55  ;;  %v1340_v35 = vrot.slane %v1338_v21, 4  ;;  %v1346_v7 = vrot.slane %v1344_v9, 5  ;;  %v3107_v23 = vshll.u32 %v2971_v2, 16 }
  0xf9   : > { %v6313_v52 = vcombine.low %v1313_v22, %v1323_v32  ;;  %v1331_v13 = vor.u32 %v1330_v27, %v1327_v61  ;;  %v3106_v24 = vrot.slane %v3104_v31, 4  ;;  %v3113_v54 = vshll.u32 %v8592_v3, 16  ;;  %v555_v61 = vld [vmem:[#allocation2 + $0x54] sm:$0x1]  ;;  %v1078_v27 = vld [vmem:[#allocation2 + $0x50] sm:$0x1] }
  0xfa   : > { %v1341_v42 = vor.u32 %v1340_v35, %v1336_v28  ;;  %v3109_v58 = vrot.slane %v3107_v23, 5  ;;  %v3117_v25 = vshrl.u32 %v8592_v3, 16  ;;  %v3123_v36 = vshll.u32 %v8594_v26, 16  ;;  %v605_v31 = vld [vmem:[#allocation2 + $0x5c] sm:$0x1] }
  0xfb   : > { %6993 = vmatprep.mubr.msk.bf16.mxu1 %vm1638_vm9, %v6313_v52  ;;  %v1332_v15 = vrot.slane %v1331_v13, 4  ;;  %v3115_v59 = vrot.slane %v3113_v54, 5  ;;  %v805_v11 = vrot.slane %v803_v6, 7  ;;  %v811_v55 = vshrl.u32 %v8553_v37, 16 }
  0xfc   : > { %v1342_v62 = vrot.slane %v1341_v42, 4  ;;  %v3110_v1 = vor.u32 %v3109_v58, %v3106_v24  ;;  %v3119_v2 = vrot.slane %v3117_v25, 4  ;;  %v3125_v4 = vrot.slane %v3123_v36, 5  ;;  %v558_v42 = vld [vmem:[#allocation2 + $0x60] sm:$0x1] }
  0xfd   : > { %v1337_v47 = vsel %vm8312_vm10, %v1332_v15, %v1336_v28  ;;  %v808_v48 = vor.u32 %v806_v39, %v805_v11  ;;  %v809_v50 = vrot.slane %v805_v11, 4  ;;  %v813_v18 = vrot.slane %v811_v55, 7  ;;  %v608_v15 = vld [vmem:[#allocation2 + $0x68] sm:$0x1] }
  0xfe   : > { %v1347_v21 = vsel %vm8312_vm10, %v1342_v62, %v1346_v7  ;;  %v3111_v9 = vrot.slane %v3110_v1, 4  ;;  %v3120_v22 = vor.u32 %v3119_v2, %v3115_v59  ;;  %v814_v6 = vshll.u32 %v8553_v37, 16  ;;  %v561_v1 = vld [vmem:[#allocation2 + $0x6c] sm:$0x1] }
  0xff   : > { %v6314_v32 = vcombine.low %v1337_v47, %v1347_v21  ;;  %v818_v35 = vrot.slane %v813_v18, 4  ;;  %v1075_v23 = vsel %vm8351_vm12, %v808_v48, %v1074_v17  ;;  %v488_v28 = vmax.f32 %v8556_v44, 0.0 }
 0x100   : > { %v3116_v39 = vsel %vm8312_vm10, %v3111_v9, %v3115_v59  ;;  %v3121_v52 = vrot.slane %v3120_v22, 4  ;;  %v816_v13 = vor.u32 %v814_v6, %v813_v18  ;;  %1076 = vst [vmem:[#allocation2 + $0x48] sm:$0xf] %v1075_v23  ;;  %v489_v7 = vmax.f32 %v8566_v38, 0.0 }
 0x101   : > { %6994 = vmatmul.mubr.msk.bf16.gmra.mrb[8].mxu1 %vm1638_vm9, %v6314_v32  ;;  %v1079_v37 = vsel %vm8290_vm7, %v818_v35, %v1078_v27  ;;  %v556_v24 = vsel %vm8290_vm7, 0, %v555_v61  ;;  %v606_v54 = vsel %vm8296_vm8, 0, %v605_v31  ;;  %v6698_v44 = vpack.c.bf16 %v488_v28, %v488_v28 }
 0x102   : > { %v3126_v58 = vsel %vm8312_vm10, %v3121_v52, %v3125_v4  ;;  %v817_v25 = vsel %vm8360_vm13, %v809_v50, %v816_v13  ;;  %1080 = vst [vmem:[#allocation2 + $0x50] sm:$0x1] %v1079_v37  ;;  %557 = vst [vmem:[#allocation2 + $0x54] sm:$0x1] %v556_v24  ;;  %v6699_v38 = vpack.c.bf16 %v489_v7, %v489_v7  ;;  %v559_v47 = vsel %vm8290_vm7, 0, %v558_v42 }
 0x103   : > { %607 = vst [vmem:[#allocation2 + $0x5c] sm:$0x1] %v606_v54  ;;  %v458_v36 = vadd.f32 %v8302_v19, %v8582_v29  ;;  %v6457_v59 = vcombine.low %v3116_v39, %v3126_v58  ;;  %1077 = vst.msk [vmem:[#allocation2 + $0x4c] sm:$0xf] %vm524_vm0, %v817_v25  ;;  %v820_v11 = vshrl.u32 %v6698_v44, 16  ;;  %v823_v55 = vshll.u32 %v6698_v44, 16 }
 0x104   : > { %v459_v62 = vadd.f32 %v8302_v19, %v8585_v45  ;;  %v828_v2 = vshrl.u32 %v6699_v38, 16  ;;  %v831_v4 = vshll.u32 %v6699_v38, 16  ;;  %560 = vst [vmem:[#allocation2 + $0x60] sm:$0x1] %v559_v47  ;;  %v609_v50 = vsel %vm8296_vm8, 0, %v608_v15 }
 0x105   : > { %v490_v17 = vmax.f32 %v458_v36, 0.0  ;;  %7129 = vmatprep.mubr.msk.bf16.mxu0 %vm1638_vm9, %v6457_v59  ;;  %v822_v48 = vrot.slane %v820_v11, 7  ;;  %v6786_v18 = vunpack.c.h.bf16 %v8577_v33  ;;  %610 = vst [vmem:[#allocation2 + $0x68] sm:$0x1] %v609_v50  ;;  %v8641_v45 = vld [vmem:[#allocation6] ss:$0 sm:$0xff] }
 0x106   : > { %v491_v29 = vmax.f32 %v459_v62, 0.0  ;;  %v830_v61 = vrot.slane %v828_v2, 7  ;;  %v421_v21 = vmul.f32 %v8641_v45, %v6785_v46  ;;  %v562_v9 = vsel %vm8290_vm7, 0, %v561_v1  ;;  %v8654_v24 = vld [vmem:[#allocation8] ss:$0 sm:$0xff] }
 0x107   : > { %v8639_v19 = vpack.c.bf16 %v490_v17, %v490_v17  ;;  %v2974_v22 = vld [vmem:[#allocation2 + $0x48] sm:$0xf]  ;;  %v825_v27 = vor.u32 %v823_v55, %v822_v48  ;;  %v826_v31 = vrot.slane %v822_v48, 4  ;;  %v422_v35 = vmul.f32 %v8641_v45, %v6786_v18  ;;  %563 = vst [vmem:[#allocation2 + $0x6c] sm:$0x1] %v562_v9 }
 0x108   : > { %v1164_v6 = vld [vmem:[#allocation2 + $0x48] sm:$0xf]  ;;  %v8648_v32 = vpack.c.bf16 %v491_v29, %v491_v29  ;;  %v3128_v23 = vshrl.u32 %v2974_v22, 16  ;;  %v3131_v28 = vshll.u32 %v2974_v22, 16  ;;  %v833_v46 = vor.u32 %v831_v4, %v830_v61 }
 0x109   : > { %v1349_v39 = vshrl.u32 %v1164_v6, 16  ;;  %v1352_v52 = vshll.u32 %v1164_v6, 16  ;;  %v8651_v13 = vld [vmem:[#allocation2 + $0x50] sm:$0x1]  ;;  %v835_v7 = vrot.slane %v830_v61, 4  ;;  %v837_v37 = vshrl.u32 %v8639_v19, 16 }
 0x10a   : > { %v1191_v33 = vld [vmem:[#allocation2 + $0x50] sm:$0x1]  ;;  %v8657_v54 = vadd.f32 %v8654_v24, %v421_v21  ;;  %v8659_v44 = vld [vmem:[#allocation2 + $0x4c] sm:$0xf]  ;;  %v3130_v42 = vrot.slane %v3128_v23, 4  ;;  %v3133_v58 = vrot.slane %v3131_v28, 5  ;;  %v834_v22 = vsel %vm8360_vm13, %v826_v31, %v833_v46 }
 0x10b   : > { %v3147_v25 = vshll.u32 %v8651_v13, 16  ;;  %v1351_v38 = vrot.slane %v1349_v39, 4  ;;  %v3137_v36 = vshll.u32 %v8659_v44, 16  ;;  %v3141_v15 = vshrl.u32 %v8659_v44, 16  ;;  %v1165_v59 = vld [vmem:[#allocation2 + $0x4c] sm:$0xf] }
 0x10c   : > { %v1354_v11 = vrot.slane %v1352_v52, 5  ;;  %v1368_v55 = vshll.u32 %v1191_v33, 16  ;;  %v3134_v62 = vor.u32 %v3133_v58, %v3130_v42  ;;  %v1358_v2 = vshll.u32 %v1165_v59, 16  ;;  %v1081_v17 = vld [vmem:[#allocation2 + $0x54] sm:$0xf] }
 0x10d   : > { %v3149_v1 = vrot.slane %v3147_v25, 5  ;;  %v1362_v4 = vshrl.u32 %v1165_v59, 16  ;;  %v3139_v47 = vrot.slane %v3137_v36, 5  ;;  %v3143_v48 = vrot.slane %v3141_v15, 4  ;;  %v1085_v18 = vld [vmem:[#allocation2 + $0x5c] sm:$0x1] }
 0x10e   : > { %v1355_v29 = vor.u32 %v1354_v11, %v1351_v38  ;;  %v1370_v50 = vrot.slane %v1368_v55, 5  ;;  %v3135_v61 = vrot.slane %v3134_v62, 4  ;;  %v1360_v21 = vrot.slane %v1358_v2, 5  ;;  %1084 = vst.msk [vmem:[#allocation2 + $0x58] sm:$0xf] %vm524_vm0, %v834_v22 }
 0x10f   : > { %v1364_v9 = vrot.slane %v1362_v4, 4  ;;  %v3144_v6 = vor.u32 %v3143_v48, %v3139_v47  ;;  %v1082_v28 = vsel %vm8351_vm12, %v825_v27, %v1081_v17  ;;  %v1086_v39 = vsel %vm8290_vm7, %v835_v7, %v1085_v18  ;;  %v1088_v52 = vld [vmem:[#allocation2 + $0x60] sm:$0xf]  ;;  %v611_v33 = vld [vmem:[#allocation2 + $0x74] sm:$0x1] }
 0x110   : > { %v1356_v23 = vrot.slane %v1355_v29, 4  ;;  %v3140_v42 = vsel %vm8312_vm10, %v3135_v61, %v3139_v47  ;;  %1083 = vst [vmem:[#allocation2 + $0x54] sm:$0xf] %v1082_v28  ;;  %1087 = vst [vmem:[#allocation2 + $0x5c] sm:$0x1] %v1086_v39  ;;  %v839_v25 = vrot.slane %v837_v37, 7  ;;  %v461_v55 = vadd.f32 %v8654_v24, %v422_v35 }
 0x111   : > { %v1365_v58 = vor.u32 %v1364_v9, %v1360_v21  ;;  %v840_v31 = vshll.u32 %v8639_v19, 16  ;;  %v2308_v46 = vld [vmem:[#allocation9 + $0x4] sm:$0x3]  ;;  %v3145_v38 = vrot.slane %v3144_v6, 4  ;;  %v845_v36 = vshrl.u32 %v8648_v32, 16 }
 0x112   : > { %v1361_v27 = vsel %vm8312_vm10, %v1356_v23, %v1360_v21  ;;  %v848_v7 = vshll.u32 %v8648_v32, 16  ;;  %7549 = vmatprep.subr.msk.bf16.mxu1 %vm1687_vm2, %v2308_v46  ;;  %v843_v11 = vrot.slane %v839_v25, 4  ;;  %v492_v62 = vmax.f32 %v8657_v54, 0.0  ;;  %v8686_v4 = vld [vmem:[%s8260_s14 + $0x48] sm:$0xff]   ;;  %v1092_v48 = vld [vmem:[#allocation2 + $0x68] sm:$0x1] }
 0x113   : > { %v1366_v15 = vrot.slane %v1365_v58, 4  ;;  %v842_v59 = vor.u32 %v840_v31, %v839_v25  ;;  %v3150_v37 = vsel %vm8312_vm10, %v3145_v38, %v3149_v1  ;;  %v847_v19 = vrot.slane %v845_v36, 7 }
 0x114   : > { %v612_v2 = vsel %vm8296_vm8, 0, %v611_v33  ;;  %v6458_v17 = vcombine.low %v3140_v42, %v3150_v37  ;;  %v493_v35 = vmax.f32 %v461_v55, 0.0  ;;  %v8692_v54 = vpack.c.bf16 %v492_v62, %v492_v62 }
 0x115   : > { %v1371_v32 = vsel %vm8312_vm10, %v1366_v15, %v1370_v50  ;;  %v1089_v47 = vsel %vm8351_vm12, %v842_v59, %v1088_v52  ;;  %613 = vst [vmem:[#allocation2 + $0x74] sm:$0x1] %v612_v2  ;;  %v850_v1 = vor.u32 %v848_v7, %v847_v19  ;;  %v852_v18 = vrot.slane %v847_v19, 4  ;;  %v1167_v61 = vld [vmem:[#allocation2 + $0x58] sm:$0xf] }
 0x116   : > { %v6315_v29 = vcombine.low %v1361_v27, %v1371_v32  ;;  %1090 = vst [vmem:[#allocation2 + $0x60] sm:$0xf] %v1089_v47  ;;  %7130 = vmatmul.mubr.msk.bf16.gmra.mrb[8].mxu0 %vm1638_vm9, %v6458_v17  ;;  %v8695_v21 = vld [vmem:[#allocation2 + $0x58] sm:$0xf]  ;;  %v8697_v9 = vpack.c.bf16 %v493_v35, %v493_v35  ;;  %v6789_v50 = vunpack.c.l.bf16 %v8686_v4  ;;  %v1382_v23 = vshll.u32 %v1167_v61, 16 }
 0x117   : > { %v1166_v22 = vld [vmem:[#allocation2 + $0x54] sm:$0xf]  ;;  %v1192_v6 = vld [vmem:[#allocation2 + $0x5c] sm:$0x1]  ;;  %v1386_v28 = vshrl.u32 %v1167_v61, 16  ;;  %v851_v39 = vsel %vm8360_vm13, %v843_v11, %v850_v1  ;;  %v1093_v52 = vsel %vm8290_vm7, %v852_v18, %v1092_v48  ;;  %v3161_v31 = vshll.u32 %v8695_v21, 16 }
 0x118   : > { %6997 = vmatprep.mubr.msk.bf16.mxu1 %vm1638_vm9, %v6315_v29  ;;  %v1373_v33 = vshrl.u32 %v1166_v22, 16  ;;  %v1376_v42 = vshll.u32 %v1166_v22, 16  ;;  %v1392_v58 = vshll.u32 %v1192_v6, 16  ;;  %v2977_v25 = vld [vmem:[#allocation2 + $0x54] sm:$0xf]  ;;  %v1384_v46 = vrot.slane %v1382_v23, 5 }
 0x119   : > { %1091 = vst.msk [vmem:[#allocation2 + $0x64] sm:$0xf] %vm524_vm0, %v851_v39  ;;  %1094 = vst [vmem:[#allocation2 + $0x68] sm:$0x1] %v1093_v52  ;;  %v1388_v38 = vrot.slane %v1386_v28, 4  ;;  %v3152_v36 = vshrl.u32 %v2977_v25, 16  ;;  %v8723_v1 = vsel %vm8711_vm1, %v8456_v51, %v3761_v41 }
 0x11a   : > { %v8707_v27 = vld [vmem:[#allocation2 + $0x5c] sm:$0x1]  ;;  %v3155_v7 = vshll.u32 %v2977_v25, 16  ;;  %v1375_v59 = vrot.slane %v1373_v33, 4  ;;  %v1378_v11 = vrot.slane %v1376_v42, 5  ;;  %v1394_v55 = vrot.slane %v1392_v58, 5 }
 0x11b   : > { %v3163_v37 = vrot.slane %v3161_v31, 5  ;;  %v1389_v19 = vor.u32 %v1388_v38, %v1384_v46  ;;  %v3154_v62 = vrot.slane %v3152_v36, 4  ;;  %v3165_v17 = vshrl.u32 %v8695_v21, 16 }
 0x11c   : > { %v3157_v2 = vrot.slane %v3155_v7, 5  ;;  %v1379_v32 = vor.u32 %v1378_v11, %v1375_v59  ;;  %v3171_v47 = vshll.u32 %v8707_v27, 16  ;;  %v854_v29 = vshrl.u32 %v8692_v54, 16 }
 0x11d   : > { %v2980_v48 = vld [vmem:[#allocation2 + $0x60] sm:$0xf]  ;;  %v1390_v18 = vrot.slane %v1389_v19, 4  ;;  %v3167_v22 = vrot.slane %v3165_v17, 4  ;;  %v4319_v34 = vsel %vm1687_vm2, %v8465_v14, 0  ;;  %v423_v14 = vmul.f32 %v8641_v45, %v6789_v50 }
 0x11e   : > { %v1168_v35 = vld [vmem:[#allocation2 + $0x60] sm:$0xf]  ;;  %v3158_v61 = vor.u32 %v3157_v2, %v3154_v62  ;;  %v3176_v6 = vshrl.u32 %v2980_v48, 16  ;;  %v1380_v23 = vrot.slane %v1379_v32, 4  ;;  %v3173_v28 = vrot.slane %v3171_v47, 5 }
 0x11f   : > { %v3179_v39 = vshll.u32 %v2980_v48, 16  ;;  %v1397_v52 = vshrl.u32 %v1168_v35, 16  ;;  %v1395_v33 = vsel %vm8312_vm10, %v1390_v18, %v1394_v55  ;;  %v3168_v58 = vor.u32 %v3167_v22, %v3163_v37 }
 0x120   : > { %v3159_v42 = vrot.slane %v3158_v61, 4  ;;  %v8727_v25 = vld [vmem:[#allocation2 + $0x64] sm:$0xf]  ;;  %v8729_v0 = vld [vmem:[#allocation2 + $0x68] sm:$0x1]  ;;  %v3178_v31 = vrot.slane %v3176_v6, 4  ;;  %v1385_v41 = vsel %vm8312_vm10, %v1380_v23, %v1384_v46  ;;  %v462_v50 = vadd.f32 %v8654_v24, %v423_v14 }
 0x121   : > { %v3181_v51 = vrot.slane %v3179_v39, 5  ;;  %v3185_v38 = vshll.u32 %v8727_v25, 16  ;;  %v3189_v36 = vshrl.u32 %v8727_v25, 16  ;;  %v1169_v7 = vld [vmem:[#allocation2 + $0x64] sm:$0xf]  ;;  %v6316_v59 = vcombine.low %v1385_v41, %v1395_v33 }
 0x122   : > { %v3164_v11 = vsel %vm8312_vm10, %v3159_v42, %v3163_v37  ;;  %v3169_v55 = vrot.slane %v3168_v58, 4  ;;  %v3195_v19 = vshll.u32 %v8729_v0, 16  ;;  %v1193_v62 = vld [vmem:[#allocation2 + $0x68] sm:$0x1]  ;;  %v1399_v47 = vrot.slane %v1397_v52, 4 }
 0x123   : > { %v3182_v2 = vor.u32 %v3181_v51, %v3178_v31  ;;  %v3187_v17 = vrot.slane %v3185_v38, 5  ;;  %v3191_v32 = vrot.slane %v3189_v36, 4  ;;  %6998 = vmatmul.mubr.msk.bf16.gmra.mrb[12].mxu1 %vm1638_vm9, %v6316_v59  ;;  %v1400_v18 = vshll.u32 %v1168_v35, 16  ;;  %v3685_v39 = vld [vmem:[#allocation2 + $0xc] sm:$0xe] }
 0x124   : > { %v3174_v46 = vsel %vm8312_vm10, %v3169_v55, %v3173_v28  ;;  %v3197_v48 = vrot.slane %v3195_v19, 5  ;;  %v1406_v61 = vshll.u32 %v1169_v7, 16  ;;  %v1410_v37 = vshrl.u32 %v1169_v7, 16  ;;  %v3686_v41 = vld [vmem:[#allocation2 + $0x18] sm:$0xe] }
 0x125   : > { %v6459_v22 = vcombine.low %v3164_v11, %v3174_v46  ;;  %v3183_v6 = vrot.slane %v3182_v2, 4  ;;  %v3192_v23 = vor.u32 %v3191_v32, %v3187_v17  ;;  %v1402_v33 = vrot.slane %v1400_v18, 5  ;;  %v1095_v11 = vld [vmem:[#allocation2 + $0x6c] sm:$0xf] }
 0x126   : > { %v1408_v42 = vrot.slane %v1406_v61, 5  ;;  %v1416_v58 = vshll.u32 %v1193_v62, 16  ;;  %v856_v31 = vrot.slane %v854_v29, 7  ;;  %v1412_v28 = vrot.slane %v1410_v37, 4  ;;  %v564_v37 = vld [vmem:[#allocation2 + $0x78] sm:$0x1] }
 0x127   : > { %7133 = vmatprep.mubr.msk.bf16.mxu0 %vm1638_vm9, %v6459_v22  ;;  %v3188_v52 = vsel %vm8312_vm10, %v3183_v6, %v3187_v17  ;;  %v3193_v51 = vrot.slane %v3192_v23, 4  ;;  %v857_v35 = vshll.u32 %v8692_v54, 16  ;;  %v1403_v38 = vor.u32 %v1402_v33, %v1399_v47  ;;  %v1099_v47 = vld [vmem:[#allocation2 + $0x74] sm:$0x1] }
 0x128   : > { %v1418_v36 = vrot.slane %v1416_v58, 5  ;;  %v860_v59 = vrot.slane %v856_v31, 4  ;;  %v862_v7 = vshrl.u32 %v8697_v9, 16  ;;  %v1413_v29 = vor.u32 %v1412_v28, %v1408_v42  ;;  %v614_v58 = vld [vmem:[#allocation2 + $0x80] sm:$0x1] }
 0x129   : > { %v3198_v55 = vsel %vm8312_vm10, %v3193_v51, %v3197_v48  ;;  %v859_v19 = vor.u32 %v857_v35, %v856_v31  ;;  %v865_v62 = vshll.u32 %v8697_v9, 16  ;;  %v1404_v32 = vrot.slane %v1403_v38, 4  ;;  %v6824_v31 = vld [vmem:[%s8260_s14 + $0x50] sm:$0xff]   ;;  %v3687_v28 = vld [vmem:[#allocation2 + $0x24] sm:$0xe] }
 0x12a   : > { %v6460_v2 = vcombine.low %v3188_v52, %v3198_v55  ;;  %v864_v17 = vrot.slane %v862_v7, 7  ;;  %v6485_v46 = vrot.slane %v3685_v39, 9  ;;  %v1414_v18 = vrot.slane %v1413_v29, 4  ;;  %v3688_v7 = vld [vmem:[#allocation2 + $0x30] sm:$0xe] }
 0x12b   : > { %v1096_v54 = vsel %vm8351_vm12, %v859_v19, %v1095_v11  ;;  %v3753_v61 = vrot.slane %v3751_v56, 4  ;;  %v6486_v22 = vrot.slane %v3686_v41, 9  ;;  %v1409_v48 = vsel %vm8312_vm10, %v1404_v32, %v1408_v42  ;;  %v4947_v32 = vld [vmem:[#allocation9 + $0xe] sm:$0x3] }
 0x12c   : > { %7134 = vmatmul.mubr.msk.bf16.gmra.mrb[12].mxu0 %vm1638_vm9, %v6460_v2  ;;  %v867_v9 = vor.u32 %v865_v62, %v864_v17  ;;  %v869_v6 = vrot.slane %v864_v17, 4  ;;  %1097 = vst [vmem:[#allocation2 + $0x6c] sm:$0xf] %v1096_v54  ;;  %v3752_v23 = vsel %vm8711_vm1, %v6485_v46, %v3751_v56  ;;  %v1419_v39 = vsel %vm8312_vm10, %v1414_v18, %v1418_v36  ;;  %v567_v56 = vld [vmem:[#allocation2 + $0x84] sm:$0x1] }
 0x12d   : > { %v3755_v33 = vsel %vm8711_vm1, %v3753_v61, %v3754_v57  ;;  %v3759_v42 = vsel %vm8711_vm1, %v6486_v22, %v3758_v40  ;;  %v6317_v41 = vcombine.low %v1409_v48, %v1419_v39  ;;  %v617_v57 = vld [vmem:[#allocation2 + $0x8c] sm:$0x1]  ;;  %v6790_v40 = vunpack.c.h.bf16 %v8686_v4  ;;  %v8802_v61 = vld [vmem:[%s8260_s14 + $0x58] sm:$0xff]  }
 0x12e   : > { %v868_v52 = vsel %vm8360_vm13, %v860_v59, %v867_v9  ;;  %v1100_v43 = vsel %vm8290_vm7, %v869_v6, %v1099_v47  ;;  %v6501_v51 = vcombine.low %v3752_v23, %v3755_v33  ;;  %v6502_v53 = vcombine.low %v3759_v42, %v8723_v1 }
 0x12f   : > { %1098 = vst.msk [vmem:[#allocation2 + $0x70] sm:$0xf] %vm524_vm0, %v868_v52  ;;  %1101 = vst [vmem:[#allocation2 + $0x74] sm:$0x1] %v1100_v43  ;;  %v565_v35 = vsel %vm8290_vm7, 0, %v564_v37  ;;  %7001 = vmatprep.mubr.msk.bf16.mxu1 %vm1638_vm9, %v6317_v41  ;;  %v615_v38 = vsel %vm8296_vm8, 0, %v614_v58  ;;  %v6793_v36 = vunpack.c.l.bf16 %v6824_v31  ;;  %v6794_v59 = vunpack.c.h.bf16 %v6824_v31 }
 0x130   : > { %7155 = vmatprep.mubr.msk.bf16.mxu0 %vm1638_vm9, %v6501_v51  ;;  %566 = vst [vmem:[#allocation2 + $0x78] sm:$0x1] %v565_v35  ;;  %v568_v1 = vsel %vm8290_vm7, 0, %v567_v56  ;;  %v424_v4 = vmul.f32 %v8641_v45, %v6790_v40  ;;  %616 = vst [vmem:[#allocation2 + $0x80] sm:$0x1] %v615_v38  ;;  %v618_v11 = vsel %vm8296_vm8, 0, %v617_v57  ;;  %v6797_v56 = vunpack.c.l.bf16 %v8802_v61 }
 0x131   : > { %569 = vst [vmem:[#allocation2 + $0x84] sm:$0x1] %v568_v1  ;;  %v6487_v55 = vrot.slane %v3687_v28, 9  ;;  %v425_v29 = vmul.f32 %v8641_v45, %v6793_v36  ;;  %v426_v19 = vmul.f32 %v8641_v45, %v6794_v59  ;;  %619 = vst [vmem:[#allocation2 + $0x8c] sm:$0x1] %v618_v11  ;;  %v3765_v62 = vrot.slane %v8509_v60, 5 }
 0x132   : > { %v3768_v2 = vrot.slane %v8518_v8, 5  ;;  %v463_v46 = vadd.f32 %v8654_v24, %v424_v4  ;;  %v494_v18 = vmax.f32 %v462_v50, 0.0  ;;  %v6488_v54 = vrot.slane %v3688_v7, 9 }
 0x133   : > { %v1170_v17 = vld [vmem:[#allocation2 + $0x6c] sm:$0xf]  ;;  %v3772_v47 = vrot.slane %v8559_v63, 5  ;;  %v464_v9 = vadd.f32 %v8654_v24, %v425_v29  ;;  %v465_v60 = vadd.f32 %v8654_v24, %v426_v19  ;;  %v8809_v23 = vsel %vm8711_vm1, %v6487_v55, %v3765_v62 }
 0x134   : > { %v1421_v22 = vshrl.u32 %v1170_v17, 16  ;;  %v1424_v48 = vshll.u32 %v1170_v17, 16  ;;  %7156 = vmatmul.mubr.msk.bf16.vlgmr.msra.gmra.mrb[0].mxu0 %vm1638_vm9, %v6502_v53  ;;  %v495_v8 = vmax.f32 %v463_v46, 0.0  ;;  %v6704_v6 = vpack.c.bf16 %v494_v18, %v494_v18 }
 0x135   : > { %7188 = vmatpush3.bf16.msra.mxu0 %v4319_v34  ;;  %v3767_v37 = vrot.slane %v3765_v62, 4  ;;  %v8815_v31 = vsel %vm8711_vm1, %v6488_v54, %v3772_v47  ;;  %v496_v53 = vmax.f32 %v464_v9, 0.0  ;;  %v497_v7 = vmax.f32 %v465_v60, 0.0 }
 0x136   : > { %v1171_v39 = vld [vmem:[#allocation2 + $0x70] sm:$0xf]  ;;  %v1194_v33 = vld [vmem:[#allocation2 + $0x74] sm:$0x1]  ;;  %v1423_v42 = vrot.slane %v1421_v22, 4  ;;  %v1426_v58 = vrot.slane %v1424_v48, 5  ;;  %7555 = vmatprep.subr.msk.bf16.mxu0 %vm1687_vm2, %v4947_v32  ;;  %v6705_v43 = vpack.c.bf16 %v495_v8, %v495_v8 }
 0x137   : > { %v1430_v34 = vshll.u32 %v1171_v39, 16  ;;  %v1434_v41 = vshrl.u32 %v1171_v39, 16  ;;  %v1440_v52 = vshll.u32 %v1194_v33, 16  ;;  %v871_v57 = vshrl.u32 %v6704_v6, 16  ;;  %v1102_v11 = vld [vmem:[#allocation2 + $0x78] sm:$0xf] }
 0x138   : > { %v1427_v51 = vor.u32 %v1426_v58, %v1423_v42  ;;  %v874_v28 = vshll.u32 %v6704_v6, 16  ;;  %v879_v38 = vshrl.u32 %v6705_v43, 16  ;;  %v882_v1 = vshll.u32 %v6705_v43, 16  ;;  %v1106_v55 = vld [vmem:[#allocation2 + $0x80] sm:$0x1] }
 0x139   : > { %v1432_v40 = vrot.slane %v1430_v34, 5  ;;  %v1436_v14 = vrot.slane %v1434_v41, 4  ;;  %v1442_v35 = vrot.slane %v1440_v52, 5  ;;  %v873_v59 = vrot.slane %v871_v57, 7  ;;  %v570_v42 = vld [vmem:[#allocation2 + $0x90] sm:$0x1] }
 0x13a   : > { %v1428_v36 = vrot.slane %v1427_v51, 4  ;;  %v881_v50 = vrot.slane %v879_v38, 7  ;;  %v6706_v29 = vpack.c.bf16 %v496_v53, %v496_v53  ;;  %v3769_v19 = vsel %vm8711_vm1, %v3767_v37, %v3768_v2  ;;  %v1109_v41 = vld [vmem:[#allocation2 + $0x84] sm:$0xf]  ;;  %v620_v51 = vld [vmem:[#allocation2 + $0x98] sm:$0x1] }
 0x13b   : > { %v1437_v4 = vor.u32 %v1436_v14, %v1432_v40  ;;  %v876_v32 = vor.u32 %v874_v28, %v873_v59  ;;  %v877_v17 = vrot.slane %v873_v59, 4  ;;  %v6707_v46 = vpack.c.bf16 %v497_v7, %v497_v7  ;;  %v1113_v53 = vld [vmem:[#allocation2 + $0x8c] sm:$0x1]  ;;  %v623_v7 = vld [vmem:[#allocation2 + $0xa4] sm:$0x1] }
 0x13c   : > { %v1433_v62 = vsel %vm8312_vm10, %v1428_v36, %v1432_v40  ;;  %v884_v54 = vor.u32 %v882_v1, %v881_v50  ;;  %v886_v22 = vrot.slane %v881_v50, 4  ;;  %v888_v48 = vshrl.u32 %v6706_v29, 16 }
 0x13d   : > { %v1438_v18 = vrot.slane %v1437_v4, 4  ;;  %v1103_v9 = vsel %vm8351_vm12, %v876_v32, %v1102_v11  ;;  %v891_v60 = vshll.u32 %v6706_v29, 16  ;;  %v896_v8 = vshrl.u32 %v6707_v46, 16  ;;  %v3689_v4 = vld [vmem:[#allocation2 + $0x3c] sm:$0xe] }
 0x13e   : > { %v899_v6 = vshll.u32 %v6707_v46, 16  ;;  %v885_v2 = vsel %vm8360_vm13, %v877_v17, %v884_v54  ;;  %1104 = vst [vmem:[#allocation2 + $0x78] sm:$0xf] %v1103_v9  ;;  %v1107_v37 = vsel %vm8290_vm7, %v886_v22, %v1106_v55  ;;  %v890_v33 = vrot.slane %v888_v48, 7 }
 0x13f   : > { %v1443_v39 = vsel %vm8312_vm10, %v1438_v18, %v1442_v35  ;;  %1105 = vst.msk [vmem:[#allocation2 + $0x7c] sm:$0xf] %vm524_vm0, %v885_v2  ;;  %1108 = vst [vmem:[#allocation2 + $0x80] sm:$0x1] %v1107_v37  ;;  %v898_v34 = vrot.slane %v896_v8, 7  ;;  %v6503_v52 = vcombine.low %v8809_v23, %v3769_v19  ;;  %v3774_v43 = vrot.slane %v3772_v47, 4 }
 0x140   : > { %v6318_v58 = vcombine.low %v1433_v62, %v1443_v39  ;;  %v893_v57 = vor.u32 %v891_v60, %v890_v33  ;;  %v894_v28 = vrot.slane %v890_v33, 4  ;;  %v3775_v40 = vrot.slane %v8568_v49, 5  ;;  %v6826_v47 = vld [vmem:[%s8260_s14 + $0x60] sm:$0xff]  }
 0x141   : > { %v6798_v14 = vunpack.c.h.bf16 %v8802_v61  ;;  %v901_v35 = vor.u32 %v899_v6, %v898_v34  ;;  %v903_v38 = vrot.slane %v898_v34, 4  ;;  %7159 = vmatprep.mubr.msk.bf16.mxu0 %vm1638_vm9, %v6503_v52  ;;  %v427_v36 = vmul.f32 %v8641_v45, %v6797_v56  ;;  %v573_v23 = vld [vmem:[#allocation2 + $0x9c] sm:$0x1] }
 0x142   : > { %7002 = vmatmul.mubr.msk.bf16.gmra.mrb[16].mxu1 %vm1638_vm9, %v6318_v58  ;;  %v571_v63 = vsel %vm8290_vm7, 0, %v570_v42  ;;  %v1110_v59 = vsel %vm8351_vm12, %v893_v57, %v1109_v41  ;;  %v3776_v49 = vsel %vm8711_vm1, %v3774_v43, %v3775_v40  ;;  %v621_v1 = vsel %vm8296_vm8, 0, %v620_v51 }
 0x143   : > { %v428_v61 = vmul.f32 %v8641_v45, %v6798_v14  ;;  %572 = vst [vmem:[#allocation2 + $0x90] sm:$0x1] %v571_v63  ;;  %v902_v56 = vsel %vm8360_vm13, %v894_v28, %v901_v35  ;;  %1111 = vst [vmem:[#allocation2 + $0x84] sm:$0xf] %v1110_v59  ;;  %v1114_v50 = vsel %vm8290_vm7, %v903_v38, %v1113_v53  ;;  %v6801_v19 = vunpack.c.l.bf16 %v6826_v47 }
 0x144   : > { %v6504_v11 = vcombine.low %v8815_v31, %v3776_v49  ;;  %v466_v55 = vadd.f32 %v8654_v24, %v427_v36  ;;  %622 = vst [vmem:[#allocation2 + $0x98] sm:$0x1] %v621_v1  ;;  %1112 = vst.msk [vmem:[#allocation2 + $0x88] sm:$0xf] %vm524_vm0, %v902_v56  ;;  %v6802_v62 = vunpack.c.h.bf16 %v6826_v47  ;;  %v574_v32 = vsel %vm8290_vm7, 0, %v573_v23 }
 0x145   : > { %1115 = vst [vmem:[#allocation2 + $0x8c] sm:$0x1] %v1114_v50  ;;  %v467_v29 = vadd.f32 %v8654_v24, %v428_v61  ;;  %v8860_v17 = vld [vmem:[#allocation2 + $0x78] sm:$0xf]  ;;  %575 = vst [vmem:[#allocation2 + $0x9c] sm:$0x1] %v574_v32  ;;  %v429_v8 = vmul.f32 %v8641_v45, %v6801_v19 }
 0x146   : > { %7160 = vmatmul.mubr.msk.bf16.gmra.mrb[4].mxu0 %vm1638_vm9, %v6504_v11  ;;  %v498_v46 = vmax.f32 %v466_v55, 0.0  ;;  %v624_v31 = vsel %vm8296_vm8, 0, %v623_v7  ;;  %v6489_v18 = vrot.slane %v3689_v4, 9  ;;  %v3779_v54 = vrot.slane %v8592_v3, 5  ;;  %v8866_v22 = vld [vmem:[#allocation2 + $0x7c] sm:$0xf] }
 0x147   : > { %v1195_v48 = vld [vmem:[#allocation2 + $0x80] sm:$0x1]  ;;  %v1445_v9 = vshrl.u32 %v8860_v17, 16  ;;  %v1448_v60 = vshll.u32 %v8860_v17, 16  ;;  %v430_v6 = vmul.f32 %v8641_v45, %v6802_v62  ;;  %625 = vst [vmem:[#allocation2 + $0xa4] sm:$0x1] %v624_v31  ;;  %v468_v34 = vadd.f32 %v8654_v24, %v429_v8 }
 0x148   : > { %v1454_v39 = vshll.u32 %v8866_v22, 16  ;;  %v1458_v2 = vshrl.u32 %v8866_v22, 16  ;;  %v1464_v37 = vshll.u32 %v1195_v48, 16  ;;  %v499_v33 = vmax.f32 %v467_v29, 0.0 }
 0x149   : > { %v1447_v42 = vrot.slane %v1445_v9, 4  ;;  %v1450_v3 = vrot.slane %v1448_v60, 5  ;;  %v6708_v58 = vpack.c.bf16 %v498_v46, %v498_v46  ;;  %v469_v14 = vadd.f32 %v8654_v24, %v430_v6  ;;  %v3690_v6 = vld [vmem:[#allocation2 + $0x48] sm:$0xe] }
 0x14a   : > { %v1456_v41 = vrot.slane %v1454_v39, 5  ;;  %v1460_v52 = vrot.slane %v1458_v2, 4  ;;  %v1466_v43 = vrot.slane %v1464_v37, 5  ;;  %v6709_v51 = vpack.c.bf16 %v499_v33, %v499_v33  ;;  %v8875_v28 = vld [vmem:[#allocation2 + $0x84] sm:$0xf] }
 0x14b   : > { %v1451_v57 = vor.u32 %v1450_v3, %v1447_v42  ;;  %v905_v53 = vshrl.u32 %v6708_v58, 16  ;;  %v908_v40 = vshll.u32 %v6708_v58, 16  ;;  %v8878_v38 = vld [vmem:[#allocation2 + $0x88] sm:$0xf]  ;;  %v1469_v63 = vshrl.u32 %v8875_v28, 16 }
 0x14c   : > { %v1461_v35 = vor.u32 %v1460_v52, %v1456_v41  ;;  %v1196_v36 = vld [vmem:[#allocation2 + $0x8c] sm:$0x1]  ;;  %v1472_v47 = vshll.u32 %v8875_v28, 16  ;;  %v8884_v23 = vsel %vm8711_vm1, %v6489_v18, %v3779_v54  ;;  %v1478_v49 = vshll.u32 %v8878_v38, 16  ;;  %v1116_v62 = vld [vmem:[#allocation2 + $0x90] sm:$0xf] }
 0x14d   : > { %v1452_v59 = vrot.slane %v1451_v57, 4  ;;  %v1482_v61 = vshrl.u32 %v8878_v38, 16  ;;  %v1488_v1 = vshll.u32 %v1196_v36, 16  ;;  %v1471_v4 = vrot.slane %v1469_v63, 4  ;;  %v1120_v37 = vld [vmem:[#allocation2 + $0x98] sm:$0x1] }
 0x14e   : > { %v1462_v7 = vrot.slane %v1461_v35, 4  ;;  %v1474_v56 = vrot.slane %v1472_v47, 5  ;;  %v907_v50 = vrot.slane %v905_v53, 7  ;;  %v1480_v55 = vrot.slane %v1478_v49, 5  ;;  %v576_v36 = vld [vmem:[#allocation2 + $0xa8] sm:$0x1] }
 0x14f   : > { %v1457_v11 = vsel %vm8312_vm10, %v1452_v59, %v1456_v41  ;;  %v1484_v29 = vrot.slane %v1482_v61, 4  ;;  %v1490_v19 = vrot.slane %v1488_v1, 5  ;;  %v913_v60 = vshrl.u32 %v6709_v51, 16  ;;  %v626_v49 = vld [vmem:[#allocation2 + $0xb0] sm:$0x1] }
 0x150   : > { %v1467_v32 = vsel %vm8312_vm10, %v1462_v7, %v1466_v43  ;;  %v1475_v46 = vor.u32 %v1474_v56, %v1471_v4  ;;  %v910_v31 = vor.u32 %v908_v40, %v907_v50  ;;  %v911_v18 = vrot.slane %v907_v50, 4  ;;  %v1123_v4 = vld [vmem:[#allocation2 + $0x9c] sm:$0xf]  ;;  %v7739_v15 = vld [vmem:[#allocation2 + $0x88] sm:$0xf] }
 0x151   : > { %v6319_v48 = vcombine.low %v1457_v11, %v1467_v32  ;;  %v1485_v9 = vor.u32 %v1484_v29, %v1480_v55  ;;  %v916_v8 = vshll.u32 %v6709_v51, 16  ;;  %v500_v33 = vmax.f32 %v468_v34, 0.0 }
 0x152   : > { %v1476_v39 = vrot.slane %v1475_v46, 4  ;;  %v1117_v2 = vsel %vm8351_vm12, %v910_v31, %v1116_v62  ;;  %v501_v42 = vmax.f32 %v469_v14, 0.0  ;;  %v915_v58 = vrot.slane %v913_v60, 7 }
 0x153   : > { %7005 = vmatprep.mubr.msk.bf16.mxu1 %vm1638_vm9, %v6319_v48  ;;  %v1486_v3 = vrot.slane %v1485_v9, 4  ;;  %1118 = vst [vmem:[#allocation2 + $0x90] sm:$0xf] %v1117_v2  ;;  %v3781_v41 = vrot.slane %v3779_v54, 4  ;;  %v3782_v52 = vrot.slane %v8594_v26, 5  ;;  %v6710_v51 = vpack.c.bf16 %v500_v33, %v500_v33  ;;  %v6827_v26 = vld [vmem:[%s8260_s14 + $0x68] sm:$0xff]  }
 0x154   : > { %v1481_v43 = vsel %vm8312_vm10, %v1476_v39, %v1480_v55  ;;  %v6711_v57 = vpack.c.bf16 %v501_v42, %v501_v42  ;;  %v6490_v53 = vrot.slane %v3690_v6, 9  ;;  %v918_v34 = vor.u32 %v916_v8, %v915_v58  ;;  %v6828_v39 = vld [vmem:[%s8260_s14 + $0x70] sm:$0xff]  }
 0x155   : > { %v1491_v40 = vsel %vm8312_vm10, %v1486_v3, %v1490_v19  ;;  %v920_v14 = vrot.slane %v915_v58, 4  ;;  %v3783_v35 = vsel %vm8711_vm1, %v3781_v41, %v3782_v52  ;;  %v922_v47 = vshrl.u32 %v6710_v51, 16  ;;  %v1127_v19 = vld [vmem:[#allocation2 + $0xa4] sm:$0x1]  ;;  %v579_v3 = vld [vmem:[#allocation2 + $0xb4] sm:$0x1] }
 0x156   : > { %v6320_v63 = vcombine.low %v1481_v43, %v1491_v40  ;;  %v925_v54 = vshll.u32 %v6710_v51, 16  ;;  %v930_v59 = vshrl.u32 %v6711_v57, 16  ;;  %v919_v61 = vsel %vm8360_vm13, %v911_v18, %v918_v34  ;;  %v629_v58 = vld [vmem:[#allocation2 + $0xbc] sm:$0x1] }
 0x157   : > { %v1121_v1 = vsel %vm8290_vm7, %v920_v14, %v1120_v37  ;;  %v933_v7 = vshll.u32 %v6711_v57, 16  ;;  %v6505_v56 = vcombine.low %v8884_v23, %v3783_v35  ;;  %1119 = vst.msk [vmem:[#allocation2 + $0x94] sm:$0xf] %vm524_vm0, %v919_v61  ;;  %v924_v50 = vrot.slane %v922_v47, 7  ;;  %v3691_v61 = vld [vmem:[#allocation2 + $0x54] sm:$0xe] }
 0x158   : > { %7006 = vmatmul.mubr.msk.bf16.gmra.mrb[20].mxu1 %vm1638_vm9, %v6320_v63  ;;  %1122 = vst [vmem:[#allocation2 + $0x98] sm:$0x1] %v1121_v1  ;;  %v932_v11 = vrot.slane %v930_v59, 7  ;;  %v3786_v55 = vrot.slane %v8659_v44, 5  ;;  %v3789_v29 = vrot.slane %v8651_v13, 5  ;;  %v6805_v62 = vunpack.c.l.bf16 %v6827_v26 }
 0x159   : > { %7163 = vmatprep.mubr.msk.bf16.mxu0 %vm1638_vm9, %v6505_v56  ;;  %v6806_v32 = vunpack.c.h.bf16 %v6827_v26  ;;  %v577_v23 = vsel %vm8290_vm7, 0, %v576_v36  ;;  %v627_v46 = vsel %vm8296_vm8, 0, %v626_v49  ;;  %v927_v18 = vor.u32 %v925_v54, %v924_v50 }
 0x15a   : > { %v8917_v31 = vld [vmem:[#allocation2 + $0x90] sm:$0xf]  ;;  %v928_v48 = vrot.slane %v924_v50, 4  ;;  %v935_v9 = vor.u32 %v933_v7, %v932_v11  ;;  %v937_v44 = vrot.slane %v932_v11, 4  ;;  %578 = vst [vmem:[#allocation2 + $0xa8] sm:$0x1] %v577_v23  ;;  %v3787_v8 = vsel %vm8711_vm1, %v6490_v53, %v3786_v55 }
 0x15b   : > { %628 = vst [vmem:[#allocation2 + $0xb0] sm:$0x1] %v627_v46  ;;  %v1493_v13 = vshrl.u32 %v8917_v31, 16  ;;  %v1496_v60 = vshll.u32 %v8917_v31, 16  ;;  %v3788_v6 = vrot.slane %v3786_v55, 4  ;;  %v1124_v37 = vsel %vm8351_vm12, %v927_v18, %v1123_v4 }
 0x15c   : > { %v936_v2 = vsel %vm8360_vm13, %v928_v48, %v935_v9  ;;  %v1128_v33 = vsel %vm8290_vm7, %v937_v44, %v1127_v19  ;;  %v431_v42 = vmul.f32 %v8641_v45, %v6805_v62  ;;  %1125 = vst [vmem:[#allocation2 + $0x9c] sm:$0xf] %v1124_v37  ;;  %v432_v51 = vmul.f32 %v8641_v45, %v6806_v32  ;;  %v8946_v4 = vld [vmem:[#allocation6] ss:$0 sm:$0xff] }
 0x15d   : > { %v1495_v41 = vrot.slane %v1493_v13, 4  ;;  %v1498_v52 = vrot.slane %v1496_v60, 5  ;;  %1126 = vst.msk [vmem:[#allocation2 + $0xa0] sm:$0xf] %vm524_vm0, %v936_v2  ;;  %1129 = vst [vmem:[#allocation2 + $0xa4] sm:$0x1] %v1128_v33  ;;  %v3790_v43 = vsel %vm8711_vm1, %v3788_v6, %v3789_v29  ;;  %v6809_v40 = vunpack.c.l.bf16 %v6828_v39 }
 0x15e   : > { %v6506_v57 = vcombine.low %v3787_v8, %v3790_v43  ;;  %v470_v53 = vadd.f32 %v8654_v24, %v431_v42  ;;  %v6810_v34 = vunpack.c.h.bf16 %v6828_v39  ;;  %v8936_v14 = vld [vmem:[#allocation2 + $0x94] sm:$0xf]  ;;  %v471_v63 = vadd.f32 %v8654_v24, %v432_v51 }
 0x15f   : > { %v1197_v35 = vld [vmem:[#allocation2 + $0x98] sm:$0x1]  ;;  %v1499_v36 = vor.u32 %v1498_v52, %v1495_v41  ;;  %v580_v47 = vsel %vm8290_vm7, 0, %v579_v3  ;;  %v630_v54 = vsel %vm8296_vm8, 0, %v629_v58  ;;  %v1502_v59 = vshll.u32 %v8936_v14, 16 }
 0x160   : > { %v1506_v45 = vshrl.u32 %v8936_v14, 16  ;;  %v1512_v26 = vshll.u32 %v1197_v35, 16  ;;  %7164 = vmatmul.mubr.msk.bf16.gmra.mrb[8].mxu0 %vm1638_vm9, %v6506_v57  ;;  %v502_v49 = vmax.f32 %v470_v53, 0.0  ;;  %581 = vst [vmem:[#allocation2 + $0xb4] sm:$0x1] %v580_v47  ;;  %v503_v7 = vmax.f32 %v471_v63, 0.0 }
 0x161   : > { %631 = vst [vmem:[#allocation2 + $0xbc] sm:$0x1] %v630_v54  ;;  %v1500_v1 = vrot.slane %v1499_v36, 4  ;;  %v433_v56 = vmul.f32 %v8946_v4, %v6809_v40  ;;  %v434_v50 = vmul.f32 %v8946_v4, %v6810_v34  ;;  %v1504_v11 = vrot.slane %v1502_v59, 5  ;;  %v1130_v36 = vld [vmem:[#allocation2 + $0xa8] sm:$0xf] }
 0x162   : > { %v1508_v55 = vrot.slane %v1506_v45, 4  ;;  %v6712_v29 = vpack.c.bf16 %v502_v49, %v502_v49  ;;  %v1514_v19 = vrot.slane %v1512_v26, 5  ;;  %v6713_v62 = vpack.c.bf16 %v503_v7, %v503_v7  ;;  %v1134_v49 = vld [vmem:[#allocation2 + $0xb0] sm:$0x1] }
 0x163   : > { %v6491_v32 = vrot.slane %v3691_v61, 9  ;;  %v1505_v23 = vsel %vm8312_vm10, %v1500_v1, %v1504_v11  ;;  %v8952_v18 = vld [vmem:[#allocation2 + $0x9c] sm:$0xf]  ;;  %v472_v44 = vadd.f32 %v8654_v24, %v433_v56  ;;  %v473_v13 = vadd.f32 %v8654_v24, %v434_v50 }
 0x164   : > { %v1509_v46 = vor.u32 %v1508_v55, %v1504_v11  ;;  %v8954_v48 = vld [vmem:[#allocation2 + $0xa0] sm:$0xf]  ;;  %v1198_v9 = vld [vmem:[#allocation2 + $0xa4] sm:$0x1]  ;;  %v1517_v60 = vshrl.u32 %v8952_v18, 16  ;;  %v1520_v8 = vshll.u32 %v8952_v18, 16 }
 0x165   : > { %v1526_v6 = vshll.u32 %v8954_v48, 16  ;;  %v1530_v39 = vshrl.u32 %v8954_v48, 16  ;;  %v1536_v37 = vshll.u32 %v1198_v9, 16  ;;  %v939_v33 = vshrl.u32 %v6712_v29, 16 }
 0x166   : > { %v1510_v2 = vrot.slane %v1509_v46, 4  ;;  %v942_v42 = vshll.u32 %v6712_v29, 16  ;;  %v1519_v3 = vrot.slane %v1517_v60, 4  ;;  %v1522_v58 = vrot.slane %v1520_v8, 5  ;;  %v3693_v60 = vld [vmem:[#allocation2 + $0x6c] sm:$0xe] }
 0x167   : > { %v1528_v41 = vrot.slane %v1526_v6, 5  ;;  %v1532_v52 = vrot.slane %v1530_v39, 4  ;;  %v1538_v24 = vrot.slane %v1536_v37, 5  ;;  %v941_v51 = vrot.slane %v939_v33, 7 }
 0x168   : > { %v1515_v43 = vsel %vm8312_vm10, %v1510_v2, %v1514_v19  ;;  %v947_v57 = vshrl.u32 %v6713_v62, 16  ;;  %v1523_v40 = vor.u32 %v1522_v58, %v1519_v3  ;;  %v950_v35 = vshll.u32 %v6713_v62, 16  ;;  %v2985_v3 = vld [vmem:[#allocation2 + $0x74] sm:$0x1] }
 0x169   : > { %v6321_v53 = vcombine.low %v1505_v23, %v1515_v43  ;;  %v1533_v34 = vor.u32 %v1532_v52, %v1528_v41  ;;  %v944_v63 = vor.u32 %v942_v42, %v941_v51  ;;  %v945_v47 = vrot.slane %v941_v51, 4  ;;  %v3692_v23 = vld [vmem:[#allocation2 + $0x60] sm:$0xe] }
 0x16a   : > { %v949_v54 = vrot.slane %v947_v57, 7  ;;  %v504_v59 = vmax.f32 %v472_v44, 0.0  ;;  %v1524_v45 = vrot.slane %v1523_v40, 4  ;;  %v505_v61 = vmax.f32 %v473_v13, 0.0  ;;  %v2984_v13 = vld [vmem:[#allocation2 + $0x70] sm:$0xf] }
 0x16b   : > { %7009 = vmatprep.mubr.msk.bf16.mxu1 %vm1638_vm9, %v6321_v53  ;;  %v1534_v26 = vrot.slane %v1533_v34, 4  ;;  %v3793_v1 = vrot.slane %v8695_v21, 5  ;;  %v1131_v50 = vsel %vm8351_vm12, %v944_v63, %v1130_v36  ;;  %v3796_v37 = vrot.slane %v8707_v27, 5  ;;  %v1141_v53 = vld [vmem:[#allocation2 + $0xbc] sm:$0x1] }
 0x16c   : > { %v952_v7 = vor.u32 %v950_v35, %v949_v54  ;;  %v954_v56 = vrot.slane %v949_v54, 4  ;;  %v6714_v11 = vpack.c.bf16 %v504_v59, %v504_v59  ;;  %v1529_v55 = vsel %vm8312_vm10, %v1524_v45, %v1528_v41  ;;  %1132 = vst [vmem:[#allocation2 + $0xa8] sm:$0xf] %v1131_v50  ;;  %v1137_v41 = vld [vmem:[#allocation2 + $0xb4] sm:$0xf] }
 0x16d   : > { %v1539_v29 = vsel %vm8312_vm10, %v1534_v26, %v1538_v24  ;;  %v6715_v19 = vpack.c.bf16 %v505_v61, %v505_v61  ;;  %v3794_v62 = vsel %vm8711_vm1, %v6491_v32, %v3793_v1  ;;  %v3795_v2 = vrot.slane %v3793_v1, 4 }
 0x16e   : > { %v6322_v46 = vcombine.low %v1529_v55, %v1539_v29  ;;  %v953_v21 = vsel %vm8360_vm13, %v945_v47, %v952_v7  ;;  %v1135_v9 = vsel %vm8290_vm7, %v954_v56, %v1134_v49  ;;  %v956_v44 = vshrl.u32 %v6714_v11, 16 }
 0x16f   : > { %1133 = vst.msk [vmem:[#allocation2 + $0xac] sm:$0xf] %vm524_vm0, %v953_v21  ;;  %1136 = vst [vmem:[#allocation2 + $0xb0] sm:$0x1] %v1135_v9  ;;  %v959_v8 = vshll.u32 %v6714_v11, 16  ;;  %v964_v6 = vshrl.u32 %v6715_v19, 16  ;;  %v3797_v40 = vsel %vm8711_vm1, %v3795_v2, %v3796_v37 }
 0x170   : > { %v967_v39 = vshll.u32 %v6715_v19, 16  ;;  %7010 = vmatmul.mubr.msk.bf16.gmra.mrb[24].mxu1 %vm1638_vm9, %v6322_v46  ;;  %v958_v32 = vrot.slane %v956_v44, 7  ;;  %v6492_v33 = vrot.slane %v3692_v23, 9  ;;  %v3800_v42 = vrot.slane %v8727_v25, 5  ;;  %v9009_v11 = vld [vmem:[#allocation2 + $0x7c] sm:$0xf] }
 0x171   : > { %v966_v58 = vrot.slane %v964_v6, 7  ;;  %v3803_v52 = vrot.slane %v8729_v0, 5  ;;  %v6493_v43 = vrot.slane %v3693_v60, 9  ;;  %v3807_v24 = vrot.slane %v2984_v13, 5  ;;  %v3694_v23 = vld [vmem:[#allocation2 + $0x78] sm:$0xe] }
 0x172   : > { %v961_v51 = vor.u32 %v959_v8, %v958_v32  ;;  %v962_v57 = vrot.slane %v958_v32, 4  ;;  %v3801_v34 = vsel %vm8711_vm1, %v6492_v33, %v3800_v42  ;;  %v6507_v36 = vcombine.low %v3794_v62, %v3797_v40  ;;  %v9014_v44 = vld [vmem:[#allocation2 + $0x80] sm:$0x1]  ;;  %v2991_v40 = vld [vmem:[#allocation2 + $0x8c] sm:$0x1] }
 0x173   : > { %v969_v27 = vor.u32 %v967_v39, %v966_v58  ;;  %v971_v35 = vrot.slane %v966_v58, 4  ;;  %v3802_v25 = vrot.slane %v3800_v42, 4  ;;  %v8987_v63 = vld [vmem:[#allocation2 + $0xa8] sm:$0xf]  ;;  %v3808_v47 = vsel %vm8711_vm1, %v6493_v43, %v3807_v24  ;;  %v3695_v58 = vld [vmem:[#allocation2 + $0x84] sm:$0xe] }
 0x174   : > { %v1138_v0 = vsel %vm8351_vm12, %v961_v51, %v1137_v41  ;;  %v3809_v54 = vrot.slane %v3807_v24, 4  ;;  %v3810_v59 = vrot.slane %v2985_v3, 5  ;;  %v1541_v45 = vshrl.u32 %v8987_v63, 16  ;;  %7167 = vmatprep.mubr.msk.bf16.mxu0 %vm1638_vm9, %v6507_v36 }
 0x175   : > { %v1544_v26 = vshll.u32 %v8987_v63, 16  ;;  %v970_v49 = vsel %vm8360_vm13, %v962_v57, %v969_v27  ;;  %1139 = vst [vmem:[#allocation2 + $0xb4] sm:$0xf] %v1138_v0  ;;  %v1142_v61 = vsel %vm8290_vm7, %v971_v35, %v1141_v53  ;;  %v3804_v56 = vsel %vm8711_vm1, %v3802_v25, %v3803_v52  ;;  %v2990_v53 = vld [vmem:[#allocation2 + $0x88] sm:$0xf] }
 0x176   : > { %v9000_v1 = vld [vmem:[#allocation2 + $0xac] sm:$0xf]  ;;  %v9002_v7 = vld [vmem:[#allocation2 + $0xb0] sm:$0x1]  ;;  %1140 = vst.msk [vmem:[#allocation2 + $0xb8] sm:$0xf] %vm524_vm0, %v970_v49  ;;  %v3811_v50 = vsel %vm8711_vm1, %v3809_v54, %v3810_v59  ;;  %v6508_v21 = vcombine.low %v3801_v34, %v3804_v56 }
 0x177   : > { %1143 = vst [vmem:[#allocation2 + $0xbc] sm:$0x1] %v1142_v61  ;;  %v1543_v55 = vrot.slane %v1541_v45, 4  ;;  %v1546_v29 = vrot.slane %v1544_v26, 5  ;;  %v1550_v19 = vshll.u32 %v9000_v1, 16  ;;  %v1554_v62 = vshrl.u32 %v9000_v1, 16 }
 0x178   : > { %v1560_v46 = vshll.u32 %v9002_v7, 16  ;;  %v6509_v9 = vcombine.low %v3808_v47, %v3811_v50  ;;  %7168 = vmatmul.mubr.msk.bf16.gmra.mrb[12].mxu0 %vm1638_vm9, %v6508_v21  ;;  %v6494_v6 = vrot.slane %v3694_v23, 9  ;;  %v3814_v39 = vrot.slane %v9009_v11, 5  ;;  %v2993_v25 = vld [vmem:[#allocation2 + $0x94] sm:$0xf] }
 0x179   : > { %v1547_v13 = vor.u32 %v1546_v29, %v1543_v55  ;;  %v1552_v60 = vrot.slane %v1550_v19, 5  ;;  %v1556_v8 = vrot.slane %v1554_v62, 4  ;;  %v3817_v33 = vrot.slane %v9014_v44, 5  ;;  %v3696_v0 = vld [vmem:[#allocation2 + $0x90] sm:$0xe] }
 0x17a   : > { %v1562_v37 = vrot.slane %v1560_v46, 5  ;;  %7171 = vmatprep.mubr.msk.bf16.mxu0 %vm1638_vm9, %v6509_v9  ;;  %v3816_v3 = vrot.slane %v3814_v39, 4  ;;  %v3815_v57 = vsel %vm8711_vm1, %v6494_v6, %v3814_v39  ;;  %v2994_v45 = vld [vmem:[#allocation2 + $0x98] sm:$0x1]  ;;  %v6495_v29 = vrot.slane %v3695_v58, 9 }
 0x17b   : > { %v1548_v2 = vrot.slane %v1547_v13, 4  ;;  %v1557_v32 = vor.u32 %v1556_v8, %v1552_v60  ;;  %v3821_v23 = vrot.slane %v2990_v53, 5  ;;  %v3824_v46 = vrot.slane %v2991_v40, 5  ;;  %v3697_v21 = vld [vmem:[#allocation2 + $0x9c] sm:$0xe] }
 0x17c   : > { %v9020_v42 = vld [vmem:[#allocation2 + $0xb4] sm:$0xf]  ;;  %v3818_v59 = vsel %vm8711_vm1, %v3816_v3, %v3817_v33  ;;  %v6496_v9 = vrot.slane %v3696_v0, 9  ;;  %v3828_v13 = vrot.slane %v2993_v25, 5  ;;  %v2996_v8 = vld [vmem:[#allocation2 + $0xa0] sm:$0xf] }
 0x17d   : > { %v1553_v41 = vsel %vm8312_vm10, %v1548_v2, %v1552_v60  ;;  %v1558_v52 = vrot.slane %v1557_v32, 4  ;;  %v9024_v43 = vld [vmem:[#allocation2 + $0xb8] sm:$0xf]  ;;  %v1565_v51 = vshrl.u32 %v9020_v42, 16  ;;  %v1568_v34 = vshll.u32 %v9020_v42, 16 }
 0x17e   : > { %v9026_v24 = vld [vmem:[#allocation2 + $0xbc] sm:$0x1]  ;;  %v1574_v27 = vshll.u32 %v9024_v43, 16  ;;  %v1578_v35 = vshrl.u32 %v9024_v43, 16  ;;  %v6510_v55 = vcombine.low %v3815_v57, %v3818_v59  ;;  %v3831_v60 = vrot.slane %v2994_v45, 5 }
 0x17f   : > { %v1584_v36 = vshll.u32 %v9026_v24, 16  ;;  %v1563_v47 = vsel %vm8312_vm10, %v1558_v52, %v1562_v37  ;;  %v1567_v54 = vrot.slane %v1565_v51, 4  ;;  %v1570_v49 = vrot.slane %v1568_v34, 5  ;;  %v2997_v37 = vld [vmem:[#allocation2 + $0xa4] sm:$0x1] }
 0x180   : > { %v6323_v26 = vcombine.low %v1553_v41, %v1563_v47  ;;  %v1576_v61 = vrot.slane %v1574_v27, 5  ;;  %v1580_v56 = vrot.slane %v1578_v35, 4  ;;  %7172 = vmatmul.mubr.msk.bf16.gmra.mrb[16].mxu0 %vm1638_vm9, %v6510_v55  ;;  %v3822_v2 = vsel %vm8711_vm1, %v6495_v29, %v3821_v23  ;;  %v7691_v33 = vld [vmem:[#allocation2] sm:$0xf]  ;;  %v9043_v3 = vld [vmem:[#allocation2 + $0x4] sm:$0xf] }
 0x181   : > { %v1586_v50 = vrot.slane %v1584_v36, 5  ;;  %v1571_v19 = vor.u32 %v1570_v49, %v1567_v54  ;;  %v3823_v32 = vrot.slane %v3821_v23, 4  ;;  %v6341_v58 = vcombine.low %v7691_v33, %v9043_v3  ;;  %v2999_v57 = vld [vmem:[#allocation2 + $0xac] sm:$0xf]  ;;  %v3698_v53 = vld [vmem:[#allocation2 + $0xa8] sm:$0xe] }
 0x182   : > { %7013 = vmatprep.mubr.msk.bf16.mxu1 %vm1638_vm9, %v6323_v26  ;;  %v1581_v62 = vor.u32 %v1580_v56, %v1576_v61  ;;  %v3829_v41 = vsel %vm8711_vm1, %v6496_v9, %v3828_v13  ;;  %v3830_v52 = vrot.slane %v3828_v13, 4  ;;  %v6497_v51 = vrot.slane %v3697_v21, 9  ;;  %v3000_v36 = vld [vmem:[#allocation2 + $0xb0] sm:$0x1]  ;;  %v3699_v25 = vld [vmem:[#allocation2 + $0xb4] sm:$0xe] }
 0x183   : > { %v1572_v6 = vrot.slane %v1571_v19, 4  ;;  %v3825_v27 = vsel %vm8711_vm1, %v3823_v32, %v3824_v46  ;;  %v3835_v35 = vrot.slane %v2996_v8, 5  ;;  %v3838_v59 = vrot.slane %v2997_v37, 5  ;;  %v3002_v45 = vld [vmem:[#allocation2 + $0xb8] sm:$0xf]  ;;  %v6829_v55 = vld [vmem:[%s8260_s14 + $0x78] sm:$0xff]  }
 0x184   : > { %v1582_v39 = vrot.slane %v1581_v62, 4  ;;  %v6511_v47 = vcombine.low %v3822_v2, %v3825_v27  ;;  %v3832_v54 = vsel %vm8711_vm1, %v3830_v52, %v3831_v60  ;;  %v3003_v26 = vld [vmem:[#allocation2 + $0xbc] sm:$0x1]  ;;  %v3842_v29 = vrot.slane %v2999_v57, 5  ;;  %v582_v62 = vld [vmem:[#allocation2 + $0xc0] sm:$0x1] }
 0x185   : > { %v1577_v40 = vsel %vm8312_vm10, %v1572_v6, %v1576_v61  ;;  %v6512_v49 = vcombine.low %v3829_v41, %v3832_v54  ;;  %v3836_v61 = vsel %vm8711_vm1, %v6497_v51, %v3835_v35  ;;  %v3837_v56 = vrot.slane %v3835_v35, 4  ;;  %v632_v13 = vld [vmem:[#allocation2 + $0xc8] sm:$0x1]  ;;  %v7693_v60 = vld [vmem:[#allocation2 + $0xc] sm:$0xf] }
 0x186   : > { %v1587_v34 = vsel %vm8312_vm10, %v1582_v39, %v1586_v50  ;;  %v6498_v50 = vrot.slane %v3698_v53, 9  ;;  %7175 = vmatprep.mubr.msk.bf16.mxu0 %vm1638_vm9, %v6511_v47  ;;  %v3845_v19 = vrot.slane %v3000_v36, 5  ;;  %v6499_v46 = vrot.slane %v3699_v25, 9  ;;  %v9064_v8 = vld [vmem:[#allocation2 + $0x10] sm:$0xf] }
 0x187   : > { %v6324_v0 = vcombine.low %v1577_v40, %v1587_v34  ;;  %v3839_v23 = vsel %vm8711_vm1, %v3837_v56, %v3838_v59  ;;  %v3849_v21 = vrot.slane %v3002_v45, 5  ;;  %v3852_v9 = vrot.slane %v3003_v26, 5  ;;  %v7695_v40 = vld [vmem:[#allocation2 + $0x18] sm:$0xf]  ;;  %v9080_v34 = vld [vmem:[#allocation2 + $0x1c] sm:$0xf] }
 0x188   : > { %v6342_v6 = vcombine.low %v7693_v60, %v9064_v8  ;;  %7176 = vmatmul.mubr.msk.bf16.gmra.mrb[20].mxu0 %vm1638_vm9, %v6512_v49  ;;  %v6513_v39 = vcombine.low %v3836_v61, %v3839_v23  ;;  %v3844_v2 = vrot.slane %v3842_v29, 4  ;;  %v6813_v32 = vunpack.c.l.bf16 %v6829_v55  ;;  %v7697_v25 = vld [vmem:[#allocation9 + $0x4] sm:$0x3]  ;;  %v7698_v54 = vld [vmem:[#allocation8] ss:$0 sm:$0xff] }
 0x189   : > { %7014 = vmatmul.mubr.msk.bf16.gmra.mrb[28].mxu1 %vm1638_vm9, %v6324_v0  ;;  %v3843_v37 = vsel %vm8711_vm1, %v6498_v50, %v3842_v29  ;;  %v3851_v33 = vrot.slane %v3849_v21, 4  ;;  %v583_v41 = vsel %vm8290_vm7, 0, %v582_v62  ;;  %v3850_v51 = vsel %vm8711_vm1, %v6499_v46, %v3849_v21  ;;  %v9087_v26 = vld [vmem:[#allocation9 + $0x6] sm:$0x3]  ;;  %v9095_v50 = vld [vmem:[#allocation2 + $0x28] sm:$0xf] }
 0x18a   : > { %7019 = vmatprep.mubr.msk.bf16.mxu1 %vm1638_vm9, %v6341_v58  ;;  %v6814_v58 = vunpack.c.h.bf16 %v6829_v55  ;;  %7179 = vmatprep.mubr.msk.bf16.mxu0 %vm1638_vm9, %v6513_v39  ;;  %v3846_v52 = vsel %vm8711_vm1, %v3844_v2, %v3845_v19  ;;  %v435_v57 = vmul.f32 %v8946_v4, %v6813_v32  ;;  %584 = vst [vmem:[#allocation2 + $0xc0] sm:$0x1] %v583_v41  ;;  %v633_v53 = vsel %vm8296_vm8, 0, %v632_v13  ;;  %v7700_v55 = vld [vmem:[#allocation2 + $0x24] sm:$0xf] }
 0x18b   : > { %v6343_v27 = vcombine.low %v7695_v40, %v9080_v34  ;;  %v3853_v35 = vsel %vm8711_vm1, %v3851_v33, %v3852_v9  ;;  %634 = vst [vmem:[#allocation2 + $0xc8] sm:$0x1] %v633_v53  ;;  %v2406_v0 = vsel %vm1687_vm2, %v7697_v25, 0  ;;  %v6514_v47 = vcombine.low %v3843_v37, %v3846_v52  ;;  %v7701_v23 = vld [vmem:[#allocation2 + $0x30] sm:$0xf] }
 0x18c   : > { %v436_v36 = vmul.f32 %v8946_v4, %v6814_v58  ;;  %v474_v59 = vadd.f32 %v7698_v54, %v435_v57  ;;  %v6515_v45 = vcombine.low %v3850_v51, %v3853_v35  ;;  %v6344_v29 = vcombine.low %v7700_v55, %v9095_v50  ;;  %v9098_v46 = vld [vmem:[#allocation2 + $0x34] sm:$0xf]  ;;  %v7703_v57 = vld [vmem:[#allocation2 + $0x3c] sm:$0xf]  ;;  %v9109_v53 = vld [vmem:[#allocation2 + $0x40] sm:$0xf] }
 0x18d   : > { %v6345_v21 = vcombine.low %v7701_v23, %v9098_v46  ;;  %v6346_v40 = vcombine.low %v7703_v57, %v9109_v53  ;;  %v9113_v35 = vld [vmem:[#allocation2 + $0x4c] sm:$0xf]  ;;  %v3233_v20 = vshll.u32 %v9009_v11, 16  ;;  %v3237_v10 = vshrl.u32 %v9009_v11, 16  ;;  %v9125_v55 = vld [vmem:[#allocation2 + $0x64] sm:$0xf] }
 0x18e   : > { %v475_v16 = vadd.f32 %v7698_v54, %v436_v36  ;;  %v506_v49 = vmax.f32 %v474_v59, 0.0  ;;  %v9120_v54 = vld [vmem:[#allocation2 + $0x58] sm:$0xf]  ;;  %v7708_v59 = vld [vmem:[#allocation2 + $0x54] sm:$0xf]  ;;  %v3243_v23 = vshll.u32 %v9014_v44, 16 }
 0x18f   : > { %v7712_v44 = vld [vmem:[#allocation2 + $0x14] sm:$0x1]  ;;  %v9142_v57 = vld [vmem:[#allocation2 + $0x70] sm:$0xf] }
 0x190   : > { %v507_v61 = vmax.f32 %v475_v16, 0.0  ;;  %7180 = vmatmul.mubr.msk.bf16.gmra.mrb[24].mxu0 %vm1638_vm9, %v6514_v47  ;;  %v6716_v4 = vpack.c.bf16 %v506_v49, %v506_v49 }
 0x191   : > { %7020 = vmatmul.mubr.msk.bf16.vlgmr.msra.gmra.mrb[0].mxu1 %vm1638_vm9, %v6342_v6  ;;  %7183 = vmatprep.mubr.msk.bf16.mxu0 %vm1638_vm9, %v6515_v45  ;;  %v1144_v39 = vld [vmem:[#allocation2 + $0xc0] sm:$0xf]  ;;  %v6348_v45 = vcombine.low %v7708_v59, %v9120_v54 }
 0x192   : > { %7052 = vmatpush3.bf16.msra.mxu1 %v2406_v0  ;;  %7023 = vmatprep.mubr.msk.bf16.mxu1 %vm1638_vm9, %v6343_v27  ;;  %v6717_v56 = vpack.c.bf16 %v507_v61, %v507_v61  ;;  %v973_v19 = vshrl.u32 %v6716_v4, 16  ;;  %v976_v62 = vshll.u32 %v6716_v4, 16  ;;  %v1148_v37 = vld [vmem:[#allocation2 + $0xc8] sm:$0x1]  ;;  %v9123_v61 = vrot.slane %v3233_v20, 5 }
 0x193   : > { %7550 = vmatprep.subr.msk.bf16.mxu1 %vm1687_vm2, %v9087_v26  ;;  %v7705_v27 = vld [vmem:[#allocation2 + $0x48] sm:$0xf]  ;;  %v3239_v4 = vrot.slane %v3237_v10, 4  ;;  %v2147_v10 = vld [vmem:[#allocation2 + $0x24] sm:$0xe] }
 0x194   : > { %v981_v9 = vshrl.u32 %v6717_v56, 16  ;;  %v984_v13 = vshll.u32 %v6717_v56, 16  ;;  %v975_v60 = vrot.slane %v973_v19, 7  ;;  %v6347_v12 = vcombine.low %v7705_v27, %v9113_v35  ;;  %10426 = vst [vmem:[#allocation21_spill] sm:$0xff] %v9123_v61  ;;  %v7709_v56 = vld [vmem:[#allocation2 + $0x60] sm:$0xf] }
 0x195   : > { %v6349_v11 = vcombine.low %v7709_v56, %v9125_v55  ;;  %v7715_v59 = vld [vmem:[#allocation2 + $0x20] sm:$0x1] }
 0x196   : > { %v983_v6 = vrot.slane %v981_v9, 7  ;;  %v978_v2 = vor.u32 %v976_v62, %v975_v60  ;;  %v979_v32 = vrot.slane %v975_v60, 4  ;;  %v2204_v62 = vrot.slane %v9064_v8, 5  ;;  %v7656_v9 = vld [vmem:[#allocation2 + $0x18] sm:$0xff]   ;;  %v7711_v8 = vld [vmem:[#allocation2 + $0x8] sm:$0x1] }
 0x197   : > { %v3240_v60 = vor.u32 %v3239_v4, %v9123_v61  ;;  %v7716_v4 = vld [vmem:[#allocation9 + $0xe] sm:$0x3] }
 0x198   : > { %v986_v33 = vor.u32 %v984_v13, %v983_v6  ;;  %v988_v58 = vrot.slane %v983_v6, 4  ;;  %v1145_v41 = vsel %vm8351_vm12, %v978_v2, %v1144_v39  ;;  %v2145_v13 = vld [vmem:[#allocation2 + $0xc] sm:$0xe]  ;;  %v2144_v39 = vld [vmem:[#allocation2] sm:$0xe]  ;;  %v2197_v2 = vrot.slane %v9043_v3, 5 }
 0x199   : > { %7024 = vmatmul.mubr.msk.bf16.gmra.mrb[4].mxu1 %vm1638_vm9, %v6344_v29  ;;  %1146 = vst [vmem:[#allocation2 + $0xc0] sm:$0xf] %v1145_v41  ;;  %v2146_v41 = vld [vmem:[#allocation2 + $0x18] sm:$0xe]  ;;  %v2206_v3 = vrot.slane %v2204_v62, 4  ;;  %v9147_v27 = vrot.slane %v3240_v60, 4 }
 0x19a   : > { %7027 = vmatprep.mubr.msk.bf16.mxu1 %vm1638_vm9, %v6345_v21  ;;  %v987_v52 = vsel %vm8360_vm13, %v979_v32, %v986_v33  ;;  %v1149_v51 = vsel %vm8290_vm7, %v988_v58, %v1148_v37  ;;  %v2211_v32 = vrot.slane %v9080_v34, 5  ;;  %v2200_v37 = vrot.slane %v7711_v8, 5  ;;  %v9185_v8 = vld [vmem:[#allocation9 + $0x10] sm:$0x3] }
 0x19b   : > { %1147 = vst.msk [vmem:[#allocation2 + $0xc4] sm:$0xf] %vm524_vm0, %v987_v52  ;;  %1150 = vst [vmem:[#allocation2 + $0xc8] sm:$0x1] %v1149_v51  ;;  %v2207_v33 = vrot.slane %v7712_v44, 5  ;;  %v6374_v58 = vrot.slane %v2145_v13, 9 }
 0x19c   : > { %v9140_v52 = vrot.slane %v3243_v23, 5  ;;  %v7713_v51 = vld [vmem:[#allocation2 + $0x6c] sm:$0xf]  ;;  %v2218_v34 = vrot.slane %v9095_v50, 5  ;;  %10428 = vst [vmem:[#allocation23_spill] sm:$0xff] %v9147_v27  ;;  %v6373_v20 = vrot.slane %v2144_v39, 9  ;;  %v6352_v50 = vcombine.low %v8875_v28, %v8878_v38 }
 0x19d   : > { %v5045_v56 = vsel %vm1687_vm2, %v7716_v4, 0  ;;  %v7717_v23 = vld [vmem:[#allocation2 + $0x2c] sm:$0x1]  ;;  %v2239_v4 = vrot.slane %v9113_v35, 5  ;;  %v4516_v35 = vld [vmem:[#allocation2 + $0x20] sm:$0x1] }
 0x19e   : > { %10427 = vst [vmem:[#allocation22_spill] sm:$0xff] %v9140_v52  ;;  %v9171_v13 = vsel %vm8711_vm1, %v6373_v20, %v2197_v2  ;;  %v7723_v44 = vld [vmem:[#allocation2 + $0x74] sm:$0x1]  ;;  %v4582_v5 = vshll.u32 %v4516_v35, 16  ;;  %v10429_v35 = vcombine.low %v8952_v18, %v8954_v48  ;;  %v7667_v27 = vld [vmem:[#allocation2 + $0x9c] sm:$0xff]  }
 0x1a0   : > { %v3700_v36 = vld [vmem:[#allocation2 + $0xc0] sm:$0xe] }
 0x1a1   : > { %7028 = vmatmul.mubr.msk.bf16.gmra.mrb[8].mxu1 %vm1638_vm9, %v6346_v40  ;;  %v6500_v47 = vrot.slane %v3700_v36, 9  ;;  %v6350_v40 = vcombine.low %v7713_v51, %v9142_v57  ;;  %v2225_v36 = vrot.slane %v9098_v46, 5  ;;  %v7658_v46 = vld [vmem:[#allocation2 + $0x30] sm:$0xff]  }
 0x1a2   : > { %7031 = vmatprep.mubr.msk.bf16.mxu1 %vm1638_vm9, %v6347_v12  ;;  %v3005_v25 = vld [vmem:[#allocation2 + $0xc4] sm:$0xf]  ;;  %v3006_v0 = vld [vmem:[#allocation2 + $0xc8] sm:$0x1]  ;;  %v6351_v12 = vcombine.low %v8860_v17, %v8866_v22  ;;  %v6353_v17 = vcombine.low %v8917_v31, %v8936_v14  ;;  %v9159_v22 = vsel %vm8711_vm1, %v6374_v58, %v2204_v62  ;;  %v7718_v14 = vld [vmem:[#allocation2 + $0x38] sm:$0x1] }
 0x1a3   : > { %v3856_v16 = vrot.slane %v3005_v25, 5  ;;  %v3859_v49 = vrot.slane %v3006_v0, 5  ;;  %v2199_v25 = vrot.slane %v2197_v2, 4  ;;  %v6375_v0 = vrot.slane %v2146_v41, 9  ;;  %v4515_v58 = vld [vmem:[#allocation2 + $0x1c] sm:$0xf] }
 0x1a4   : > { %v2227_v31 = vrot.slane %v2225_v36, 4  ;;  %v2228_v62 = vrot.slane %v7718_v14, 5  ;;  %v2153_v14 = vld [vmem:[#allocation2 + $0x6c] sm:$0xe]  ;;  %v2263_v2 = vrot.slane %v7723_v44, 5 }
 0x1a5   : > { %v3857_v29 = vsel %vm8711_vm1, %v6500_v47, %v3856_v16  ;;  %v3858_v19 = vrot.slane %v3856_v16, 4  ;;  %v2213_v47 = vrot.slane %v2211_v32, 4  ;;  %v2148_v16 = vld [vmem:[#allocation2 + $0x30] sm:$0xe]  ;;  %v9175_v60 = vsel %vm8711_vm1, %v2199_v25, %v2200_v37  ;;  %v2151_v25 = vld [vmem:[#allocation2 + $0x54] sm:$0xe] }
 0x1a6   : > { %v6377_v38 = vrot.slane %v2148_v16, 9 }
 0x1a7   : > { %v3860_v21 = vsel %vm8711_vm1, %v3858_v19, %v3859_v49  ;;  %v7657_v49 = vld [vmem:[#allocation2 + $0x24] sm:$0xff]   ;;  %v2220_v19 = vrot.slane %v2218_v34, 4 }
 0x1a8   : > { %v6516_v6 = vcombine.low %v3857_v29, %v3860_v21  ;;  %v6376_v29 = vrot.slane %v2147_v10, 9  ;;  %v2221_v21 = vrot.slane %v7717_v23, 5  ;;  %v9214_v20 = vsel %vm8711_vm1, %v6377_v38, %v2225_v36  ;;  %v2150_v10 = vld [vmem:[#allocation2 + $0x48] sm:$0xe]  ;;  %v7720_v38 = vld [vmem:[#allocation2 + $0x50] sm:$0x1] }
 0x1a9   : > { %7032 = vmatmul.mubr.msk.bf16.gmra.mrb[12].mxu1 %vm1638_vm9, %v6348_v45  ;;  %v2214_v45 = vrot.slane %v7715_v59, 5  ;;  %v4576_v59 = vshrl.u32 %v4515_v58, 16 }
 0x1aa   : > { %7035 = vmatprep.mubr.msk.bf16.mxu1 %vm1638_vm9, %v6349_v11  ;;  %7184 = vmatmul.mubr.msk.bf16.gmra.mrb[28].mxu0 %vm1638_vm9, %v6516_v6  ;;  %v9164_v11 = vsel %vm8711_vm1, %v2206_v3, %v2207_v33  ;;  %v9179_v6 = vsel %vm8711_vm1, %v6375_v0, %v2211_v32  ;;  %v9196_v32 = vsel %vm1687_vm2, %v9087_v26, 0  ;;  %v4514_v33 = vld [vmem:[#allocation2 + $0x18] sm:$0xf]  ;;  %v9201_v41 = vsel %vm8711_vm1, %v6376_v29, %v2218_v34  ;;  %v7660_v29 = vld [vmem:[#allocation2 + $0x48] sm:$0xff]  }
 0x1ab   : > { %7189 = vmatprep.mubr.msk.bf16.mxu0 %vm1638_vm9, %v7656_v9  ;;  %v2149_v9 = vld [vmem:[#allocation2 + $0x3c] sm:$0xe]  ;;  %v9183_v39 = vsel %vm8711_vm1, %v2213_v47, %v2214_v45  ;;  %v9205_v51 = vsel %vm8711_vm1, %v2220_v19, %v2221_v21  ;;  %v2232_v3 = vrot.slane %v9109_v53, 5  ;;  %v9218_v34 = vsel %vm8711_vm1, %v2227_v31, %v2228_v62 }
 0x1ac   : > { %v4563_v53 = vshrl.u32 %v4514_v33, 16  ;;  %v4566_v0 = vshll.u32 %v4514_v33, 16  ;;  %v4572_v47 = vshll.u32 %v4515_v58, 16  ;;  %v7659_v45 = vld [vmem:[#allocation2 + $0x3c] sm:$0xff]   ;;  %v6379_v21 = vrot.slane %v2150_v10, 9 }
 0x1ad   : > { %v2234_v23 = vrot.slane %v2232_v3, 4  ;;  %v2242_v31 = vrot.slane %v7720_v38, 5  ;;  %v6380_v62 = vrot.slane %v2151_v25, 9  ;;  %v4518_v10 = vld [vmem:[#allocation2 + $0x28] sm:$0xf] }
 0x1ae   : > { %v4565_v33 = vrot.slane %v4563_v53, 4  ;;  %v4568_v58 = vrot.slane %v4566_v0, 5  ;;  %v4596_v26 = vshll.u32 %v4518_v10, 16 }
 0x1b1   : > { %7036 = vmatmul.mubr.msk.bf16.gmra.mrb[16].mxu1 %vm1638_vm9, %v6350_v40  ;;  %v6378_v40 = vrot.slane %v2149_v9, 9  ;;  %v4517_v9 = vld [vmem:[#allocation2 + $0x24] sm:$0xf] }
 0x1b2   : > { %7039 = vmatprep.mubr.msk.bf16.mxu1 %vm1638_vm9, %v6351_v12  ;;  %7190 = vmatmul.mubr.msk.bf16.vlgmr.msra.gmra.mrb[0].mxu0 %vm1638_vm9, %v7657_v49  ;;  %v7719_v49 = vld [vmem:[#allocation2 + $0x44] sm:$0x1]  ;;  %v4587_v37 = vshrl.u32 %v4517_v9, 16  ;;  %v4590_v53 = vshll.u32 %v4517_v9, 16 }
 0x1b3   : > { %7222 = vmatpush3.bf16.msra.mxu0 %v5045_v56  ;;  %7193 = vmatprep.mubr.msk.bf16.mxu0 %vm1638_vm9, %v7658_v46  ;;  %v2235_v36 = vrot.slane %v7719_v49, 5  ;;  %v2246_v56 = vrot.slane %v9120_v54, 5  ;;  %v2152_v46 = vld [vmem:[#allocation2 + $0x60] sm:$0xe]  ;;  %v9229_v19 = vsel %vm8711_vm1, %v6378_v40, %v2232_v3  ;;  %v2253_v54 = vrot.slane %v9125_v55, 5 }
 0x1b4   : > { %7556 = vmatprep.subr.msk.bf16.mxu0 %vm1687_vm2, %v9185_v8  ;;  %v9236_v40 = vrot.slane %v4572_v47, 5  ;;  %v4578_v3 = vrot.slane %v4576_v59, 4  ;;  %v2241_v49 = vrot.slane %v2239_v4, 4  ;;  %v6381_v12 = vrot.slane %v2152_v46, 9  ;;  %v7722_v55 = vld [vmem:[#allocation2 + $0x68] sm:$0x1] }
 0x1b5   : > { %v2248_v38 = vrot.slane %v2246_v56, 4  ;;  %v2256_v25 = vrot.slane %v7722_v55, 5  ;;  %v2255_v0 = vrot.slane %v2253_v54, 4  ;;  %v4600_v59 = vshrl.u32 %v4518_v10, 16  ;;  %v7662_v9 = vld [vmem:[#allocation2 + $0x60] sm:$0xff]  }
 0x1b6   : > { %v4579_v28 = vor.u32 %v4578_v3, %v9236_v40  ;;  %v9243_v46 = vsel %vm8711_vm1, %v2234_v23, %v2235_v36  ;;  %v9255_v44 = vsel %vm8711_vm1, %v6380_v62, %v2246_v56  ;;  %v4519_v23 = vld [vmem:[#allocation2 + $0x2c] sm:$0x1]  ;;  %v10430_v56 = vcombine.low %v8987_v63, %v9000_v1  ;;  %v2154_v62 = vld [vmem:[#allocation2 + $0x78] sm:$0xe] }
 0x1b7   : > { %v9275_v18 = vsel %vm8711_vm1, %v2255_v0, %v2256_v25  ;;  %v4606_v10 = vshll.u32 %v4519_v23, 16  ;;  %v9297_v25 = vld [vmem:[#allocation2 + $0x34] sm:$0xf] }
 0x1b8   : > { %v4580_v63 = vrot.slane %v4579_v28, 4  ;;  %10431 = vst [vmem:[#allocation24_spill] sm:$0xff] %v9297_v25 }
 0x1b9   : > { %7040 = vmatmul.mubr.msk.bf16.gmra.mrb[20].mxu1 %vm1638_vm9, %v6352_v50  ;;  %v2260_v50 = vrot.slane %v9142_v57, 5  ;;  %v6382_v57 = vrot.slane %v2153_v14, 9  ;;  %v9251_v14 = vsel %vm8711_vm1, %v2241_v49, %v2242_v31  ;;  %v4592_v31 = vrot.slane %v4590_v53, 5  ;;  %v4520_v49 = vld [vmem:[#allocation2 + $0x30] sm:$0xf] }
 0x1ba   : > { %7043 = vmatprep.mubr.msk.bf16.mxu1 %vm1638_vm9, %v6353_v17  ;;  %7194 = vmatmul.mubr.msk.bf16.gmra.mrb[4].mxu0 %vm1638_vm9, %v7659_v45  ;;  %v7721_v17 = vld [vmem:[#allocation2 + $0x5c] sm:$0x1]  ;;  %v4569_v45 = vor.u32 %v4568_v58, %v4565_v33  ;;  %v4584_v33 = vrot.slane %v4582_v5, 5  ;;  %v2155_v58 = vld [vmem:[#allocation2 + $0x84] sm:$0xe]  ;;  %v4614_v23 = vshll.u32 %v4520_v49, 16 }
 0x1bb   : > { %v2249_v16 = vrot.slane %v7721_v17, 5  ;;  %7197 = vmatprep.mubr.msk.bf16.mxu0 %vm1638_vm9, %v7660_v29  ;;  %v2262_v47 = vrot.slane %v2260_v50, 4  ;;  %v7661_v17 = vld [vmem:[#allocation2 + $0x54] sm:$0xff]   ;;  %v9247_v29 = vsel %vm8711_vm1, %v6379_v21, %v2239_v4  ;;  %v9267_v4 = vsel %vm8711_vm1, %v6381_v12, %v2253_v54 }
 0x1bc   : > { %v4589_v21 = vrot.slane %v4587_v37, 4  ;;  %v9279_v48 = vsel %vm8711_vm1, %v6382_v57, %v2260_v50  ;;  %v4602_v12 = vrot.slane %v4600_v59, 4  ;;  %v4570_v54 = vrot.slane %v4569_v45, 4  ;;  %v7663_v45 = vld [vmem:[#allocation2 + $0x6c] sm:$0xff]  }
 0x1bd   : > { %v9263_v36 = vsel %vm8711_vm1, %v2248_v38, %v2249_v16  ;;  %v9281_v16 = vrot.slane %v4596_v26, 5  ;;  %v9285_v37 = vsel %vm8711_vm1, %v2262_v47, %v2263_v2  ;;  %v6383_v2 = vrot.slane %v2154_v62, 9  ;;  %v7724_v38 = vld [vmem:[#allocation2 + $0x7c] sm:$0xf]  ;;  %v7725_v47 = vld [vmem:[#allocation2 + $0x88] sm:$0xf] }
 0x1be   : > { %v4593_v5 = vor.u32 %v4592_v31, %v4589_v21  ;;  %v2267_v55 = vrot.slane %v7724_v38, 5  ;;  %v6384_v0 = vrot.slane %v2155_v58, 9  ;;  %v2274_v59 = vrot.slane %v7725_v47, 5  ;;  %v4523_v62 = vld [vmem:[#allocation2 + $0x3c] sm:$0xf] }
 0x1bf   : > { %v4603_v53 = vor.u32 %v4602_v12, %v9281_v16  ;;  %v4608_v21 = vrot.slane %v4606_v10, 5  ;;  %v9309_v31 = vsel %vm1687_vm2, %v9185_v8, 0  ;;  %v4624_v12 = vshrl.u32 %v9297_v25, 16  ;;  %v7726_v10 = vld [vmem:[#allocation2 + $0x80] sm:$0x1] }
 0x1c0   : > { %v10432_v58 = vcombine.low %v9020_v42, %v9024_v43  ;;  %v2270_v8 = vrot.slane %v7726_v10, 5  ;;  %v10434_v38 = vcombine.low %v9171_v13, %v9175_v60  ;;  %v4635_v28 = vshrl.u32 %v4523_v62, 16  ;;  %v9333_v26 = vld [vmem:[#allocation2 + $0x4c] sm:$0xf]  ;;  %v9336_v13 = vld [vmem:[#allocation2 + $0x38] sm:$0x1] }
 0x1c1   : > { %7044 = vmatmul.mubr.msk.bf16.gmra.mrb[24].mxu1 %vm1638_vm9, %v10429_v35  ;;  %v4585_v35 = vsel %vm8312_vm10, %v4580_v63, %v4584_v33  ;;  %v9319_v63 = vsel %vm8711_vm1, %v6383_v2, %v2267_v55  ;;  %v2269_v33 = vrot.slane %v2267_v55, 4  ;;  %v4604_v42 = vrot.slane %v4603_v53, 4  ;;  %v4526_v2 = vld [vmem:[#allocation2 + $0x48] sm:$0xf]  ;;  %10435 = vst [vmem:[#allocation26_spill] sm:$0xff] %v9336_v13 }
 0x1c2   : > { %7047 = vmatprep.mubr.msk.bf16.mxu1 %vm1638_vm9, %v10430_v56  ;;  %7198 = vmatmul.mubr.msk.bf16.gmra.mrb[8].mxu0 %vm1638_vm9, %v7661_v17  ;;  %v4575_v17 = vsel %vm8312_vm10, %v4570_v54, %v9236_v40  ;;  %v4620_v56 = vshll.u32 %v9297_v25, 16  ;;  %v7664_v40 = vld [vmem:[#allocation2 + $0x78] sm:$0xff]   ;;  %v4594_v54 = vrot.slane %v4593_v5, 4  ;;  %v9331_v5 = vsel %vm8711_vm1, %v6384_v0, %v2274_v59 }
 0x1c3   : > { %7201 = vmatprep.mubr.msk.bf16.mxu0 %vm1638_vm9, %v7662_v9  ;;  %v4611_v9 = vshrl.u32 %v4520_v49, 16  ;;  %v9321_v49 = vld [vmem:[#allocation2 + $0x40] sm:$0xf]  ;;  %v9327_v47 = vcombine.low %v4575_v17, %v4585_v35  ;;  %v4616_v55 = vrot.slane %v4614_v23, 5  ;;  %v4638_v10 = vshll.u32 %v4523_v62, 16 }
 0x1c4   : > { %10433 = vst [vmem:[#allocation25_spill] sm:$0xff] %v9321_v49  ;;  %v9338_v60 = vrot.slane %v4620_v56, 5  ;;  %v4626_v17 = vrot.slane %v4624_v12, 4  ;;  %v4644_v53 = vshll.u32 %v9321_v49, 16  ;;  %v4648_v0 = vshrl.u32 %v9321_v49, 16 }
 0x1c5   : > { %v4613_v57 = vrot.slane %v4611_v9, 4  ;;  %v9348_v35 = vsel %vm8711_vm1, %v2269_v33, %v2270_v8  ;;  %v4659_v9 = vshrl.u32 %v4526_v2, 16  ;;  %v4662_v23 = vshll.u32 %v4526_v2, 16  ;;  %v7727_v12 = vld [vmem:[#allocation2 + $0x8c] sm:$0x1]  ;;  %v7665_v8 = vld [vmem:[#allocation2 + $0x84] sm:$0xff]  }
 0x1c6   : > { %v4609_v56 = vsel %vm8312_vm10, %v4604_v42, %v4608_v21  ;;  %v2277_v62 = vrot.slane %v7727_v12, 5  ;;  %v4640_v3 = vrot.slane %v4638_v10, 5  ;;  %v4529_v33 = vld [vmem:[#allocation2 + $0x54] sm:$0xf]  ;;  %v4627_v49 = vor.u32 %v4626_v17, %v9338_v60 }
 0x1c7   : > { %v4617_v50 = vor.u32 %v4616_v55, %v4613_v57  ;;  %v9358_v25 = vrot.slane %v4644_v53, 5  ;;  %v4650_v2 = vrot.slane %v4648_v0, 4  ;;  %v10437_v42 = vcombine.low %v9159_v22, %v9164_v11  ;;  %v7666_v12 = vld [vmem:[#allocation2 + $0x90] sm:$0xff]   ;;  %v9378_v0 = vld [vmem:[#allocation2 + $0x58] sm:$0xf] }
 0x1c8   : > { %v9369_v55 = vld [vmem:[#allocation2 + $0x50] sm:$0x1]  ;;  %v4661_v10 = vrot.slane %v4659_v9, 4  ;;  %v4664_v17 = vrot.slane %v4662_v23, 5  ;;  %v10439_v53 = vcombine.low %v9179_v6, %v9183_v39  ;;  %10440 = vst [vmem:[#allocation29_spill] sm:$0xff] %v9378_v0  ;;  %v4628_v39 = vrot.slane %v4627_v49, 4 }
 0x1c9   : > { %7048 = vmatmul.mubr.msk.bf16.gmra.mrb[28].mxu1 %vm1638_vm9, %v10432_v58  ;;  %v2276_v58 = vrot.slane %v2274_v59, 4  ;;  %v4599_v59 = vsel %vm8312_vm10, %v4594_v54, %v9281_v16  ;;  %v4630_v16 = vshll.u32 %v9336_v13, 16  ;;  %v4637_v54 = vrot.slane %v4635_v28, 4  ;;  %10438 = vst [vmem:[#allocation28_spill] sm:$0xff] %v9369_v55  ;;  %v2156_v28 = vld [vmem:[#allocation2 + $0x90] sm:$0xe] }
 0x1ca   : > { %7053 = vmatprep.mubr.msk.bf16.mxu1 %vm1638_vm9, %v10434_v38  ;;  %7202 = vmatmul.mubr.msk.bf16.gmra.mrb[12].mxu0 %vm1638_vm9, %v7663_v45  ;;  %v9350_v45 = vld [vmem:[#allocation2 + $0x44] sm:$0x1]  ;;  %v4668_v38 = vshll.u32 %v9333_v26, 16  ;;  %v9365_v57 = vcombine.low %v4599_v59, %v4609_v56  ;;  %v4683_v59 = vshrl.u32 %v4529_v33, 16  ;;  %v4686_v56 = vshll.u32 %v4529_v33, 16 }
 0x1cb   : > { %7205 = vmatprep.mubr.msk.bf16.mxu0 %vm1638_vm9, %v7664_v40  ;;  %10436 = vst [vmem:[#allocation27_spill] sm:$0xff] %v9350_v45  ;;  %v4672_v40 = vshrl.u32 %v9333_v26, 16  ;;  %v4654_v21 = vshll.u32 %v9350_v45, 16  ;;  %v9384_v9 = vrot.slane %v4617_v50, 4  ;;  %v9386_v23 = vrot.slane %v4630_v16, 5 }
 0x1cc   : > { %v9376_v22 = vrot.slane %v4668_v38, 5  ;;  %v7728_v6 = vld [vmem:[#allocation9 + $0x8] sm:$0x3]  ;;  %v4651_v38 = vor.u32 %v4650_v2, %v9358_v25  ;;  %v7729_v33 = vld [vmem:[#allocation2 + $0x94] sm:$0xf]  ;;  %v4692_v16 = vshll.u32 %v9378_v0, 16 }
 0x1cd   : > { %v4674_v11 = vrot.slane %v4672_v40, 4  ;;  %v9391_v40 = vrot.slane %v4654_v21, 5  ;;  %v7730_v50 = vld [vmem:[#allocation2 + $0xa0] sm:$0xf]  ;;  %v4688_v2 = vrot.slane %v4686_v56, 5  ;;  %v6385_v45 = vrot.slane %v2156_v28, 9 }
 0x1ce   : > { %v7731_v13 = vld [vmem:[#allocation2 + $0x98] sm:$0x1]  ;;  %v10441_v28 = vcombine.low %v9201_v41, %v9205_v51  ;;  %v7732_v56 = vld [vmem:[#allocation2 + $0xa4] sm:$0x1] }
 0x1cf   : > { %v4675_v49 = vor.u32 %v4674_v11, %v9376_v22 }
 0x1d1   : > { %7054 = vmatmul.mubr.msk.bf16.vlgmr.msra.gmra.mrb[0].mxu1 %vm1638_vm9, %v10437_v42  ;;  %v9382_v42 = vsel %vm8711_vm1, %v2276_v58, %v2277_v62  ;;  %v2157_v58 = vld [vmem:[#allocation2 + $0x9c] sm:$0xe]  ;;  %v2288_v62 = vrot.slane %v7730_v50, 5  ;;  %v4623_v50 = vsel %vm8312_vm10, %v9384_v9, %v9338_v60  ;;  %v2158_v60 = vld [vmem:[#allocation2 + $0xa8] sm:$0xe]  ;;  %v10442_v9 = vcombine.low %v9214_v20, %v9218_v34 }
 0x1d2   : > { %7086 = vmatpush3.bf16.msra.mxu1 %v9196_v32  ;;  %7057 = vmatprep.mubr.msk.bf16.mxu1 %vm1638_vm9, %v10439_v53  ;;  %v4641_v32 = vor.u32 %v4640_v3, %v4637_v54  ;;  %v2281_v53 = vrot.slane %v7729_v33, 5  ;;  %v4678_v3 = vshll.u32 %v9369_v55, 16  ;;  %v4696_v54 = vshrl.u32 %v9378_v0, 16  ;;  %v2159_v55 = vld [vmem:[#allocation2 + $0xb4] sm:$0xe] }
 0x1d3   : > { %7552 = vmatprep.subr.msk.bf16.mxu1 %vm1687_vm2, %v7728_v6  ;;  %7206 = vmatmul.mubr.msk.bf16.gmra.mrb[16].mxu0 %vm1638_vm9, %v7665_v8  ;;  %v4665_v6 = vor.u32 %v4664_v17, %v4661_v10  ;;  %v4685_v8 = vrot.slane %v4683_v59, 4  ;;  %v2284_v33 = vrot.slane %v7731_v13, 5  ;;  %v6386_v61 = vrot.slane %v2157_v58, 9  ;;  %v9405_v59 = vld [vmem:[#allocation2 + $0x5c] sm:$0x1] }
 0x1d4   : > { %7209 = vmatprep.mubr.msk.bf16.mxu0 %vm1638_vm9, %v7666_v12  ;;  %v4642_v21 = vrot.slane %v4641_v32, 4  ;;  %v7668_v12 = vld [vmem:[#allocation2 + $0xa8] sm:$0xff]   ;;  %v4633_v10 = vsel %vm8312_vm10, %v4628_v39, %v9386_v23  ;;  %v4652_v17 = vrot.slane %v4651_v38, 4  ;;  %v2283_v11 = vrot.slane %v2281_v53, 4 }
 0x1d5   : > { %v2290_v13 = vrot.slane %v2288_v62, 4  ;;  %v2291_v32 = vrot.slane %v7732_v56, 5  ;;  %v9411_v58 = vrot.slane %v4692_v16, 5  ;;  %v4698_v52 = vrot.slane %v4696_v54, 4 }
 0x1d6   : > { %v4666_v23 = vrot.slane %v4665_v6, 4  ;;  %v4676_v39 = vrot.slane %v4675_v49, 4  ;;  %v4680_v38 = vrot.slane %v4678_v3, 5  ;;  %v4689_v0 = vor.u32 %v4688_v2, %v4685_v8  ;;  %v4532_v8 = vld [vmem:[#allocation2 + $0x60] sm:$0xf] }
 0x1d7   : > { %v4647_v41 = vsel %vm8312_vm10, %v4642_v21, %v9358_v25  ;;  %v9422_v51 = vsel %vm8711_vm1, %v6385_v45, %v2281_v53  ;;  %v9426_v16 = vsel %vm8711_vm1, %v6386_v61, %v2288_v62  ;;  %v2295_v20 = vrot.slane %v9000_v1, 5  ;;  %v9459_v2 = vld [vmem:[#allocation2 + $0x64] sm:$0xf]  ;;  %v7669_v21 = vld [vmem:[#allocation2 + $0xb4] sm:$0xff]  }
 0x1d8   : > { %v4657_v34 = vsel %vm8312_vm10, %v4652_v17, %v9391_v40  ;;  %v9435_v3 = vsel %vm8711_vm1, %v2283_v11, %v2284_v33  ;;  %v4702_v25 = vshll.u32 %v9405_v59, 16  ;;  %v6387_v45 = vrot.slane %v2158_v60, 9  ;;  %v7670_v17 = vld [vmem:[#allocation2 + $0xc0] sm:$0xff]  }
 0x1d9   : > { %7058 = vmatmul.mubr.msk.bf16.gmra.mrb[4].mxu1 %vm1638_vm9, %v10441_v28  ;;  %v9441_v61 = vsel %vm8711_vm1, %v2290_v13, %v2291_v32  ;;  %v4699_v1 = vor.u32 %v4698_v52, %v9411_v58  ;;  %v2302_v53 = vrot.slane %v9024_v43, 5  ;;  %v4671_v62 = vsel %vm8312_vm10, %v4666_v23, %v9376_v22  ;;  %v4538_v32 = vld [vmem:[#allocation2 + $0x78] sm:$0xf]  ;;  %v9521_v52 = vld [vmem:[#allocation2 + $0x88] sm:$0xf] }
 0x1da   : > { %7061 = vmatprep.mubr.msk.bf16.mxu1 %vm1638_vm9, %v10442_v9  ;;  %v4681_v54 = vsel %vm8312_vm10, %v4676_v39, %v4680_v38  ;;  %v9452_v6 = vrot.slane %v4689_v0, 4  ;;  %v9454_v49 = vcombine.low %v4623_v50, %v4633_v10  ;;  %v2298_v43 = vrot.slane %v9002_v7, 5  ;;  %v4535_v50 = vld [vmem:[#allocation2 + $0x6c] sm:$0xf]  ;;  %v9471_v10 = vld [vmem:[#allocation2 + $0x70] sm:$0xf] }
 0x1db   : > { %7210 = vmatmul.mubr.msk.bf16.gmra.mrb[20].mxu0 %vm1638_vm9, %v7667_v27  ;;  %v6388_v27 = vrot.slane %v2159_v55, 9  ;;  %v2297_v55 = vrot.slane %v2295_v20, 4  ;;  %v9461_v33 = vcombine.low %v4647_v41, %v4657_v34  ;;  %v9469_v0 = vsel %vm8711_vm1, %v6387_v45, %v2295_v20  ;;  %10443 = vst [vmem:[#allocation30_spill] sm:$0xff] %v9471_v10  ;;  %v9494_v39 = vld [vmem:[#allocation2 + $0x7c] sm:$0xf]  ;;  %10449 = vst [vmem:[#allocation34_spill] sm:$0xff] %v9521_v52 }
 0x1dc   : > { %7213 = vmatprep.mubr.msk.bf16.mxu0 %vm1638_vm9, %v7668_v12  ;;  %v9465_v12 = vrot.slane %v4702_v25, 5  ;;  %v10444_v7 = vcombine.low %v9229_v19, %v9243_v46  ;;  %v9477_v11 = vcombine.low %v4671_v62, %v4681_v54  ;;  %v9479_v28 = vrot.slane %v4699_v1, 4  ;;  %10446 = vst [vmem:[#allocation31_spill] sm:$0xff] %v9494_v39  ;;  %v9502_v20 = vld [vmem:[#allocation2 + $0x68] sm:$0x1] }
 0x1dd   : > { %v9483_v13 = vsel %vm8711_vm1, %v6388_v27, %v2302_v53  ;;  %v2304_v56 = vrot.slane %v2302_v53, 4  ;;  %v10445_v60 = vcombine.low %v9247_v29, %v9251_v14  ;;  %v4707_v46 = vshrl.u32 %v4532_v8, 16  ;;  %v9512_v62 = vld [vmem:[#allocation2 + $0x74] sm:$0x1] }
 0x1de   : > { %v4710_v9 = vshll.u32 %v4532_v8, 16  ;;  %v4716_v23 = vshll.u32 %v9459_v2, 16  ;;  %v9498_v38 = vsel %vm8711_vm1, %v2297_v55, %v2298_v43  ;;  %v4720_v41 = vshrl.u32 %v9459_v2, 16  ;;  %10448 = vst [vmem:[#allocation33_spill] sm:$0xff] %v9512_v62  ;;  %v7671_v43 = vld [vmem:[#allocation2 + $0xcc] sm:$0xff]  }
 0x1df   : > { %10447 = vst [vmem:[#allocation32_spill] sm:$0xff] %v9498_v38  ;;  %v4731_v29 = vshrl.u32 %v4535_v50, 16  ;;  %v4734_v14 = vshll.u32 %v4535_v50, 16  ;;  %v4740_v34 = vshll.u32 %v9471_v10, 16  ;;  %v4744_v25 = vshrl.u32 %v9471_v10, 16 }
 0x1e0   : > { %v4755_v45 = vshrl.u32 %v4538_v32, 16  ;;  %v4758_v1 = vshll.u32 %v4538_v32, 16  ;;  %v2305_v53 = vrot.slane %v9026_v24, 5  ;;  %v4764_v54 = vshll.u32 %v9494_v39, 16  ;;  %v4544_v10 = vld [vmem:[#allocation2 + $0x90] sm:$0xf] }
 0x1e1   : > { %7062 = vmatmul.mubr.msk.bf16.gmra.mrb[8].mxu1 %vm1638_vm9, %v10444_v7  ;;  %v4768_v55 = vshrl.u32 %v9494_v39, 16  ;;  %v4712_v50 = vrot.slane %v4710_v9, 5  ;;  %v9518_v7 = vrot.slane %v4716_v23, 5  ;;  %v4722_v32 = vrot.slane %v4720_v41, 4  ;;  %v9529_v9 = vld [vmem:[#allocation2 + $0x80] sm:$0x1] }
 0x1e2   : > { %7065 = vmatprep.mubr.msk.bf16.mxu1 %vm1638_vm9, %v10445_v60  ;;  %v4726_v60 = vshll.u32 %v9502_v20, 16  ;;  %v4733_v22 = vrot.slane %v4731_v29, 4  ;;  %v4736_v24 = vrot.slane %v4734_v14, 5  ;;  %v9523_v40 = vrot.slane %v4740_v34, 5  ;;  %10451 = vst [vmem:[#allocation35_spill] sm:$0xff] %v9529_v9 }
 0x1e3   : > { %7214 = vmatmul.mubr.msk.bf16.gmra.mrb[24].mxu0 %vm1638_vm9, %v7669_v21  ;;  %v4709_v21 = vrot.slane %v4707_v46, 4  ;;  %v4746_v19 = vrot.slane %v4744_v25, 4  ;;  %v4757_v27 = vrot.slane %v4755_v45, 4  ;;  %v4760_v39 = vrot.slane %v4758_v1, 5 }
 0x1e4   : > { %7217 = vmatprep.mubr.msk.bf16.mxu0 %vm1638_vm9, %v7670_v17  ;;  %v4541_v17 = vld [vmem:[#allocation2 + $0x84] sm:$0xf]  ;;  %v10450_v46 = vcombine.low %v9255_v44, %v9263_v36  ;;  %v9531_v23 = vrot.slane %v4764_v54, 5  ;;  %v4770_v41 = vrot.slane %v4768_v55, 4  ;;  %v10452_v34 = vcombine.low %v9267_v4, %v9275_v18 }
 0x1e5   : > { %v4779_v29 = vshrl.u32 %v4541_v17, 16  ;;  %v4782_v14 = vshll.u32 %v4541_v17, 16  ;;  %v4713_v25 = vor.u32 %v4712_v50, %v4709_v21  ;;  %v4750_v45 = vshll.u32 %v9512_v62, 16 }
 0x1e6   : > { %v4788_v1 = vshll.u32 %v9521_v52, 16  ;;  %v4792_v44 = vshrl.u32 %v9521_v52, 16  ;;  %v9542_v36 = vsel %vm8711_vm1, %v2304_v56, %v2305_v53  ;;  %v9544_v54 = vrot.slane %v4726_v60, 5  ;;  %v9555_v60 = vld [vmem:[#allocation2 + $0x8c] sm:$0x1] }
 0x1e7   : > { %v4803_v55 = vshrl.u32 %v4544_v10, 16  ;;  %v4806_v17 = vshll.u32 %v4544_v10, 16  ;;  %v4723_v4 = vor.u32 %v4722_v32, %v9518_v7  ;;  %v4737_v18 = vor.u32 %v4736_v24, %v4733_v22 }
 0x1e8   : > { %v4747_v21 = vor.u32 %v4746_v19, %v9523_v40  ;;  %v4774_v50 = vshll.u32 %v9529_v9, 16  ;;  %v4761_v56 = vor.u32 %v4760_v39, %v4757_v27  ;;  %v4771_v53 = vor.u32 %v4770_v41, %v9531_v23  ;;  %v4547_v19 = vld [vmem:[#allocation2 + $0x9c] sm:$0xf] }
 0x1e9   : > { %7066 = vmatmul.mubr.msk.bf16.gmra.mrb[12].mxu1 %vm1638_vm9, %v10450_v46  ;;  %v9550_v46 = vld [vmem:[#allocation2 + $0x94] sm:$0xf]  ;;  %v4781_v10 = vrot.slane %v4779_v29, 4  ;;  %v4752_v8 = vrot.slane %v4750_v45, 5  ;;  %v9557_v32 = vrot.slane %v4788_v1, 5  ;;  %v4794_v22 = vrot.slane %v4792_v44, 4 }
 0x1ea   : > { %7069 = vmatprep.mubr.msk.bf16.mxu1 %vm1638_vm9, %v10452_v34  ;;  %v4784_v34 = vrot.slane %v4782_v14, 5  ;;  %v4805_v24 = vrot.slane %v4803_v55, 4  ;;  %v4808_v52 = vrot.slane %v4806_v17, 5  ;;  %v4812_v9 = vshll.u32 %v9550_v46, 16  ;;  %v9572_v55 = vld [vmem:[#allocation2 + $0x98] sm:$0x1] }
 0x1eb   : > { %7218 = vmatmul.mubr.msk.bf16.gmra.mrb[28].mxu0 %vm1638_vm9, %v7671_v43  ;;  %v4714_v43 = vrot.slane %v4713_v25, 4  ;;  %v4816_v62 = vshrl.u32 %v9550_v46, 16  ;;  %v4724_v39 = vrot.slane %v4723_v4, 4  ;;  %v4738_v27 = vrot.slane %v4737_v18, 4 }
 0x1ec   : > { %7223 = vmatprep.mubr.msk.bf16.mxu0 %vm1638_vm9, %v9327_v47  ;;  %v9561_v47 = vld [vmem:[#allocation2 + $0xa0] sm:$0xf]  ;;  %v4748_v41 = vrot.slane %v4747_v21, 4  ;;  %v4776_v38 = vrot.slane %v4774_v50, 5  ;;  %v10453_v29 = vcombine.low %v9279_v48, %v9285_v37  ;;  %v4762_v14 = vrot.slane %v4761_v56, 4 }
 0x1ed   : > { %v4772_v25 = vrot.slane %v4771_v53, 4  ;;  %v4785_v45 = vor.u32 %v4784_v34, %v4781_v10  ;;  %v4798_v1 = vshll.u32 %v9555_v60, 16  ;;  %v10454_v44 = vcombine.low %v9319_v63, %v9348_v35 }
 0x1ee   : > { %v4827_v17 = vshrl.u32 %v4547_v19, 16  ;;  %v4830_v4 = vshll.u32 %v4547_v19, 16  ;;  %v4836_v18 = vshll.u32 %v9561_v47, 16  ;;  %v4840_v48 = vshrl.u32 %v9561_v47, 16 }
 0x1ef   : > { %v4795_v37 = vor.u32 %v4794_v22, %v9557_v32  ;;  %v4809_v21 = vor.u32 %v4808_v52, %v4805_v24  ;;  %v9577_v50 = vrot.slane %v4812_v9, 5  ;;  %v4818_v56 = vrot.slane %v4816_v62, 4 }
 0x1f0   : > { %v4719_v63 = vsel %vm8312_vm10, %v4714_v43, %v9518_v7  ;;  %v4729_v35 = vsel %vm8312_vm10, %v4724_v39, %v9544_v54  ;;  %v4743_v53 = vsel %vm8312_vm10, %v4738_v27, %v9523_v40  ;;  %v4753_v52 = vsel %vm8312_vm10, %v4748_v41, %v4752_v8  ;;  %v9603_v40 = vld [vmem:[#allocation2 + $0xa4] sm:$0x1]  ;;  %v4550_v54 = vld [vmem:[#allocation2 + $0xa8] sm:$0xf]  ;;  %v9625_v27 = vld [vmem:[#allocation2 + $0xac] sm:$0xf] }
 0x1f1   : > { %7070 = vmatmul.mubr.msk.bf16.gmra.mrb[16].mxu1 %vm1638_vm9, %v10453_v29  ;;  %v4777_v62 = vsel %vm8312_vm10, %v4772_v25, %v4776_v38  ;;  %v9600_v7 = vrot.slane %v4785_v45, 4  ;;  %v4822_v9 = vshll.u32 %v9572_v55, 16  ;;  %v4829_v8 = vrot.slane %v4827_v17, 4  ;;  %v5245_v17 = vld [vmem:[#allocation2 + $0x54] sm:$0xe] }
 0x1f2   : > { %7073 = vmatprep.mubr.msk.bf16.mxu1 %vm1638_vm9, %v10454_v44  ;;  %v4832_v10 = vrot.slane %v4830_v4, 5  ;;  %v4842_v34 = vrot.slane %v4840_v48, 4  ;;  %v9609_v43 = vrot.slane %v4798_v1, 5  ;;  %v4819_v38 = vor.u32 %v4818_v56, %v9577_v50  ;;  %v5244_v44 = vld [vmem:[#allocation2 + $0x48] sm:$0xe] }
 0x1f3   : > { %7224 = vmatmul.mubr.msk.bf16.vlgmr.msra.gmra.mrb[0].mxu0 %vm1638_vm9, %v9365_v57  ;;  %v4767_v57 = vsel %vm8312_vm10, %v4762_v14, %v9531_v23  ;;  %v9611_v23 = vrot.slane %v4809_v21, 4  ;;  %v10455_v22 = vsel %vm8312_vm10, %v9479_v28, %v9465_v12  ;;  %v10456_v19 = vsel %vm8312_vm10, %v9452_v6, %v9411_v58 }
 0x1f4   : > { %7256 = vmatpush3.bf16.msra.mxu0 %v9309_v31  ;;  %7227 = vmatprep.mubr.msk.bf16.mxu0 %vm1638_vm9, %v9454_v49  ;;  %v9605_v31 = vrot.slane %v4836_v18, 5  ;;  %v9607_v49 = vrot.slane %v4795_v37, 4  ;;  %v6570_v24 = vcombine.low %v10456_v19, %v10455_v22  ;;  %v4846_v39 = vshll.u32 %v9603_v40, 16  ;;  %v9658_v18 = vld [vmem:[#allocation2 + $0xb0] sm:$0x1] }
 0x1f5   : > { %v4851_v41 = vshrl.u32 %v4550_v54, 16  ;;  %v4854_v29 = vshll.u32 %v4550_v54, 16  ;;  %v10457_v14 = vcombine.low %v9331_v5, %v9382_v42  ;;  %v6404_v12 = vcombine.low %v9483_v13, %v9542_v36  ;;  %v5247_v19 = vld [vmem:[#allocation2 + $0x6c] sm:$0xe] }
 0x1f6   : > { %v6571_v28 = vcombine.low %v4719_v63, %v4729_v35  ;;  %v9633_v25 = vcombine.low %v4743_v53, %v4753_v52  ;;  %v9635_v45 = vcombine.low %v4767_v57, %v4777_v62  ;;  %v10458_v58 = vcombine.low %v9422_v51, %v9435_v3  ;;  %v10459_v52 = vld [vmem:[#allocation28_spill] sm:$0xff]  ;;  %v9772_v51 = vld [vmem:[#allocation2 + $0xc4] sm:$0xf] }
 0x1f7   : > { %v4791_v5 = vsel %vm8312_vm10, %v9600_v7, %v9557_v32  ;;  %v9645_v42 = vrot.slane %v4822_v9, 5  ;;  %v4833_v6 = vor.u32 %v4832_v10, %v4829_v8  ;;  %v4843_v1 = vor.u32 %v4842_v34, %v9605_v31  ;;  %v5246_v9 = vld [vmem:[#allocation2 + $0x60] sm:$0xe] }
 0x1f8   : > { %v4801_v4 = vsel %vm8312_vm10, %v9607_v49, %v9609_v43  ;;  %v9656_v3 = vrot.slane %v4819_v38, 4  ;;  %v4860_v48 = vshll.u32 %v9625_v27, 16  ;;  %v9663_v37 = vrot.slane %v4846_v39, 5  ;;  %v10460_v10 = vld [vmem:[#allocation29_spill] sm:$0xff]  ;;  %v4559_v43 = vld [vmem:[#allocation2 + $0xcc] sm:$0xf] }
 0x1f9   : > { %7074 = vmatmul.mubr.msk.bf16.gmra.mrb[20].mxu1 %vm1638_vm9, %v10457_v14  ;;  %v4853_v21 = vrot.slane %v4851_v41, 4  ;;  %v4856_v56 = vrot.slane %v4854_v29, 5  ;;  %v4864_v63 = vshrl.u32 %v9625_v27, 16  ;;  %v6601_v35 = vrot.slane %v5244_v44, 9 }
 0x1fa   : > { %7077 = vmatprep.mubr.msk.bf16.mxu1 %vm1638_vm9, %v10458_v58  ;;  %v5334_v53 = vrot.slane %v9333_v26, 5  ;;  %v5337_v57 = vrot.slane %v10459_v52, 5  ;;  %v6602_v62 = vrot.slane %v5245_v17, 9  ;;  %v9670_v54 = vrot.slane %v4833_v6, 4  ;;  %v10465_v52 = vld [vmem:[#allocation33_spill] sm:$0xff] }
 0x1fb   : > { %7228 = vmatmul.mubr.msk.bf16.gmra.mrb[4].mxu0 %vm1638_vm9, %v9461_v33  ;;  %v9672_v8 = vrot.slane %v4843_v1, 4  ;;  %v4870_v33 = vshll.u32 %v9658_v18, 16  ;;  %v5341_v34 = vrot.slane %v10460_v10, 5  ;;  %v9676_v38 = vrot.slane %v4860_v48, 5  ;;  %v4553_v1 = vld [vmem:[#allocation2 + $0xb4] sm:$0xf] }
 0x1fc   : > { %7231 = vmatprep.mubr.msk.bf16.mxu0 %vm1638_vm9, %v9477_v11  ;;  %v9680_v11 = vsel %vm8711_vm1, %v6601_v35, %v5334_v53  ;;  %v5336_v22 = vrot.slane %v5334_v53, 4  ;;  %v5344_v26 = vrot.slane %v9405_v59, 5  ;;  %v4857_v39 = vor.u32 %v4856_v56, %v4853_v21  ;;  %v10462_v48 = vld [vmem:[#allocation32_spill] sm:$0xff] }
 0x1fd   : > { %v9685_v41 = vsel %vm8711_vm1, %v6602_v62, %v5341_v34  ;;  %v5343_v29 = vrot.slane %v5341_v34, 4  ;;  %v6603_v14 = vrot.slane %v5246_v9, 9  ;;  %v10461_v58 = vcombine.low %v9426_v16, %v9441_v61  ;;  %v9710_v53 = vld [vmem:[#allocation2 + $0xb8] sm:$0xf] }
 0x1fe   : > { %v9691_v6 = vrot.slane %v4864_v63, 4  ;;  %v9695_v44 = vsel %vm8711_vm1, %v5336_v22, %v5337_v57  ;;  %v5348_v59 = vrot.slane %v9459_v2, 5  ;;  %v5351_v17 = vrot.slane %v9502_v20, 5  ;;  %v10464_v63 = vld [vmem:[#allocation30_spill] sm:$0xff] }
 0x1ff   : > { %v10463_v21 = vcombine.low %v9469_v0, %v10462_v48  ;;  %v9707_v61 = vsel %vm8711_vm1, %v5343_v29, %v5344_v26  ;;  %v6604_v56 = vrot.slane %v5247_v19, 9  ;;  %v5355_v35 = vrot.slane %v10464_v63, 5  ;;  %v2986_v29 = vld [vmem:[#allocation2 + $0x78] sm:$0xf]  ;;  %v4556_v48 = vld [vmem:[#allocation2 + $0xc0] sm:$0xf] }
 0x200   : > { %v9716_v0 = vsel %vm8711_vm1, %v6603_v14, %v5348_v59  ;;  %v5350_v20 = vrot.slane %v5348_v59, 4  ;;  %v5358_v57 = vrot.slane %v10465_v52, 5  ;;  %v4825_v62 = vsel %vm8312_vm10, %v9656_v3, %v9645_v42  ;;  %v7672_v14 = vld [vmem:[#allocation2 + $0xc] sm:$0xff]  }
 0x201   : > { %7078 = vmatmul.mubr.msk.bf16.gmra.mrb[24].mxu1 %vm1638_vm9, %v10461_v58  ;;  %v4875_v9 = vshrl.u32 %v4553_v1, 16  ;;  %v9726_v10 = vsel %vm8711_vm1, %v6604_v56, %v5355_v35  ;;  %v5357_v34 = vrot.slane %v5355_v35, 4  ;;  %v4839_v22 = vsel %vm8312_vm10, %v9670_v54, %v9605_v31  ;;  %v5248_v54 = vld [vmem:[#allocation2 + $0x78] sm:$0xe]  ;;  %v10466_v35 = vld [vmem:[#allocation22_spill] sm:$0xff] }
 0x202   : > { %7081 = vmatprep.mubr.msk.bf16.mxu1 %vm1638_vm9, %v10463_v21  ;;  %v9733_v26 = vrot.slane %v4870_v33, 5  ;;  %v9737_v19 = vsel %vm8711_vm1, %v5350_v20, %v5351_v17  ;;  %v4849_v58 = vsel %vm8312_vm10, %v9672_v8, %v9663_v37  ;;  %v9750_v33 = vrot.slane %v4857_v39, 4  ;;  %v5249_v8 = vld [vmem:[#allocation2 + $0x84] sm:$0xe]  ;;  %v10467_v20 = vld [vmem:[#allocation23_spill] sm:$0xff] }
 0x203   : > { %7232 = vmatmul.mubr.msk.bf16.gmra.mrb[8].mxu0 %vm1638_vm9, %v6570_v24  ;;  %v4878_v24 = vshll.u32 %v4553_v1, 16  ;;  %v9748_v31 = vsel %vm8711_vm1, %v5357_v34, %v5358_v57  ;;  %v4867_v1 = vor.u32 %v9691_v6, %v9676_v38  ;;  %v4888_v17 = vshrl.u32 %v9710_v53, 16  ;;  %v10468_v57 = vld [vmem:[#allocation31_spill] sm:$0xff] }
 0x204   : > { %7235 = vmatprep.mubr.msk.bf16.mxu0 %vm1638_vm9, %v6571_v28  ;;  %v4884_v28 = vshll.u32 %v9710_v53, 16  ;;  %v9757_v21 = vrot.slane %v4875_v9, 4  ;;  %v3224_v56 = vshrl.u32 %v2986_v29, 16  ;;  %v3227_v63 = vshll.u32 %v2986_v29, 16  ;;  %v10469_v37 = vld [vmem:[#allocation35_spill] sm:$0xff] }
 0x205   : > { %v3246_v39 = vsel %vm8312_vm10, %v10467_v20, %v10466_v35  ;;  %v9767_v6 = vrot.slane %v4878_v24, 5  ;;  %v6605_v52 = vrot.slane %v5248_v54, 9  ;;  %v5362_v34 = vrot.slane %v10468_v57, 5  ;;  %v9781_v54 = vld [vmem:[#allocation2 + $0xbc] sm:$0x1] }
 0x206   : > { %v5365_v9 = vrot.slane %v10469_v37, 5  ;;  %v4899_v29 = vshrl.u32 %v4556_v48, 16  ;;  %v3226_v59 = vrot.slane %v3224_v56, 4  ;;  %v3229_v2 = vrot.slane %v3227_v63, 5  ;;  %v7673_v63 = vld [vmem:[#allocation2 + $0x18] sm:$0xff]  }
 0x207   : > { %v6606_v16 = vrot.slane %v5249_v8, 9  ;;  %v4902_v35 = vshll.u32 %v4556_v48, 16  ;;  %v9776_v13 = vsel %vm8711_vm1, %v6605_v52, %v5362_v34  ;;  %v5364_v36 = vrot.slane %v5362_v34, 4 }
 0x208   : > { %v4890_v37 = vrot.slane %v4888_v17, 4  ;;  %v3230_v56 = vor.u32 %v3229_v2, %v3226_v59  ;;  %v5372_v8 = vrot.slane %v9555_v60, 5  ;;  %v4868_v48 = vrot.slane %v4867_v1, 4 }
 0x209   : > { %7082 = vmatmul.mubr.msk.bf16.gmra.mrb[28].mxu1 %vm1638_vm9, %v6404_v12  ;;  %v10470_v12 = vld [vmem:[#allocation34_spill] sm:$0xff]  ;;  %v9790_v20 = vsel %vm8711_vm1, %v5364_v36, %v5365_v9  ;;  %v4908_v17 = vshll.u32 %v9772_v51, 16  ;;  %v4912_v2 = vshrl.u32 %v9772_v51, 16  ;;  %v4901_v1 = vrot.slane %v4899_v29, 4  ;;  %v10471_v9 = vld [vmem:[#allocation21_spill] sm:$0xff]  ;;  %v10473_v36 = vld [vmem:[#allocation20_spill] sm:$0xff] }
 0x20a   : > { %7087 = vmatprep.mubr.msk.bf16.mxu1 %vm1638_vm9, %v7672_v14  ;;  %v5369_v24 = vrot.slane %v10470_v12, 5  ;;  %v9783_v14 = vrot.slane %v4884_v28, 5  ;;  %v7674_v28 = vld [vmem:[#allocation2 + $0x24] sm:$0xff]   ;;  %v3231_v60 = vrot.slane %v3230_v56, 4  ;;  %v6621_v59 = vcombine.low %v9776_v13, %v9790_v20  ;;  %v7747_v13 = vld [vmem:[#allocation2 + $0xb0] sm:$0x1] }
 0x20b   : > { %7236 = vmatmul.mubr.msk.bf16.gmra.mrb[12].mxu0 %vm1638_vm9, %v9633_v25  ;;  %v4904_v57 = vrot.slane %v4902_v35, 5  ;;  %v10472_v32 = vsel %vm8312_vm10, %v9611_v23, %v9577_v50  ;;  %v6576_v49 = vcombine.low %v4839_v22, %v4849_v58  ;;  %v4863_v42 = vsel %vm8312_vm10, %v9750_v33, %v9676_v38  ;;  %v9842_v50 = vld [vmem:[#allocation2 + $0xc8] sm:$0x1]  ;;  %v9846_v22 = vld [vmem:[#allocation2 + $0xd0] sm:$0xf] }
 0x20c   : > { %7239 = vmatprep.mubr.msk.bf16.mxu0 %vm1638_vm9, %v9635_v45  ;;  %v9794_v25 = vsel %vm8711_vm1, %v6606_v16, %v5369_v24  ;;  %v5371_v52 = vrot.slane %v5369_v24, 4  ;;  %v4894_v45 = vshll.u32 %v9781_v54, 16  ;;  %v6574_v16 = vcombine.low %v4791_v5, %v4801_v4  ;;  %v5250_v4 = vld [vmem:[#allocation2 + $0x90] sm:$0xe] }
 0x20d   : > { %v3236_v29 = vsel %vm8312_vm10, %v3231_v60, %v10471_v9  ;;  %v6575_v7 = vcombine.low %v10472_v32, %v4825_v62  ;;  %v4873_v3 = vsel %vm8312_vm10, %v4868_v48, %v9733_v26  ;;  %v9844_v23 = vrot.slane %v4908_v17, 5 }
 0x20e   : > { %v9803_v34 = vsel %vm8711_vm1, %v5371_v52, %v5372_v8  ;;  %v9831_v5 = vcombine.low %v3236_v29, %v3246_v39  ;;  %v4914_v62 = vrot.slane %v4912_v2, 4  ;;  %v4881_v58 = vor.u32 %v9767_v6, %v9757_v21  ;;  %v5251_v8 = vld [vmem:[#allocation2 + $0x9c] sm:$0xe] }
 0x20f   : > { %v6622_v35 = vcombine.low %v9794_v25, %v9803_v34  ;;  %v4891_v39 = vor.u32 %v4890_v37, %v9783_v14  ;;  %v4896_v12 = vrot.slane %v4894_v45, 5  ;;  %v4905_v24 = vor.u32 %v4904_v57, %v4901_v1  ;;  %v7676_v37 = vld [vmem:[#allocation2 + $0x3c] sm:$0xff]  }
 0x210   : > { %v4923_v38 = vshrl.u32 %v4559_v43, 16  ;;  %v4926_v33 = vshll.u32 %v4559_v43, 16  ;;  %v6607_v56 = vrot.slane %v5250_v4, 9  ;;  %v5376_v26 = vrot.slane %v9550_v46, 5 }
 0x211   : > { %7088 = vmatmul.mubr.msk.bf16.vlgmr.msra.gmra.mrb[0].mxu1 %vm1638_vm9, %v7673_v63  ;;  %v7675_v63 = vld [vmem:[#allocation2 + $0x30] sm:$0xff]   ;;  %v6577_v48 = vcombine.low %v4863_v42, %v4873_v3  ;;  %v4918_v52 = vshll.u32 %v9842_v50, 16  ;;  %v4932_v21 = vshll.u32 %v9846_v22, 16  ;;  %v4936_v6 = vshrl.u32 %v9846_v22, 16 }
 0x212   : > { %7290 = vmatpush3.bf16.msra.mxu1 %v10473_v36  ;;  %7091 = vmatprep.mubr.msk.bf16.mxu1 %vm1638_vm9, %v7674_v28  ;;  %v4915_v28 = vor.u32 %v4914_v62, %v9844_v23  ;;  %v9860_v17 = vsel %vm8711_vm1, %v6607_v56, %v5376_v26  ;;  %v5378_v2 = vrot.slane %v5376_v26, 4  ;;  %v5379_v46 = vrot.slane %v9572_v55, 5 }
 0x213   : > { %7240 = vmatmul.mubr.msk.bf16.gmra.mrb[16].mxu0 %vm1638_vm9, %v6574_v16  ;;  %v4882_v60 = vrot.slane %v4881_v58, 4  ;;  %v4892_v45 = vrot.slane %v4891_v39, 4  ;;  %v4906_v1 = vrot.slane %v4905_v24, 4  ;;  %v6608_v57 = vrot.slane %v5251_v8, 9  ;;  %v7677_v24 = vld [vmem:[#allocation2 + $0x48] sm:$0xff]   ;;  %v7678_v8 = vld [vmem:[#allocation2 + $0x54] sm:$0xff]  }
 0x214   : > { %7243 = vmatprep.mubr.msk.bf16.mxu0 %vm1638_vm9, %v6575_v7  ;;  %v4925_v16 = vrot.slane %v4923_v38, 4  ;;  %v4928_v9 = vrot.slane %v4926_v33, 5  ;;  %v9865_v29 = vsel %vm8711_vm1, %v5378_v2, %v5379_v46  ;;  %v5383_v32 = vrot.slane %v9561_v47, 5  ;;  %v9869_v7 = vld [vmem:[#allocation2 + $0xd4] sm:$0x1] }
 0x215   : > { %v9871_v43 = vrot.slane %v4932_v21, 5  ;;  %v4938_v4 = vrot.slane %v4936_v6, 4  ;;  %v6623_v55 = vcombine.low %v9860_v17, %v9865_v29  ;;  %v5386_v36 = vrot.slane %v9603_v40, 5  ;;  %v5253_v6 = vld [vmem:[#allocation2 + $0xb4] sm:$0xe] }
 0x216   : > { %v4916_v42 = vrot.slane %v4915_v28, 4  ;;  %v4920_v3 = vrot.slane %v4918_v52, 5  ;;  %v9879_v62 = vsel %vm8711_vm1, %v6608_v57, %v5383_v32  ;;  %v5385_v47 = vrot.slane %v5383_v32, 4  ;;  %v7750_v29 = vld [vmem:[#allocation2 + $0xc8] sm:$0x1] }
 0x217   : > { %v4887_v58 = vsel %vm8312_vm10, %v4882_v60, %v9783_v14  ;;  %v4942_v39 = vshll.u32 %v9869_v7, 16  ;;  %v4897_v38 = vsel %vm8312_vm10, %v4892_v45, %v4896_v12  ;;  %v4929_v33 = vor.u32 %v4928_v9, %v4925_v16  ;;  %v5252_v14 = vld [vmem:[#allocation2 + $0xa8] sm:$0xe] }
 0x218   : > { %v9888_v40 = vsel %vm8711_vm1, %v5385_v47, %v5386_v36  ;;  %v4939_v56 = vor.u32 %v4938_v4, %v9871_v43  ;;  %v4921_v52 = vsel %vm8312_vm10, %v4916_v42, %v4920_v3  ;;  %v6578_v12 = vcombine.low %v4887_v58, %v4897_v38  ;;  %v7735_v3 = vld [vmem:[#allocation2 + $0x28] sm:$0xf]  ;;  %v5241_v38 = vld [vmem:[#allocation2 + $0x24] sm:$0xe] }
 0x219   : > { %7092 = vmatmul.mubr.msk.bf16.gmra.mrb[4].mxu1 %vm1638_vm9, %v7675_v63  ;;  %v6624_v26 = vcombine.low %v9879_v62, %v9888_v40  ;;  %v4911_v63 = vsel %vm8312_vm10, %v4906_v1, %v9844_v23  ;;  %v6609_v2 = vrot.slane %v5252_v14, 9  ;;  %v4930_v60 = vrot.slane %v4929_v33, 4  ;;  %v7734_v1 = vld [vmem:[#allocation2 + $0x20] sm:$0x1]  ;;  %v10474_v33 = vld [vmem:[#allocation24_spill] sm:$0xff] }
 0x21a   : > { %7095 = vmatprep.mubr.msk.bf16.mxu1 %vm1638_vm9, %v7676_v37  ;;  %v4944_v37 = vrot.slane %v4942_v39, 5  ;;  %v6579_v46 = vcombine.low %v4911_v63, %v4921_v52  ;;  %v4940_v45 = vrot.slane %v4939_v56, 4  ;;  %v5390_v57 = vrot.slane %v9625_v27, 5  ;;  %v7679_v39 = vld [vmem:[#allocation2 + $0x60] sm:$0xff]   ;;  %v5242_v14 = vld [vmem:[#allocation2 + $0x30] sm:$0xe] }
 0x21b   : > { %7244 = vmatmul.mubr.msk.bf16.gmra.mrb[20].mxu0 %vm1638_vm9, %v6576_v49  ;;  %v5240_v49 = vld [vmem:[#allocation2 + $0x18] sm:$0xe]  ;;  %v5309_v16 = vrot.slane %v7734_v1, 5  ;;  %v5393_v9 = vrot.slane %v9658_v18, 5  ;;  %v6610_v32 = vrot.slane %v5253_v6, 9  ;;  %v5313_v27 = vrot.slane %v7735_v3, 5 }
 0x21c   : > { %7247 = vmatprep.mubr.msk.bf16.mxu0 %vm1638_vm9, %v6577_v48  ;;  %v7733_v48 = vld [vmem:[#allocation2 + $0x1c] sm:$0xf]  ;;  %v6597_v28 = vrot.slane %v5240_v49, 9  ;;  %v9907_v4 = vsel %vm8711_vm1, %v6609_v2, %v5390_v57  ;;  %v5392_v36 = vrot.slane %v5390_v57, 4  ;;  %v5397_v47 = vrot.slane %v9710_v53, 5  ;;  %v7680_v53 = vld [vmem:[#allocation2 + $0x6c] sm:$0xff]  }
 0x21d   : > { %v5306_v21 = vrot.slane %v7733_v48, 5  ;;  %v5400_v58 = vrot.slane %v9781_v54, 5  ;;  %v4935_v18 = vsel %vm8312_vm10, %v4930_v60, %v9871_v43  ;;  %v5320_v56 = vrot.slane %v10474_v33, 5  ;;  %v5254_v60 = vld [vmem:[#allocation2 + $0xc0] sm:$0xe]  ;;  %v10475_v57 = vld [vmem:[#allocation26_spill] sm:$0xff] }
 0x21e   : > { %v9923_v49 = vsel %vm8711_vm1, %v5392_v36, %v5393_v9  ;;  %v9931_v43 = vsel %vm8711_vm1, %v6610_v32, %v5397_v47  ;;  %v5399_v63 = vrot.slane %v5397_v47, 4  ;;  %v6598_v48 = vrot.slane %v5241_v38, 9  ;;  %v5243_v1 = vld [vmem:[#allocation2 + $0x3c] sm:$0xe]  ;;  %v5255_v9 = vld [vmem:[#allocation2 + $0xcc] sm:$0xe] }
 0x21f   : > { %v5308_v23 = vrot.slane %v5306_v21, 4  ;;  %v5307_v42 = vsel %vm8711_vm1, %v6597_v28, %v5306_v21  ;;  %v5315_v21 = vrot.slane %v5313_v27, 4  ;;  %v6599_v2 = vrot.slane %v5242_v14, 9  ;;  %v10476_v36 = vld [vmem:[#allocation25_spill] sm:$0xff]  ;;  %v7682_v38 = vld [vmem:[#allocation2 + $0x84] sm:$0xff]  }
 0x220   : > { %v9935_v6 = vsel %vm8711_vm1, %v5399_v63, %v5400_v58  ;;  %v5314_v32 = vsel %vm8711_vm1, %v6598_v48, %v5313_v27  ;;  %v6611_v3 = vrot.slane %v5254_v60, 9  ;;  %v7681_v47 = vld [vmem:[#allocation2 + $0x78] sm:$0xff]   ;;  %v5411_v48 = vrot.slane %v9846_v22, 5 }
 0x221   : > { %7096 = vmatmul.mubr.msk.bf16.gmra.mrb[8].mxu1 %vm1638_vm9, %v7677_v24  ;;  %v4945_v24 = vsel %vm8312_vm10, %v4940_v45, %v4944_v37  ;;  %v5310_v54 = vsel %vm8711_vm1, %v5308_v23, %v5309_v16  ;;  %v7736_v37 = vld [vmem:[#allocation2 + $0x2c] sm:$0x1]  ;;  %v5322_v45 = vrot.slane %v5320_v56, 4  ;;  %v5323_v23 = vrot.slane %v10475_v57, 5 }
 0x222   : > { %7099 = vmatprep.mubr.msk.bf16.mxu1 %vm1638_vm9, %v7678_v8  ;;  %v6625_v8 = vcombine.low %v9907_v4, %v9923_v49  ;;  %v6580_v52 = vcombine.low %v4935_v18, %v4945_v24  ;;  %v5316_v28 = vrot.slane %v7736_v37, 5  ;;  %v2983_v16 = vld [vmem:[#allocation2 + $0x6c] sm:$0xf]  ;;  %v6600_v18 = vrot.slane %v5243_v1, 9 }
 0x223   : > { %7248 = vmatmul.mubr.msk.bf16.gmra.mrb[24].mxu0 %vm1638_vm9, %v6578_v12  ;;  %v6613_v12 = vcombine.low %v5307_v42, %v5310_v54  ;;  %v5327_v42 = vrot.slane %v10476_v36, 5  ;;  %v5404_v24 = vrot.slane %v9772_v51, 5  ;;  %v5324_v33 = vsel %vm8711_vm1, %v5322_v45, %v5323_v23 }
 0x224   : > { %7251 = vmatprep.mubr.msk.bf16.mxu0 %vm1638_vm9, %v6579_v46  ;;  %v6626_v46 = vcombine.low %v9931_v43, %v9935_v6  ;;  %v5317_v58 = vsel %vm8711_vm1, %v5315_v21, %v5316_v28  ;;  %v3200_v27 = vshrl.u32 %v2983_v16, 16  ;;  %v6612_v54 = vrot.slane %v5255_v9, 9 }
 0x225   : > { %v3203_v14 = vshll.u32 %v2983_v16, 16  ;;  %v9957_v63 = vsel %vm8711_vm1, %v6611_v3, %v5404_v24  ;;  %v5329_v21 = vrot.slane %v5327_v42, 4  ;;  %v5414_v37 = vrot.slane %v9869_v7, 5 }
 0x226   : > { %v9972_v57 = vsel %vm8711_vm1, %v6612_v54, %v5411_v48  ;;  %v5413_v7 = vrot.slane %v5411_v48, 4  ;;  %v3202_v23 = vrot.slane %v3200_v27, 4  ;;  %v5328_v16 = vsel %vm8711_vm1, %v6600_v18, %v5327_v42  ;;  %v7738_v18 = vld [vmem:[#allocation2 + $0x74] sm:$0x1]  ;;  %v2992_v48 = vld [vmem:[#allocation2 + $0x90] sm:$0xf] }
 0x227   : > { %v3205_v1 = vrot.slane %v3203_v14, 5  ;;  %v3219_v27 = vshll.u32 %v7738_v18, 16  ;;  %v3257_v14 = vshll.u32 %v7739_v15, 16  ;;  %v3339_v20 = vshll.u32 %v7747_v13, 16 }
 0x228   : > { %v9979_v9 = vsel %vm8711_vm1, %v5413_v7, %v5414_v37 }
 0x229   : > { %7100 = vmatmul.mubr.msk.bf16.gmra.mrb[12].mxu1 %vm1638_vm9, %v7679_v39  ;;  %v5321_v39 = vsel %vm8711_vm1, %v6599_v2, %v5320_v56  ;;  %v6614_v56 = vcombine.low %v5314_v32, %v5317_v58  ;;  %v7737_v2 = vld [vmem:[#allocation2 + $0x70] sm:$0xf]  ;;  %v6628_v58 = vcombine.low %v9972_v57, %v9979_v9  ;;  %v3221_v37 = vrot.slane %v3219_v27, 5 }
 0x22a   : > { %7103 = vmatprep.mubr.msk.bf16.mxu1 %vm1638_vm9, %v7680_v53  ;;  %v5407_v53 = vrot.slane %v9842_v50, 5  ;;  %v6615_v28 = vcombine.low %v5321_v39, %v5324_v33  ;;  %v3209_v50 = vshll.u32 %v7737_v2, 16  ;;  %v3213_v60 = vshrl.u32 %v7737_v2, 16  ;;  %v7683_v32 = vld [vmem:[#allocation2 + $0x90] sm:$0xff]   ;;  %v7684_v39 = vld [vmem:[#allocation2 + $0x9c] sm:$0xff]  }
 0x22b   : > { %7252 = vmatmul.mubr.msk.bf16.gmra.mrb[28].mxu0 %vm1638_vm9, %v6580_v52  ;;  %v5406_v52 = vrot.slane %v5404_v24, 4  ;;  %v2989_v24 = vld [vmem:[#allocation2 + $0x84] sm:$0xf]  ;;  %v3272_v2 = vshrl.u32 %v2992_v48, 16 }
 0x22c   : > { %7257 = vmatprep.mubr.msk.bf16.mxu0 %vm1638_vm9, %v6613_v12  ;;  %v10477_v12 = vld [vmem:[#allocation27_spill] sm:$0xff]  ;;  %v3211_v3 = vrot.slane %v3209_v50, 5  ;;  %v3251_v54 = vshll.u32 %v2989_v24, 16  ;;  %v2995_v50 = vld [vmem:[#allocation2 + $0x9c] sm:$0xf] }
 0x22d   : > { %v5330_v51 = vrot.slane %v10477_v12, 5  ;;  %v9965_v45 = vsel %vm8711_vm1, %v5406_v52, %v5407_v53  ;;  %v3248_v53 = vshrl.u32 %v2989_v24, 16  ;;  %v3261_v52 = vshrl.u32 %v7739_v15, 16 }
 0x22e   : > { %v6627_v22 = vcombine.low %v9957_v63, %v9965_v45  ;;  %v10478_v12 = vcombine.low %v9680_v11, %v9695_v44  ;;  %v3253_v7 = vrot.slane %v3251_v54, 5  ;;  %v3296_v11 = vshrl.u32 %v2995_v50, 16 }
 0x22f   : > { %v5331_v36 = vsel %vm8711_vm1, %v5329_v21, %v5330_v51  ;;  %v7685_v21 = vld [vmem:[#allocation2 + $0xa8] sm:$0xff]   ;;  %v3299_v44 = vshll.u32 %v2995_v50, 16  ;;  %v3274_v54 = vrot.slane %v3272_v2, 4 }
 0x230   : > { %v6616_v33 = vcombine.low %v5328_v16, %v5331_v36  ;;  %v3275_v16 = vshll.u32 %v2992_v48, 16  ;;  %v7740_v36 = vld [vmem:[#allocation2 + $0x94] sm:$0xf] }
 0x231   : > { %7104 = vmatmul.mubr.msk.bf16.gmra.mrb[16].mxu1 %vm1638_vm9, %v7681_v47  ;;  %v3215_v47 = vrot.slane %v3213_v60, 4  ;;  %v7686_v60 = vld [vmem:[#allocation2 + $0xb4] sm:$0xff]  }
 0x232   : > { %7107 = vmatprep.mubr.msk.bf16.mxu1 %vm1638_vm9, %v7682_v38  ;;  %v3206_v38 = vor.u32 %v3205_v1, %v3202_v23  ;;  %v9993_v23 = vrot.slane %v3257_v14, 5  ;;  %v3263_v1 = vrot.slane %v3261_v52, 4  ;;  %v3277_v15 = vrot.slane %v3275_v16, 5 }
 0x233   : > { %7258 = vmatmul.mubr.msk.bf16.vlgmr.msra.gmra.mrb[0].mxu0 %vm1638_vm9, %v6614_v56  ;;  %v3216_v42 = vor.u32 %v3215_v47, %v3211_v3  ;;  %v3281_v47 = vshll.u32 %v7740_v36, 16  ;;  %v10479_v14 = vcombine.low %v9685_v41, %v9707_v61 }
 0x234   : > { %7261 = vmatprep.mubr.msk.bf16.mxu0 %vm1638_vm9, %v6615_v28  ;;  %v3207_v56 = vrot.slane %v3206_v38, 4  ;;  %v3250_v28 = vrot.slane %v3248_v53, 4  ;;  %v7741_v38 = vld [vmem:[#allocation2 + $0x8c] sm:$0x1] }
 0x235   : > { %v3217_v51 = vrot.slane %v3216_v42, 4  ;;  %v7742_v42 = vld [vmem:[#allocation2 + $0xa0] sm:$0xf]  ;;  %v10006_v52 = vrot.slane %v3281_v47, 5 }
 0x236   : > { %v3305_v18 = vshll.u32 %v7742_v42, 16  ;;  %v3309_v27 = vshrl.u32 %v7742_v42, 16  ;;  %v3254_v53 = vor.u32 %v3253_v7, %v3250_v28  ;;  %v3278_v7 = vor.u32 %v3277_v15, %v3274_v54  ;;  %v7746_v15 = vld [vmem:[#allocation2 + $0xb8] sm:$0xf] }
 0x237   : > { %v3222_v24 = vsel %vm8312_vm10, %v3217_v51, %v3221_v37  ;;  %v10480_v51 = vcombine.low %v9716_v0, %v9737_v19  ;;  %v3001_v0 = vld [vmem:[#allocation2 + $0xb4] sm:$0xf] }
 0x238   : > { %v10012_v2 = vrot.slane %v3305_v18, 5  ;;  %v3311_v50 = vrot.slane %v3309_v27, 4  ;;  %v3255_v41 = vrot.slane %v3254_v53, 4  ;;  %v3279_v27 = vrot.slane %v3278_v7, 4 }
 0x239   : > { %7108 = vmatmul.mubr.msk.bf16.gmra.mrb[20].mxu1 %vm1638_vm9, %v7683_v32  ;;  %v3212_v32 = vsel %vm8312_vm10, %v3207_v56, %v3211_v3  ;;  %v3264_v3 = vor.u32 %v3263_v1, %v9993_v23  ;;  %v3298_v56 = vrot.slane %v3296_v11, 4  ;;  %v7743_v1 = vld [vmem:[#allocation2 + $0x98] sm:$0x1]  ;;  %v3347_v54 = vshll.u32 %v3001_v0, 16 }
 0x23a   : > { %7111 = vmatprep.mubr.msk.bf16.mxu1 %vm1638_vm9, %v7684_v39  ;;  %v3285_v39 = vshrl.u32 %v7740_v36, 16  ;;  %v6461_v37 = vcombine.low %v3212_v32, %v3222_v24  ;;  %v3291_v16 = vshll.u32 %v7743_v1, 16  ;;  %v3312_v19 = vor.u32 %v3311_v50, %v10012_v2  ;;  %v7745_v24 = vld [vmem:[#allocation2 + $0xac] sm:$0xf] }
 0x23b   : > { %7262 = vmatmul.mubr.msk.bf16.gmra.mrb[4].mxu0 %vm1638_vm9, %v6616_v33  ;;  %v3267_v33 = vshll.u32 %v7741_v38, 16  ;;  %v3265_v61 = vrot.slane %v3264_v3, 4  ;;  %v3329_v38 = vshll.u32 %v7745_v24, 16  ;;  %v3260_v42 = vsel %vm8312_vm10, %v3255_v41, %v9993_v23 }
 0x23c   : > { %7265 = vmatprep.mubr.msk.bf16.mxu0 %vm1638_vm9, %v10478_v12  ;;  %v3287_v48 = vrot.slane %v3285_v39, 4  ;;  %v7687_v12 = vld [vmem:[#allocation2 + $0xc0] sm:$0xff]   ;;  %v3293_v53 = vrot.slane %v3291_v16, 5  ;;  %v3344_v3 = vshrl.u32 %v3001_v0, 16  ;;  %v3313_v23 = vrot.slane %v3312_v19, 4 }
 0x23d   : > { %v3269_v28 = vrot.slane %v3267_v33, 5  ;;  %v7744_v39 = vld [vmem:[#allocation2 + $0xa4] sm:$0x1]  ;;  %v3333_v33 = vshrl.u32 %v7745_v24, 16  ;;  %v3331_v50 = vrot.slane %v3329_v38, 5  ;;  %v3349_v7 = vrot.slane %v3347_v54, 5 }
 0x23e   : > { %v3288_v36 = vor.u32 %v3287_v48, %v10006_v52  ;;  %v3315_v11 = vshll.u32 %v7744_v39, 16  ;;  %v3357_v48 = vshrl.u32 %v7746_v15, 16  ;;  %v3284_v16 = vsel %vm8312_vm10, %v3279_v27, %v10006_v52  ;;  %v7748_v0 = vld [vmem:[#allocation2 + $0xc4] sm:$0xf] }
 0x23f   : > { %v3270_v18 = vsel %vm8312_vm10, %v3265_v61, %v3269_v28  ;;  %v3346_v61 = vrot.slane %v3344_v3, 4  ;;  %v3377_v19 = vshll.u32 %v7748_v0, 16 }
 0x240   : > { %v6463_v41 = vcombine.low %v3260_v42, %v3270_v18 }
 0x241   : > { %7112 = vmatmul.mubr.msk.bf16.gmra.mrb[24].mxu1 %vm1638_vm9, %v7685_v21  ;;  %v3301_v21 = vrot.slane %v3299_v44, 5  ;;  %v3350_v24 = vor.u32 %v3349_v7, %v3346_v61 }
 0x242   : > { %7115 = vmatprep.mubr.msk.bf16.mxu1 %vm1638_vm9, %v7686_v60  ;;  %v2998_v60 = vld [vmem:[#allocation2 + $0xa8] sm:$0xf] }
 0x243   : > { %7266 = vmatmul.mubr.msk.bf16.gmra.mrb[8].mxu0 %vm1638_vm9, %v10479_v14  ;;  %v3302_v47 = vor.u32 %v3301_v21, %v3298_v56  ;;  %v3320_v44 = vshrl.u32 %v2998_v60, 16  ;;  %v3323_v32 = vshll.u32 %v2998_v60, 16  ;;  %v3353_v14 = vshll.u32 %v7746_v15, 16 }
 0x244   : > { %7269 = vmatprep.mubr.msk.bf16.mxu0 %vm1638_vm9, %v10480_v51  ;;  %v10481_v56 = vcombine.low %v9726_v10, %v9748_v31  ;;  %v3289_v21 = vrot.slane %v3288_v36, 4  ;;  %v3317_v51 = vrot.slane %v3315_v11, 5  ;;  %v3335_v60 = vrot.slane %v3333_v33, 4  ;;  %v3004_v31 = vld [vmem:[#allocation2 + $0xc0] sm:$0xf] }
 0x245   : > { %v3325_v28 = vrot.slane %v3323_v32, 5  ;;  %v3355_v1 = vrot.slane %v3353_v14, 5  ;;  %v3359_v10 = vrot.slane %v3357_v48, 4  ;;  %v3368_v52 = vshrl.u32 %v3004_v31, 16  ;;  %v7749_v33 = vld [vmem:[#allocation2 + $0xbc] sm:$0x1] }
 0x246   : > { %v3294_v36 = vsel %vm8312_vm10, %v3289_v21, %v3293_v53  ;;  %v3336_v11 = vor.u32 %v3335_v60, %v3331_v50  ;;  %v3381_v32 = vshrl.u32 %v7748_v0, 16  ;;  %v3341_v53 = vrot.slane %v3339_v20, 5 }
 0x247   : > { %v3360_v38 = vor.u32 %v3359_v10, %v3355_v1  ;;  %v3370_v3 = vrot.slane %v3368_v52, 4  ;;  %v3379_v15 = vrot.slane %v3377_v19, 5  ;;  %v3351_v48 = vrot.slane %v3350_v24, 4 }
 0x248   : > { %v3337_v27 = vrot.slane %v3336_v11, 4  ;;  %v3383_v14 = vrot.slane %v3381_v32, 4 }
 0x249   : > { %7116 = vmatmul.mubr.msk.bf16.gmra.mrb[28].mxu1 %vm1638_vm9, %v7687_v12  ;;  %v3303_v12 = vrot.slane %v3302_v47, 4  ;;  %v3318_v47 = vsel %vm8312_vm10, %v3313_v23, %v3317_v51 }
 0x24a   : > { %7137 = vmatprep.mubr.msk.bf16.mxu1 %vm1638_vm9, %v6461_v37  ;;  %v3322_v37 = vrot.slane %v3320_v44, 4  ;;  %v3371_v44 = vshll.u32 %v3004_v31, 16  ;;  %v3342_v34 = vsel %vm8312_vm10, %v3337_v27, %v3341_v53  ;;  %v3384_v17 = vor.u32 %v3383_v14, %v3379_v15 }
 0x24b   : > { %7270 = vmatmul.mubr.msk.bf16.gmra.mrb[12].mxu0 %vm1638_vm9, %v10481_v56  ;;  %v3361_v56 = vrot.slane %v3360_v38, 4 }
 0x24c   : > { %7273 = vmatprep.mubr.msk.bf16.mxu0 %vm1638_vm9, %v6621_v59  ;;  %v3308_v59 = vsel %vm8312_vm10, %v3303_v12, %v10012_v2  ;;  %v3326_v39 = vor.u32 %v3325_v28, %v3322_v37  ;;  %v6464_v2 = vcombine.low %v3284_v16, %v3294_v36  ;;  %v3373_v54 = vrot.slane %v3371_v44, 5 }
 0x24d   : > { %v6465_v42 = vcombine.low %v3308_v59, %v3318_v47  ;;  %v3356_v12 = vsel %vm8312_vm10, %v3351_v48, %v3355_v1  ;;  %v10105_v1 = vld [vmem:[#allocation11] ss:$0 sm:$0xff] }
 0x24e   : > { %v3327_v18 = vrot.slane %v3326_v39, 4 }
 0x250   : > { %v3332_v25 = vsel %vm8312_vm10, %v3327_v18, %v3331_v50  ;;  %v3385_v50 = vrot.slane %v3384_v17, 4 }
 0x251   : > { %7138 = vmatmul.mubr.msk.bf16.vlgmr.msra.gmra.mrb[16].mxu1 %vm1638_vm9, %v9831_v5  ;;  %v3363_v5 = vshll.u32 %v7749_v33, 16  ;;  %v6466_v37 = vcombine.low %v3332_v25, %v3342_v34 }
 0x252   : > { %7141 = vmatprep.mubr.msk.bf16.mxu1 %vm1638_vm9, %v6463_v41 }
 0x253   : > { %7274 = vmatmul.mubr.msk.bf16.gmra.mrb[16].mxu0 %vm1638_vm9, %v6622_v35  ;;  %v3365_v21 = vrot.slane %v3363_v5, 5  ;;  %v3374_v35 = vor.u32 %v3373_v54, %v3370_v3 }
 0x254   : > { %7277 = vmatprep.mubr.msk.bf16.mxu0 %vm1638_vm9, %v6623_v55  ;;  %v3387_v55 = vshll.u32 %v7750_v29, 16 }
 0x255   : > { %v3366_v51 = vsel %vm8312_vm10, %v3361_v56, %v3365_v21  ;;  %v3375_v28 = vrot.slane %v3374_v35, 4 }
 0x256   : > { %v6467_v23 = vcombine.low %v3356_v12, %v3366_v51  ;;  %v3389_v60 = vrot.slane %v3387_v55, 5 }
 0x257   : > { %v3380_v41 = vsel %vm8312_vm10, %v3375_v28, %v3379_v15 }
 0x258   : > { %v3390_v62 = vsel %vm8312_vm10, %v3385_v50, %v3389_v60 }
 0x259   : > { %7142 = vmatmul.mubr.msk.bf16.gmra.mrb[20].mxu1 %vm1638_vm9, %v6464_v2  ;;  %v6468_v40 = vcombine.low %v3380_v41, %v3390_v62 }
 0x25a   : > { %7145 = vmatprep.mubr.msk.bf16.mxu1 %vm1638_vm9, %v6465_v42 }
 0x25b   : > { %7278 = vmatmul.mubr.msk.bf16.gmra.mrb[20].mxu0 %vm1638_vm9, %v6624_v26 }
 0x25c   : > { %7281 = vmatprep.mubr.msk.bf16.mxu0 %vm1638_vm9, %v6625_v8 }
 0x261   : > { %7146 = vmatmul.mubr.msk.bf16.gmra.mrb[24].mxu1 %vm1638_vm9, %v6466_v37 }
 0x262   : > { %7149 = vmatprep.mubr.msk.bf16.mxu1 %vm1638_vm9, %v6467_v23 }
 0x263   : > { %7282 = vmatmul.mubr.msk.bf16.gmra.mrb[24].mxu0 %vm1638_vm9, %v6626_v46 }
 0x264   : > { %7285 = vmatprep.mubr.msk.bf16.mxu0 %vm1638_vm9, %v6627_v22 }
 0x269   : > { %7150 = vmatmul.mubr.msk.bf16.gmra.mrb[28].mxu1 %vm1638_vm9, %v6468_v40 }
 0x26b   : > { %7286 = vmatmul.mubr.msk.bf16.gmra.mrb[28].mxu0 %vm1638_vm9, %v6628_v58 }
 0x2e4   : > { %v7089_v30 = vpop.f32.mrb[0].mxu1 }
 0x2e5   : > { %v2800_v26 = vpop.f32.mrb[1].mxu1 }
 0x2e6   : > { %v7090_v4 = vpop.f32.mrb[2].mxu1 }
 0x2e7   : > { %v2803_v49 = vpop.f32.mrb[3].mxu1 }
 0x2ec   : > { %v7093_v8 = vpop.f32.mrb[4].mxu1 }
 0x2ed   : > { %v2816_v43 = vpop.f32.mrb[5].mxu1 }
 0x2ee   : > { %v7094_v6 = vpop.f32.mrb[6].mxu1 }
 0x2ef   : > { %v2819_v46 = vpop.f32.mrb[7].mxu1 }
 0x2f4   : > { %v10089_v61 = vpop.f32.mrb[8].mxu1 }
 0x2f5   : > { %v10091_v63 = vpop.f32.mrb[9].mxu1 }
 0x2f6   : > { %v10093_v45 = vpop.f32.mrb[10].mxu1 }
 0x2f7   : > { %v10095_v22 = vpop.f32.mrb[11].mxu1 }
 0x2fc   : > { %v10097_v7 = vpop.f32.mrb[12].mxu1 }
 0x2fd   : > { %v10099_v57 = vpop.f32.mrb[13].mxu1 }
 0x2fe   : > { %v10101_v9 = vpop.f32.mrb[14].mxu1 }
 0x2ff   : > { %v10103_v58 = vpop.f32.mrb[15].mxu1 }
 0x306   : > { %v7259_v10 = vpop.f32.mrb[0].mxu0 }
 0x307   : > { %v7291_v31 = vadd.f32 %v7259_v10, %v7089_v30  ;;  %v5551_v16 = vpop.f32.mrb[1].mxu0 }
 0x308   : > { %v7292_v36 = vadd.f32 %v5551_v16, %v2800_v26  ;;  %v7260_v13 = vpop.f32.mrb[2].mxu0 }
 0x309   : > { %v5718_v20 = vadd.f32 %v7291_v31, %v10105_v1  ;;  %v7293_v59 = vadd.f32 %v7260_v13, %v7090_v4  ;;  %v5554_v47 = vpop.f32.mrb[3].mxu0 }
 0x30a   : > { %v5716_v39 = vadd.f32 %v7292_v36, %v10105_v1  ;;  %v7294_v11 = vadd.f32 %v5554_v47, %v2803_v49 }
 0x30b   : > { %v6720_v52 = vpack.c.bf16 %v5718_v20, %v5718_v20  ;;  %v5719_v44 = vadd.f32 %v7293_v59, %v10105_v1  ;;  %v5979_v24 = vmul.f32 %v5718_v20, %v5718_v20  ;;  %v5911_v15 = vsel %vm1638_vm9, %v5718_v20, 0.0 }
 0x30c   : > { %v6718_v0 = vpack.c.bf16 %v5716_v39, %v5716_v39  ;;  %v5977_v19 = vmul.f32 %v5716_v39, %v5716_v39  ;;  %v5717_v32 = vadd.f32 %v7294_v11, %v10105_v1  ;;  %v5908_v33 = vsel %vm1638_vm9, %v5716_v39, 0.0 }
 0x30d   : > { %5878 = vst.msk [vmem:[%s10113_s27 + $0x8] sm:$0xf] %vm524_vm0, %v6720_v52  ;;  %v6721_v38 = vpack.c.bf16 %v5719_v44, %v5719_v44  ;;  %v5980_v27 = vmul.f32 %v5719_v44, %v5719_v44  ;;  %v6012_v55 = vsel %vm1638_vm9, %v5979_v24, 0.0  ;;  %v5913_v37 = vsel %vm1638_vm9, %v5719_v44, 0.0 }
 0x30e   : > { %5876 = vst.msk [vmem:[%s10113_s27] sm:$0xf] %vm524_vm0, %v6718_v0  ;;  %v6719_v5 = vpack.c.bf16 %v5717_v32, %v5717_v32  ;;  %v5909_v2 = vsel %vm1638_vm9, %v5717_v32, 0.0  ;;  %v5978_v42 = vmul.f32 %v5717_v32, %v5717_v32  ;;  %v7263_v18 = vpop.f32.mrb[4].mxu0  ;;  %v6009_v14 = vsel %vm1638_vm9, %v5977_v19, 0.0 }
 0x30f   : > { %5879 = vst.msk [vmem:[%s10113_s27 + $0xc] sm:$0xf] %vm524_vm0, %v6721_v38  ;;  %v5910_v53 = vadd.f32 %v5909_v2, %v5908_v33  ;;  %v7295_v3 = vadd.f32 %v7263_v18, %v7093_v8  ;;  %v5567_v54 = vpop.f32.mrb[5].mxu0  ;;  %v6014_v23 = vsel %vm1638_vm9, %v5980_v27, 0.0 }
 0x310   : > { %5877 = vst.msk [vmem:[%s10113_s27 + $0x4] sm:$0xf] %vm524_vm0, %v6719_v5  ;;  %v6010_v48 = vsel %vm1638_vm9, %v5978_v42, 0.0  ;;  %v7296_v56 = vadd.f32 %v5567_v54, %v2816_v43  ;;  %v7264_v21 = vpop.f32.mrb[6].mxu0 }
 0x311   : > { %v5912_v25 = vadd.f32 %v5911_v15, %v5910_v53  ;;  %v6011_v34 = vadd.f32 %v6010_v48, %v6009_v14  ;;  %v5722_v35 = vadd.f32 %v7295_v3, %v10105_v1  ;;  %v7297_v17 = vadd.f32 %v7264_v21, %v7094_v6  ;;  %v5570_v29 = vpop.f32.mrb[7].mxu0 }
 0x312   : > { %v5720_v12 = vadd.f32 %v7296_v56, %v10105_v1  ;;  %v7298_v51 = vadd.f32 %v5570_v29, %v2819_v46 }
 0x313   : > { %v6013_v28 = vadd.f32 %v6012_v55, %v6011_v34  ;;  %v6724_v50 = vpack.c.bf16 %v5722_v35, %v5722_v35  ;;  %v5914_v41 = vadd.f32 %v5913_v37, %v5912_v25  ;;  %v5723_v26 = vadd.f32 %v7297_v17, %v10105_v1 }
 0x314   : > { %v6722_v60 = vpack.c.bf16 %v5720_v12, %v5720_v12  ;;  %v5915_v62 = vsel %vm1638_vm9, %v5720_v12, 0.0  ;;  %v5981_v40 = vmul.f32 %v5720_v12, %v5720_v12  ;;  %v5721_v4 = vadd.f32 %v7298_v51, %v10105_v1 }
 0x315   : > { %5882 = vst.msk [vmem:[%s10113_s27 + $0x18] sm:$0xf] %vm524_vm0, %v6724_v50  ;;  %v6015_v30 = vadd.f32 %v6014_v23, %v6013_v28  ;;  %v5916_v49 = vadd.f32 %v5915_v62, %v5914_v41  ;;  %v5983_v6 = vmul.f32 %v5722_v35, %v5722_v35  ;;  %v6725_v10 = vpack.c.bf16 %v5723_v26, %v5723_v26 }
 0x316   : > { %5880 = vst.msk [vmem:[%s10113_s27 + $0x10] sm:$0xf] %vm524_vm0, %v6722_v60  ;;  %v6016_v8 = vsel %vm1638_vm9, %v5981_v40, 0.0  ;;  %v7267_v43 = vpop.f32.mrb[8].mxu0  ;;  %v6723_v16 = vpack.c.bf16 %v5721_v4, %v5721_v4  ;;  %v5917_v36 = vsel %vm1638_vm9, %v5721_v4, 0.0  ;;  %v5982_v13 = vmul.f32 %v5721_v4, %v5721_v4 }
 0x317   : > { %v6017_v46 = vadd.f32 %v6016_v8, %v6015_v30  ;;  %v5583_v31 = vpop.f32.mrb[9].mxu0  ;;  %v7299_v20 = vadd.f32 %v7267_v43, %v10089_v61  ;;  %v5919_v47 = vsel %vm1638_vm9, %v5722_v35, 0.0  ;;  %5883 = vst.msk [vmem:[%s10113_s27 + $0x1c] sm:$0xf] %vm524_vm0, %v6725_v10  ;;  %v5918_v39 = vadd.f32 %v5917_v36, %v5916_v49 }
 0x318   : > { %v7268_v59 = vpop.f32.mrb[10].mxu0  ;;  %v7300_v11 = vadd.f32 %v5583_v31, %v10091_v63  ;;  %v5984_v0 = vmul.f32 %v5723_v26, %v5723_v26  ;;  %5881 = vst.msk [vmem:[%s10113_s27 + $0x14] sm:$0xf] %vm524_vm0, %v6723_v16  ;;  %v6018_v19 = vsel %vm1638_vm9, %v5982_v13, 0.0  ;;  %v6020_v63 = vsel %vm1638_vm9, %v5983_v6, 0.0 }
 0x319   : > { %v7301_v52 = vadd.f32 %v7268_v59, %v10093_v45  ;;  %v5586_v44 = vpop.f32.mrb[11].mxu0  ;;  %v5726_v32 = vadd.f32 %v7299_v20, %v10105_v1  ;;  %v5920_v24 = vadd.f32 %v5919_v47, %v5918_v39  ;;  %v6019_v38 = vadd.f32 %v6018_v19, %v6017_v46 }
 0x31a   : > { %v7302_v61 = vadd.f32 %v5586_v44, %v10095_v22  ;;  %v5724_v33 = vadd.f32 %v7300_v11, %v10105_v1  ;;  %v5921_v45 = vsel %vm1638_vm9, %v5723_v26, 0.0  ;;  %v6022_v3 = vsel %vm1638_vm9, %v5984_v0, 0.0 }
 0x31b   : > { %v5727_v5 = vadd.f32 %v7301_v52, %v10105_v1  ;;  %v6728_v2 = vpack.c.bf16 %v5726_v32, %v5726_v32  ;;  %v6021_v18 = vadd.f32 %v6020_v63, %v6019_v38  ;;  %v5922_v53 = vadd.f32 %v5921_v45, %v5920_v24 }
 0x31c   : > { %v5725_v42 = vadd.f32 %v7302_v61, %v10105_v1  ;;  %v6726_v27 = vpack.c.bf16 %v5724_v33, %v5724_v33  ;;  %v5923_v22 = vsel %vm1638_vm9, %v5724_v33, 0.0  ;;  %v5927_v54 = vsel %vm1638_vm9, %v5726_v32, 0.0 }
 0x31d   : > { %5886 = vst.msk [vmem:[%s10113_s27 + $0x28] sm:$0xf] %vm524_vm0, %v6728_v2  ;;  %v5985_v15 = vmul.f32 %v5724_v33, %v5724_v33  ;;  %v6729_v14 = vpack.c.bf16 %v5727_v5, %v5727_v5  ;;  %v5987_v56 = vmul.f32 %v5726_v32, %v5726_v32  ;;  %v5924_v21 = vadd.f32 %v5923_v22, %v5922_v53 }
 0x31e   : > { %v7271_v48 = vpop.f32.mrb[12].mxu0  ;;  %5884 = vst.msk [vmem:[%s10113_s27 + $0x20] sm:$0xf] %vm524_vm0, %v6726_v27  ;;  %v6023_v25 = vadd.f32 %v6022_v3, %v6021_v18  ;;  %v6727_v34 = vpack.c.bf16 %v5725_v42, %v5725_v42  ;;  %v5925_v29 = vsel %vm1638_vm9, %v5725_v42, 0.0  ;;  %v5986_v55 = vmul.f32 %v5725_v42, %v5725_v42 }
 0x31f   : > { %v5599_v35 = vpop.f32.mrb[13].mxu0  ;;  %v6024_v17 = vsel %vm1638_vm9, %v5985_v15, 0.0  ;;  %5887 = vst.msk [vmem:[%s10113_s27 + $0x2c] sm:$0xf] %vm524_vm0, %v6729_v14  ;;  %v7303_v12 = vadd.f32 %v7271_v48, %v10097_v7  ;;  %v5988_v23 = vmul.f32 %v5727_v5, %v5727_v5  ;;  %v5926_v28 = vadd.f32 %v5925_v29, %v5924_v21 }
 0x320   : > { %v7272_v51 = vpop.f32.mrb[14].mxu0  ;;  %v6025_v37 = vadd.f32 %v6024_v17, %v6023_v25  ;;  %5885 = vst.msk [vmem:[%s10113_s27 + $0x24] sm:$0xf] %vm524_vm0, %v6727_v34  ;;  %v7304_v50 = vadd.f32 %v5599_v35, %v10099_v57  ;;  %v6026_v41 = vsel %vm1638_vm9, %v5986_v55, 0.0  ;;  %v6028_v8 = vsel %vm1638_vm9, %v5987_v56, 0.0 }
 0x321   : > { %v5602_v60 = vpop.f32.mrb[15].mxu0  ;;  %v5730_v62 = vadd.f32 %v7303_v12, %v10105_v1  ;;  %v7305_v40 = vadd.f32 %v7272_v51, %v10101_v9  ;;  %v5928_v26 = vadd.f32 %v5927_v54, %v5926_v28  ;;  %v5929_v57 = vsel %vm1638_vm9, %v5727_v5, 0.0 }
 0x322   : > { %v7306_v30 = vadd.f32 %v5602_v60, %v10103_v58  ;;  %v6027_v7 = vadd.f32 %v6026_v41, %v6025_v37  ;;  %v5728_v4 = vadd.f32 %v7304_v50, %v10105_v1  ;;  %v6030_v36 = vsel %vm1638_vm9, %v5988_v23, 0.0 }
 0x323   : > { %v6732_v43 = vpack.c.bf16 %v5730_v62, %v5730_v62  ;;  %v5731_v6 = vadd.f32 %v7305_v40, %v10105_v1  ;;  %v5930_v9 = vadd.f32 %v5929_v57, %v5928_v26  ;;  %v5991_v0 = vmul.f32 %v5730_v62, %v5730_v62 }
 0x324   : > { %v7139_v49 = vpop.f32.mrb[16].mxu1  ;;  %v6029_v10 = vadd.f32 %v6028_v8, %v6027_v7  ;;  %v6730_v31 = vpack.c.bf16 %v5728_v4, %v5728_v4  ;;  %v5931_v58 = vsel %vm1638_vm9, %v5728_v4, 0.0  ;;  %v5989_v13 = vmul.f32 %v5728_v4, %v5728_v4 }
 0x325   : > { %v3590_v46 = vpop.f32.mrb[17].mxu1  ;;  %5890 = vst.msk [vmem:[%s10113_s27 + $0x38] sm:$0xf] %vm524_vm0, %v6732_v43  ;;  %v6733_v20 = vpack.c.bf16 %v5731_v6, %v5731_v6  ;;  %v5932_v39 = vadd.f32 %v5931_v58, %v5930_v9  ;;  %v5729_v52 = vadd.f32 %v7306_v30, %v10105_v1  ;;  %v5935_v27 = vsel %vm1638_vm9, %v5730_v62, 0.0 }
 0x326   : > { %v7140_v16 = vpop.f32.mrb[18].mxu1  ;;  %v7275_v59 = vpop.f32.mrb[16].mxu0  ;;  %5888 = vst.msk [vmem:[%s10113_s27 + $0x30] sm:$0xf] %vm524_vm0, %v6730_v31  ;;  %v6031_v11 = vadd.f32 %v6030_v36, %v6029_v10  ;;  %v6032_v19 = vsel %vm1638_vm9, %v5989_v13, 0.0  ;;  %v5992_v53 = vmul.f32 %v5731_v6, %v5731_v6  ;;  %v6036_v15 = vsel %vm1638_vm9, %v5991_v0, 0.0 }
 0x327   : > { %v3593_v47 = vpop.f32.mrb[19].mxu1  ;;  %v5615_v44 = vpop.f32.mrb[17].mxu0  ;;  %5891 = vst.msk [vmem:[%s10113_s27 + $0x3c] sm:$0xf] %vm524_vm0, %v6733_v20  ;;  %v7307_v32 = vadd.f32 %v7275_v59, %v7139_v49  ;;  %v6731_v33 = vpack.c.bf16 %v5729_v52, %v5729_v52  ;;  %v5933_v5 = vsel %vm1638_vm9, %v5729_v52, 0.0  ;;  %v5990_v2 = vmul.f32 %v5729_v52, %v5729_v52 }
 0x328   : > { %v7308_v61 = vadd.f32 %v5615_v44, %v3590_v46  ;;  %v7276_v24 = vpop.f32.mrb[18].mxu0  ;;  %v6033_v38 = vadd.f32 %v6032_v19, %v6031_v11  ;;  %v5934_v45 = vadd.f32 %v5933_v5, %v5932_v39  ;;  %v5937_v25 = vsel %vm1638_vm9, %v5731_v6, 0.0 }
 0x329   : > { %v5618_v63 = vpop.f32.mrb[19].mxu0  ;;  %v5734_v42 = vadd.f32 %v7307_v32, %v10105_v1  ;;  %5889 = vst.msk [vmem:[%s10113_s27 + $0x34] sm:$0xf] %vm524_vm0, %v6731_v33  ;;  %v7309_v22 = vadd.f32 %v7276_v24, %v7140_v16  ;;  %v6034_v48 = vsel %vm1638_vm9, %v5990_v2, 0.0  ;;  %v6038_v50 = vsel %vm1638_vm9, %v5992_v53, 0.0 }
 0x32a   : > { %v5732_v18 = vadd.f32 %v7308_v61, %v10105_v1  ;;  %v7310_v3 = vadd.f32 %v5618_v63, %v3593_v47  ;;  %v5936_v14 = vadd.f32 %v5935_v27, %v5934_v45  ;;  %v6035_v34 = vadd.f32 %v6034_v48, %v6033_v38 }
 0x32b   : > { %v6736_v56 = vpack.c.bf16 %v5734_v42, %v5734_v42  ;;  %v5735_v51 = vadd.f32 %v7309_v22, %v10105_v1  ;;  %v5943_v40 = vsel %vm1638_vm9, %v5734_v42, 0.0  ;;  %v5995_v49 = vmul.f32 %v5734_v42, %v5734_v42 }
 0x32c   : > { %v7143_v54 = vpop.f32.mrb[20].mxu1  ;;  %v6734_v35 = vpack.c.bf16 %v5732_v18, %v5732_v18  ;;  %v5939_v17 = vsel %vm1638_vm9, %v5732_v18, 0.0  ;;  %v5938_v55 = vadd.f32 %v5937_v25, %v5936_v14  ;;  %v5993_v12 = vmul.f32 %v5732_v18, %v5732_v18 }
 0x32d   : > { %v3606_v21 = vpop.f32.mrb[21].mxu1  ;;  %5894 = vst.msk [vmem:[%s10113_s27 + $0x48] sm:$0xf] %vm524_vm0, %v6736_v56  ;;  %v5733_v37 = vadd.f32 %v7310_v3, %v10105_v1  ;;  %v6037_v60 = vadd.f32 %v6036_v15, %v6035_v34  ;;  %v6737_v7 = vpack.c.bf16 %v5735_v51, %v5735_v51  ;;  %v5996_v16 = vmul.f32 %v5735_v51, %v5735_v51 }
 0x32e   : > { %v7144_v29 = vpop.f32.mrb[22].mxu1  ;;  %v7279_v23 = vpop.f32.mrb[20].mxu0  ;;  %5892 = vst.msk [vmem:[%s10113_s27 + $0x40] sm:$0xf] %vm524_vm0, %v6734_v35  ;;  %v5940_v30 = vadd.f32 %v5939_v17, %v5938_v55  ;;  %v6040_v26 = vsel %vm1638_vm9, %v5993_v12, 0.0  ;;  %v5945_v52 = vsel %vm1638_vm9, %v5735_v51, 0.0 }
 0x32f   : > { %v3609_v28 = vpop.f32.mrb[23].mxu1  ;;  %v7311_v41 = vadd.f32 %v7279_v23, %v7143_v54  ;;  %v5631_v62 = vpop.f32.mrb[21].mxu0  ;;  %v6039_v8 = vadd.f32 %v6038_v50, %v6037_v60  ;;  %v6735_v57 = vpack.c.bf16 %v5733_v37, %v5733_v37  ;;  %v5941_v43 = vsel %vm1638_vm9, %v5733_v37, 0.0  ;;  %5895 = vst.msk [vmem:[%s10113_s27 + $0x4c] sm:$0xf] %vm524_vm0, %v6737_v7 }
 0x330   : > { %v7280_v4 = vpop.f32.mrb[22].mxu0  ;;  %v5942_v46 = vadd.f32 %v5941_v43, %v5940_v30  ;;  %v5994_v10 = vmul.f32 %v5733_v37, %v5733_v37  ;;  %v7312_v9 = vadd.f32 %v5631_v62, %v3606_v21  ;;  %v6044_v61 = vsel %vm1638_vm9, %v5995_v49, 0.0 }
 0x331   : > { %v5634_v6 = vpop.f32.mrb[23].mxu0  ;;  %v5738_v31 = vadd.f32 %v7311_v41, %v10105_v1  ;;  %v6041_v58 = vadd.f32 %v6040_v26, %v6039_v8  ;;  %5893 = vst.msk [vmem:[%s10113_s27 + $0x44] sm:$0xf] %vm524_vm0, %v6735_v57  ;;  %v7313_v36 = vadd.f32 %v7280_v4, %v7144_v29  ;;  %v6046_v63 = vsel %vm1638_vm9, %v5996_v16, 0.0 }
 0x332   : > { %v7314_v13 = vadd.f32 %v5634_v6, %v3609_v28  ;;  %v5944_v59 = vadd.f32 %v5943_v40, %v5942_v46  ;;  %v6042_v47 = vsel %vm1638_vm9, %v5994_v10, 0.0  ;;  %v5736_v0 = vadd.f32 %v7312_v9, %v10105_v1 }
 0x333   : > { %v6740_v39 = vpack.c.bf16 %v5738_v31, %v5738_v31  ;;  %v6043_v44 = vadd.f32 %v6042_v47, %v6041_v58  ;;  %v5739_v19 = vadd.f32 %v7313_v36, %v10105_v1  ;;  %v5951_v27 = vsel %vm1638_vm9, %v5738_v31, 0.0 }
 0x334   : > { %v7147_v20 = vpop.f32.mrb[24].mxu1  ;;  %v5946_v24 = vadd.f32 %v5945_v52, %v5944_v59  ;;  %v5737_v38 = vadd.f32 %v7314_v13, %v10105_v1  ;;  %v6738_v2 = vpack.c.bf16 %v5736_v0, %v5736_v0  ;;  %v5947_v42 = vsel %vm1638_vm9, %v5736_v0, 0.0 }
 0x335   : > { %v3622_v11 = vpop.f32.mrb[25].mxu1  ;;  %5898 = vst.msk [vmem:[%s10113_s27 + $0x58] sm:$0xf] %vm524_vm0, %v6740_v39  ;;  %v6045_v45 = vadd.f32 %v6044_v61, %v6043_v44  ;;  %v5997_v22 = vmul.f32 %v5736_v0, %v5736_v0  ;;  %v6741_v3 = vpack.c.bf16 %v5739_v19, %v5739_v19  ;;  %v5999_v15 = vmul.f32 %v5738_v31, %v5738_v31 }
 0x336   : > { %v7148_v32 = vpop.f32.mrb[26].mxu1  ;;  %v7283_v33 = vpop.f32.mrb[24].mxu0  ;;  %v5948_v53 = vadd.f32 %v5947_v42, %v5946_v24  ;;  %5896 = vst.msk [vmem:[%s10113_s27 + $0x50] sm:$0xf] %vm524_vm0, %v6738_v2  ;;  %v6739_v48 = vpack.c.bf16 %v5737_v38, %v5737_v38  ;;  %v5949_v56 = vsel %vm1638_vm9, %v5737_v38, 0.0  ;;  %v5998_v35 = vmul.f32 %v5737_v38, %v5737_v38 }
 0x337   : > { %v3625_v5 = vpop.f32.mrb[27].mxu1  ;;  %v5647_v18 = vpop.f32.mrb[25].mxu0  ;;  %v6047_v14 = vadd.f32 %v6046_v63, %v6045_v45  ;;  %v6048_v25 = vsel %vm1638_vm9, %v5997_v22, 0.0  ;;  %5899 = vst.msk [vmem:[%s10113_s27 + $0x5c] sm:$0xf] %vm524_vm0, %v6741_v3  ;;  %v7315_v17 = vadd.f32 %v7283_v33, %v7147_v20  ;;  %v6000_v55 = vmul.f32 %v5739_v19, %v5739_v19 }
 0x338   : > { %v7284_v54 = vpop.f32.mrb[26].mxu0  ;;  %v5950_v34 = vadd.f32 %v5949_v56, %v5948_v53  ;;  %5897 = vst.msk [vmem:[%s10113_s27 + $0x54] sm:$0xf] %vm524_vm0, %v6739_v48  ;;  %v7316_v12 = vadd.f32 %v5647_v18, %v3622_v11  ;;  %v6050_v28 = vsel %vm1638_vm9, %v5998_v35, 0.0  ;;  %v5953_v62 = vsel %vm1638_vm9, %v5739_v19, 0.0 }
 0x339   : > { %v5650_v21 = vpop.f32.mrb[27].mxu0  ;;  %v6049_v29 = vadd.f32 %v6048_v25, %v6047_v14  ;;  %v7317_v51 = vadd.f32 %v7284_v54, %v7148_v32  ;;  %v5742_v50 = vadd.f32 %v7315_v17, %v10105_v1  ;;  %v6052_v4 = vsel %vm1638_vm9, %v5999_v15, 0.0 }
 0x33a   : > { %v5952_v23 = vadd.f32 %v5951_v27, %v5950_v34  ;;  %v7318_v60 = vadd.f32 %v5650_v21, %v3625_v5  ;;  %v5740_v30 = vadd.f32 %v7316_v12, %v10105_v1  ;;  %v6054_v58 = vsel %vm1638_vm9, %v6000_v55, 0.0 }
 0x33b   : > { %v6051_v40 = vadd.f32 %v6050_v28, %v6049_v29  ;;  %v5743_v26 = vadd.f32 %v7317_v51, %v10105_v1  ;;  %v6744_v49 = vpack.c.bf16 %v5742_v50, %v5742_v50  ;;  %v6003_v19 = vmul.f32 %v5742_v50, %v5742_v50 }
 0x33c   : > { %v7151_v37 = vpop.f32.mrb[28].mxu1  ;;  %v5954_v8 = vadd.f32 %v5953_v62, %v5952_v23  ;;  %v6742_v46 = vpack.c.bf16 %v5740_v30, %v5740_v30  ;;  %v5955_v10 = vsel %vm1638_vm9, %v5740_v30, 0.0  ;;  %v6001_v31 = vmul.f32 %v5740_v30, %v5740_v30 }
 0x33d   : > { %v3638_v41 = vpop.f32.mrb[29].mxu1  ;;  %v6053_v6 = vadd.f32 %v6052_v4, %v6051_v40  ;;  %5902 = vst.msk [vmem:[%s10113_s27 + $0x68] sm:$0xf] %vm524_vm0, %v6744_v49  ;;  %v6745_v36 = vpack.c.bf16 %v5743_v26, %v5743_v26  ;;  %v5741_v47 = vadd.f32 %v7318_v60, %v10105_v1  ;;  %v5959_v45 = vsel %vm1638_vm9, %v5742_v50, 0.0 }
 0x33e   : > { %v7152_v7 = vpop.f32.mrb[30].mxu1  ;;  %v7287_v57 = vpop.f32.mrb[28].mxu0  ;;  %v5956_v16 = vadd.f32 %v5955_v10, %v5954_v8  ;;  %5900 = vst.msk [vmem:[%s10113_s27 + $0x60] sm:$0xf] %vm524_vm0, %v6742_v46  ;;  %v6056_v59 = vsel %vm1638_vm9, %v6001_v31, 0.0  ;;  %v6004_v2 = vmul.f32 %v5743_v26, %v5743_v26  ;;  %v5961_v3 = vsel %vm1638_vm9, %v5743_v26, 0.0 }
 0x33f   : > { %v3641_v43 = vpop.f32.mrb[31].mxu1  ;;  %v5663_v9 = vpop.f32.mrb[29].mxu0  ;;  %v6055_v20 = vadd.f32 %v6054_v58, %v6053_v6  ;;  %5903 = vst.msk [vmem:[%s10113_s27 + $0x6c] sm:$0xf] %vm524_vm0, %v6745_v36  ;;  %v7319_v11 = vadd.f32 %v7287_v57, %v7151_v37  ;;  %v6743_v61 = vpack.c.bf16 %v5741_v47, %v5741_v47  ;;  %v5957_v24 = vsel %vm1638_vm9, %v5741_v47, 0.0 }
 0x340   : > { %v7288_v13 = vpop.f32.mrb[30].mxu0  ;;  %v7320_v52 = vadd.f32 %v5663_v9, %v3638_v41  ;;  %v5958_v38 = vadd.f32 %v5957_v24, %v5956_v16  ;;  %v6002_v33 = vmul.f32 %v5741_v47, %v5741_v47  ;;  %v6060_v48 = vsel %vm1638_vm9, %v6003_v19, 0.0 }
 0x341   : > { %v5666_v39 = vpop.f32.mrb[31].mxu0  ;;  %v7321_v44 = vadd.f32 %v7288_v13, %v7152_v7  ;;  %v6057_v32 = vadd.f32 %v6056_v59, %v6055_v20  ;;  %v10253_v5 = vadd.f32 %v7319_v11, %v10105_v1  ;;  %5901 = vst.msk [vmem:[%s10113_s27 + $0x64] sm:$0xf] %vm524_vm0, %v6743_v61  ;;  %v6062_v25 = vsel %vm1638_vm9, %v6004_v2, 0.0 }
 0x342   : > { %v7322_v0 = vadd.f32 %v5666_v39, %v3641_v43  ;;  %v5744_v63 = vadd.f32 %v7320_v52, %v10105_v1  ;;  %v5960_v27 = vadd.f32 %v5959_v45, %v5958_v38  ;;  %v6058_v53 = vsel %vm1638_vm9, %v6002_v33, 0.0 }
 0x343   : > { %v10260_v42 = vadd.f32 %v7321_v44, %v10105_v1  ;;  %v6748_v22 = vpack.c.bf16 %v10253_v5, %v10253_v5  ;;  %v6059_v54 = vadd.f32 %v6058_v53, %v6057_v32  ;;  %v6007_v37 = vmul.f32 %v10253_v5, %v10253_v5 }
 0x344   : > { %v5745_v18 = vadd.f32 %v7322_v0, %v10105_v1  ;;  %v6746_v15 = vpack.c.bf16 %v5744_v63, %v5744_v63  ;;  %v5963_v14 = vsel %vm1638_vm9, %v5744_v63, 0.0  ;;  %v5962_v1 = vadd.f32 %v5961_v3, %v5960_v27 }
 0x345   : > { %5906 = vst.msk [vmem:[%s10113_s27 + $0x78] sm:$0xf] %vm524_vm0, %v6748_v22  ;;  %v6005_v56 = vmul.f32 %v5744_v63, %v5744_v63  ;;  %v6749_v21 = vpack.c.bf16 %v10260_v42, %v10260_v42  ;;  %v6061_v34 = vadd.f32 %v6060_v48, %v6059_v54 }
 0x346   : > { %5904 = vst.msk [vmem:[%s10113_s27 + $0x70] sm:$0xf] %vm524_vm0, %v6746_v15  ;;  %v6747_v35 = vpack.c.bf16 %v5745_v18, %v5745_v18  ;;  %v5964_v17 = vadd.f32 %v5963_v14, %v5962_v1  ;;  %v5965_v55 = vsel %vm1638_vm9, %v5745_v18, 0.0  ;;  %v6006_v12 = vmul.f32 %v5745_v18, %v5745_v18 }
 0x347   : > { %v6064_v29 = vsel %vm1638_vm9, %v6005_v56, 0.0  ;;  %5907 = vst.msk [vmem:[%s10113_s27 + $0x7c] sm:$0xf] %vm524_vm0, %v6749_v21  ;;  %v6063_v51 = vadd.f32 %v6062_v25, %v6061_v34 }
 0x348   : > { %5905 = vst.msk [vmem:[%s10113_s27 + $0x74] sm:$0xf] %vm524_vm0, %v6747_v35  ;;  %v5966_v23 = vadd.f32 %v5965_v55, %v5964_v17  ;;  %v6066_v28 = vsel %vm1638_vm9, %v6006_v12, 0.0 }
 0x349   : > { %7906 = shalt.err (!%p7903_p13)
}
 0x34a   : > { %s7907_s11 = scalar_lea.hbm %s10278_s9, 2048  ;;  %s7911_s27 = scalar_lea.hbm %s10380_s5, 4096 }
 0x34b   : > { %p7908_p0 = scmp.ne.s32.totalorder %s10278_s9, %s7907_s11  ;;  %p7912_p9 = scmp.lt.u32.totalorder %s10278_s9, %s10380_s5 }
 0x34c   : > { %p7913_p12 = scmp.lt.u32.totalorder %s7911_s27, %s7907_s11  ;;  %p7915_p4 = scmp.lt.u32.totalorder %s7907_s11, %s10278_s9 }
 0x34d   : > { %p7909_p5 = pnand %p7908_p0, %p8202_p1 }
 0x34e   : > { %p7914_p2 = por %p7913_p12, %p7912_p9 }
 0x34f   : > { %p7910_p11 = pneg %p7909_p5 }
 0x350   : > { %p7916_p6 = por %p7915_p4, %p7914_p2 }
 0x352   : > { %p7917_p8 = pnand %p7916_p6, %p7910_p11 }
 0x354   : > { %7920 = shalt.err (!%p7917_p8)
}
 0x355   : > { %s8012_s7 = smov 64   ;;  %s8013_s20 = smov 4   ;;  %v5967_v50 = vsel %vm1638_vm9, %v10253_v5, 0.0  ;;  %v6065_v60 = vadd.f32 %v6064_v29, %v6063_v51  ;;  %v6008_v41 = vmul.f32 %v10260_v42, %v10260_v42  ;;  %v5969_v40 = vsel %vm1638_vm9, %v10260_v42, 0.0 }
 0x356   : > { %7575 = dma.vmem_to_hbm [thread:$0]  (%p8202_p1), %s10280_s19, 2048, %s10278_s9, %s6083_s17, %s8012_s7, %s8012_s7, %s8013_s20   ;;  %v5968_v62 = vadd.f32 %v5967_v50, %v5966_v23  ;;  %v6068_v26 = vsel %vm1638_vm9, %v6007_v37, 0.0  ;;  %vm6078_vm0 = vcmask 1040384   ;;  %vm6080_vm2 = vcmask 25600  }
 0x357   : > { %v6067_v30 = vadd.f32 %v6066_v28, %v6065_v60  ;;  %v6070_v49 = vsel %vm1638_vm9, %v6008_v41, 0.0  ;;  %s6274_s19 = sshll.u32 %s8254_s15, 1  ;;  %s6682_s9 = sshll.u32 %s8071_s25, 5 }
 0x358   : > { %v5970_v7 = vadd.f32 %v5969_v40, %v5968_v62  ;;  %s332_s17 = scalar_lea.vmem [#allocation13], %s6274_s19  ;;  %s10331_s11 = scalar_lea.hbm %s10381_s6, %s6682_s9 }
 0x359   : > { %v6069_v4 = vadd.f32 %v6068_v26, %v6067_v30  ;;  %s6117_s30 = sshll.u32 %s332_s17, 4  ;;  %s6088_s16 = scalar_lea.sflag [#allocation14], %s8254_s15  ;;  %s10333_s30 = int_to_ptr.vmem [resolvable:$true] %s6117_s30 }
 0x35a   : > { %v5971_v8 = vrot.slane %v5970_v7, 4  ;;  %s7921_s25 = scalar_lea.vmem %s10333_s30, 32  ;;  %s8014_s14 = smov [#allocation13]  }
 0x35b   : > { %v6071_v57 = vadd.f32 %v6070_v49, %v6069_v4  ;;  %p7922_p3 = scmp.ne.s32.totalorder %s10333_s30, %s7921_s25  ;;  %s7925_s27 = sshll.u32 %s8014_s14, 4  ;;  %s7926_s27 = int_to_ptr.vmem [resolvable:$false] %s7925_s27 }
 0x35c   : > { %v5972_v43 = vadd.f32 %v5971_v8, %v5970_v7  ;;  %s7927_s29 = scalar_lea.vmem %s7926_s27, 64  ;;  %p7928_p13 = scmp.lt.s32.totalorder %s10333_s30, %s7926_s27 }
 0x35d   : > { %v6072_v6 = vrot.slane %v6071_v57, 4  ;;  %p7923_p7 = pnand %p7922_p3, %p8202_p1  ;;  %p7929_p0 = scmp.lt.s32.totalorder %s7927_s29, %s7921_s25 }
 0x35e   : > { %v5973_v46 = vrot.slane %v5972_v43, 2 }
 0x35f   : > { %v6073_v10 = vadd.f32 %v6072_v6, %v6071_v57  ;;  %p7924_p10 = pneg %p7923_p7  ;;  %p7930_p5 = por %p7929_p0, %p7928_p13 }
 0x360   : > { %v5974_v31 = vadd.f32 %v5973_v46, %v5972_v43 }
 0x361   : > { %v6074_v9 = vrot.slane %v6073_v10, 2  ;;  %p7931_p11 = pnand %p7930_p5, %p7924_p10 }
 0x362   : > { %v5975_v58 = vrot.slane %v5974_v31, 1 }
 0x363   : > { %v6075_v16 = vadd.f32 %v6074_v9, %v6073_v10 }
 0x364   : > { %v5976_v13 = vadd.f32 %v5975_v58, %v5974_v31 }
 0x365   : > { %v6076_v36 = vrot.slane %v6075_v16, 1 }
 0x367   : > { %v6077_v20 = vadd.f32 %v6076_v36, %v6075_v16 }
 0x369   : > { %v6079_v59 = vsel %vm6078_vm0, %v5976_v13, %v6077_v20 }
 0x36a   : > { %6081 = vst.msk [vmem:[%s332_s17] sm:$0x3] %vm6080_vm2, %v6079_v59 }
 0x36b   : > { %7934 = shalt.err (!%p7931_p11)
}
 0x36c   : > { %s7935_s15 = scalar_lea.hbm %s10331_s11, 32  ;;  %s7939_s20 = scalar_lea.hbm %s10381_s6, 64 }
 0x36d   : > { %p7936_p9 = scmp.ne.s32.totalorder %s10331_s11, %s7935_s15  ;;  %p7940_p4 = scmp.lt.u32.totalorder %s10331_s11, %s10381_s6 }
 0x36e   : > { %p7941_p6 = scmp.lt.u32.totalorder %s7939_s20, %s7935_s15  ;;  %p7943_p3 = scmp.lt.u32.totalorder %s7935_s15, %s10331_s11 }
 0x36f   : > { %p7937_p12 = pnand %p7936_p9, %p8202_p1 }
 0x370   : > { %p7942_p8 = por %p7941_p6, %p7940_p4 }
 0x371   : > { %p7938_p2 = pneg %p7937_p12 }
 0x372   : > { %p7944_p7 = por %p7943_p3, %p7942_p8 }
 0x374   : > { %p7945_p10 = pnand %p7944_p7, %p7938_p2 }
 0x376   : > { %7948 = shalt.err (!%p7945_p10)
}
 0x377   : > { %7576 = dma.vmem_to_hbm [thread:$0]  (%p8202_p1), %s10333_s30, 32, %s10331_s11, %s6088_s16  }
 0x378 PF: > { %s6129_s17 = sand.u32 1, %s7987_s21   ;;  %p10482_p13 = scmp.ne.s32.totalorder %s10400_s28, 0 }
 0x379   : > { %p10483_p0 = scmp.ge.s32.totalorder %s7999_s24, 2  ;;  %s6130_s26 = scalar_lea.sflag [#allocation5], %s6129_s17 }
 0x37b   : > { %p7597_p5 = pnand %p10483_p0, %p10482_p13 }
 0x37d   : > { %7978 = dma.done.wait (!%p7597_p5), %s6130_s26, 2048  }
 0x37e   : > { %7980 = vsyncadd (!%p7597_p5), %s6130_s26, 4294965248  ;;  %s6139_s10 = scalar_lea.sflag [#allocation14], %s6129_s17 }
 0x37f   : > { %7982 = dma.done.wait (!%p7597_p5), %s6139_s10, 32  }
 0x380   : > { %7984 = vsyncadd (!%p7597_p5), %s6139_s10, 4294967264  ;;  %p25_p1 = scmp.ge.s32.totalorder %s8192_s18, 4   ;;  %s10484_s21 = smov %s7991_s22 }
 0x381   : > { %s10485_s22 = smov %s7995_s23  ;;  %s10486_s23 = smov %s8208_s13 }
 0x382   : > { %s10487_s24 = smov %s8192_s18  ;;  %27 = sbr.rel (!%p25_p1) target bundleno = 9 (0x9), region = 129 }
 0x389   :  { %6144 = vsyncpa [#allocation4], 1 }
 0x38a   :  { %6146 = vsyncpa [#allocation4 + $0x1], 1 }
 0x38b   :  { %6147 = vsyncpa [#allocation7], 1 }
 0x38c   :  { %6148 = vsyncpa [#allocation10], 1 }
 0x38d   :  { %6149 = vsyncpa [#allocation5], 1 }
 0x38e   :  { %6151 = vsyncpa [#allocation5 + $0x1], 1 }
 0x38f   :  { %6152 = vsyncpa [#allocation14], 1 }
 0x390   :  { %6154 = vsyncpa [#allocation14 + $0x1], 1 }

</bundles_post_ra>
